<compile_context>
chip_gen: v7x
topology: tpu7x:2x2x1
jax: 0.10.0
libtpu: 0.0.40
codegen_flags: <defaults>
</compile_context>

<pallas_src>
import functools

import jax
import jax.numpy as jnp
from jax.experimental import pallas as pl
from jax.experimental.pallas import tpu as pltpu

GROUPS = 32
EPS = 1e-5


def _layout(H, W):
    """Padded-flat layout constants shared by wrapper and kernel.

    Each image row stores W real pixels followed by (Wp - W) zero gap pixels; rows are
    flattened to an (H * Wp, C) slab.  Wp and the interior start o0 are multiples of 16
    so bf16 window loads / interior stores are sublane-aligned."""
    Wp = ((W + 2 + 15) // 16) * 16          # row pitch (>= W + 2), 16-aligned
    L = H * Wp                              # flat interior length
    o0 = Wp + 16                            # interior start (>= Wp + 1), 16-aligned
    nflat = o0 + L + Wp + 16                # covers the furthest shifted tap window
    return Wp, L, o0, nflat


def _gn_silu(h, mred, mbc, gamma, beta, inv_n):
    """GroupNorm + SiLU in f32.  h: (L, C) with gap pixels == 0 (stats stay exact).
    mred: (C, G) group-reduce matrix, mbc: (G, C) group-broadcast matrix."""
    s = jnp.sum(h, axis=0, keepdims=True)                                   # (1, C)
    sq = jnp.sum(h * h, axis=0, keepdims=True)                              # (1, C)
    gmean = jnp.dot(s, mred, preferred_element_type=jnp.float32) * inv_n    # (1, G)
    gmsq = jnp.dot(sq, mred, preferred_element_type=jnp.float32) * inv_n    # (1, G)
    gvar = jnp.maximum(gmsq - gmean * gmean, 0.0)       # clamp: cancellation safety
    ginv = jax.lax.rsqrt(gvar + EPS)
    mean_c = jnp.dot(gmean, mbc, preferred_element_type=jnp.float32)        # (1, C)
    inv_c = jnp.dot(ginv, mbc, preferred_element_type=jnp.float32)          # (1, C)
    scale = inv_c * gamma
    shift = beta - mean_c * scale
    y = h * scale + shift
    # SiLU: exp on the EUP + approx reciprocal (keeps the f32 divide off the VALU).
    return y * pl.reciprocal(1.0 + jnp.exp(-y), approx=True)


def _conv3x3_flat(pad_ref, w_ref, init, o0, Wp, L, C, pack):
    """3x3 SAME conv over the flat padded scratch.

    pack=True : im2col K-packing -- per ky the 3 kx-shifted contiguous windows are
                lane-concatenated into an (L, 3*C) operand and multiplied by the
                (3*C, Cout) weight slab w_ref[ky]  (3 deep MXU matmuls per conv).
    pack=False: conservative per-tap path (9 shallow matmuls per conv)."""
    acc = init                                           # broadcasts to (L, Cout) f32
    for ky in range(3):
        t = o0 + (ky - 1) * Wp                           # static, multiple of 16
        if pack:
            vk = jnp.concatenate(
                [pad_ref[t - 1:t - 1 + L, :],            # kx = 0
                 pad_ref[t:t + L, :],                    # kx = 1 (aligned)
                 pad_ref[t + 1:t + 1 + L, :]],           # kx = 2
                axis=-1)                                 # (L, 3*C) bf16
            acc = acc + jnp.dot(vk, w_ref[ky], preferred_element_type=jnp.float32)
        else:
            for kx in range(3):
                acc = acc + jnp.dot(pad_ref[t + kx - 1:t + kx - 1 + L, :],
                                    w_ref[ky, kx * C:(kx + 1) * C, :],
                                    preferred_element_type=jnp.float32)
    return acc


def _vae_resblock_kernel(x_ref, g1_ref, bt1_ref, w1_ref, b1_ref,
                         g2_ref, bt2_ref, w2_ref, b2_ref,
                         mri_ref, mbi_ref, mro_ref, mbo_ref,
                         *rest, H, W, Cin, Cout, has_proj, pack):
    if has_proj:
        wres_ref, bres_ref, out_ref, pad1, pad2 = rest
    else:
        out_ref, pad1, pad2 = rest

    Wp, L, o0, nflat = _layout(H, W)
    inv_n_in = 1.0 / float(H * W * (Cin // GROUPS))
    inv_n_out = 1.0 / float(H * W * (Cout // GROUPS))

    # Real-pixel mask over the padded-flat rows (1 on the W real pixels of each image
    # row, 0 on the gap pixels), built in-kernel -- no HBM operand for it.
    col = jax.lax.broadcasted_iota(jnp.int32, (L, 1), 0)
    xcol = jnp.bitwise_and(col, Wp - 1) if (Wp & (Wp - 1)) == 0 else col % Wp
    mask = (xcol < W).astype(jnp.float32)                                   # (L, 1)

    # Zero only the small halo head/tail of the flat scratches; the interior [o0, o0+L)
    # is fully rewritten below.  (Kept per-step: it is only ~2*(Wp+16) rows, and a
    # "zero once" guard via program_id()==0 would be unsafe under megacore partitioning.)
    pad1[0:o0, :] = jnp.zeros((o0, Cin), pad1.dtype)
    pad1[o0 + L:nflat, :] = jnp.zeros((nflat - o0 - L, Cin), pad1.dtype)
    pad2[0:o0, :] = jnp.zeros((o0, Cout), pad2.dtype)
    pad2[o0 + L:nflat, :] = jnp.zeros((nflat - o0 - L, Cout), pad2.dtype)

    # GroupNorm_1 + SiLU (f32 stats are exact: the gap pixels of the input are zero).
    h1 = _gn_silu(x_ref[0], mri_ref[...], mbi_ref[...],
                  g1_ref[...], bt1_ref[...], inv_n_in)
    pad1[o0:o0 + L, :] = (h1 * mask).astype(pad1.dtype)

    # Conv_1 (3x3, pad=1), bias folded into the accumulator init.
    acc1 = _conv3x3_flat(pad1, w1_ref, b1_ref[...], o0, Wp, L, Cin, pack)   # (L, Cout)

    # GroupNorm_2 + SiLU: mask gap pixels so the statistics only see real pixels.
    h2 = _gn_silu(acc1 * mask, mro_ref[...], mbo_ref[...],
                  g2_ref[...], bt2_ref[...], inv_n_out)
    pad2[o0:o0 + L, :] = (h2 * mask).astype(pad2.dtype)

    # Residual path: re-read the resident input block at the point of use (instead of
    # keeping an (L, Cin) f32 value live across both convs).  Identity path: no matmul.
    if has_proj:
        res = jnp.dot(x_ref[0].astype(jnp.bfloat16), wres_ref[...],
                      preferred_element_type=jnp.float32) + bres_ref[...]
    else:
        res = x_ref[0]

    # Conv_2 with residual + bias fused into the accumulator init.
    acc2 = _conv3x3_flat(pad2, w2_ref, res + b2_ref[...], o0, Wp, L, Cout, pack)

    # Gap-free output: drop the gap pixels in-kernel (no padded HBM writeback).
    out_ref[0] = acc2.reshape(H, Wp, Cout)[:, :W, :].astype(out_ref.dtype)


def vae_residual_block(x_nchw, params):
    """x_nchw: (B, Cin, H, W) float32 (PyTorch layout).  Returns (B, Cout, H, W) f32."""
    x = jnp.transpose(x_nchw, (0, 2, 3, 1))                    # -> NHWC
    B, H, W, Cin = x.shape
    Cout = params["w1"].shape[-1]
    assert Cin % GROUPS == 0 and Cout % GROUPS == 0
    has_proj = Cin != Cout

    Wp, L, o0, nflat = _layout(H, W)

    # Padded-flat input: each image row followed by (Wp - W) zero gap pixels.
    # TODO(synk): when chaining NHWC blocks, build this in-kernel (per-row stores/DMA)
    # and keep activations bf16 to drop this extra HBM pass and both NCHW transposes.
    xp = jnp.pad(x, ((0, 0), (0, 0), (0, Wp - W), (0, 0))).reshape(B, L, Cin)

    def membership(c):  # factored group reduce / broadcast matrices
        mred = jnp.kron(jnp.eye(GROUPS, dtype=jnp.float32),
                        jnp.ones((c // GROUPS, 1), jnp.float32))           # (c, G)
        return mred, mred.T                                                # (c,G),(G,c)

    mri, mbi = membership(Cin)
    mro, mbo = membership(Cout)

    # bf16 conv weights packed as (3, 3*C, Cout): row block kx of slab ky is w[ky, kx].
    w1 = params["w1"].reshape(3, 3 * Cin, Cout).astype(jnp.bfloat16)
    w2 = params["w2"].reshape(3, 3 * Cout, Cout).astype(jnp.bfloat16)

    operands = [xp,
                params["gn1_gamma"], params["gn1_beta"], w1, params["b1"],
                params["gn2_gamma"], params["gn2_beta"], w2, params["b2"],
                mri, mbi, mro, mbo]
    if has_proj:
        operands += [params["wres"].astype(jnp.bfloat16), params["bres"]]

    # Explicit VMEM budget: blocks + scratches + constants + live f32 intermediates,
    # clamped well below v7x's 64 MiB physical VMEM.
    const_bytes = sum(int(a.size) * a.dtype.itemsize for a in operands[1:])
    est = (2 * L * Cin * 4                      # double-buffered input block
           + 2 * H * W * Cout * 4               # double-buffered (gap-free) output block
           + nflat * (Cin + Cout) * 2           # bf16 pad scratches
           + 2 * const_bytes                    # constants (worst case: double-buffered)
           + 8 * L * max(Cin, Cout) * 4)        # live f32 intermediates headroom
    vmem_limit = int(min(max(2 * est, 16 * 2 ** 20), 56 * 2 ** 20))

    def run(fast):
        def const_spec(shape, ndim):
            def imap(b):
                return (0,) * ndim
            if fast:  # constant index map -> DMA'd once; single-buffer to save VMEM
                return pl.BlockSpec(shape, imap,
                                    pipeline_mode=pl.Buffered(buffer_count=1))
            return pl.BlockSpec(shape, imap)

        in_specs = [pl.BlockSpec((1, L, Cin), lambda b: (b, 0, 0))]
        in_specs += [const_spec(a.shape, a.ndim) for a in operands[1:]]

        kernel = functools.partial(_vae_resblock_kernel, H=H, W=W, Cin=Cin,
                                   Cout=Cout, has_proj=has_proj, pack=fast)

        return pl.pallas_call(
            kernel,
            out_shape=jax.ShapeDtypeStruct((B, H, W, Cout), jnp.float32),
            grid_spec=pltpu.PrefetchScalarGridSpec(
                num_scalar_prefetch=0,
                grid=(B,),
                in_specs=in_specs,
                out_specs=pl.BlockSpec((1, H, W, Cout), lambda b: (b, 0, 0, 0)),
                scratch_shapes=[
                    pltpu.VMEM((nflat, Cin), jnp.bfloat16),
                    pltpu.VMEM((nflat, Cout), jnp.bfloat16),
                ],
            ),
            compiler_params=pltpu.CompilerParams(
                dimension_semantics=("parallel",),
                vmem_limit_bytes=vmem_limit),
        )(*operands)

    try:
        out = run(fast=True)
    except Exception:
        # Conservative fallback (double-buffered constants, per-tap matmuls) in case
        # the K-packed / single-buffered fast path fails to lower on this toolchain.
        out = run(fast=False)

    return jnp.transpose(out, (0, 3, 1, 2))                    # NHWC -> NCHW


# ---------------- pure-JAX reference (for correctness check) ----------------
def _reference(x_nchw, params):
    x = jnp.transpose(x_nchw, (0, 2, 3, 1))
    B, H, W, Cin = x.shape
    Cout = params["w1"].shape[-1]

    def gn(h, gamma, beta):
        C = h.shape[-1]
        g = h.reshape(B, H, W, GROUPS, C // GROUPS)
        mean = g.mean(axis=(1, 2, 4), keepdims=True)
        var = g.var(axis=(1, 2, 4), keepdims=True)
        g = (g - mean) / jnp.sqrt(var + EPS)
        return g.reshape(B, H, W, C) * gamma.reshape(1, 1, 1, C) + beta.reshape(1, 1, 1, C)

    def silu(h):
        return h * jax.nn.sigmoid(h)

    def conv(h, w, b):
        out = jax.lax.conv_general_dilated(
            h, w, (1, 1), "SAME", dimension_numbers=("NHWC", "HWIO", "NHWC"))
        return out + b.reshape(1, 1, 1, -1)

    h = silu(gn(x, params["gn1_gamma"], params["gn1_beta"]))
    h = conv(h, params["w1"], params["b1"])
    h = silu(gn(h, params["gn2_gamma"], params["gn2_beta"]))
    h = conv(h, params["w2"], params["b2"])
    if Cin == Cout:
        res = x
    else:
        res = jnp.einsum("bhwc,cd->bhwd", x, params["wres"]) + params["bres"].reshape(1, 1, 1, -1)
    return jnp.transpose(h + res, (0, 3, 1, 2))


def make_params(key, in_channels, out_channels):
    ks = jax.random.split(key, 10)
    p = {
        "gn1_gamma": 1.0 + 0.1 * jax.random.normal(ks[0], (1, in_channels), jnp.float32),
        "gn1_beta": 0.1 * jax.random.normal(ks[1], (1, in_channels), jnp.float32),
        "w1": 0.05 * jax.random.normal(ks[2], (3, 3, in_channels, out_channels), jnp.float32),
        "b1": 0.05 * jax.random.normal(ks[3], (1, out_channels), jnp.float32),
        "gn2_gamma": 1.0 + 0.1 * jax.random.normal(ks[4], (1, out_channels), jnp.float32),
        "gn2_beta": 0.1 * jax.random.normal(ks[5], (1, out_channels), jnp.float32),
        "w2": 0.05 * jax.random.normal(ks[6], (3, 3, out_channels, out_channels), jnp.float32),
        "b2": 0.05 * jax.random.normal(ks[7], (1, out_channels), jnp.float32),
    }
    if in_channels != out_channels:
        p["wres"] = 0.1 * jax.random.normal(ks[8], (in_channels, out_channels), jnp.float32)
        p["bres"] = 0.05 * jax.random.normal(ks[9], (1, out_channels), jnp.float32)
    return p


if __name__ == "__main__":
    # GroupNorm(32, C) needs C % 32 == 0.  Exercise both residual paths:
    #   (32 -> 64): 1x1 projection residual;  (64 -> 64): identity residual (no matmul).
    key = jax.random.PRNGKey(0)
    B, H, W = 2, 8, 8
    for cin, cout in [(32, 64), (64, 64)]:
        kx, kp = jax.random.split(jax.random.fold_in(key, 1000 * cin + cout))
        x = jax.random.normal(kx, (B, cin, H, W), jnp.float32)      # NCHW like PyTorch
        params = make_params(kp, cin, cout)

        out = jax.block_until_ready(vae_residual_block(x, params))
        ref = jax.block_until_ready(_reference(x, params))

        assert out.shape == (B, cout, H, W), out.shape
        err = float(jnp.max(jnp.abs(out - ref)))
        # bf16 MXU operands + approx-reciprocal sigmoid (f32 accumulation/stats) =>
        # slightly looser tolerance than pure f32.
        assert jnp.allclose(out, ref, atol=4e-2, rtol=4e-2), err
    print("KERNEL_OK")
</pallas_src>

<mosaic_0001>
module attributes {stable_mosaic.version = 11 : i64} {
  func.func @_vae_resblock_kernel(%arg0: i32, %arg1: memref<1x128x32xf32, #tpu.memory_space<vmem>>, %arg2: memref<1x32xf32, #tpu.memory_space<vmem>>, %arg3: memref<1x32xf32, #tpu.memory_space<vmem>>, %arg4: memref<3x96x64xbf16, #tpu.memory_space<vmem>>, %arg5: memref<1x64xf32, #tpu.memory_space<vmem>>, %arg6: memref<1x64xf32, #tpu.memory_space<vmem>>, %arg7: memref<1x64xf32, #tpu.memory_space<vmem>>, %arg8: memref<3x192x64xbf16, #tpu.memory_space<vmem>>, %arg9: memref<1x64xf32, #tpu.memory_space<vmem>>, %arg10: memref<32x32xf32, #tpu.memory_space<vmem>>, %arg11: memref<32x32xf32, #tpu.memory_space<vmem>>, %arg12: memref<64x32xf32, #tpu.memory_space<vmem>>, %arg13: memref<32x64xf32, #tpu.memory_space<vmem>>, %arg14: memref<32x64xbf16, #tpu.memory_space<vmem>>, %arg15: memref<1x64xf32, #tpu.memory_space<vmem>>, %arg16: memref<1x8x8x64xf32, #tpu.memory_space<vmem>>, %arg17: memref<192x32xbf16, #tpu.memory_space<vmem>>, %arg18: memref<192x64xbf16, #tpu.memory_space<vmem>>) attributes {dimension_semantics = [#tpu.dimension_semantics<parallel>], iteration_bounds = array<i64: 2>, scalar_prefetch = 0 : i64, scratch_operands = 2 : i64, tpu.core_type = #tpu.core_type<tc>, window_params = [{transform_indices = @transform_0, window_bounds = array<i64: 1, 128, 32>}, {pipeline_mode = #tpu.pipeline_mode<synchronous>, transform_indices = @transform_1, window_bounds = array<i64: 1, 32>}, {pipeline_mode = #tpu.pipeline_mode<synchronous>, transform_indices = @transform_2, window_bounds = array<i64: 1, 32>}, {pipeline_mode = #tpu.pipeline_mode<synchronous>, transform_indices = @transform_3, window_bounds = array<i64: 3, 96, 64>}, {pipeline_mode = #tpu.pipeline_mode<synchronous>, transform_indices = @transform_4, window_bounds = array<i64: 1, 64>}, {pipeline_mode = #tpu.pipeline_mode<synchronous>, transform_indices = @transform_5, window_bounds = array<i64: 1, 64>}, {pipeline_mode = #tpu.pipeline_mode<synchronous>, transform_indices = @transform_6, window_bounds = array<i64: 1, 64>}, {pipeline_mode = #tpu.pipeline_mode<synchronous>, transform_indices = @transform_7, window_bounds = array<i64: 3, 192, 64>}, {pipeline_mode = #tpu.pipeline_mode<synchronous>, transform_indices = @transform_8, window_bounds = array<i64: 1, 64>}, {pipeline_mode = #tpu.pipeline_mode<synchronous>, transform_indices = @transform_9, window_bounds = array<i64: 32, 32>}, {pipeline_mode = #tpu.pipeline_mode<synchronous>, transform_indices = @transform_10, window_bounds = array<i64: 32, 32>}, {pipeline_mode = #tpu.pipeline_mode<synchronous>, transform_indices = @transform_11, window_bounds = array<i64: 64, 32>}, {pipeline_mode = #tpu.pipeline_mode<synchronous>, transform_indices = @transform_12, window_bounds = array<i64: 32, 64>}, {pipeline_mode = #tpu.pipeline_mode<synchronous>, transform_indices = @transform_13, window_bounds = array<i64: 32, 64>}, {pipeline_mode = #tpu.pipeline_mode<synchronous>, transform_indices = @transform_14, window_bounds = array<i64: 1, 64>}, {transform_indices = @transform_15, window_bounds = array<i64: 1, 8, 8, 64>}]} {
    %0 = tpu.iota {dimensions = array<i32: 0>} : vector<128x1xi32>
    %c15_i32 = arith.constant 15 : i32
    %1 = vector.broadcast %c15_i32 : i32 to vector<128x1xi32>
    %2 = arith.andi %0, %1 : vector<128x1xi32>
    %c8_i32 = arith.constant 8 : i32
    %3 = vector.broadcast %c8_i32 : i32 to vector<128x1xi32>
    %4 = arith.cmpi slt, %2, %3 : vector<128x1xi32>
    %5 = arith.extui %4 : vector<128x1xi1> to vector<128x1xi32>
    %6 = arith.sitofp %5 : vector<128x1xi32> to vector<128x1xf32>
    %cst = arith.constant 0.000000e+00 : bf16
    %7 = vector.broadcast %cst : bf16 to vector<32x32xbf16>
    %c0 = arith.constant 0 : index
    %c0_0 = arith.constant 0 : index
    %8 = vector.load %arg17[%c0, %c0_0] : memref<192x32xbf16, #tpu.memory_space<vmem>>, vector<32x32xbf16>
    tpu.vector_store %arg17[%c0, %c0_0], %7 {strides = array<i32>} : memref<192x32xbf16, #tpu.memory_space<vmem>>, vector<32x32xbf16>,
    %cst_1 = arith.constant 0.000000e+00 : bf16
    %9 = vector.broadcast %cst_1 : bf16 to vector<32x32xbf16>
    %c160 = arith.constant 160 : index
    %c0_2 = arith.constant 0 : index
    %10 = vector.load %arg17[%c160, %c0_2] : memref<192x32xbf16, #tpu.memory_space<vmem>>, vector<32x32xbf16>
    tpu.vector_store %arg17[%c160, %c0_2], %9 {strides = array<i32>} : memref<192x32xbf16, #tpu.memory_space<vmem>>, vector<32x32xbf16>,
    %cst_3 = arith.constant 0.000000e+00 : bf16
    %11 = vector.broadcast %cst_3 : bf16 to vector<32x64xbf16>
    %c0_4 = arith.constant 0 : index
    %c0_5 = arith.constant 0 : index
    %12 = vector.load %arg18[%c0_4, %c0_5] : memref<192x64xbf16, #tpu.memory_space<vmem>>, vector<32x64xbf16>
    tpu.vector_store %arg18[%c0_4, %c0_5], %11 {strides = array<i32>} : memref<192x64xbf16, #tpu.memory_space<vmem>>, vector<32x64xbf16>,
    %cst_6 = arith.constant 0.000000e+00 : bf16
    %13 = vector.broadcast %cst_6 : bf16 to vector<32x64xbf16>
    %c160_7 = arith.constant 160 : index
    %c0_8 = arith.constant 0 : index
    %14 = vector.load %arg18[%c160_7, %c0_8] : memref<192x64xbf16, #tpu.memory_space<vmem>>, vector<32x64xbf16>
    tpu.vector_store %arg18[%c160_7, %c0_8], %13 {strides = array<i32>} : memref<192x64xbf16, #tpu.memory_space<vmem>>, vector<32x64xbf16>,
    %c0_9 = arith.constant 0 : index
    %c0_10 = arith.constant 0 : index
    %c0_11 = arith.constant 0 : index
    %15 = vector.load %arg1[%c0_9, %c0_10, %c0_11] : memref<1x128x32xf32, #tpu.memory_space<vmem>>, vector<1x128x32xf32>
    %16 = vector.shape_cast %15 : vector<1x128x32xf32> to vector<128x32xf32>
    %c0_12 = arith.constant 0 : index
    %c0_13 = arith.constant 0 : index
    %17 = vector.load %arg10[%c0_12, %c0_13] : memref<32x32xf32, #tpu.memory_space<vmem>>, vector<32x32xf32>
    %c0_14 = arith.constant 0 : index
    %c0_15 = arith.constant 0 : index
    %18 = vector.load %arg11[%c0_14, %c0_15] : memref<32x32xf32, #tpu.memory_space<vmem>>, vector<32x32xf32>
    %c0_16 = arith.constant 0 : index
    %c0_17 = arith.constant 0 : index
    %19 = vector.load %arg2[%c0_16, %c0_17] : memref<1x32xf32, #tpu.memory_space<vmem>>, vector<1x32xf32>
    %c0_18 = arith.constant 0 : index
    %c0_19 = arith.constant 0 : index
    %20 = vector.load %arg3[%c0_18, %c0_19] : memref<1x32xf32, #tpu.memory_space<vmem>>, vector<1x32xf32>
    %cst_20 = arith.constant dense<0.000000e+00> : vector<32xf32>
    %21 = vector.multi_reduction <add>, %16, %cst_20 [0] : vector<128x32xf32> to vector<32xf32>
    %22 = vector.shape_cast %21 : vector<32xf32> to vector<1x32xf32>
    %23 = arith.mulf %16, %16 : vector<128x32xf32>
    %cst_21 = arith.constant dense<0.000000e+00> : vector<32xf32>
    %24 = vector.multi_reduction <add>, %23, %cst_21 [0] : vector<128x32xf32> to vector<32xf32>
    %25 = vector.shape_cast %24 : vector<32xf32> to vector<1x32xf32>
    %cst_22 = arith.constant dense<0.000000e+00> : vector<1x32xf32>
    %26 = tpu.matmul %22, %17, %cst_22 {dimension_numbers = #tpu.dot_dimension_numbers<[1], [0], [0], [1], [0, 0, 1, 1], [], []>} : vector<1x32xf32>, vector<32x32xf32>, vector<1x32xf32> -> vector<1x32xf32>
    %cst_23 = arith.constant 1.562500e-02 : f32
    %27 = vector.broadcast %cst_23 : f32 to vector<1x32xf32>
    %28 = arith.mulf %26, %27 : vector<1x32xf32>
    %cst_24 = arith.constant dense<0.000000e+00> : vector<1x32xf32>
    %29 = tpu.matmul %25, %17, %cst_24 {dimension_numbers = #tpu.dot_dimension_numbers<[1], [0], [0], [1], [0, 0, 1, 1], [], []>} : vector<1x32xf32>, vector<32x32xf32>, vector<1x32xf32> -> vector<1x32xf32>
    %cst_25 = arith.constant 1.562500e-02 : f32
    %30 = vector.broadcast %cst_25 : f32 to vector<1x32xf32>
    %31 = arith.mulf %29, %30 : vector<1x32xf32>
    %32 = arith.mulf %28, %28 : vector<1x32xf32>
    %33 = arith.subf %31, %32 : vector<1x32xf32>
    %cst_26 = arith.constant 0.000000e+00 : f32
    %34 = vector.broadcast %cst_26 : f32 to vector<1x32xf32>
    %35 = arith.maximumf %33, %34 : vector<1x32xf32>
    %cst_27 = arith.constant 9.99999974E-6 : f32
    %36 = vector.broadcast %cst_27 : f32 to vector<1x32xf32>
    %37 = arith.addf %35, %36 : vector<1x32xf32>
    %38 = math.rsqrt %37 : vector<1x32xf32>
    %cst_28 = arith.constant dense<0.000000e+00> : vector<1x32xf32>
    %39 = tpu.matmul %28, %18, %cst_28 {dimension_numbers = #tpu.dot_dimension_numbers<[1], [0], [0], [1], [0, 0, 1, 1], [], []>} : vector<1x32xf32>, vector<32x32xf32>, vector<1x32xf32> -> vector<1x32xf32>
    %cst_29 = arith.constant dense<0.000000e+00> : vector<1x32xf32>
    %40 = tpu.matmul %38, %18, %cst_29 {dimension_numbers = #tpu.dot_dimension_numbers<[1], [0], [0], [1], [0, 0, 1, 1], [], []>} : vector<1x32xf32>, vector<32x32xf32>, vector<1x32xf32> -> vector<1x32xf32>
    %41 = arith.mulf %40, %19 : vector<1x32xf32>
    %42 = arith.mulf %39, %41 : vector<1x32xf32>
    %43 = arith.subf %20, %42 : vector<1x32xf32>
    %44 = vector.broadcast %41 : vector<1x32xf32> to vector<128x32xf32>
    %45 = arith.mulf %16, %44 : vector<128x32xf32>
    %46 = vector.broadcast %43 : vector<1x32xf32> to vector<128x32xf32>
    %47 = arith.addf %45, %46 : vector<128x32xf32>
    %cst_30 = arith.constant 0.000000e+00 : f32
    %48 = vector.broadcast %cst_30 : f32 to vector<128x32xf32>
    %49 = arith.subf %48, %47 : vector<128x32xf32>
    %50 = math.exp %49 : vector<128x32xf32>
    %cst_31 = arith.constant 1.000000e+00 : f32
    %51 = vector.broadcast %cst_31 : f32 to vector<128x32xf32>
    %52 = arith.addf %51, %50 : vector<128x32xf32>
    %53 = tpu.reciprocal %52 {approx = true} : vector<128x32xf32> -> vector<128x32xf32>
    %54 = arith.mulf %47, %53 : vector<128x32xf32>
    %55 = vector.broadcast %6 : vector<128x1xf32> to vector<128x32xf32>
    %56 = arith.mulf %54, %55 : vector<128x32xf32>
    %57 = arith.truncf %56 : vector<128x32xf32> to vector<128x32xbf16>
    %c32 = arith.constant 32 : index
    %c0_32 = arith.constant 0 : index
    %58 = vector.load %arg17[%c32, %c0_32] : memref<192x32xbf16, #tpu.memory_space<vmem>>, vector<128x32xbf16>
    tpu.vector_store %arg17[%c32, %c0_32], %57 {strides = array<i32>} : memref<192x32xbf16, #tpu.memory_space<vmem>>, vector<128x32xbf16>,
    %c0_33 = arith.constant 0 : index
    %c0_34 = arith.constant 0 : index
    %59 = vector.load %arg5[%c0_33, %c0_34] : memref<1x64xf32, #tpu.memory_space<vmem>>, vector<1x64xf32>
    %c15 = arith.constant 15 : index
    %c0_35 = arith.constant 0 : index
    %60 = vector.load %arg17[%c15, %c0_35] : memref<192x32xbf16, #tpu.memory_space<vmem>>, vector<128x32xbf16>
    %c16 = arith.constant 16 : index
    %c0_36 = arith.constant 0 : index
    %61 = vector.load %arg17[%c16, %c0_36] : memref<192x32xbf16, #tpu.memory_space<vmem>>, vector<128x32xbf16>
    %c17 = arith.constant 17 : index
    %c0_37 = arith.constant 0 : index
    %62 = vector.load %arg17[%c17, %c0_37] : memref<192x32xbf16, #tpu.memory_space<vmem>>, vector<128x32xbf16>
    %63 = tpu.concatenate %60, %61, %62 in 1 : vector<128x32xbf16>, vector<128x32xbf16>, vector<128x32xbf16> -> vector<128x96xbf16>
    %c0_38 = arith.constant 0 : index
    %c0_39 = arith.constant 0 : index
    %c0_40 = arith.constant 0 : index
    %64 = vector.load %arg4[%c0_38, %c0_39, %c0_40] : memref<3x96x64xbf16, #tpu.memory_space<vmem>>, vector<1x96x64xbf16>
    %65 = vector.shape_cast %64 : vector<1x96x64xbf16> to vector<96x64xbf16>
    %cst_41 = arith.constant dense<0.000000e+00> : vector<128x64xf32>
    %66 = tpu.matmul %63, %65, %cst_41 {dimension_numbers = #tpu.dot_dimension_numbers<[1], [0], [0], [1], [0, 0, 1, 1], [], []>} : vector<128x96xbf16>, vector<96x64xbf16>, vector<128x64xf32> -> vector<128x64xf32>
    %67 = vector.broadcast %59 : vector<1x64xf32> to vector<128x64xf32>
    %68 = arith.addf %67, %66 : vector<128x64xf32>
    %c31 = arith.constant 31 : index
    %c0_42 = arith.constant 0 : index
    %69 = vector.load %arg17[%c31, %c0_42] : memref<192x32xbf16, #tpu.memory_space<vmem>>, vector<128x32xbf16>
    %c32_43 = arith.constant 32 : index
    %c0_44 = arith.constant 0 : index
    %70 = vector.load %arg17[%c32_43, %c0_44] : memref<192x32xbf16, #tpu.memory_space<vmem>>, vector<128x32xbf16>
    %c33 = arith.constant 33 : index
    %c0_45 = arith.constant 0 : index
    %71 = vector.load %arg17[%c33, %c0_45] : memref<192x32xbf16, #tpu.memory_space<vmem>>, vector<128x32xbf16>
    %72 = tpu.concatenate %69, %70, %71 in 1 : vector<128x32xbf16>, vector<128x32xbf16>, vector<128x32xbf16> -> vector<128x96xbf16>
    %c1 = arith.constant 1 : index
    %c0_46 = arith.constant 0 : index
    %c0_47 = arith.constant 0 : index
    %73 = vector.load %arg4[%c1, %c0_46, %c0_47] : memref<3x96x64xbf16, #tpu.memory_space<vmem>>, vector<1x96x64xbf16>
    %74 = vector.shape_cast %73 : vector<1x96x64xbf16> to vector<96x64xbf16>
    %cst_48 = arith.constant dense<0.000000e+00> : vector<128x64xf32>
    %75 = tpu.matmul %72, %74, %cst_48 {dimension_numbers = #tpu.dot_dimension_numbers<[1], [0], [0], [1], [0, 0, 1, 1], [], []>} : vector<128x96xbf16>, vector<96x64xbf16>, vector<128x64xf32> -> vector<128x64xf32>
    %76 = arith.addf %68, %75 : vector<128x64xf32>
    %c47 = arith.constant 47 : index
    %c0_49 = arith.constant 0 : index
    %77 = vector.load %arg17[%c47, %c0_49] : memref<192x32xbf16, #tpu.memory_space<vmem>>, vector<128x32xbf16>
    %c48 = arith.constant 48 : index
    %c0_50 = arith.constant 0 : index
    %78 = vector.load %arg17[%c48, %c0_50] : memref<192x32xbf16, #tpu.memory_space<vmem>>, vector<128x32xbf16>
    %c49 = arith.constant 49 : index
    %c0_51 = arith.constant 0 : index
    %79 = vector.load %arg17[%c49, %c0_51] : memref<192x32xbf16, #tpu.memory_space<vmem>>, vector<128x32xbf16>
    %80 = tpu.concatenate %77, %78, %79 in 1 : vector<128x32xbf16>, vector<128x32xbf16>, vector<128x32xbf16> -> vector<128x96xbf16>
    %c2 = arith.constant 2 : index
    %c0_52 = arith.constant 0 : index
    %c0_53 = arith.constant 0 : index
    %81 = vector.load %arg4[%c2, %c0_52, %c0_53] : memref<3x96x64xbf16, #tpu.memory_space<vmem>>, vector<1x96x64xbf16>
    %82 = vector.shape_cast %81 : vector<1x96x64xbf16> to vector<96x64xbf16>
    %cst_54 = arith.constant dense<0.000000e+00> : vector<128x64xf32>
    %83 = tpu.matmul %80, %82, %cst_54 {dimension_numbers = #tpu.dot_dimension_numbers<[1], [0], [0], [1], [0, 0, 1, 1], [], []>} : vector<128x96xbf16>, vector<96x64xbf16>, vector<128x64xf32> -> vector<128x64xf32>
    %84 = arith.addf %76, %83 : vector<128x64xf32>
    %85 = vector.broadcast %6 : vector<128x1xf32> to vector<128x64xf32>
    %86 = arith.mulf %84, %85 : vector<128x64xf32>
    %c0_55 = arith.constant 0 : index
    %c0_56 = arith.constant 0 : index
    %87 = vector.load %arg12[%c0_55, %c0_56] : memref<64x32xf32, #tpu.memory_space<vmem>>, vector<64x32xf32>
    %c0_57 = arith.constant 0 : index
    %c0_58 = arith.constant 0 : index
    %88 = vector.load %arg13[%c0_57, %c0_58] : memref<32x64xf32, #tpu.memory_space<vmem>>, vector<32x64xf32>
    %c0_59 = arith.constant 0 : index
    %c0_60 = arith.constant 0 : index
    %89 = vector.load %arg6[%c0_59, %c0_60] : memref<1x64xf32, #tpu.memory_space<vmem>>, vector<1x64xf32>
    %c0_61 = arith.constant 0 : index
    %c0_62 = arith.constant 0 : index
    %90 = vector.load %arg7[%c0_61, %c0_62] : memref<1x64xf32, #tpu.memory_space<vmem>>, vector<1x64xf32>
    %cst_63 = arith.constant dense<0.000000e+00> : vector<64xf32>
    %91 = vector.multi_reduction <add>, %86, %cst_63 [0] : vector<128x64xf32> to vector<64xf32>
    %92 = vector.shape_cast %91 : vector<64xf32> to vector<1x64xf32>
    %93 = arith.mulf %86, %86 : vector<128x64xf32>
    %cst_64 = arith.constant dense<0.000000e+00> : vector<64xf32>
    %94 = vector.multi_reduction <add>, %93, %cst_64 [0] : vector<128x64xf32> to vector<64xf32>
    %95 = vector.shape_cast %94 : vector<64xf32> to vector<1x64xf32>
    %cst_65 = arith.constant dense<0.000000e+00> : vector<1x32xf32>
    %96 = tpu.matmul %92, %87, %cst_65 {dimension_numbers = #tpu.dot_dimension_numbers<[1], [0], [0], [1], [0, 0, 1, 1], [], []>} : vector<1x64xf32>, vector<64x32xf32>, vector<1x32xf32> -> vector<1x32xf32>
    %cst_66 = arith.constant 7.812500e-03 : f32
    %97 = vector.broadcast %cst_66 : f32 to vector<1x32xf32>
    %98 = arith.mulf %96, %97 : vector<1x32xf32>
    %cst_67 = arith.constant dense<0.000000e+00> : vector<1x32xf32>
    %99 = tpu.matmul %95, %87, %cst_67 {dimension_numbers = #tpu.dot_dimension_numbers<[1], [0], [0], [1], [0, 0, 1, 1], [], []>} : vector<1x64xf32>, vector<64x32xf32>, vector<1x32xf32> -> vector<1x32xf32>
    %cst_68 = arith.constant 7.812500e-03 : f32
    %100 = vector.broadcast %cst_68 : f32 to vector<1x32xf32>
    %101 = arith.mulf %99, %100 : vector<1x32xf32>
    %102 = arith.mulf %98, %98 : vector<1x32xf32>
    %103 = arith.subf %101, %102 : vector<1x32xf32>
    %cst_69 = arith.constant 0.000000e+00 : f32
    %104 = vector.broadcast %cst_69 : f32 to vector<1x32xf32>
    %105 = arith.maximumf %103, %104 : vector<1x32xf32>
    %cst_70 = arith.constant 9.99999974E-6 : f32
    %106 = vector.broadcast %cst_70 : f32 to vector<1x32xf32>
    %107 = arith.addf %105, %106 : vector<1x32xf32>
    %108 = math.rsqrt %107 : vector<1x32xf32>
    %cst_71 = arith.constant dense<0.000000e+00> : vector<1x64xf32>
    %109 = tpu.matmul %98, %88, %cst_71 {dimension_numbers = #tpu.dot_dimension_numbers<[1], [0], [0], [1], [0, 0, 1, 1], [], []>} : vector<1x32xf32>, vector<32x64xf32>, vector<1x64xf32> -> vector<1x64xf32>
    %cst_72 = arith.constant dense<0.000000e+00> : vector<1x64xf32>
    %110 = tpu.matmul %108, %88, %cst_72 {dimension_numbers = #tpu.dot_dimension_numbers<[1], [0], [0], [1], [0, 0, 1, 1], [], []>} : vector<1x32xf32>, vector<32x64xf32>, vector<1x64xf32> -> vector<1x64xf32>
    %111 = arith.mulf %110, %89 : vector<1x64xf32>
    %112 = arith.mulf %109, %111 : vector<1x64xf32>
    %113 = arith.subf %90, %112 : vector<1x64xf32>
    %114 = vector.broadcast %111 : vector<1x64xf32> to vector<128x64xf32>
    %115 = arith.mulf %86, %114 : vector<128x64xf32>
    %116 = vector.broadcast %113 : vector<1x64xf32> to vector<128x64xf32>
    %117 = arith.addf %115, %116 : vector<128x64xf32>
    %cst_73 = arith.constant 0.000000e+00 : f32
    %118 = vector.broadcast %cst_73 : f32 to vector<128x64xf32>
    %119 = arith.subf %118, %117 : vector<128x64xf32>
    %120 = math.exp %119 : vector<128x64xf32>
    %cst_74 = arith.constant 1.000000e+00 : f32
    %121 = vector.broadcast %cst_74 : f32 to vector<128x64xf32>
    %122 = arith.addf %121, %120 : vector<128x64xf32>
    %123 = tpu.reciprocal %122 {approx = true} : vector<128x64xf32> -> vector<128x64xf32>
    %124 = arith.mulf %117, %123 : vector<128x64xf32>
    %125 = vector.broadcast %6 : vector<128x1xf32> to vector<128x64xf32>
    %126 = arith.mulf %124, %125 : vector<128x64xf32>
    %127 = arith.truncf %126 : vector<128x64xf32> to vector<128x64xbf16>
    %c32_75 = arith.constant 32 : index
    %c0_76 = arith.constant 0 : index
    %128 = vector.load %arg18[%c32_75, %c0_76] : memref<192x64xbf16, #tpu.memory_space<vmem>>, vector<128x64xbf16>
    tpu.vector_store %arg18[%c32_75, %c0_76], %127 {strides = array<i32>} : memref<192x64xbf16, #tpu.memory_space<vmem>>, vector<128x64xbf16>,
    %c0_77 = arith.constant 0 : index
    %c0_78 = arith.constant 0 : index
    %c0_79 = arith.constant 0 : index
    %129 = vector.load %arg1[%c0_77, %c0_78, %c0_79] : memref<1x128x32xf32, #tpu.memory_space<vmem>>, vector<1x128x32xf32>
    %130 = vector.shape_cast %129 : vector<1x128x32xf32> to vector<128x32xf32>
    %131 = arith.truncf %130 : vector<128x32xf32> to vector<128x32xbf16>
    %c0_80 = arith.constant 0 : index
    %c0_81 = arith.constant 0 : index
    %132 = vector.load %arg14[%c0_80, %c0_81] : memref<32x64xbf16, #tpu.memory_space<vmem>>, vector<32x64xbf16>
    %cst_82 = arith.constant dense<0.000000e+00> : vector<128x64xf32>
    %133 = tpu.matmul %131, %132, %cst_82 {dimension_numbers = #tpu.dot_dimension_numbers<[1], [0], [0], [1], [0, 0, 1, 1], [], []>} : vector<128x32xbf16>, vector<32x64xbf16>, vector<128x64xf32> -> vector<128x64xf32>
    %c0_83 = arith.constant 0 : index
    %c0_84 = arith.constant 0 : index
    %134 = vector.load %arg15[%c0_83, %c0_84] : memref<1x64xf32, #tpu.memory_space<vmem>>, vector<1x64xf32>
    %135 = vector.broadcast %134 : vector<1x64xf32> to vector<128x64xf32>
    %136 = arith.addf %133, %135 : vector<128x64xf32>
    %c0_85 = arith.constant 0 : index
    %c0_86 = arith.constant 0 : index
    %137 = vector.load %arg9[%c0_85, %c0_86] : memref<1x64xf32, #tpu.memory_space<vmem>>, vector<1x64xf32>
    %138 = vector.broadcast %137 : vector<1x64xf32> to vector<128x64xf32>
    %139 = arith.addf %136, %138 : vector<128x64xf32>
    %c15_87 = arith.constant 15 : index
    %c0_88 = arith.constant 0 : index
    %140 = vector.load %arg18[%c15_87, %c0_88] : memref<192x64xbf16, #tpu.memory_space<vmem>>, vector<128x64xbf16>
    %c16_89 = arith.constant 16 : index
    %c0_90 = arith.constant 0 : index
    %141 = vector.load %arg18[%c16_89, %c0_90] : memref<192x64xbf16, #tpu.memory_space<vmem>>, vector<128x64xbf16>
    %c17_91 = arith.constant 17 : index
    %c0_92 = arith.constant 0 : index
    %142 = vector.load %arg18[%c17_91, %c0_92] : memref<192x64xbf16, #tpu.memory_space<vmem>>, vector<128x64xbf16>
    %143 = tpu.concatenate %140, %141, %142 in 1 : vector<128x64xbf16>, vector<128x64xbf16>, vector<128x64xbf16> -> vector<128x192xbf16>
    %c0_93 = arith.constant 0 : index
    %c0_94 = arith.constant 0 : index
    %c0_95 = arith.constant 0 : index
    %144 = vector.load %arg8[%c0_93, %c0_94, %c0_95] : memref<3x192x64xbf16, #tpu.memory_space<vmem>>, vector<1x192x64xbf16>
    %145 = vector.shape_cast %144 : vector<1x192x64xbf16> to vector<192x64xbf16>
    %cst_96 = arith.constant dense<0.000000e+00> : vector<128x64xf32>
    %146 = tpu.matmul %143, %145, %cst_96 {dimension_numbers = #tpu.dot_dimension_numbers<[1], [0], [0], [1], [0, 0, 1, 1], [], []>} : vector<128x192xbf16>, vector<192x64xbf16>, vector<128x64xf32> -> vector<128x64xf32>
    %147 = arith.addf %139, %146 : vector<128x64xf32>
    %c31_97 = arith.constant 31 : index
    %c0_98 = arith.constant 0 : index
    %148 = vector.load %arg18[%c31_97, %c0_98] : memref<192x64xbf16, #tpu.memory_space<vmem>>, vector<128x64xbf16>
    %c32_99 = arith.constant 32 : index
    %c0_100 = arith.constant 0 : index
    %149 = vector.load %arg18[%c32_99, %c0_100] : memref<192x64xbf16, #tpu.memory_space<vmem>>, vector<128x64xbf16>
    %c33_101 = arith.constant 33 : index
    %c0_102 = arith.constant 0 : index
    %150 = vector.load %arg18[%c33_101, %c0_102] : memref<192x64xbf16, #tpu.memory_space<vmem>>, vector<128x64xbf16>
    %151 = tpu.concatenate %148, %149, %150 in 1 : vector<128x64xbf16>, vector<128x64xbf16>, vector<128x64xbf16> -> vector<128x192xbf16>
    %c1_103 = arith.constant 1 : index
    %c0_104 = arith.constant 0 : index
    %c0_105 = arith.constant 0 : index
    %152 = vector.load %arg8[%c1_103, %c0_104, %c0_105] : memref<3x192x64xbf16, #tpu.memory_space<vmem>>, vector<1x192x64xbf16>
    %153 = vector.shape_cast %152 : vector<1x192x64xbf16> to vector<192x64xbf16>
    %cst_106 = arith.constant dense<0.000000e+00> : vector<128x64xf32>
    %154 = tpu.matmul %151, %153, %cst_106 {dimension_numbers = #tpu.dot_dimension_numbers<[1], [0], [0], [1], [0, 0, 1, 1], [], []>} : vector<128x192xbf16>, vector<192x64xbf16>, vector<128x64xf32> -> vector<128x64xf32>
    %155 = arith.addf %147, %154 : vector<128x64xf32>
    %c47_107 = arith.constant 47 : index
    %c0_108 = arith.constant 0 : index
    %156 = vector.load %arg18[%c47_107, %c0_108] : memref<192x64xbf16, #tpu.memory_space<vmem>>, vector<128x64xbf16>
    %c48_109 = arith.constant 48 : index
    %c0_110 = arith.constant 0 : index
    %157 = vector.load %arg18[%c48_109, %c0_110] : memref<192x64xbf16, #tpu.memory_space<vmem>>, vector<128x64xbf16>
    %c49_111 = arith.constant 49 : index
    %c0_112 = arith.constant 0 : index
    %158 = vector.load %arg18[%c49_111, %c0_112] : memref<192x64xbf16, #tpu.memory_space<vmem>>, vector<128x64xbf16>
    %159 = tpu.concatenate %156, %157, %158 in 1 : vector<128x64xbf16>, vector<128x64xbf16>, vector<128x64xbf16> -> vector<128x192xbf16>
    %c2_113 = arith.constant 2 : index
    %c0_114 = arith.constant 0 : index
    %c0_115 = arith.constant 0 : index
    %160 = vector.load %arg8[%c2_113, %c0_114, %c0_115] : memref<3x192x64xbf16, #tpu.memory_space<vmem>>, vector<1x192x64xbf16>
    %161 = vector.shape_cast %160 : vector<1x192x64xbf16> to vector<192x64xbf16>
    %cst_116 = arith.constant dense<0.000000e+00> : vector<128x64xf32>
    %162 = tpu.matmul %159, %161, %cst_116 {dimension_numbers = #tpu.dot_dimension_numbers<[1], [0], [0], [1], [0, 0, 1, 1], [], []>} : vector<128x192xbf16>, vector<192x64xbf16>, vector<128x64xf32> -> vector<128x64xf32>
    %163 = arith.addf %155, %162 : vector<128x64xf32>
    %164 = vector.shape_cast %163 : vector<128x64xf32> to vector<8x16x64xf32>
    %165 = vector.extract_strided_slice %164 {offsets = [0, 0, 0], sizes = [8, 8, 64], strides = [1, 1, 1]} : vector<8x16x64xf32> to vector<8x8x64xf32>
    %c0_117 = arith.constant 0 : index
    %c0_118 = arith.constant 0 : index
    %c0_119 = arith.constant 0 : index
    %c0_120 = arith.constant 0 : index
    %166 = vector.load %arg16[%c0_117, %c0_118, %c0_119, %c0_120] : memref<1x8x8x64xf32, #tpu.memory_space<vmem>>, vector<1x8x8x64xf32>
    %167 = vector.shape_cast %166 : vector<1x8x8x64xf32> to vector<8x8x64xf32>
    %168 = vector.shape_cast %165 : vector<8x8x64xf32> to vector<1x8x8x64xf32>
    tpu.vector_store %arg16[%c0_117, %c0_118, %c0_119, %c0_120], %168 {strides = array<i32>} : memref<1x8x8x64xf32, #tpu.memory_space<vmem>>, vector<1x8x8x64xf32>,
    return
  }
  func.func @transform_0(%arg0: i32) -> (i32, i32, i32) {
    %c0_i32 = arith.constant 0 : i32
    %c0_i32_0 = arith.constant 0 : i32
    %c0_i32_1 = arith.constant 0 : i32
    return %arg0, %c0_i32, %c0_i32_0 : i32, i32, i32
  }
  func.func @transform_1(%arg0: i32) -> (i32, i32) {
    %c0_i32 = arith.constant 0 : i32
    %c0_i32_0 = arith.constant 0 : i32
    %c0_i32_1 = arith.constant 0 : i32
    return %c0_i32, %c0_i32_0 : i32, i32
  }
  func.func @transform_2(%arg0: i32) -> (i32, i32) {
    %c0_i32 = arith.constant 0 : i32
    %c0_i32_0 = arith.constant 0 : i32
    %c0_i32_1 = arith.constant 0 : i32
    return %c0_i32, %c0_i32_0 : i32, i32
  }
  func.func @transform_3(%arg0: i32) -> (i32, i32, i32) {
    %c0_i32 = arith.constant 0 : i32
    %c0_i32_0 = arith.constant 0 : i32
    %c0_i32_1 = arith.constant 0 : i32
    %c0_i32_2 = arith.constant 0 : i32
    return %c0_i32, %c0_i32_0, %c0_i32_1 : i32, i32, i32
  }
  func.func @transform_4(%arg0: i32) -> (i32, i32) {
    %c0_i32 = arith.constant 0 : i32
    %c0_i32_0 = arith.constant 0 : i32
    %c0_i32_1 = arith.constant 0 : i32
    return %c0_i32, %c0_i32_0 : i32, i32
  }
  func.func @transform_5(%arg0: i32) -> (i32, i32) {
    %c0_i32 = arith.constant 0 : i32
    %c0_i32_0 = arith.constant 0 : i32
    %c0_i32_1 = arith.constant 0 : i32
    return %c0_i32, %c0_i32_0 : i32, i32
  }
  func.func @transform_6(%arg0: i32) -> (i32, i32) {
    %c0_i32 = arith.constant 0 : i32
    %c0_i32_0 = arith.constant 0 : i32
    %c0_i32_1 = arith.constant 0 : i32
    return %c0_i32, %c0_i32_0 : i32, i32
  }
  func.func @transform_7(%arg0: i32) -> (i32, i32, i32) {
    %c0_i32 = arith.constant 0 : i32
    %c0_i32_0 = arith.constant 0 : i32
    %c0_i32_1 = arith.constant 0 : i32
    %c0_i32_2 = arith.constant 0 : i32
    return %c0_i32, %c0_i32_0, %c0_i32_1 : i32, i32, i32
  }
  func.func @transform_8(%arg0: i32) -> (i32, i32) {
    %c0_i32 = arith.constant 0 : i32
    %c0_i32_0 = arith.constant 0 : i32
    %c0_i32_1 = arith.constant 0 : i32
    return %c0_i32, %c0_i32_0 : i32, i32
  }
  func.func @transform_9(%arg0: i32) -> (i32, i32) {
    %c0_i32 = arith.constant 0 : i32
    %c0_i32_0 = arith.constant 0 : i32
    %c0_i32_1 = arith.constant 0 : i32
    return %c0_i32, %c0_i32_0 : i32, i32
  }
  func.func @transform_10(%arg0: i32) -> (i32, i32) {
    %c0_i32 = arith.constant 0 : i32
    %c0_i32_0 = arith.constant 0 : i32
    %c0_i32_1 = arith.constant 0 : i32
    return %c0_i32, %c0_i32_0 : i32, i32
  }
  func.func @transform_11(%arg0: i32) -> (i32, i32) {
    %c0_i32 = arith.constant 0 : i32
    %c0_i32_0 = arith.constant 0 : i32
    %c0_i32_1 = arith.constant 0 : i32
    return %c0_i32, %c0_i32_0 : i32, i32
  }
  func.func @transform_12(%arg0: i32) -> (i32, i32) {
    %c0_i32 = arith.constant 0 : i32
    %c0_i32_0 = arith.constant 0 : i32
    %c0_i32_1 = arith.constant 0 : i32
    return %c0_i32, %c0_i32_0 : i32, i32
  }
  func.func @transform_13(%arg0: i32) -> (i32, i32) {
    %c0_i32 = arith.constant 0 : i32
    %c0_i32_0 = arith.constant 0 : i32
    %c0_i32_1 = arith.constant 0 : i32
    return %c0_i32, %c0_i32_0 : i32, i32
  }
  func.func @transform_14(%arg0: i32) -> (i32, i32) {
    %c0_i32 = arith.constant 0 : i32
    %c0_i32_0 = arith.constant 0 : i32
    %c0_i32_1 = arith.constant 0 : i32
    return %c0_i32, %c0_i32_0 : i32, i32
  }
  func.func @transform_15(%arg0: i32) -> (i32, i32, i32, i32) {
    %c0_i32 = arith.constant 0 : i32
    %c0_i32_0 = arith.constant 0 : i32
    %c0_i32_1 = arith.constant 0 : i32
    %c0_i32_2 = arith.constant 0 : i32
    return %arg0, %c0_i32, %c0_i32_0, %c0_i32_1 : i32, i32, i32, i32
  }
}

module attributes {stable_mosaic.version = 11 : i64} {
  func.func @_vae_resblock_kernel(%arg0: i32, %arg1: memref<1x128x32xf32, #tpu.memory_space<vmem>>, %arg2: memref<1x32xf32, #tpu.memory_space<vmem>>, %arg3: memref<1x32xf32, #tpu.memory_space<vmem>>, %arg4: memref<3x96x64xbf16, #tpu.memory_space<vmem>>, %arg5: memref<1x64xf32, #tpu.memory_space<vmem>>, %arg6: memref<1x64xf32, #tpu.memory_space<vmem>>, %arg7: memref<1x64xf32, #tpu.memory_space<vmem>>, %arg8: memref<3x192x64xbf16, #tpu.memory_space<vmem>>, %arg9: memref<1x64xf32, #tpu.memory_space<vmem>>, %arg10: memref<32x32xf32, #tpu.memory_space<vmem>>, %arg11: memref<32x32xf32, #tpu.memory_space<vmem>>, %arg12: memref<64x32xf32, #tpu.memory_space<vmem>>, %arg13: memref<32x64xf32, #tpu.memory_space<vmem>>, %arg14: memref<32x64xbf16, #tpu.memory_space<vmem>>, %arg15: memref<1x64xf32, #tpu.memory_space<vmem>>, %arg16: memref<1x8x8x64xf32, #tpu.memory_space<vmem>>, %arg17: memref<192x32xbf16, #tpu.memory_space<vmem>>, %arg18: memref<192x64xbf16, #tpu.memory_space<vmem>>) attributes {dimension_semantics = [#tpu.dimension_semantics<parallel>], iteration_bounds = array<i64: 2>, scalar_prefetch = 0 : i64, scratch_operands = 2 : i64, tpu.core_type = #tpu.core_type<tc>, window_params = [{transform_indices = @transform_0, window_bounds = array<i64: 1, 128, 32>}, {pipeline_mode = #tpu.pipeline_mode<synchronous>, transform_indices = @transform_1, window_bounds = array<i64: 1, 32>}, {pipeline_mode = #tpu.pipeline_mode<synchronous>, transform_indices = @transform_2, window_bounds = array<i64: 1, 32>}, {pipeline_mode = #tpu.pipeline_mode<synchronous>, transform_indices = @transform_3, window_bounds = array<i64: 3, 96, 64>}, {pipeline_mode = #tpu.pipeline_mode<synchronous>, transform_indices = @transform_4, window_bounds = array<i64: 1, 64>}, {pipeline_mode = #tpu.pipeline_mode<synchronous>, transform_indices = @transform_5, window_bounds = array<i64: 1, 64>}, {pipeline_mode = #tpu.pipeline_mode<synchronous>, transform_indices = @transform_6, window_bounds = array<i64: 1, 64>}, {pipeline_mode = #tpu.pipeline_mode<synchronous>, transform_indices = @transform_7, window_bounds = array<i64: 3, 192, 64>}, {pipeline_mode = #tpu.pipeline_mode<synchronous>, transform_indices = @transform_8, window_bounds = array<i64: 1, 64>}, {pipeline_mode = #tpu.pipeline_mode<synchronous>, transform_indices = @transform_9, window_bounds = array<i64: 32, 32>}, {pipeline_mode = #tpu.pipeline_mode<synchronous>, transform_indices = @transform_10, window_bounds = array<i64: 32, 32>}, {pipeline_mode = #tpu.pipeline_mode<synchronous>, transform_indices = @transform_11, window_bounds = array<i64: 64, 32>}, {pipeline_mode = #tpu.pipeline_mode<synchronous>, transform_indices = @transform_12, window_bounds = array<i64: 32, 64>}, {pipeline_mode = #tpu.pipeline_mode<synchronous>, transform_indices = @transform_13, window_bounds = array<i64: 32, 64>}, {pipeline_mode = #tpu.pipeline_mode<synchronous>, transform_indices = @transform_14, window_bounds = array<i64: 1, 64>}, {transform_indices = @transform_15, window_bounds = array<i64: 1, 8, 8, 64>}]} {
    %0 = tpu.iota {dimensions = array<i32: 0>} : vector<128x1xi32>
    %c15_i32 = arith.constant 15 : i32
    %1 = vector.broadcast %c15_i32 : i32 to vector<128x1xi32>
    %2 = arith.andi %0, %1 : vector<128x1xi32>
    %c8_i32 = arith.constant 8 : i32
    %3 = vector.broadcast %c8_i32 : i32 to vector<128x1xi32>
    %4 = arith.cmpi slt, %2, %3 : vector<128x1xi32>
    %5 = arith.extui %4 : vector<128x1xi1> to vector<128x1xi32>
    %6 = arith.sitofp %5 : vector<128x1xi32> to vector<128x1xf32>
    %cst = arith.constant 0.000000e+00 : bf16
    %7 = vector.broadcast %cst : bf16 to vector<32x32xbf16>
    %c0 = arith.constant 0 : index
    %c0_0 = arith.constant 0 : index
    %8 = vector.load %arg17[%c0, %c0_0] : memref<192x32xbf16, #tpu.memory_space<vmem>>, vector<32x32xbf16>
    tpu.vector_store %arg17[%c0, %c0_0], %7 {strides = array<i32>} : memref<192x32xbf16, #tpu.memory_space<vmem>>, vector<32x32xbf16>,
    %cst_1 = arith.constant 0.000000e+00 : bf16
    %9 = vector.broadcast %cst_1 : bf16 to vector<32x32xbf16>
    %c160 = arith.constant 160 : index
    %c0_2 = arith.constant 0 : index
    %10 = vector.load %arg17[%c160, %c0_2] : memref<192x32xbf16, #tpu.memory_space<vmem>>, vector<32x32xbf16>
    tpu.vector_store %arg17[%c160, %c0_2], %9 {strides = array<i32>} : memref<192x32xbf16, #tpu.memory_space<vmem>>, vector<32x32xbf16>,
    %cst_3 = arith.constant 0.000000e+00 : bf16
    %11 = vector.broadcast %cst_3 : bf16 to vector<32x64xbf16>
    %c0_4 = arith.constant 0 : index
    %c0_5 = arith.constant 0 : index
    %12 = vector.load %arg18[%c0_4, %c0_5] : memref<192x64xbf16, #tpu.memory_space<vmem>>, vector<32x64xbf16>
    tpu.vector_store %arg18[%c0_4, %c0_5], %11 {strides = array<i32>} : memref<192x64xbf16, #tpu.memory_space<vmem>>, vector<32x64xbf16>,
    %cst_6 = arith.constant 0.000000e+00 : bf16
    %13 = vector.broadcast %cst_6 : bf16 to vector<32x64xbf16>
    %c160_7 = arith.constant 160 : index
    %c0_8 = arith.constant 0 : index
    %14 = vector.load %arg18[%c160_7, %c0_8] : memref<192x64xbf16, #tpu.memory_space<vmem>>, vector<32x64xbf16>
    tpu.vector_store %arg18[%c160_7, %c0_8], %13 {strides = array<i32>} : memref<192x64xbf16, #tpu.memory_space<vmem>>, vector<32x64xbf16>,
    %c0_9 = arith.constant 0 : index
    %c0_10 = arith.constant 0 : index
    %c0_11 = arith.constant 0 : index
    %15 = vector.load %arg1[%c0_9, %c0_10, %c0_11] : memref<1x128x32xf32, #tpu.memory_space<vmem>>, vector<1x128x32xf32>
    %16 = vector.shape_cast %15 : vector<1x128x32xf32> to vector<128x32xf32>
    %c0_12 = arith.constant 0 : index
    %c0_13 = arith.constant 0 : index
    %17 = vector.load %arg10[%c0_12, %c0_13] : memref<32x32xf32, #tpu.memory_space<vmem>>, vector<32x32xf32>
    %c0_14 = arith.constant 0 : index
    %c0_15 = arith.constant 0 : index
    %18 = vector.load %arg11[%c0_14, %c0_15] : memref<32x32xf32, #tpu.memory_space<vmem>>, vector<32x32xf32>
    %c0_16 = arith.constant 0 : index
    %c0_17 = arith.constant 0 : index
    %19 = vector.load %arg2[%c0_16, %c0_17] : memref<1x32xf32, #tpu.memory_space<vmem>>, vector<1x32xf32>
    %c0_18 = arith.constant 0 : index
    %c0_19 = arith.constant 0 : index
    %20 = vector.load %arg3[%c0_18, %c0_19] : memref<1x32xf32, #tpu.memory_space<vmem>>, vector<1x32xf32>
    %cst_20 = arith.constant dense<0.000000e+00> : vector<32xf32>
    %21 = vector.multi_reduction <add>, %16, %cst_20 [0] : vector<128x32xf32> to vector<32xf32>
    %22 = vector.shape_cast %21 : vector<32xf32> to vector<1x32xf32>
    %23 = arith.mulf %16, %16 : vector<128x32xf32>
    %cst_21 = arith.constant dense<0.000000e+00> : vector<32xf32>
    %24 = vector.multi_reduction <add>, %23, %cst_21 [0] : vector<128x32xf32> to vector<32xf32>
    %25 = vector.shape_cast %24 : vector<32xf32> to vector<1x32xf32>
    %cst_22 = arith.constant dense<0.000000e+00> : vector<1x32xf32>
    %26 = tpu.matmul %22, %17, %cst_22 {dimension_numbers = #tpu.dot_dimension_numbers<[1], [0], [0], [1], [0, 0, 1, 1], [], []>} : vector<1x32xf32>, vector<32x32xf32>, vector<1x32xf32> -> vector<1x32xf32>
    %cst_23 = arith.constant 1.562500e-02 : f32
    %27 = vector.broadcast %cst_23 : f32 to vector<1x32xf32>
    %28 = arith.mulf %26, %27 : vector<1x32xf32>
    %cst_24 = arith.constant dense<0.000000e+00> : vector<1x32xf32>
    %29 = tpu.matmul %25, %17, %cst_24 {dimension_numbers = #tpu.dot_dimension_numbers<[1], [0], [0], [1], [0, 0, 1, 1], [], []>} : vector<1x32xf32>, vector<32x32xf32>, vector<1x32xf32> -> vector<1x32xf32>
    %cst_25 = arith.constant 1.562500e-02 : f32
    %30 = vector.broadcast %cst_25 : f32 to vector<1x32xf32>
    %31 = arith.mulf %29, %30 : vector<1x32xf32>
    %32 = arith.mulf %28, %28 : vector<1x32xf32>
    %33 = arith.subf %31, %32 : vector<1x32xf32>
    %cst_26 = arith.constant 0.000000e+00 : f32
    %34 = vector.broadcast %cst_26 : f32 to vector<1x32xf32>
    %35 = arith.maximumf %33, %34 : vector<1x32xf32>
    %cst_27 = arith.constant 9.99999974E-6 : f32
    %36 = vector.broadcast %cst_27 : f32 to vector<1x32xf32>
    %37 = arith.addf %35, %36 : vector<1x32xf32>
    %38 = math.rsqrt %37 : vector<1x32xf32>
    %cst_28 = arith.constant dense<0.000000e+00> : vector<1x32xf32>
    %39 = tpu.matmul %28, %18, %cst_28 {dimension_numbers = #tpu.dot_dimension_numbers<[1], [0], [0], [1], [0, 0, 1, 1], [], []>} : vector<1x32xf32>, vector<32x32xf32>, vector<1x32xf32> -> vector<1x32xf32>
    %cst_29 = arith.constant dense<0.000000e+00> : vector<1x32xf32>
    %40 = tpu.matmul %38, %18, %cst_29 {dimension_numbers = #tpu.dot_dimension_numbers<[1], [0], [0], [1], [0, 0, 1, 1], [], []>} : vector<1x32xf32>, vector<32x32xf32>, vector<1x32xf32> -> vector<1x32xf32>
    %41 = arith.mulf %40, %19 : vector<1x32xf32>
    %42 = arith.mulf %39, %41 : vector<1x32xf32>
    %43 = arith.subf %20, %42 : vector<1x32xf32>
    %44 = vector.broadcast %41 : vector<1x32xf32> to vector<128x32xf32>
    %45 = arith.mulf %16, %44 : vector<128x32xf32>
    %46 = vector.broadcast %43 : vector<1x32xf32> to vector<128x32xf32>
    %47 = arith.addf %45, %46 : vector<128x32xf32>
    %cst_30 = arith.constant 0.000000e+00 : f32
    %48 = vector.broadcast %cst_30 : f32 to vector<128x32xf32>
    %49 = arith.subf %48, %47 : vector<128x32xf32>
    %50 = math.exp %49 : vector<128x32xf32>
    %cst_31 = arith.constant 1.000000e+00 : f32
    %51 = vector.broadcast %cst_31 : f32 to vector<128x32xf32>
    %52 = arith.addf %51, %50 : vector<128x32xf32>
    %53 = tpu.reciprocal %52 {approx = true} : vector<128x32xf32> -> vector<128x32xf32>
    %54 = arith.mulf %47, %53 : vector<128x32xf32>
    %55 = vector.broadcast %6 : vector<128x1xf32> to vector<128x32xf32>
    %56 = arith.mulf %54, %55 : vector<128x32xf32>
    %57 = arith.truncf %56 : vector<128x32xf32> to vector<128x32xbf16>
    %c32 = arith.constant 32 : index
    %c0_32 = arith.constant 0 : index
    %58 = vector.load %arg17[%c32, %c0_32] : memref<192x32xbf16, #tpu.memory_space<vmem>>, vector<128x32xbf16>
    tpu.vector_store %arg17[%c32, %c0_32], %57 {strides = array<i32>} : memref<192x32xbf16, #tpu.memory_space<vmem>>, vector<128x32xbf16>,
    %c0_33 = arith.constant 0 : index
    %c0_34 = arith.constant 0 : index
    %59 = vector.load %arg5[%c0_33, %c0_34] : memref<1x64xf32, #tpu.memory_space<vmem>>, vector<1x64xf32>
    %c15 = arith.constant 15 : index
    %c0_35 = arith.constant 0 : index
    %60 = vector.load %arg17[%c15, %c0_35] : memref<192x32xbf16, #tpu.memory_space<vmem>>, vector<128x32xbf16>
    %c0_36 = arith.constant 0 : index
    %c0_37 = arith.constant 0 : index
    %c0_38 = arith.constant 0 : index
    %61 = vector.load %arg4[%c0_36, %c0_37, %c0_38] : memref<3x96x64xbf16, #tpu.memory_space<vmem>>, vector<1x32x64xbf16>
    %62 = vector.shape_cast %61 : vector<1x32x64xbf16> to vector<32x64xbf16>
    %cst_39 = arith.constant dense<0.000000e+00> : vector<128x64xf32>
    %63 = tpu.matmul %60, %62, %cst_39 {dimension_numbers = #tpu.dot_dimension_numbers<[1], [0], [0], [1], [0, 0, 1, 1], [], []>} : vector<128x32xbf16>, vector<32x64xbf16>, vector<128x64xf32> -> vector<128x64xf32>
    %64 = vector.broadcast %59 : vector<1x64xf32> to vector<128x64xf32>
    %65 = arith.addf %64, %63 : vector<128x64xf32>
    %c16 = arith.constant 16 : index
    %c0_40 = arith.constant 0 : index
    %66 = vector.load %arg17[%c16, %c0_40] : memref<192x32xbf16, #tpu.memory_space<vmem>>, vector<128x32xbf16>
    %c0_41 = arith.constant 0 : index
    %c32_42 = arith.constant 32 : index
    %c0_43 = arith.constant 0 : index
    %67 = vector.load %arg4[%c0_41, %c32_42, %c0_43] : memref<3x96x64xbf16, #tpu.memory_space<vmem>>, vector<1x32x64xbf16>
    %68 = vector.shape_cast %67 : vector<1x32x64xbf16> to vector<32x64xbf16>
    %cst_44 = arith.constant dense<0.000000e+00> : vector<128x64xf32>
    %69 = tpu.matmul %66, %68, %cst_44 {dimension_numbers = #tpu.dot_dimension_numbers<[1], [0], [0], [1], [0, 0, 1, 1], [], []>} : vector<128x32xbf16>, vector<32x64xbf16>, vector<128x64xf32> -> vector<128x64xf32>
    %70 = arith.addf %65, %69 : vector<128x64xf32>
    %c17 = arith.constant 17 : index
    %c0_45 = arith.constant 0 : index
    %71 = vector.load %arg17[%c17, %c0_45] : memref<192x32xbf16, #tpu.memory_space<vmem>>, vector<128x32xbf16>
    %c0_46 = arith.constant 0 : index
    %c64 = arith.constant 64 : index
    %c0_47 = arith.constant 0 : index
    %72 = vector.load %arg4[%c0_46, %c64, %c0_47] : memref<3x96x64xbf16, #tpu.memory_space<vmem>>, vector<1x32x64xbf16>
    %73 = vector.shape_cast %72 : vector<1x32x64xbf16> to vector<32x64xbf16>
    %cst_48 = arith.constant dense<0.000000e+00> : vector<128x64xf32>
    %74 = tpu.matmul %71, %73, %cst_48 {dimension_numbers = #tpu.dot_dimension_numbers<[1], [0], [0], [1], [0, 0, 1, 1], [], []>} : vector<128x32xbf16>, vector<32x64xbf16>, vector<128x64xf32> -> vector<128x64xf32>
    %75 = arith.addf %70, %74 : vector<128x64xf32>
    %c31 = arith.constant 31 : index
    %c0_49 = arith.constant 0 : index
    %76 = vector.load %arg17[%c31, %c0_49] : memref<192x32xbf16, #tpu.memory_space<vmem>>, vector<128x32xbf16>
    %c1 = arith.constant 1 : index
    %c0_50 = arith.constant 0 : index
    %c0_51 = arith.constant 0 : index
    %77 = vector.load %arg4[%c1, %c0_50, %c0_51] : memref<3x96x64xbf16, #tpu.memory_space<vmem>>, vector<1x32x64xbf16>
    %78 = vector.shape_cast %77 : vector<1x32x64xbf16> to vector<32x64xbf16>
    %cst_52 = arith.constant dense<0.000000e+00> : vector<128x64xf32>
    %79 = tpu.matmul %76, %78, %cst_52 {dimension_numbers = #tpu.dot_dimension_numbers<[1], [0], [0], [1], [0, 0, 1, 1], [], []>} : vector<128x32xbf16>, vector<32x64xbf16>, vector<128x64xf32> -> vector<128x64xf32>
    %80 = arith.addf %75, %79 : vector<128x64xf32>
    %c32_53 = arith.constant 32 : index
    %c0_54 = arith.constant 0 : index
    %81 = vector.load %arg17[%c32_53, %c0_54] : memref<192x32xbf16, #tpu.memory_space<vmem>>, vector<128x32xbf16>
    %c1_55 = arith.constant 1 : index
    %c32_56 = arith.constant 32 : index
    %c0_57 = arith.constant 0 : index
    %82 = vector.load %arg4[%c1_55, %c32_56, %c0_57] : memref<3x96x64xbf16, #tpu.memory_space<vmem>>, vector<1x32x64xbf16>
    %83 = vector.shape_cast %82 : vector<1x32x64xbf16> to vector<32x64xbf16>
    %cst_58 = arith.constant dense<0.000000e+00> : vector<128x64xf32>
    %84 = tpu.matmul %81, %83, %cst_58 {dimension_numbers = #tpu.dot_dimension_numbers<[1], [0], [0], [1], [0, 0, 1, 1], [], []>} : vector<128x32xbf16>, vector<32x64xbf16>, vector<128x64xf32> -> vector<128x64xf32>
    %85 = arith.addf %80, %84 : vector<128x64xf32>
    %c33 = arith.constant 33 : index
    %c0_59 = arith.constant 0 : index
    %86 = vector.load %arg17[%c33, %c0_59] : memref<192x32xbf16, #tpu.memory_space<vmem>>, vector<128x32xbf16>
    %c1_60 = arith.constant 1 : index
    %c64_61 = arith.constant 64 : index
    %c0_62 = arith.constant 0 : index
    %87 = vector.load %arg4[%c1_60, %c64_61, %c0_62] : memref<3x96x64xbf16, #tpu.memory_space<vmem>>, vector<1x32x64xbf16>
    %88 = vector.shape_cast %87 : vector<1x32x64xbf16> to vector<32x64xbf16>
    %cst_63 = arith.constant dense<0.000000e+00> : vector<128x64xf32>
    %89 = tpu.matmul %86, %88, %cst_63 {dimension_numbers = #tpu.dot_dimension_numbers<[1], [0], [0], [1], [0, 0, 1, 1], [], []>} : vector<128x32xbf16>, vector<32x64xbf16>, vector<128x64xf32> -> vector<128x64xf32>
    %90 = arith.addf %85, %89 : vector<128x64xf32>
    %c47 = arith.constant 47 : index
    %c0_64 = arith.constant 0 : index
    %91 = vector.load %arg17[%c47, %c0_64] : memref<192x32xbf16, #tpu.memory_space<vmem>>, vector<128x32xbf16>
    %c2 = arith.constant 2 : index
    %c0_65 = arith.constant 0 : index
    %c0_66 = arith.constant 0 : index
    %92 = vector.load %arg4[%c2, %c0_65, %c0_66] : memref<3x96x64xbf16, #tpu.memory_space<vmem>>, vector<1x32x64xbf16>
    %93 = vector.shape_cast %92 : vector<1x32x64xbf16> to vector<32x64xbf16>
    %cst_67 = arith.constant dense<0.000000e+00> : vector<128x64xf32>
    %94 = tpu.matmul %91, %93, %cst_67 {dimension_numbers = #tpu.dot_dimension_numbers<[1], [0], [0], [1], [0, 0, 1, 1], [], []>} : vector<128x32xbf16>, vector<32x64xbf16>, vector<128x64xf32> -> vector<128x64xf32>
    %95 = arith.addf %90, %94 : vector<128x64xf32>
    %c48 = arith.constant 48 : index
    %c0_68 = arith.constant 0 : index
    %96 = vector.load %arg17[%c48, %c0_68] : memref<192x32xbf16, #tpu.memory_space<vmem>>, vector<128x32xbf16>
    %c2_69 = arith.constant 2 : index
    %c32_70 = arith.constant 32 : index
    %c0_71 = arith.constant 0 : index
    %97 = vector.load %arg4[%c2_69, %c32_70, %c0_71] : memref<3x96x64xbf16, #tpu.memory_space<vmem>>, vector<1x32x64xbf16>
    %98 = vector.shape_cast %97 : vector<1x32x64xbf16> to vector<32x64xbf16>
    %cst_72 = arith.constant dense<0.000000e+00> : vector<128x64xf32>
    %99 = tpu.matmul %96, %98, %cst_72 {dimension_numbers = #tpu.dot_dimension_numbers<[1], [0], [0], [1], [0, 0, 1, 1], [], []>} : vector<128x32xbf16>, vector<32x64xbf16>, vector<128x64xf32> -> vector<128x64xf32>
    %100 = arith.addf %95, %99 : vector<128x64xf32>
    %c49 = arith.constant 49 : index
    %c0_73 = arith.constant 0 : index
    %101 = vector.load %arg17[%c49, %c0_73] : memref<192x32xbf16, #tpu.memory_space<vmem>>, vector<128x32xbf16>
    %c2_74 = arith.constant 2 : index
    %c64_75 = arith.constant 64 : index
    %c0_76 = arith.constant 0 : index
    %102 = vector.load %arg4[%c2_74, %c64_75, %c0_76] : memref<3x96x64xbf16, #tpu.memory_space<vmem>>, vector<1x32x64xbf16>
    %103 = vector.shape_cast %102 : vector<1x32x64xbf16> to vector<32x64xbf16>
    %cst_77 = arith.constant dense<0.000000e+00> : vector<128x64xf32>
    %104 = tpu.matmul %101, %103, %cst_77 {dimension_numbers = #tpu.dot_dimension_numbers<[1], [0], [0], [1], [0, 0, 1, 1], [], []>} : vector<128x32xbf16>, vector<32x64xbf16>, vector<128x64xf32> -> vector<128x64xf32>
    %105 = arith.addf %100, %104 : vector<128x64xf32>
    %106 = vector.broadcast %6 : vector<128x1xf32> to vector<128x64xf32>
    %107 = arith.mulf %105, %106 : vector<128x64xf32>
    %c0_78 = arith.constant 0 : index
    %c0_79 = arith.constant 0 : index
    %108 = vector.load %arg12[%c0_78, %c0_79] : memref<64x32xf32, #tpu.memory_space<vmem>>, vector<64x32xf32>
    %c0_80 = arith.constant 0 : index
    %c0_81 = arith.constant 0 : index
    %109 = vector.load %arg13[%c0_80, %c0_81] : memref<32x64xf32, #tpu.memory_space<vmem>>, vector<32x64xf32>
    %c0_82 = arith.constant 0 : index
    %c0_83 = arith.constant 0 : index
    %110 = vector.load %arg6[%c0_82, %c0_83] : memref<1x64xf32, #tpu.memory_space<vmem>>, vector<1x64xf32>
    %c0_84 = arith.constant 0 : index
    %c0_85 = arith.constant 0 : index
    %111 = vector.load %arg7[%c0_84, %c0_85] : memref<1x64xf32, #tpu.memory_space<vmem>>, vector<1x64xf32>
    %cst_86 = arith.constant dense<0.000000e+00> : vector<64xf32>
    %112 = vector.multi_reduction <add>, %107, %cst_86 [0] : vector<128x64xf32> to vector<64xf32>
    %113 = vector.shape_cast %112 : vector<64xf32> to vector<1x64xf32>
    %114 = arith.mulf %107, %107 : vector<128x64xf32>
    %cst_87 = arith.constant dense<0.000000e+00> : vector<64xf32>
    %115 = vector.multi_reduction <add>, %114, %cst_87 [0] : vector<128x64xf32> to vector<64xf32>
    %116 = vector.shape_cast %115 : vector<64xf32> to vector<1x64xf32>
    %cst_88 = arith.constant dense<0.000000e+00> : vector<1x32xf32>
    %117 = tpu.matmul %113, %108, %cst_88 {dimension_numbers = #tpu.dot_dimension_numbers<[1], [0], [0], [1], [0, 0, 1, 1], [], []>} : vector<1x64xf32>, vector<64x32xf32>, vector<1x32xf32> -> vector<1x32xf32>
    %cst_89 = arith.constant 7.812500e-03 : f32
    %118 = vector.broadcast %cst_89 : f32 to vector<1x32xf32>
    %119 = arith.mulf %117, %118 : vector<1x32xf32>
    %cst_90 = arith.constant dense<0.000000e+00> : vector<1x32xf32>
    %120 = tpu.matmul %116, %108, %cst_90 {dimension_numbers = #tpu.dot_dimension_numbers<[1], [0], [0], [1], [0, 0, 1, 1], [], []>} : vector<1x64xf32>, vector<64x32xf32>, vector<1x32xf32> -> vector<1x32xf32>
    %cst_91 = arith.constant 7.812500e-03 : f32
    %121 = vector.broadcast %cst_91 : f32 to vector<1x32xf32>
    %122 = arith.mulf %120, %121 : vector<1x32xf32>
    %123 = arith.mulf %119, %119 : vector<1x32xf32>
    %124 = arith.subf %122, %123 : vector<1x32xf32>
    %cst_92 = arith.constant 0.000000e+00 : f32
    %125 = vector.broadcast %cst_92 : f32 to vector<1x32xf32>
    %126 = arith.maximumf %124, %125 : vector<1x32xf32>
    %cst_93 = arith.constant 9.99999974E-6 : f32
    %127 = vector.broadcast %cst_93 : f32 to vector<1x32xf32>
    %128 = arith.addf %126, %127 : vector<1x32xf32>
    %129 = math.rsqrt %128 : vector<1x32xf32>
    %cst_94 = arith.constant dense<0.000000e+00> : vector<1x64xf32>
    %130 = tpu.matmul %119, %109, %cst_94 {dimension_numbers = #tpu.dot_dimension_numbers<[1], [0], [0], [1], [0, 0, 1, 1], [], []>} : vector<1x32xf32>, vector<32x64xf32>, vector<1x64xf32> -> vector<1x64xf32>
    %cst_95 = arith.constant dense<0.000000e+00> : vector<1x64xf32>
    %131 = tpu.matmul %129, %109, %cst_95 {dimension_numbers = #tpu.dot_dimension_numbers<[1], [0], [0], [1], [0, 0, 1, 1], [], []>} : vector<1x32xf32>, vector<32x64xf32>, vector<1x64xf32> -> vector<1x64xf32>
    %132 = arith.mulf %131, %110 : vector<1x64xf32>
    %133 = arith.mulf %130, %132 : vector<1x64xf32>
    %134 = arith.subf %111, %133 : vector<1x64xf32>
    %135 = vector.broadcast %132 : vector<1x64xf32> to vector<128x64xf32>
    %136 = arith.mulf %107, %135 : vector<128x64xf32>
    %137 = vector.broadcast %134 : vector<1x64xf32> to vector<128x64xf32>
    %138 = arith.addf %136, %137 : vector<128x64xf32>
    %cst_96 = arith.constant 0.000000e+00 : f32
    %139 = vector.broadcast %cst_96 : f32 to vector<128x64xf32>
    %140 = arith.subf %139, %138 : vector<128x64xf32>
    %141 = math.exp %140 : vector<128x64xf32>
    %cst_97 = arith.constant 1.000000e+00 : f32
    %142 = vector.broadcast %cst_97 : f32 to vector<128x64xf32>
    %143 = arith.addf %142, %141 : vector<128x64xf32>
    %144 = tpu.reciprocal %143 {approx = true} : vector<128x64xf32> -> vector<128x64xf32>
    %145 = arith.mulf %138, %144 : vector<128x64xf32>
    %146 = vector.broadcast %6 : vector<128x1xf32> to vector<128x64xf32>
    %147 = arith.mulf %145, %146 : vector<128x64xf32>
    %148 = arith.truncf %147 : vector<128x64xf32> to vector<128x64xbf16>
    %c32_98 = arith.constant 32 : index
    %c0_99 = arith.constant 0 : index
    %149 = vector.load %arg18[%c32_98, %c0_99] : memref<192x64xbf16, #tpu.memory_space<vmem>>, vector<128x64xbf16>
    tpu.vector_store %arg18[%c32_98, %c0_99], %148 {strides = array<i32>} : memref<192x64xbf16, #tpu.memory_space<vmem>>, vector<128x64xbf16>,
    %c0_100 = arith.constant 0 : index
    %c0_101 = arith.constant 0 : index
    %c0_102 = arith.constant 0 : index
    %150 = vector.load %arg1[%c0_100, %c0_101, %c0_102] : memref<1x128x32xf32, #tpu.memory_space<vmem>>, vector<1x128x32xf32>
    %151 = vector.shape_cast %150 : vector<1x128x32xf32> to vector<128x32xf32>
    %152 = arith.truncf %151 : vector<128x32xf32> to vector<128x32xbf16>
    %c0_103 = arith.constant 0 : index
    %c0_104 = arith.constant 0 : index
    %153 = vector.load %arg14[%c0_103, %c0_104] : memref<32x64xbf16, #tpu.memory_space<vmem>>, vector<32x64xbf16>
    %cst_105 = arith.constant dense<0.000000e+00> : vector<128x64xf32>
    %154 = tpu.matmul %152, %153, %cst_105 {dimension_numbers = #tpu.dot_dimension_numbers<[1], [0], [0], [1], [0, 0, 1, 1], [], []>} : vector<128x32xbf16>, vector<32x64xbf16>, vector<128x64xf32> -> vector<128x64xf32>
    %c0_106 = arith.constant 0 : index
    %c0_107 = arith.constant 0 : index
    %155 = vector.load %arg15[%c0_106, %c0_107] : memref<1x64xf32, #tpu.memory_space<vmem>>, vector<1x64xf32>
    %156 = vector.broadcast %155 : vector<1x64xf32> to vector<128x64xf32>
    %157 = arith.addf %154, %156 : vector<128x64xf32>
    %c0_108 = arith.constant 0 : index
    %c0_109 = arith.constant 0 : index
    %158 = vector.load %arg9[%c0_108, %c0_109] : memref<1x64xf32, #tpu.memory_space<vmem>>, vector<1x64xf32>
    %159 = vector.broadcast %158 : vector<1x64xf32> to vector<128x64xf32>
    %160 = arith.addf %157, %159 : vector<128x64xf32>
    %c15_110 = arith.constant 15 : index
    %c0_111 = arith.constant 0 : index
    %161 = vector.load %arg18[%c15_110, %c0_111] : memref<192x64xbf16, #tpu.memory_space<vmem>>, vector<128x64xbf16>
    %c0_112 = arith.constant 0 : index
    %c0_113 = arith.constant 0 : index
    %c0_114 = arith.constant 0 : index
    %162 = vector.load %arg8[%c0_112, %c0_113, %c0_114] : memref<3x192x64xbf16, #tpu.memory_space<vmem>>, vector<1x64x64xbf16>
    %163 = vector.shape_cast %162 : vector<1x64x64xbf16> to vector<64x64xbf16>
    %cst_115 = arith.constant dense<0.000000e+00> : vector<128x64xf32>
    %164 = tpu.matmul %161, %163, %cst_115 {dimension_numbers = #tpu.dot_dimension_numbers<[1], [0], [0], [1], [0, 0, 1, 1], [], []>} : vector<128x64xbf16>, vector<64x64xbf16>, vector<128x64xf32> -> vector<128x64xf32>
    %165 = arith.addf %160, %164 : vector<128x64xf32>
    %c16_116 = arith.constant 16 : index
    %c0_117 = arith.constant 0 : index
    %166 = vector.load %arg18[%c16_116, %c0_117] : memref<192x64xbf16, #tpu.memory_space<vmem>>, vector<128x64xbf16>
    %c0_118 = arith.constant 0 : index
    %c64_119 = arith.constant 64 : index
    %c0_120 = arith.constant 0 : index
    %167 = vector.load %arg8[%c0_118, %c64_119, %c0_120] : memref<3x192x64xbf16, #tpu.memory_space<vmem>>, vector<1x64x64xbf16>
    %168 = vector.shape_cast %167 : vector<1x64x64xbf16> to vector<64x64xbf16>
    %cst_121 = arith.constant dense<0.000000e+00> : vector<128x64xf32>
    %169 = tpu.matmul %166, %168, %cst_121 {dimension_numbers = #tpu.dot_dimension_numbers<[1], [0], [0], [1], [0, 0, 1, 1], [], []>} : vector<128x64xbf16>, vector<64x64xbf16>, vector<128x64xf32> -> vector<128x64xf32>
    %170 = arith.addf %165, %169 : vector<128x64xf32>
    %c17_122 = arith.constant 17 : index
    %c0_123 = arith.constant 0 : index
    %171 = vector.load %arg18[%c17_122, %c0_123] : memref<192x64xbf16, #tpu.memory_space<vmem>>, vector<128x64xbf16>
    %c0_124 = arith.constant 0 : index
    %c128 = arith.constant 128 : index
    %c0_125 = arith.constant 0 : index
    %172 = vector.load %arg8[%c0_124, %c128, %c0_125] : memref<3x192x64xbf16, #tpu.memory_space<vmem>>, vector<1x64x64xbf16>
    %173 = vector.shape_cast %172 : vector<1x64x64xbf16> to vector<64x64xbf16>
    %cst_126 = arith.constant dense<0.000000e+00> : vector<128x64xf32>
    %174 = tpu.matmul %171, %173, %cst_126 {dimension_numbers = #tpu.dot_dimension_numbers<[1], [0], [0], [1], [0, 0, 1, 1], [], []>} : vector<128x64xbf16>, vector<64x64xbf16>, vector<128x64xf32> -> vector<128x64xf32>
    %175 = arith.addf %170, %174 : vector<128x64xf32>
    %c31_127 = arith.constant 31 : index
    %c0_128 = arith.constant 0 : index
    %176 = vector.load %arg18[%c31_127, %c0_128] : memref<192x64xbf16, #tpu.memory_space<vmem>>, vector<128x64xbf16>
    %c1_129 = arith.constant 1 : index
    %c0_130 = arith.constant 0 : index
    %c0_131 = arith.constant 0 : index
    %177 = vector.load %arg8[%c1_129, %c0_130, %c0_131] : memref<3x192x64xbf16, #tpu.memory_space<vmem>>, vector<1x64x64xbf16>
    %178 = vector.shape_cast %177 : vector<1x64x64xbf16> to vector<64x64xbf16>
    %cst_132 = arith.constant dense<0.000000e+00> : vector<128x64xf32>
    %179 = tpu.matmul %176, %178, %cst_132 {dimension_numbers = #tpu.dot_dimension_numbers<[1], [0], [0], [1], [0, 0, 1, 1], [], []>} : vector<128x64xbf16>, vector<64x64xbf16>, vector<128x64xf32> -> vector<128x64xf32>
    %180 = arith.addf %175, %179 : vector<128x64xf32>
    %c32_133 = arith.constant 32 : index
    %c0_134 = arith.constant 0 : index
    %181 = vector.load %arg18[%c32_133, %c0_134] : memref<192x64xbf16, #tpu.memory_space<vmem>>, vector<128x64xbf16>
    %c1_135 = arith.constant 1 : index
    %c64_136 = arith.constant 64 : index
    %c0_137 = arith.constant 0 : index
    %182 = vector.load %arg8[%c1_135, %c64_136, %c0_137] : memref<3x192x64xbf16, #tpu.memory_space<vmem>>, vector<1x64x64xbf16>
    %183 = vector.shape_cast %182 : vector<1x64x64xbf16> to vector<64x64xbf16>
    %cst_138 = arith.constant dense<0.000000e+00> : vector<128x64xf32>
    %184 = tpu.matmul %181, %183, %cst_138 {dimension_numbers = #tpu.dot_dimension_numbers<[1], [0], [0], [1], [0, 0, 1, 1], [], []>} : vector<128x64xbf16>, vector<64x64xbf16>, vector<128x64xf32> -> vector<128x64xf32>
    %185 = arith.addf %180, %184 : vector<128x64xf32>
    %c33_139 = arith.constant 33 : index
    %c0_140 = arith.constant 0 : index
    %186 = vector.load %arg18[%c33_139, %c0_140] : memref<192x64xbf16, #tpu.memory_space<vmem>>, vector<128x64xbf16>
    %c1_141 = arith.constant 1 : index
    %c128_142 = arith.constant 128 : index
    %c0_143 = arith.constant 0 : index
    %187 = vector.load %arg8[%c1_141, %c128_142, %c0_143] : memref<3x192x64xbf16, #tpu.memory_space<vmem>>, vector<1x64x64xbf16>
    %188 = vector.shape_cast %187 : vector<1x64x64xbf16> to vector<64x64xbf16>
    %cst_144 = arith.constant dense<0.000000e+00> : vector<128x64xf32>
    %189 = tpu.matmul %186, %188, %cst_144 {dimension_numbers = #tpu.dot_dimension_numbers<[1], [0], [0], [1], [0, 0, 1, 1], [], []>} : vector<128x64xbf16>, vector<64x64xbf16>, vector<128x64xf32> -> vector<128x64xf32>
    %190 = arith.addf %185, %189 : vector<128x64xf32>
    %c47_145 = arith.constant 47 : index
    %c0_146 = arith.constant 0 : index
    %191 = vector.load %arg18[%c47_145, %c0_146] : memref<192x64xbf16, #tpu.memory_space<vmem>>, vector<128x64xbf16>
    %c2_147 = arith.constant 2 : index
    %c0_148 = arith.constant 0 : index
    %c0_149 = arith.constant 0 : index
    %192 = vector.load %arg8[%c2_147, %c0_148, %c0_149] : memref<3x192x64xbf16, #tpu.memory_space<vmem>>, vector<1x64x64xbf16>
    %193 = vector.shape_cast %192 : vector<1x64x64xbf16> to vector<64x64xbf16>
    %cst_150 = arith.constant dense<0.000000e+00> : vector<128x64xf32>
    %194 = tpu.matmul %191, %193, %cst_150 {dimension_numbers = #tpu.dot_dimension_numbers<[1], [0], [0], [1], [0, 0, 1, 1], [], []>} : vector<128x64xbf16>, vector<64x64xbf16>, vector<128x64xf32> -> vector<128x64xf32>
    %195 = arith.addf %190, %194 : vector<128x64xf32>
    %c48_151 = arith.constant 48 : index
    %c0_152 = arith.constant 0 : index
    %196 = vector.load %arg18[%c48_151, %c0_152] : memref<192x64xbf16, #tpu.memory_space<vmem>>, vector<128x64xbf16>
    %c2_153 = arith.constant 2 : index
    %c64_154 = arith.constant 64 : index
    %c0_155 = arith.constant 0 : index
    %197 = vector.load %arg8[%c2_153, %c64_154, %c0_155] : memref<3x192x64xbf16, #tpu.memory_space<vmem>>, vector<1x64x64xbf16>
    %198 = vector.shape_cast %197 : vector<1x64x64xbf16> to vector<64x64xbf16>
    %cst_156 = arith.constant dense<0.000000e+00> : vector<128x64xf32>
    %199 = tpu.matmul %196, %198, %cst_156 {dimension_numbers = #tpu.dot_dimension_numbers<[1], [0], [0], [1], [0, 0, 1, 1], [], []>} : vector<128x64xbf16>, vector<64x64xbf16>, vector<128x64xf32> -> vector<128x64xf32>
    %200 = arith.addf %195, %199 : vector<128x64xf32>
    %c49_157 = arith.constant 49 : index
    %c0_158 = arith.constant 0 : index
    %201 = vector.load %arg18[%c49_157, %c0_158] : memref<192x64xbf16, #tpu.memory_space<vmem>>, vector<128x64xbf16>
    %c2_159 = arith.constant 2 : index
    %c128_160 = arith.constant 128 : index
    %c0_161 = arith.constant 0 : index
    %202 = vector.load %arg8[%c2_159, %c128_160, %c0_161] : memref<3x192x64xbf16, #tpu.memory_space<vmem>>, vector<1x64x64xbf16>
    %203 = vector.shape_cast %202 : vector<1x64x64xbf16> to vector<64x64xbf16>
    %cst_162 = arith.constant dense<0.000000e+00> : vector<128x64xf32>
    %204 = tpu.matmul %201, %203, %cst_162 {dimension_numbers = #tpu.dot_dimension_numbers<[1], [0], [0], [1], [0, 0, 1, 1], [], []>} : vector<128x64xbf16>, vector<64x64xbf16>, vector<128x64xf32> -> vector<128x64xf32>
    %205 = arith.addf %200, %204 : vector<128x64xf32>
    %206 = vector.shape_cast %205 : vector<128x64xf32> to vector<8x16x64xf32>
    %207 = vector.extract_strided_slice %206 {offsets = [0, 0, 0], sizes = [8, 8, 64], strides = [1, 1, 1]} : vector<8x16x64xf32> to vector<8x8x64xf32>
    %c0_163 = arith.constant 0 : index
    %c0_164 = arith.constant 0 : index
    %c0_165 = arith.constant 0 : index
    %c0_166 = arith.constant 0 : index
    %208 = vector.load %arg16[%c0_163, %c0_164, %c0_165, %c0_166] : memref<1x8x8x64xf32, #tpu.memory_space<vmem>>, vector<1x8x8x64xf32>
    %209 = vector.shape_cast %208 : vector<1x8x8x64xf32> to vector<8x8x64xf32>
    %210 = vector.shape_cast %207 : vector<8x8x64xf32> to vector<1x8x8x64xf32>
    tpu.vector_store %arg16[%c0_163, %c0_164, %c0_165, %c0_166], %210 {strides = array<i32>} : memref<1x8x8x64xf32, #tpu.memory_space<vmem>>, vector<1x8x8x64xf32>,
    return
  }
  func.func @transform_0(%arg0: i32) -> (i32, i32, i32) {
    %c0_i32 = arith.constant 0 : i32
    %c0_i32_0 = arith.constant 0 : i32
    %c0_i32_1 = arith.constant 0 : i32
    return %arg0, %c0_i32, %c0_i32_0 : i32, i32, i32
  }
  func.func @transform_1(%arg0: i32) -> (i32, i32) {
    %c0_i32 = arith.constant 0 : i32
    %c0_i32_0 = arith.constant 0 : i32
    %c0_i32_1 = arith.constant 0 : i32
    return %c0_i32, %c0_i32_0 : i32, i32
  }
  func.func @transform_2(%arg0: i32) -> (i32, i32) {
    %c0_i32 = arith.constant 0 : i32
    %c0_i32_0 = arith.constant 0 : i32
    %c0_i32_1 = arith.constant 0 : i32
    return %c0_i32, %c0_i32_0 : i32, i32
  }
  func.func @transform_3(%arg0: i32) -> (i32, i32, i32) {
    %c0_i32 = arith.constant 0 : i32
    %c0_i32_0 = arith.constant 0 : i32
    %c0_i32_1 = arith.constant 0 : i32
    %c0_i32_2 = arith.constant 0 : i32
    return %c0_i32, %c0_i32_0, %c0_i32_1 : i32, i32, i32
  }
  func.func @transform_4(%arg0: i32) -> (i32, i32) {
    %c0_i32 = arith.constant 0 : i32
    %c0_i32_0 = arith.constant 0 : i32
    %c0_i32_1 = arith.constant 0 : i32
    return %c0_i32, %c0_i32_0 : i32, i32
  }
  func.func @transform_5(%arg0: i32) -> (i32, i32) {
    %c0_i32 = arith.constant 0 : i32
    %c0_i32_0 = arith.constant 0 : i32
    %c0_i32_1 = arith.constant 0 : i32
    return %c0_i32, %c0_i32_0 : i32, i32
  }
  func.func @transform_6(%arg0: i32) -> (i32, i32) {
    %c0_i32 = arith.constant 0 : i32
    %c0_i32_0 = arith.constant 0 : i32
    %c0_i32_1 = arith.constant 0 : i32
    return %c0_i32, %c0_i32_0 : i32, i32
  }
  func.func @transform_7(%arg0: i32) -> (i32, i32, i32) {
    %c0_i32 = arith.constant 0 : i32
    %c0_i32_0 = arith.constant 0 : i32
    %c0_i32_1 = arith.constant 0 : i32
    %c0_i32_2 = arith.constant 0 : i32
    return %c0_i32, %c0_i32_0, %c0_i32_1 : i32, i32, i32
  }
  func.func @transform_8(%arg0: i32) -> (i32, i32) {
    %c0_i32 = arith.constant 0 : i32
    %c0_i32_0 = arith.constant 0 : i32
    %c0_i32_1 = arith.constant 0 : i32
    return %c0_i32, %c0_i32_0 : i32, i32
  }
  func.func @transform_9(%arg0: i32) -> (i32, i32) {
    %c0_i32 = arith.constant 0 : i32
    %c0_i32_0 = arith.constant 0 : i32
    %c0_i32_1 = arith.constant 0 : i32
    return %c0_i32, %c0_i32_0 : i32, i32
  }
  func.func @transform_10(%arg0: i32) -> (i32, i32) {
    %c0_i32 = arith.constant 0 : i32
    %c0_i32_0 = arith.constant 0 : i32
    %c0_i32_1 = arith.constant 0 : i32
    return %c0_i32, %c0_i32_0 : i32, i32
  }
  func.func @transform_11(%arg0: i32) -> (i32, i32) {
    %c0_i32 = arith.constant 0 : i32
    %c0_i32_0 = arith.constant 0 : i32
    %c0_i32_1 = arith.constant 0 : i32
    return %c0_i32, %c0_i32_0 : i32, i32
  }
  func.func @transform_12(%arg0: i32) -> (i32, i32) {
    %c0_i32 = arith.constant 0 : i32
    %c0_i32_0 = arith.constant 0 : i32
    %c0_i32_1 = arith.constant 0 : i32
    return %c0_i32, %c0_i32_0 : i32, i32
  }
  func.func @transform_13(%arg0: i32) -> (i32, i32) {
    %c0_i32 = arith.constant 0 : i32
    %c0_i32_0 = arith.constant 0 : i32
    %c0_i32_1 = arith.constant 0 : i32
    return %c0_i32, %c0_i32_0 : i32, i32
  }
  func.func @transform_14(%arg0: i32) -> (i32, i32) {
    %c0_i32 = arith.constant 0 : i32
    %c0_i32_0 = arith.constant 0 : i32
    %c0_i32_1 = arith.constant 0 : i32
    return %c0_i32, %c0_i32_0 : i32, i32
  }
  func.func @transform_15(%arg0: i32) -> (i32, i32, i32, i32) {
    %c0_i32 = arith.constant 0 : i32
    %c0_i32_0 = arith.constant 0 : i32
    %c0_i32_1 = arith.constant 0 : i32
    %c0_i32_2 = arith.constant 0 : i32
    return %arg0, %c0_i32, %c0_i32_0, %c0_i32_1 : i32, i32, i32, i32
  }
}

</mosaic_0001>

<bundles_post_ra>
// kernel: tpu_custom_call.1
= control target key start
LH: loop header
LB: loop body
LE: loop exit
PB: predicated region body
PF: predicated region fallthrough
CT: control target
= control target key end

     0   :  { %s7289_s0 = inlined_call_operand.vmem [shape: f32[2,128,32], index: 0, kind: input, shape index: {}]   ;;  %s7290_s1 = inlined_call_operand.vmem [shape: f32[1,32], index: 1, kind: input, shape index: {}]   ;;  %s7291_s2 = inlined_call_operand.vmem [shape: f32[1,32], index: 2, kind: input, shape index: {}]   ;;  %s7292_s3 = inlined_call_operand.vmem [shape: bf16[3,96,64], index: 3, kind: input, shape index: {}]   ;;  %s7293_s4 = inlined_call_operand.vmem [shape: f32[1,64], index: 4, kind: input, shape index: {}]   ;;  %s7294_s5 = inlined_call_operand.vmem [shape: f32[1,64], index: 5, kind: input, shape index: {}]   ;;  %s7295_s6 = inlined_call_operand.vmem [shape: f32[1,64], index: 6, kind: input, shape index: {}]   ;;  %s7296_s7 = inlined_call_operand.vmem [shape: bf16[3,192,64], index: 7, kind: input, shape index: {}]   ;;  %s7297_s8 = inlined_call_operand.vmem [shape: f32[1,64], index: 8, kind: input, shape index: {}]   ;;  %s7298_s9 = inlined_call_operand.vmem [shape: f32[32,32], index: 9, kind: input, shape index: {}]   ;;  %s7299_s10 = inlined_call_operand.vmem [shape: f32[32,32], index: 10, kind: input, shape index: {}]   ;;  %s7300_s11 = inlined_call_operand.vmem [shape: f32[64,32], index: 11, kind: input, shape index: {}]   ;;  %s7301_s12 = inlined_call_operand.vmem [shape: f32[32,64], index: 12, kind: input, shape index: {}]   ;;  %s7302_s13 = inlined_call_operand.vmem [shape: bf16[32,64], index: 13, kind: input, shape index: {}]   ;;  %s7303_s14 = inlined_call_operand.vmem [shape: f32[1,64], index: 14, kind: input, shape index: {}]   ;;  %s7304_s15 = inlined_call_operand.hbm [shape: f32[2,8,8,64], index: 15, kind: output, shape index: {}]  }
   0x1   :  { %7308 = sst [smem:[#allocation9_spill]] %s7289_s0 }
   0x2   :  { %7309 = sst [smem:[#allocation10_spill]] %s7290_s1 }
   0x3   :  { %20 = vsyncpa [#allocation5], 0 }
   0x4   :  { %22 = vsyncpa [#allocation5 + $0x1], 0  ;;  %s5581_s18 = smov 0   ;;  %s5583_s19 = smov 0  }
   0x5   :  { %s5585_s20 = smov 0   ;;  %s5587_s21 = smov 0  }
   0x6 LB: > { %7310 = sst [smem:[#allocation7_spill]] %s5486_s20  ;;  %s5602_s22 = sadd.s32 4294967295, %s5490_s21   ;;  %s5490_s21 = sphi %s5587_s21, %s7321_s21   ;;  %s5486_s20 = sphi %s5585_s20, %s7318_s20   ;;  %s5482_s19 = sphi %s5583_s19, %s7320_s19   ;;  %s5478_s18 = sphi %s5581_s18, %s7319_s18  }
   0x7   : > { %s4533_s23 = sadd.s32 4294967294, %s5490_s21   ;;  %s5606_s24 = sadd.s32 1, %s5490_s21  }
   0x8   : > { %s355_s25 = sadd.s32 1, %s5486_s20  ;;  %s352_s26 = ssub.s32 %s5490_s21, %s5606_s24 }
   0x9   : > { %p365_p0 = scmp.ne.s32.totalorder %s5486_s20, %s5482_s19  ;;  %p353_p1 = scmp.eq.s32.totalorder %s352_s26, 0 }
   0xa   : > { %p366_p2 = scmp.eq.s32.totalorder %s5602_s22, 1  ;;  %p371_p3 = scmp.ne.s32.totalorder %s5482_s19, %s5478_s18 }
   0xb   : > { %p372_p4 = scmp.eq.s32.totalorder %s4533_s23, 1  ;;  %p4536_p7 = scmp.ge.s32.totalorder %s5490_s21, 1 }
   0xc   : > { %s5617_s27 = scalar_select %p353_p1, %s5486_s20, %s355_s25  }
   0xd   : > { %p5619_p5 = por %p366_p2, %p365_p0  ;;  %p5623_p6 = por %p372_p4, %p371_p3 }
   0xe   : > { %7311 = sst [smem:[#allocation8_spill]] %s5617_s27  ;;  %p440_p8 = scmp.lt.s32.totalorder %s5490_s21, 3 }
  0x10   : > { %p441_p9 = pnand %p4536_p7, %p440_p8 }
  0x11   : > { %v601_v0 = vld [vmem:[%s7298_s9] sm:$0xff] (!%p441_p9)  ;;  %v602_v1 = vld [vmem:[%s7298_s9 + $0x8] sm:$0xff] (!%p441_p9)  ;;  %v603_v2 = vld [vmem:[%s7298_s9 + $0x10] sm:$0xff] (!%p441_p9)  ;;  %v5492_v3 = vmov (!%p441_p9), 0.0|0.0   ;;  %p488_p10 = scmp.lt.s32.totalorder (!%p441_p9), %s5602_s22, 1  ;;  %vm5493_vm0 = vmmov (!%p441_p9), 0  }
  0x12   : > { %444 = sbr.rel (%p441_p9) target bundleno = 2013 (0x7dd), region = 80  ;;  %5050 = vmatprep.subr.bf16.mxu0 (!%p441_p9), %v5492_v3  ;;  %v5051_v4 = vpack.c.bf16 (!%p441_p9), %v602_v1, %v601_v0  ;;  %5056 = vmatprep.subr.bf16.mxu1 (!%p441_p9), %v5492_v3  ;;  %v604_v5 = vld [vmem:[%s7298_s9 + $0x18] sm:$0xff] (!%p441_p9)  ;;  %v5494_v6 = vmov (!%p441_p9), 0.0   ;;  %vm575_vm1 = vcmask (!%p441_p9), 261120   ;;  %s7314_s0 = sld [smem:[#allocation9_spill]] (!%p441_p9)  ;;  %vm580_vm2 = vcmask (!%p441_p9), 523264  }
  0x13   : > { %4850 = vmatprep.mubr.msk.f32.mxu0 (!%p441_p9), %vm5493_vm0, %v5494_v6  ;;  %4861 = vmatprep.mubr.msk.f32.mxu1 (!%p441_p9), %vm5493_vm0, %v5494_v6  ;;  %v5054_v7 = vpack.c.bf16 (!%p441_p9), %v604_v5, %v603_v2  ;;  %s5496_s25 = smov (!%p441_p9), 32   ;;  %s7315_s1 = sld [smem:[#allocation10_spill]] (!%p441_p9)  ;;  %vm1275_vm3 = vcmask (!%p441_p9), 1046528   ;;  %vm1184_vm4 = vsmask.f32 (!%p441_p9), 7424  ;;  %vm1456_vm6 = vcmask (!%p441_p9), 785408  }
  0x14   : > { %5052 = vmatpush3.bf16.msra.mxu0 (!%p441_p9), %v5051_v4  ;;  %5058 = vmatpush3.bf16.msra.mxu1 (!%p441_p9), %v5051_v4  ;;  %s7306_s26 = smov (!%p441_p9), 64   ;;  %vm1360_vm5 = vsmask.f32 (!%p441_p9), 256  ;;  %s7316_s20 = smov (!%p441_p9), 64  }
  0x15   : > { %5053 = vmatprep.subr.bf16.mxu0 (!%p441_p9), %v5492_v3  ;;  %5059 = vmatprep.subr.bf16.mxu1 (!%p441_p9), %v5492_v3 }
  0x18   : > { %5055 = vmatpush3.bf16.msra.mxu0 (!%p441_p9), %v5054_v7  ;;  %5061 = vmatpush3.bf16.msra.mxu1 (!%p441_p9), %v5054_v7 }
  0x19   : > { %s489_s30 = scalar_select %p488_p10, %s5602_s22, 1  ;;  %5062 = vmatprep.subr.bf16.mxu0 %v5492_v3  ;;  %5068 = vmatprep.subr.bf16.mxu1 %v5492_v3 }
  0x1b   : > { %s4740_s16 = sshll.u32 %s489_s30, 7 }
  0x1c   : > { %s5654_s17 = scalar_lea.vmem %s7314_s0, %s4740_s16  ;;  %s485_s16 = sand.u32 1, %s5482_s19  }
  0x1d   : > { %v5657_v8 = vld [vmem:[%s5654_s17] sm:$0xff]  ;;  %v5660_v9 = vld [vmem:[%s5654_s17 + $0x8] sm:$0xff]  ;;  %v5663_v10 = vld [vmem:[%s5654_s17 + $0x10] sm:$0xff]  ;;  %s4537_s0 = sshll.u32 %s485_s16, 6 }
  0x1e   : > { %v5666_v11 = vld [vmem:[%s5654_s17 + $0x18] sm:$0xff]  ;;  %v5669_v12 = vld [vmem:[%s5654_s17 + $0x20] sm:$0xff]  ;;  %v5672_v13 = vld [vmem:[%s5654_s17 + $0x28] sm:$0xff]  ;;  %v611_v14 = vsel %vm575_vm1, %v5657_v8, 0.0  ;;  %v612_v15 = vsel %vm575_vm1, %v5660_v9, 0.0  ;;  %v614_v16 = vsel %vm575_vm1, %v5663_v10, 0.0  ;;  %v648_v28 = vmul.f32 %v5657_v8, %v5657_v8 }
  0x1f   : > { %v5683_v17 = vld [vmem:[%s5654_s17 + $0x30] sm:$0xff]  ;;  %v5686_v18 = vld [vmem:[%s5654_s17 + $0x38] sm:$0xff]  ;;  %v5689_v19 = vld [vmem:[%s5654_s17 + $0x40] sm:$0xff]  ;;  %v613_v20 = vadd.f32 %v612_v15, %v611_v14  ;;  %v616_v21 = vsel %vm575_vm1, %v5666_v11, 0.0  ;;  %v618_v25 = vsel %vm575_vm1, %v5669_v12, 0.0  ;;  %v620_v26 = vsel %vm575_vm1, %v5672_v13, 0.0 }
  0x20   : > { %v5694_v22 = vld [vmem:[%s5654_s17 + $0x48] sm:$0xff]  ;;  %v5697_v23 = vld [vmem:[%s5654_s17 + $0x50] sm:$0xff]  ;;  %v5700_v24 = vld [vmem:[%s5654_s17 + $0x58] sm:$0xff]  ;;  %v622_v27 = vsel %vm575_vm1, %v5683_v17, 0.0  ;;  %v624_v33 = vsel %vm575_vm1, %v5686_v18, 0.0  ;;  %v626_v34 = vsel %vm575_vm1, %v5689_v19, 0.0  ;;  %v649_v35 = vmul.f32 %v5660_v9, %v5660_v9 }
  0x21   : > { %v5711_v29 = vld [vmem:[%s5654_s17 + $0x60] sm:$0xff]  ;;  %v5714_v30 = vld [vmem:[%s5654_s17 + $0x68] sm:$0xff]  ;;  %v5717_v31 = vld [vmem:[%s5654_s17 + $0x70] sm:$0xff]  ;;  %v615_v32 = vadd.f32 %v614_v16, %v613_v20  ;;  %v628_v36 = vsel %vm575_vm1, %v5694_v22, 0.0  ;;  %v630_v37 = vsel %vm575_vm1, %v5697_v23, 0.0  ;;  %v632_v38 = vsel %vm575_vm1, %v5700_v24, 0.0 }
  0x22   : > { %v634_v39 = vsel %vm575_vm1, %v5711_v29, 0.0  ;;  %v5734_v40 = vld [vmem:[%s5654_s17 + $0x78] sm:$0xff]  ;;  %v636_v42 = vsel %vm575_vm1, %v5714_v30, 0.0  ;;  %v638_v43 = vsel %vm575_vm1, %v5717_v31, 0.0  ;;  %v650_v44 = vmul.f32 %v5663_v10, %v5663_v10 }
  0x23   : > { %v617_v41 = vadd.f32 %v616_v21, %v615_v32  ;;  %v651_v45 = vmul.f32 %v5666_v11, %v5666_v11  ;;  %v652_v46 = vmul.f32 %v5669_v12, %v5669_v12  ;;  %v653_v48 = vmul.f32 %v5672_v13, %v5672_v13 }
  0x24   : > { %v654_v49 = vmul.f32 %v5683_v17, %v5683_v17  ;;  %v655_v50 = vmul.f32 %v5686_v18, %v5686_v18  ;;  %v656_v51 = vmul.f32 %v5689_v19, %v5689_v19  ;;  %v657_v52 = vmul.f32 %v5694_v22, %v5694_v22 }
  0x25   : > { %v619_v47 = vadd.f32 %v618_v25, %v617_v41  ;;  %v658_v53 = vmul.f32 %v5697_v23, %v5697_v23  ;;  %v659_v54 = vmul.f32 %v5700_v24, %v5700_v24  ;;  %v664_v56 = vsel %vm575_vm1, %v648_v28, 0.0 }
  0x26   : > { %v665_v57 = vsel %vm575_vm1, %v649_v35, 0.0  ;;  %v667_v58 = vsel %vm575_vm1, %v650_v44, 0.0  ;;  %v640_v59 = vsel %vm575_vm1, %v5734_v40, 0.0  ;;  %v660_v60 = vmul.f32 %v5711_v29, %v5711_v29 }
  0x27   : > { %v621_v55 = vadd.f32 %v620_v26, %v619_v47  ;;  %v661_v61 = vmul.f32 %v5714_v30, %v5714_v30  ;;  %v666_v62 = vadd.f32 %v665_v57, %v664_v56  ;;  %v669_v0 = vsel %vm575_vm1, %v651_v45, 0.0 }
  0x28   : > { %v671_v1 = vsel %vm575_vm1, %v652_v46, 0.0  ;;  %v673_v2 = vsel %vm575_vm1, %v653_v48, 0.0  ;;  %v675_v5 = vsel %vm575_vm1, %v654_v49, 0.0  ;;  %v677_v7 = vsel %vm575_vm1, %v655_v50, 0.0 }
  0x29   : > { %v623_v63 = vadd.f32 %v622_v27, %v621_v55  ;;  %v668_v4 = vadd.f32 %v667_v58, %v666_v62  ;;  %v679_v14 = vsel %vm575_vm1, %v656_v51, 0.0  ;;  %v681_v16 = vsel %vm575_vm1, %v657_v52, 0.0  ;;  %v606_v58 = vld [vmem:[%s7299_s10 + $0x8] sm:$0xff] }
  0x2a   : > { %v683_v20 = vsel %vm575_vm1, %v658_v53, 0.0  ;;  %v685_v21 = vsel %vm575_vm1, %v659_v54, 0.0  ;;  %v687_v26 = vsel %vm575_vm1, %v660_v60, 0.0  ;;  %v689_v27 = vsel %vm575_vm1, %v661_v61, 0.0 }
  0x2b   : > { %v625_v15 = vadd.f32 %v624_v33, %v623_v63  ;;  %v670_v25 = vadd.f32 %v669_v0, %v668_v4  ;;  %v662_v52 = vmul.f32 %v5717_v31, %v5717_v31 }
  0x2d   : > { %v627_v28 = vadd.f32 %v626_v34, %v625_v15  ;;  %v672_v32 = vadd.f32 %v671_v1, %v670_v25  ;;  %v663_v34 = vmul.f32 %v5734_v40, %v5734_v40  ;;  %v607_v15 = vld [vmem:[%s7299_s10 + $0x10] sm:$0xff] }
  0x2f   : > { %v629_v35 = vadd.f32 %v628_v36, %v627_v28  ;;  %v674_v41 = vadd.f32 %v673_v2, %v672_v32  ;;  %v691_v36 = vsel %vm575_vm1, %v662_v52, 0.0  ;;  %v1003_v52 = vlaneseq }
  0x31   : > { %v631_v44 = vadd.f32 %v630_v37, %v629_v35  ;;  %v676_v45 = vadd.f32 %v675_v5, %v674_v41 }
  0x33   : > { %v633_v46 = vadd.f32 %v632_v38, %v631_v44  ;;  %v678_v47 = vadd.f32 %v677_v7, %v676_v45 }
  0x35   : > { %v635_v33 = vadd.f32 %v634_v39, %v633_v46  ;;  %v680_v48 = vadd.f32 %v679_v14, %v678_v47  ;;  %v5495_v47 = vmov 0  }
  0x36   : > { %577 = vst.msk [vmem:[#allocation2 + $0x8] sm:$0xff] %vm575_vm1, %v5495_v47  ;;  %576 = vst.msk [vmem:[#allocation2] sm:$0xff] %vm575_vm1, %v5495_v47 }
  0x37   : > { %v637_v49 = vadd.f32 %v636_v42, %v635_v33  ;;  %v682_v50 = vadd.f32 %v681_v16, %v680_v48  ;;  %v693_v42 = vsel %vm575_vm1, %v663_v34, 0.0  ;;  %v608_v16 = vld [vmem:[%s7299_s10 + $0x18] sm:$0xff]  ;;  %578 = vst.msk [vmem:[#allocation2 + $0x50] sm:$0xff] %vm575_vm1, %v5495_v47  ;;  %579 = vst.msk [vmem:[#allocation2 + $0x58] sm:$0xff] %vm575_vm1, %v5495_v47 }
  0x38   : > { %581 = vst.msk [vmem:[#allocation3] sm:$0xff] %vm580_vm2, %v5495_v47  ;;  %582 = vst.msk [vmem:[#allocation3 + $0x8] sm:$0xff] %vm580_vm2, %v5495_v47 }
  0x39   : > { %v639_v51 = vadd.f32 %v638_v43, %v637_v49  ;;  %v684_v53 = vadd.f32 %v683_v20, %v682_v50  ;;  %v605_v43 = vld [vmem:[%s7299_s10] sm:$0xff]  ;;  %v5066_v20 = vpack.c.bf16 %v608_v16, %v607_v15  ;;  %583 = vst.msk [vmem:[#allocation3 + $0x50] sm:$0xff] %vm580_vm2, %v5495_v47  ;;  %584 = vst.msk [vmem:[#allocation3 + $0x58] sm:$0xff] %vm580_vm2, %v5495_v47 }
  0x3a   : > { %v5063_v0 = vpack.c.bf16 %v606_v58, %v605_v43 }
  0x3b   : > { %v641_v54 = vadd.f32 %v640_v59, %v639_v51  ;;  %v686_v55 = vadd.f32 %v685_v21, %v684_v53  ;;  %v1004_v53 = vshrl.u32 %v1003_v52, 7 }
  0x3d   : > { %v642_v56 = vrot.slane %v641_v54, 4  ;;  %v688_v37 = vadd.f32 %v687_v26, %v686_v55  ;;  %v5819_v33 = vld [vmem:[#allocation2 + $0x8] sm:$0xff]  ;;  %v5829_v55 = vsub.s32 0, %v1004_v53 }
  0x3e   : > { %v1186_v48 = vshll.u32 %v5819_v33, 16 }
  0x3f   : > { %v643_v38 = vadd.f32 %v642_v56, %v641_v54  ;;  %v690_v57 = vadd.f32 %v689_v27, %v688_v37  ;;  %v609_v54 = vld [vmem:[%s7315_s1] sm:$0x1] }
  0x40   : > { %v5822_v49 = vrot.slane %v1186_v48, 1  ;;  %v610_v37 = vld [vmem:[%s7291_s2] sm:$0x1] }
  0x41   : > { %v644_v39 = vrot.slane %v643_v38, 2  ;;  %v692_v59 = vadd.f32 %v691_v36, %v690_v57 }
  0x42   : > { %1248 = vrot.lane.b32.xlu1 %v5822_v49, %s5496_s25 }
  0x43   : > { %v645_v60 = vadd.f32 %v644_v39, %v643_v38  ;;  %v694_v61 = vadd.f32 %v693_v42, %v692_v59 }
  0x45   : > { %v646_v62 = vrot.slane %v645_v60, 1  ;;  %v695_v63 = vrot.slane %v694_v61, 4 }
  0x47   : > { %v647_v1 = vadd.f32 %v646_v62, %v645_v60  ;;  %v696_v2 = vadd.f32 %v695_v63, %v694_v61 }
  0x49   : > { %4851 = vmatmul.mubr.msk.f32.vlgmr.msra.gmra.mrb[0].mxu0 %vm575_vm1, %v647_v1  ;;  %v697_v4 = vrot.slane %v696_v2, 2 }
  0x4a   : > { %5064 = vmatpush3.bf16.msra.mxu0 %v5063_v0  ;;  %4872 = vmatprep.mubr.msk.f32.mxu0 %vm5493_vm0, %v5494_v6 }
  0x4b   : > { %5065 = vmatprep.subr.bf16.mxu0 %v5492_v3  ;;  %v698_v5 = vadd.f32 %v697_v4, %v696_v2 }
  0x4d   : > { %v699_v7 = vrot.slane %v698_v5, 1 }
  0x4e   : > { %5067 = vmatpush3.bf16.msra.mxu0 %v5066_v20 }
  0x4f   : > { %v700_v14 = vadd.f32 %v699_v7, %v698_v5 }
  0x51   : > { %4862 = vmatmul.mubr.msk.f32.vlgmr.msra.gmra.mrb[0].mxu1 %vm575_vm1, %v700_v14 }
  0x52   : > { %5070 = vmatpush3.bf16.msra.mxu1 %v5063_v0  ;;  %4883 = vmatprep.mubr.msk.f32.mxu1 %vm5493_vm0, %v5494_v6 }
  0x53   : > { %5071 = vmatprep.subr.bf16.mxu1 %v5492_v3 }
  0x56   : > { %5073 = vmatpush3.bf16.msra.mxu1 %v5066_v20 }
  0x57   : > { %5074 = vmatprep.subr.bf16.mxu1 %v5492_v3 }
 0x11c   : > { %v770_v21 = vpop.f32.mrb[0].mxu0 }
 0x11d   : > { %v774_v25 = vmul.f32 0.015625, %v770_v21  ;;  %v4852_v26 = vpop.f32.mrb[1].mxu0 }
 0x11f   : > { %4873 = vmatmul.mubr.msk.f32.vlgmr.msra.gmra.mrb[2].mxu0 %vm575_vm1, %v774_v25  ;;  %v849_v27 = vmul.f32 %v774_v25, %v774_v25 }
 0x124   : > { %v844_v28 = vpop.f32.mrb[0].mxu1 }
 0x125   : > { %v848_v32 = vmul.f32 0.015625, %v844_v28  ;;  %v4863_v35 = vpop.f32.mrb[1].mxu1 }
 0x127   : > { %v850_v41 = vsub.f32 %v848_v32, %v849_v27 }
 0x129   : > { %v851_v44 = vmax.f32 %v850_v41, 0.0 }
 0x12b   : > { %v852_v45 = vadd.f32 1e-05, %v851_v44 }
 0x12d   : > { %5296 = vrsqrt.f32 %v852_v45 }
 0x137   : > { %v5297_v46 = vpop.eup %5296 }
 0x138   : > { %4884 = vmatmul.mubr.msk.f32.vlgmr.msra.gmra.mrb[2].mxu1 %vm575_vm1, %v5297_v46 }
 0x139   : > { %4986 = vmatprep.mubr.msk.f32.mxu1 %vm5493_vm0, %v5494_v6 }
 0x1f2   : > { %v923_v50 = vpop.f32.mrb[2].mxu0 }
 0x1f3   : > { %v4874_v51 = vpop.f32.mrb[3].mxu0 }
 0x20b   : > { %v996_v56 = vpop.f32.mrb[2].mxu1 }
 0x20c   : > { %v1000_v34 = vmul.f32 %v996_v56, %v609_v54  ;;  %v4885_v36 = vpop.f32.mrb[3].mxu1 }
 0x20e   : > { %v1001_v38 = vmul.f32 %v1000_v34, %v923_v50  ;;  %v1006_v57 = vrot.slane %v1000_v34, %v5829_v55 }
 0x210   : > { %v1002_v39 = vsub.f32 %v610_v37, %v1001_v38  ;;  %v1007_v42 = vmul.f32 %v1006_v57, %v5657_v8  ;;  %v1008_v43 = vmul.f32 %v1006_v57, %v5660_v9  ;;  %v1009_v58 = vmul.f32 %v1006_v57, %v5663_v10 }
 0x211   : > { %v1010_v59 = vmul.f32 %v1006_v57, %v5666_v11  ;;  %v1011_v60 = vmul.f32 %v1006_v57, %v5669_v12  ;;  %v1012_v61 = vmul.f32 %v1006_v57, %v5672_v13  ;;  %v1013_v63 = vmul.f32 %v1006_v57, %v5683_v17 }
 0x212   : > { %v1027_v62 = vrot.slane %v1002_v39, %v5829_v55  ;;  %v1014_v0 = vmul.f32 %v1006_v57, %v5686_v18  ;;  %v1015_v1 = vmul.f32 %v1006_v57, %v5689_v19  ;;  %v1016_v8 = vmul.f32 %v1006_v57, %v5694_v22 }
 0x213   : > { %v1017_v9 = vmul.f32 %v1006_v57, %v5697_v23  ;;  %v1018_v10 = vmul.f32 %v1006_v57, %v5700_v24  ;;  %v1019_v11 = vmul.f32 %v1006_v57, %v5711_v29  ;;  %v1020_v16 = vmul.f32 %v1006_v57, %v5714_v30 }
 0x214   : > { %v5849_v2 = vadd.f32 %v1027_v62, %v1007_v42  ;;  %v5851_v12 = vadd.f32 %v1027_v62, %v1008_v43  ;;  %v5853_v13 = vadd.f32 %v1027_v62, %v1009_v58  ;;  %v5855_v4 = vadd.f32 %v1027_v62, %v1010_v59 }
 0x215   : > { %v5857_v17 = vadd.f32 %v1027_v62, %v1011_v60  ;;  %v5859_v18 = vadd.f32 %v1027_v62, %v1012_v61  ;;  %v5861_v19 = vadd.f32 %v1027_v62, %v1013_v63  ;;  %v5863_v22 = vadd.f32 %v1027_v62, %v1014_v0  ;;  %v5240_v60 = vld [vmem:[%s7292_s3] sm:$0xff]  }
 0x216   : > { %v1045_v23 = vsub.f32 0.0, %v5849_v2  ;;  %v1046_v24 = vsub.f32 0.0, %v5851_v12  ;;  %v1047_v29 = vsub.f32 0.0, %v5853_v13  ;;  %v1048_v5 = vsub.f32 0.0, %v5855_v4  ;;  %4886 = vmatprep.subr.bf16.mxu0 %v5240_v60 }
 0x217   : > { %v1049_v7 = vsub.f32 0.0, %v5857_v17  ;;  %v1050_v14 = vsub.f32 0.0, %v5859_v18  ;;  %v1051_v15 = vsub.f32 0.0, %v5861_v19  ;;  %v5873_v26 = vadd.f32 %v1027_v62, %v1015_v1  ;;  %4887 = vmatpush3.bf16.msra.mxu0 %v5240_v60 }
 0x218   : > { %v1061_v20 = vmul.f32 1.442695, %v1045_v23  ;;  %v1063_v21 = vmul.f32 1.442695, %v1046_v24  ;;  %v1065_v25 = vmul.f32 1.442695, %v1047_v29  ;;  %v5876_v35 = vadd.f32 %v1027_v62, %v1016_v8 }
 0x219   : > { %v1067_v27 = vmul.f32 1.442695, %v1048_v5  ;;  %v1052_v28 = vsub.f32 0.0, %v5863_v22  ;;  %v1069_v32 = vmul.f32 1.442695, %v1049_v7  ;;  %v5878_v45 = vadd.f32 %v1027_v62, %v1017_v9 }
 0x21a   : > { %5298 = vpow2.f32 %v1061_v20  ;;  %v1071_v41 = vmul.f32 1.442695, %v1050_v14  ;;  %v1073_v44 = vmul.f32 1.442695, %v1051_v15  ;;  %v5880_v46 = vadd.f32 %v1027_v62, %v1018_v10 }
 0x21b   : > { %5300 = vpow2.f32 %v1063_v21  ;;  %v1053_v30 = vsub.f32 0.0, %v5873_v26  ;;  %v1054_v48 = vsub.f32 0.0, %v5876_v35  ;;  %v1055_v50 = vsub.f32 0.0, %v5878_v45 }
 0x21c   : > { %5302 = vpow2.f32 %v1065_v25  ;;  %v5885_v51 = vadd.f32 %v1027_v62, %v1019_v11  ;;  %v5887_v52 = vadd.f32 %v1027_v62, %v1020_v16  ;;  %v1075_v53 = vmul.f32 1.442695, %v1052_v28 }
 0x21d   : > { %5304 = vpow2.f32 %v1067_v27  ;;  %v1056_v54 = vsub.f32 0.0, %v5880_v46  ;;  %v1077_v56 = vmul.f32 1.442695, %v1053_v30  ;;  %v1079_v36 = vmul.f32 1.442695, %v1054_v48 }
 0x21e   : > { %5306 = vpow2.f32 %v1069_v32  ;;  %v1057_v34 = vsub.f32 0.0, %v5885_v51  ;;  %v1021_v37 = vmul.f32 %v1006_v57, %v5717_v31  ;;  %v1022_v38 = vmul.f32 %v1006_v57, %v5734_v40  ;;  %v5241_v31 = vld [vmem:[%s7292_s3 + $0x8] sm:$0xff]  }
 0x21f   : > { %5308 = vpow2.f32 %v1071_v41  ;;  %v1081_v39 = vmul.f32 1.442695, %v1055_v50  ;;  %v1083_v42 = vmul.f32 1.442695, %v1056_v54  ;;  %4888 = vmatprep.subr.bf16.mxu0 %v5241_v31  ;;  %v1058_v7 = vsub.f32 0.0, %v5887_v52 }
 0x220   : > { %5310 = vpow2.f32 %v1073_v44  ;;  %v5893_v43 = vadd.f32 %v1027_v62, %v1021_v37  ;;  %v5895_v58 = vadd.f32 %v1027_v62, %v1022_v38  ;;  %v1085_v59 = vmul.f32 1.442695, %v1057_v34  ;;  %4889 = vmatpush3.bf16.msra.mxu0 %v5241_v31 }
 0x221   : > { %5312 = vpow2.f32 %v1075_v53  ;;  %v1087_v44 = vmul.f32 1.442695, %v1058_v7 }
 0x222   : > { %5314 = vpow2.f32 %v1077_v56  ;;  %v1059_v21 = vsub.f32 0.0, %v5893_v43  ;;  %v1060_v28 = vsub.f32 0.0, %v5895_v58 }
 0x223   : > { %5316 = vpow2.f32 %v1079_v36 }
 0x224   : > { %v5299_v40 = vpop.eup %5298  ;;  %5318 = vpow2.f32 %v1081_v39  ;;  %v1089_v53 = vmul.f32 1.442695, %v1059_v21  ;;  %v1091_v56 = vmul.f32 1.442695, %v1060_v28 }
 0x225   : > { %v5301_v57 = vpop.eup %5300  ;;  %v1093_v61 = vadd.f32 1.0, %v5299_v40  ;;  %5320 = vpow2.f32 %v1083_v42 }
 0x226   : > { %v5303_v62 = vpop.eup %5302  ;;  %v1094_v63 = vadd.f32 1.0, %v5301_v57  ;;  %5322 = vpow2.f32 %v1085_v59 }
 0x227   : > { %v5305_v0 = vpop.eup %5304  ;;  %v1095_v1 = vadd.f32 1.0, %v5303_v62  ;;  %5324 = vrcp.f32 %v1093_v61 }
 0x228   : > { %v5307_v8 = vpop.eup %5306  ;;  %v1096_v9 = vadd.f32 1.0, %v5305_v0  ;;  %5326 = vrcp.f32 %v1094_v63 }
 0x229   : > { %v5309_v10 = vpop.eup %5308  ;;  %5328 = vrcp.f32 %v1095_v1  ;;  %v1097_v11 = vadd.f32 1.0, %v5307_v8 }
 0x22a   : > { %v5311_v23 = vpop.eup %5310  ;;  %5330 = vrcp.f32 %v1096_v9  ;;  %v1098_v24 = vadd.f32 1.0, %v5309_v10 }
 0x22b   : > { %v5313_v29 = vpop.eup %5312  ;;  %v1099_v5 = vadd.f32 1.0, %v5311_v23  ;;  %5332 = vrcp.f32 %v1097_v11 }
 0x22c   : > { %v5315_v14 = vpop.eup %5314  ;;  %v1100_v15 = vadd.f32 1.0, %v5313_v29  ;;  %5334 = vrcp.f32 %v1098_v24 }
 0x22d   : > { %v5317_v16 = vpop.eup %5316  ;;  %5336 = vrcp.f32 %v1099_v5  ;;  %v1101_v20 = vadd.f32 1.0, %v5315_v14 }
 0x22e   : > { %v5319_v25 = vpop.eup %5318  ;;  %5338 = vrcp.f32 %v1100_v15  ;;  %v1102_v27 = vadd.f32 1.0, %v5317_v16 }
 0x22f   : > { %v5321_v32 = vpop.eup %5320  ;;  %v1103_v41 = vadd.f32 1.0, %v5319_v25  ;;  %5340 = vrcp.f32 %v1101_v20 }
 0x230   : > { %v5323_v30 = vpop.eup %5322  ;;  %v1104_v48 = vadd.f32 1.0, %v5321_v32  ;;  %5342 = vrcp.f32 %v1102_v27  ;;  %v1189_v27 = vshrl.u32 %v5819_v33, 16 }
 0x231   : > { %v5325_v50 = vpop.eup %5324  ;;  %5344 = vrcp.f32 %v1103_v41  ;;  %v1105_v23 = vadd.f32 1.0, %v5323_v30 }
 0x232   : > { %v5327_v54 = vpop.eup %5326  ;;  %5346 = vrcp.f32 %v1104_v48  ;;  %v1125_v39 = vmul.f32 %v5325_v50, %v5849_v2  ;;  %v5243_v50 = vld [vmem:[%s7292_s3 + $0x18] sm:$0xff]  }
 0x233   : > { %v5329_v34 = vpop.eup %5328  ;;  %v1126_v36 = vmul.f32 %v5327_v54, %v5851_v12  ;;  %5348 = vpow2.f32 %v1087_v44  ;;  %v5242_v12 = vld [vmem:[%s7292_s3 + $0x10] sm:$0xff]  }
 0x234   : > { %v5331_v37 = vpop.eup %5330  ;;  %5350 = vpow2.f32 %v1089_v53  ;;  %v1127_v40 = vmul.f32 %v5329_v34, %v5853_v13  ;;  %4890 = vmatprep.subr.bf16.mxu0 %v5242_v12  ;;  %v1191_v53 = vor.u32 %v1189_v27, %v5822_v49 }
 0x235   : > { %v5333_v38 = vpop.eup %5332  ;;  %v1128_v42 = vmul.f32 %v5331_v37, %v5855_v4  ;;  %v1142_v59 = vmul.f32 0.0, %v1126_v36  ;;  %5352 = vpow2.f32 %v1091_v56  ;;  %4891 = vmatpush3.bf16.msra.mxu0 %v5242_v12 }
 0x236   : > { %v5335_v60 = vpop.eup %5334  ;;  %v1129_v4 = vmul.f32 %v5333_v38, %v5857_v17  ;;  %4892 = vmatprep.subr.bf16.mxu0 %v5243_v50 }
 0x237   : > { %v5337_v31 = vpop.eup %5336  ;;  %v1144_v57 = vmul.f32 0.0, %v1128_v42  ;;  %v1157_v61 = vpack.c.bf16 %v1142_v59, %v1125_v39  ;;  %v1130_v62 = vmul.f32 %v5335_v60, %v5859_v18  ;;  %v5244_v60 = vld [vmem:[%s7292_s3 + $0x20] sm:$0xff]  }
 0x238   : > { %v5339_v63 = vpop.eup %5338  ;;  %v1131_v17 = vmul.f32 %v5337_v31, %v5861_v19  ;;  %v1276_v19 = vrot.slane %v5819_v33, 1 }
 0x239   : > { %v5341_v2 = vpop.eup %5340  ;;  %v1158_v0 = vpack.c.bf16 %v1144_v57, %v1127_v40  ;;  %1165 = vst.msk [vmem:[#allocation2 + $0x10] sm:$0xff] %vm575_vm1, %v1157_v61  ;;  %v1132_v1 = vmul.f32 %v5339_v63, %v5863_v22  ;;  %v1146_v8 = vmul.f32 0.0, %v1130_v62  ;;  %4893 = vmatpush3.bf16.msra.mxu0 %v5243_v50  ;;  %v5245_v61 = vld [vmem:[%s7292_s3 + $0x28] sm:$0xff]  }
 0x23a   : > { %v5343_v13 = vpop.eup %5342  ;;  %v1133_v5 = vmul.f32 %v5341_v2, %v5873_v26  ;;  %4894 = vmatprep.subr.bf16.mxu0 %v5244_v60 }
 0x23b   : > { %v5345_v18 = vpop.eup %5344  ;;  %1166 = vst.msk [vmem:[#allocation2 + $0x18] sm:$0xff] %vm575_vm1, %v1158_v0  ;;  %v1148_v22 = vmul.f32 0.0, %v1132_v1  ;;  %v1159_v9 = vpack.c.bf16 %v1146_v8, %v1129_v4  ;;  %v1134_v10 = vmul.f32 %v5343_v13, %v5876_v35 }
 0x23c   : > { %v5347_v11 = vpop.eup %5346  ;;  %v1135_v35 = vmul.f32 %v5345_v18, %v5878_v45 }
 0x23d   : > { %v5349_v24 = vpop.eup %5348  ;;  %v1160_v29 = vpack.c.bf16 %v1148_v22, %v1131_v17  ;;  %1167 = vst.msk [vmem:[#allocation2 + $0x20] sm:$0xff] %vm575_vm1, %v1159_v9  ;;  %v1136_v7 = vmul.f32 %v5347_v11, %v5880_v46  ;;  %v1150_v14 = vmul.f32 0.0, %v1134_v10  ;;  %4895 = vmatpush3.bf16.msra.mxu0 %v5244_v60 }
 0x23e   : > { %v1106_v15 = vadd.f32 1.0, %v5349_v24  ;;  %v5351_v16 = vpop.eup %5350  ;;  %4896 = vmatprep.subr.bf16.mxu0 %v5245_v61 }
 0x23f   : > { %1168 = vst.msk [vmem:[#allocation2 + $0x28] sm:$0xff] %vm575_vm1, %v1160_v29  ;;  %v1152_v20 = vmul.f32 0.0, %v1136_v7  ;;  %v1161_v21 = vpack.c.bf16 %v1150_v14, %v1133_v5  ;;  %v5353_v25 = vpop.eup %5352  ;;  %v1107_v26 = vadd.f32 1.0, %v5351_v16 }
 0x240   : > { %v5935_v28 = vld [vmem:[#allocation2 + $0x10] sm:$0xff]  ;;  %5354 = vrcp.f32 %v1106_v15  ;;  %v1108_v44 = vadd.f32 1.0, %v5353_v25 }
 0x241   : > { %v5938_v46 = vrot.slane %v5935_v28, 1  ;;  %v1193_v32 = vshll.u32 %v5935_v28, 16  ;;  %v1162_v41 = vpack.c.bf16 %v1152_v20, %v1135_v35  ;;  %1169 = vst.msk [vmem:[#allocation2 + $0x30] sm:$0xff] %vm575_vm1, %v1161_v21  ;;  %5356 = vrcp.f32 %v1105_v23  ;;  %4897 = vmatpush3.bf16.msra.mxu0 %v5245_v61 }
 0x242   : > { %v5942_v45 = vld [vmem:[#allocation2 + $0x18] sm:$0xff]  ;;  %5358 = vrcp.f32 %v1107_v26  ;;  %v1197_v38 = vshrl.u32 %v5935_v28, 16 }
 0x243   : > { %v5945_v30 = vrot.slane %v5942_v45, 1  ;;  %v1278_v48 = vsel %vm1275_vm3, %v1276_v19, %v5938_v46  ;;  %1170 = vst.msk [vmem:[#allocation2 + $0x38] sm:$0xff] %vm575_vm1, %v1162_v41  ;;  %v5955_v54 = vrot.slane %v1193_v32, 1  ;;  %5360 = vrcp.f32 %v1108_v44 }
 0x244   : > { %1295 = vrot.lane.b32.xlu1 %v1278_v48, %s7306_s26  ;;  %v5957_v56 = vld [vmem:[#allocation2 + $0x20] sm:$0xff]  ;;  %v1201_v37 = vshll.u32 %v5942_v45, 16  ;;  %v1205_v4 = vshrl.u32 %v5942_v45, 16 }
 0x245   : > { %v5962_v34 = vsel %vm1275_vm3, %v5938_v46, %v5945_v30  ;;  %v1209_v36 = vshll.u32 %v5957_v56, 16  ;;  %v1213_v42 = vshrl.u32 %v5957_v56, 16  ;;  %v1196_v31 = vsel %vm1184_vm4, %v1191_v53, %v5955_v54 }
 0x246   : > { %1297 = vrot.lane.b32.xlu0 %v5962_v34, %s7306_s26  ;;  %v5968_v49 = vld [vmem:[#allocation2 + $0x28] sm:$0xff]  ;;  %v1199_v40 = vor.u32 %v1197_v38, %v5955_v54  ;;  %v5985_v12 = vrot.slane %v1201_v37, 1  ;;  %v1281_v18 = vrot.slane %v5957_v56, 1 }
 0x247   : > { %v1211_v39 = vrot.slane %v1209_v36, 1  ;;  %v1217_v59 = vshll.u32 %v5968_v49, 16  ;;  %v1283_v17 = vrot.slane %v5968_v49, 1  ;;  %v1221_v27 = vshrl.u32 %v5968_v49, 16 }
 0x248   : > { %1293 = vrot.lane.b32.xlu1 %v1276_v19, %s7306_s26  ;;  %v5980_v57 = vld [vmem:[#allocation2 + $0x30] sm:$0xff]  ;;  %v1204_v11 = vsel %vm1184_vm4, %v1199_v40, %v5985_v12  ;;  %v1207_v23 = vor.u32 %v1205_v4, %v5985_v12 }
 0x249   : > { %v1215_v62 = vor.u32 %v1213_v42, %v1211_v39  ;;  %v1219_v63 = vrot.slane %v1217_v59, 1  ;;  %v1225_v2 = vshll.u32 %v5980_v57, 16  ;;  %v1229_v24 = vshrl.u32 %v5980_v57, 16 }
 0x24a   : > { %v5355_v0 = vpop.eup %5354  ;;  %1250 = vrot.lane.b32.xlu0 %v1196_v31, %s5496_s25  ;;  %v5990_v1 = vld [vmem:[#allocation2 + $0x38] sm:$0xff]  ;;  %v6013_v15 = vsel %vm1275_vm3, %v1281_v18, %v1283_v17  ;;  %v1285_v26 = vrot.slane %v5980_v57, 1 }
 0x24b   : > { %v5357_v8 = vpop.eup %5356  ;;  %v5993_v13 = vsel %vm1184_vm4, %v1215_v62, %v1219_v63  ;;  %v1227_v22 = vrot.slane %v1225_v2, 1  ;;  %v1138_v9 = vmul.f32 %v5355_v0, %v5887_v52  ;;  %v1233_v29 = vshll.u32 %v5990_v1, 16  ;;  %v6010_v52 = vld [vmem:[%s7292_s3 + $0x30] sm:$0xff]  }
 0x24c   : > { %1256 = vrot.lane.b32.xlu1 %v5993_v13, %s5496_s25  ;;  %v5359_v10 = vpop.eup %5358  ;;  %v1137_v7 = vmul.f32 %v5357_v8, %v5885_v51  ;;  %4914 = vmatprep.subr.bf16.mxu0 %v6010_v52  ;;  %v6020_v51 = vsel %vm1184_vm4, %v1207_v23, %v1211_v39  ;;  %v1287_v32 = vrot.slane %v5990_v1, 1  ;;  %v1223_v44 = vor.u32 %v1221_v27, %v1219_v63  ;;  %v1947_v23 = vld [vmem:[#allocation2 + $0x58] sm:$0x1] }
 0x24d   : > { %v5361_v5 = vpop.eup %5360  ;;  %v1154_v14 = vmul.f32 0.0, %v1138_v9  ;;  %v1231_v16 = vor.u32 %v1229_v24, %v1227_v22  ;;  %v1235_v20 = vrot.slane %v1233_v29, 1  ;;  %v1139_v21 = vmul.f32 %v5359_v10, %v5893_v43 }
 0x24e   : > { %1252 = vrot.lane.b32.xlu0 %v1204_v11, %s5496_s25  ;;  %v1140_v19 = vmul.f32 %v5361_v5, %v5895_v58  ;;  %v1282_v43 = vsel %vm1275_vm3, %v5945_v30, %v1281_v18  ;;  %v1288_v48 = vsel %vm1275_vm3, %v1285_v26, %v1287_v32  ;;  %v1228_v50 = vsel %vm1184_vm4, %v1223_v44, %v1227_v22 }
 0x24f   : > { %v1163_v35 = vpack.c.bf16 %v1154_v14, %v1137_v7  ;;  %v1236_v58 = vsel %vm1184_vm4, %v1231_v16, %v1235_v20  ;;  %v1237_v37 = vshrl.u32 %v5990_v1, 16  ;;  %v1286_v59 = vsel %vm1275_vm3, %v1283_v17, %v1285_v26  ;;  %v1249_v16 = vpop.permute.xlu1 %1248 }
 0x250   : > { %1301 = vrot.lane.b32.xlu1 %v6013_v15, %s7306_s26  ;;  %v1156_v25 = vmul.f32 0.0, %v1140_v19  ;;  %v2046_v29 = vrot.slane %v1947_v23, 1  ;;  %v5248_v23 = vld [vmem:[%s7292_s3 + $0x40] sm:$0xff]  }
 0x251   : > { %1171 = vst.msk [vmem:[#allocation2 + $0x40] sm:$0xff] %vm575_vm1, %v1163_v35  ;;  %v1239_v60 = vor.u32 %v1237_v37, %v1235_v20  ;;  %v1174_v35 = vld [vmem:[#allocation2] sm:$0x80] }
 0x252   : > { %1254 = vrot.lane.b32.xlu0 %v6020_v51, %s5496_s25  ;;  %v1164_v41 = vpack.c.bf16 %v1156_v25, %v1139_v21  ;;  %v1313_v21 = vsel %vm575_vm1, %v1174_v35, %v1249_v16  ;;  %v5249_v16 = vld [vmem:[%s7292_s3 + $0x48] sm:$0xff]  }
 0x254   : > { %1260 = vrot.lane.b32.xlu1 %v1236_v58, %s5496_s25  ;;  %1172 = vst.msk [vmem:[#allocation2 + $0x48] sm:$0xff] %vm575_vm1, %v1164_v41 }
 0x256   : > { %1299 = vrot.lane.b32.xlu0 %v1282_v43, %s7306_s26 }
 0x258   : > { %1305 = vrot.lane.b32.xlu1 %v1288_v48, %s7306_s26  ;;  %v6038_v53 = vld [vmem:[#allocation2 + $0x40] sm:$0xff] }
 0x259   : > { %v1241_v36 = vshll.u32 %v6038_v53, 16  ;;  %v1245_v39 = vshrl.u32 %v6038_v53, 16  ;;  %v1289_v40 = vrot.slane %v6038_v53, 1 }
 0x25a   : > { %1258 = vrot.lane.b32.xlu0 %v1228_v50, %s5496_s25 }
 0x25b   : > { %v1243_v38 = vrot.slane %v1241_v36, 1  ;;  %v1183_v42 = vld [vmem:[#allocation2 + $0x48] sm:$0x1]  ;;  %v1290_v2 = vsel %vm1275_vm3, %v1287_v32, %v1289_v40 }
 0x25c   : > { %v1291_v61 = vrot.slane %v1183_v42, 1  ;;  %v6058_v0 = vld [vmem:[#allocation2 + $0x48] sm:$0xff] }
 0x25d   : > { %v1247_v31 = vor.u32 %v1245_v39, %v1243_v38  ;;  %v1244_v62 = vsel %vm1184_vm4, %v1239_v60, %v1243_v38  ;;  %v1611_v4 = vshll.u32 %v6058_v0, 16  ;;  %v1646_v18 = vrot.slane %v6058_v0, 1 }
 0x25e   : > { %1303 = vrot.lane.b32.xlu0 %v1286_v59, %s7306_s26  ;;  %v1292_v63 = vsel %vm1275_vm3, %v1289_v40, %v1291_v61 }
 0x25f   : > { %1264 = vrot.lane.b32.xlu1 %v1247_v31, %s5496_s25  ;;  %v1613_v8 = vrot.slane %v1611_v4, 1  ;;  %v1647_v22 = vsel %vm1275_vm3, %v1289_v40, %v1646_v18 }
 0x261   : > { %v1614_v10 = vsel %vm1184_vm4, %v1247_v31, %v1613_v8 }
 0x262   : > { %1262 = vrot.lane.b32.xlu0 %v1244_v62, %s5496_s25 }
 0x263   : > { %1309 = vrot.lane.b32.xlu1 %v1292_v63, %s7306_s26 }
 0x266   : > { %1307 = vrot.lane.b32.xlu0 %v1290_v2, %s7306_s26 }
 0x267   : > { %1618 = vrot.lane.b32.xlu1 %v5955_v54, %s5496_s25  ;;  %v1615_v54 = vshrl.u32 %v6058_v0, 16 }
 0x269   : > { %v1617_v17 = vor.u32 %v1615_v54, %v1613_v8  ;;  %v5247_v54 = vld [vmem:[%s7292_s3 + $0x38] sm:$0xff]  }
 0x26a   : > { %1652 = vrot.lane.b32.xlu0 %v5962_v34, %s7306_s26  ;;  %v1609_v34 = vld [vmem:[#allocation2 + $0x50] sm:$0x1] }
 0x26b   : > { %1650 = vrot.lane.b32.xlu1 %v5938_v46, %s7306_s26  ;;  %v1648_v46 = vrot.slane %v1609_v34, 1 }
 0x26d   : > { %v1649_v9 = vsel %vm1275_vm3, %v1646_v18, %v1648_v46 }
 0x26e   : > { %1654 = vrot.lane.b32.xlu0 %v1282_v43, %s7306_s26 }
 0x26f   : > { %1658 = vrot.lane.b32.xlu1 %v1286_v59, %s7306_s26 }
 0x272   : > { %1656 = vrot.lane.b32.xlu0 %v6013_v15, %s7306_s26 }
 0x273   : > { %1662 = vrot.lane.b32.xlu1 %v1290_v2, %s7306_s26 }
 0x276   : > { %1660 = vrot.lane.b32.xlu0 %v1288_v48, %s7306_s26 }
 0x277   : > { %1622 = vrot.lane.b32.xlu1 %v1617_v17, %s5496_s25 }
 0x27a   : > { %1664 = vrot.lane.b32.xlu0 %v1647_v22, %s7306_s26 }
 0x27b   : > { %1666 = vrot.lane.b32.xlu1 %v1649_v9, %s7306_s26 }
 0x27e   : > { %1620 = vrot.lane.b32.xlu0 %v1614_v10, %s5496_s25 }
 0x27f   : > { %2004 = vrot.lane.b32.xlu1 %v5985_v12, %s5496_s25  ;;  %v6092_v12 = vld [vmem:[#allocation2 + $0x50] sm:$0xff] }
 0x280   : > { %v2001_v11 = vshrl.u32 %v6092_v12, 16  ;;  %v2044_v5 = vrot.slane %v6092_v12, 1 }
 0x282   : > { %2050 = vrot.lane.b32.xlu0 %v1282_v43, %s7306_s26  ;;  %v2047_v14 = vsel %vm1275_vm3, %v2044_v5, %v2046_v29 }
 0x283   : > { %2008 = vrot.lane.b32.xlu1 %v5993_v13, %s5496_s25  ;;  %v1997_v13 = vshll.u32 %v6092_v12, 16 }
 0x286   : > { %2006 = vrot.lane.b32.xlu0 %v6020_v51, %s5496_s25 }
 0x287   : > { %2048 = vrot.lane.b32.xlu1 %v5945_v30, %s7306_s26  ;;  %v1999_v30 = vrot.slane %v1997_v13, 1 }
 0x289   : > { %v2003_v24 = vor.u32 %v2001_v11, %v1999_v30  ;;  %v2000_v7 = vsel %vm1184_vm4, %v1617_v17, %v1999_v30 }
 0x28a   : > { %2052 = vrot.lane.b32.xlu0 %v6013_v15, %s7306_s26  ;;  %v2045_v15 = vsel %vm1275_vm3, %v1646_v18, %v2044_v5 }
 0x28b   : > { %2012 = vrot.lane.b32.xlu1 %v1236_v58, %s5496_s25 }
 0x28e   : > { %2010 = vrot.lane.b32.xlu0 %v1228_v50, %s5496_s25 }
 0x28f   : > { %2056 = vrot.lane.b32.xlu1 %v1288_v48, %s7306_s26 }
 0x292   : > { %2054 = vrot.lane.b32.xlu0 %v1286_v59, %s7306_s26 }
 0x293   : > { %2016 = vrot.lane.b32.xlu1 %v1614_v10, %s5496_s25 }
 0x296   : > { %2014 = vrot.lane.b32.xlu0 %v1244_v62, %s5496_s25 }
 0x297   : > { %2060 = vrot.lane.b32.xlu1 %v1647_v22, %s7306_s26 }
 0x29a   : > { %2058 = vrot.lane.b32.xlu0 %v1290_v2, %s7306_s26 }
 0x29b   : > { %2020 = vrot.lane.b32.xlu1 %v2003_v24, %s5496_s25 }
 0x29e   : > { %2018 = vrot.lane.b32.xlu0 %v2000_v7, %s5496_s25 }
 0x29f   : > { %2064 = vrot.lane.b32.xlu1 %v2047_v14, %s7306_s26 }
 0x2a2   : > { %2062 = vrot.lane.b32.xlu0 %v2045_v15, %s7306_s26  ;;  %s4741_s26 = sshll.u32 %s5602_s22, 10  ;;  %s7248_s22 = scalar_lea.sflag [#allocation5], %s485_s16 }
 0x2a3   : > { %s7240_s25 = scalar_lea.hbm %s7304_s15, %s4741_s26 }
 0x2b6   : > { %v1296_v19 = vpop.permute.xlu1 %1295 }
 0x2b8   : > { %v1298_v51 = vpop.permute.xlu0 %1297 }
 0x2ba   : > { %v1294_v20 = vpop.permute.xlu1 %1293 }
 0x2bb   : > { %v1331_v25 = vsel %vm580_vm2, %v1313_v21, %v1294_v20 }
 0x2bc   : > { %v1251_v27 = vpop.permute.xlu0 %1250  ;;  %v1361_v41 = vshrl.u32 %v1331_v25, 16 }
 0x2bd   : > { %v1315_v58 = vsel %vm575_vm1, %v5819_v33, %v1251_v27 }
 0x2be   : > { %v1333_v26 = vsel %vm580_vm2, %v1315_v58, %v1296_v19  ;;  %v1257_v32 = vpop.permute.xlu1 %1256  ;;  %v1363_v39 = vrot.slane %v1361_v41, 7 }
 0x2bf   : > { %v1364_v43 = vshrl.u32 %v1333_v26, 16  ;;  %v1367_v50 = vshll.u32 %v1333_v26, 16  ;;  %v6122_v42 = vsel %vm575_vm1, %v5957_v56, %v1257_v32  ;;  %v5250_v26 = vld [vmem:[%s7292_s3 + $0x50] sm:$0xff]  }
 0x2c0   : > { %v1253_v44 = vpop.permute.xlu0 %1252 }
 0x2c1   : > { %v1366_v48 = vrot.slane %v1364_v43, 7  ;;  %v6116_v36 = vsel %vm575_vm1, %v5935_v28, %v1253_v44 }
 0x2c2   : > { %v1335_v37 = vsel %vm580_vm2, %v6116_v36, %v1298_v51  ;;  %v1302_v38 = vpop.permute.xlu1 %1301 }
 0x2c3   : > { %v1369_v33 = vor.u32 %v1367_v50, %v1366_v48  ;;  %v1371_v59 = vshrl.u32 %v1335_v37, 16  ;;  %v1339_v60 = vsel %vm580_vm2, %v6122_v42, %v1302_v38  ;;  %v1374_v28 = vshll.u32 %v1335_v37, 16 }
 0x2c4   : > { %v1255_v31 = vpop.permute.xlu0 %1254  ;;  %v1385_v2 = vshrl.u32 %v1339_v60, 16  ;;  %v1388_v24 = vshll.u32 %v1339_v60, 16 }
 0x2c5   : > { %v1373_v40 = vrot.slane %v1371_v59, 7  ;;  %v1370_v61 = vsel %vm1360_vm5, %v1363_v39, %v1369_v33  ;;  %v6130_v4 = vsel %vm575_vm1, %v5942_v45, %v1255_v31  ;;  %v5251_v59 = vld [vmem:[%s7292_s3 + $0x58] sm:$0xff]  }
 0x2c6   : > { %4898 = vmatprep.mubr.msk.bf16.mxu0 %vm1456_vm6, %v1370_v61  ;;  %v1261_v62 = vpop.permute.xlu1 %1260  ;;  %v1387_v22 = vrot.slane %v1385_v2, 7 }
 0x2c7   : > { %v1376_v63 = vor.u32 %v1374_v28, %v1373_v40  ;;  %v6141_v9 = vsel %vm575_vm1, %v5980_v57, %v1261_v62  ;;  %v1600_v62 = vld [vmem:[#allocation2 + $0x8] sm:$0x80] }
 0x2c8   : > { %v1300_v8 = vpop.permute.xlu0 %1299  ;;  %v1390_v5 = vor.u32 %v1388_v24, %v1387_v22 }
 0x2c9   : > { %v1337_v34 = vsel %vm580_vm2, %v6130_v4, %v1300_v8  ;;  %v1377_v18 = vsel %vm1360_vm5, %v1366_v48, %v1376_v63 }
 0x2ca   : > { %v1378_v17 = vshrl.u32 %v1337_v34, 16  ;;  %4899 = vmatmul.mubr.msk.bf16.vlgmr.msra.gmra.mrb[4].mxu0 %vm1456_vm6, %v1377_v18  ;;  %v1306_v46 = vpop.permute.xlu1 %1305  ;;  %v1381_v13 = vshll.u32 %v1337_v34, 16 }
 0x2cb   : > { %4915 = vmatpush3.bf16.msra.mxu0 %v6010_v52  ;;  %v1343_v11 = vsel %vm580_vm2, %v6141_v9, %v1306_v46 }
 0x2cc   : > { %v1380_v10 = vrot.slane %v1378_v17, 7  ;;  %v1259_v30 = vpop.permute.xlu0 %1258  ;;  %4916 = vmatprep.subr.bf16.mxu0 %v5247_v54  ;;  %v1399_v7 = vshrl.u32 %v1343_v11, 16  ;;  %v1402_v32 = vshll.u32 %v1343_v11, 16 }
 0x2cd   : > { %v6151_v14 = vsel %vm575_vm1, %v5968_v49, %v1259_v30 }
 0x2ce   : > { %v1383_v29 = vor.u32 %v1381_v13, %v1380_v10  ;;  %v1391_v35 = vsel %vm1360_vm5, %v1380_v10, %v1390_v5  ;;  %v1401_v21 = vrot.slane %v1399_v7, 7 }
 0x2cf   : > { %4917 = vmatpush3.bf16.msra.mxu0 %v5247_v54  ;;  %v5252_v54 = vld [vmem:[%s7292_s3 + $0x60] sm:$0xff]  }
 0x2d0   : > { %v1304_v52 = vpop.permute.xlu0 %1303  ;;  %v1384_v15 = vsel %vm1360_vm5, %v1373_v40, %v1383_v29  ;;  %4918 = vmatprep.subr.bf16.mxu0 %v5248_v23  ;;  %v1404_v48 = vor.u32 %v1402_v32, %v1401_v21 }
 0x2d1   : > { %v1341_v19 = vsel %vm580_vm2, %v6151_v14, %v1304_v52  ;;  %4902 = vmatprep.mubr.msk.bf16.mxu0 %vm1456_vm6, %v1384_v15  ;;  %v1265_v51 = vpop.permute.xlu1 %1264 }
 0x2d2   : > { %v1392_v20 = vshrl.u32 %v1341_v19, 16  ;;  %4903 = vmatmul.mubr.msk.bf16.gmra.mrb[8].mxu0 %vm1456_vm6, %v1391_v35  ;;  %v1395_v27 = vshll.u32 %v1341_v19, 16  ;;  %v1329_v41 = vsel %vm575_vm1, %v6038_v53, %v1265_v51 }
 0x2d3   : > { %4919 = vmatpush3.bf16.msra.mxu0 %v5248_v23 }
 0x2d4   : > { %v1394_v25 = vrot.slane %v1392_v20, 7  ;;  %v1263_v58 = vpop.permute.xlu0 %1262  ;;  %4920 = vmatprep.subr.bf16.mxu0 %v5249_v16 }
 0x2d5   : > { %v1310_v44 = vpop.permute.xlu1 %1309  ;;  %v6170_v38 = vsel %vm575_vm1, %v5990_v1, %v1263_v58 }
 0x2d6   : > { %v1397_v43 = vor.u32 %v1395_v27, %v1394_v25  ;;  %v1347_v50 = vsel %vm580_vm2, %v1329_v41, %v1310_v44  ;;  %v1405_v31 = vsel %vm1360_vm5, %v1394_v25, %v1404_v48 }
 0x2d7   : > { %4921 = vmatpush3.bf16.msra.mxu0 %v5249_v16  ;;  %v1413_v37 = vshrl.u32 %v1347_v50, 16  ;;  %v1416_v34 = vshll.u32 %v1347_v50, 16 }
 0x2d8   : > { %v1308_v39 = vpop.permute.xlu0 %1307  ;;  %v1398_v33 = vsel %vm1360_vm5, %v1387_v22, %v1397_v43  ;;  %4922 = vmatprep.subr.bf16.mxu0 %v5250_v26 }
 0x2d9   : > { %v1345_v60 = vsel %vm580_vm2, %v6170_v38, %v1308_v39  ;;  %4906 = vmatprep.mubr.msk.bf16.mxu0 %vm1456_vm6, %v1398_v33  ;;  %v1619_v40 = vpop.permute.xlu1 %1618  ;;  %v1415_v61 = vrot.slane %v1413_v37, 7 }
 0x2da   : > { %v1406_v28 = vshrl.u32 %v1345_v60, 16  ;;  %4907 = vmatmul.mubr.msk.bf16.gmra.mrb[12].mxu0 %vm1456_vm6, %v1405_v31  ;;  %v1409_v2 = vshll.u32 %v1345_v60, 16  ;;  %v1670_v17 = vsel %vm575_vm1, %v1600_v62, %v1619_v40 }
 0x2db   : > { %4923 = vmatpush3.bf16.msra.mxu0 %v5250_v26  ;;  %v1418_v13 = vor.u32 %v1416_v34, %v1415_v61 }
 0x2dc   : > { %v1408_v63 = vrot.slane %v1406_v28, 7  ;;  %v1653_v8 = vpop.permute.xlu0 %1652  ;;  %4924 = vmatprep.subr.bf16.mxu0 %v5251_v59 }
 0x2dd   : > { %v1678_v18 = vsel %vm580_vm2, %v6116_v36, %v1653_v8  ;;  %v1651_v22 = vpop.permute.xlu1 %1650 }
 0x2de   : > { %v1411_v46 = vor.u32 %v1409_v2, %v1408_v63  ;;  %v1709_v10 = vshrl.u32 %v1678_v18, 16  ;;  %v1676_v11 = vsel %vm580_vm2, %v1670_v17, %v1651_v22  ;;  %v1712_v24 = vshll.u32 %v1678_v18, 16 }
 0x2df   : > { %4925 = vmatpush3.bf16.msra.mxu0 %v5251_v59  ;;  %v1706_v30 = vshrl.u32 %v1676_v11, 16  ;;  %v1419_v36 = vsel %vm1360_vm5, %v1408_v63, %v1418_v13 }
 0x2e0   : > { %v1711_v23 = vrot.slane %v1709_v10, 7  ;;  %v1655_v29 = vpop.permute.xlu0 %1654  ;;  %v1412_v5 = vsel %vm1360_vm5, %v1401_v21, %v1411_v46  ;;  %4942 = vmatprep.subr.bf16.mxu0 %v5252_v54 }
 0x2e1   : > { %v1680_v7 = vsel %vm580_vm2, %v6130_v4, %v1655_v29  ;;  %4910 = vmatprep.mubr.msk.bf16.mxu0 %vm1456_vm6, %v1412_v5  ;;  %v1708_v52 = vrot.slane %v1706_v30, 7  ;;  %v1659_v16 = vpop.permute.xlu1 %1658 }
 0x2e2   : > { %v1714_v15 = vor.u32 %v1712_v24, %v1711_v23  ;;  %v1716_v19 = vshrl.u32 %v1680_v7, 16  ;;  %4911 = vmatmul.mubr.msk.bf16.gmra.mrb[16].mxu0 %vm1456_vm6, %v1419_v36  ;;  %v1684_v35 = vsel %vm580_vm2, %v6151_v14, %v1659_v16  ;;  %v1719_v20 = vshll.u32 %v1680_v7, 16  ;;  %v5253_v14 = vld [vmem:[%s7292_s3 + $0x68] sm:$0xff]   ;;  %v5256_v24 = vld [vmem:[%s7292_s3 + $0x80] sm:$0xff]  }
 0x2e3   : > { %v1730_v32 = vshrl.u32 %v1684_v35, 16  ;;  %v1733_v61 = vshll.u32 %v1684_v35, 16  ;;  %v5257_v35 = vld [vmem:[%s7292_s3 + $0x88] sm:$0xff]  }
 0x2e4   : > { %v1718_v51 = vrot.slane %v1716_v19, 7  ;;  %v1657_v21 = vpop.permute.xlu0 %1656  ;;  %v1715_v25 = vsel %vm1360_vm5, %v1708_v52, %v1714_v15 }
 0x2e5   : > { %v1682_v4 = vsel %vm580_vm2, %v6122_v42, %v1657_v21  ;;  %4926 = vmatprep.mubr.msk.bf16.mxu0 %vm1456_vm6, %v1715_v25  ;;  %v1663_v58 = vpop.permute.xlu1 %1662  ;;  %v1732_v33 = vrot.slane %v1730_v32, 7 }
 0x2e6   : > { %v1721_v27 = vor.u32 %v1719_v20, %v1718_v51  ;;  %v1723_v26 = vshrl.u32 %v1682_v4, 16  ;;  %v1726_v43 = vshll.u32 %v1682_v4, 16  ;;  %v1688_v59 = vsel %vm580_vm2, %v6170_v38, %v1663_v58  ;;  %v5255_v38 = vld [vmem:[%s7292_s3 + $0x78] sm:$0xff]  }
 0x2e7   : > { %v1735_v2 = vor.u32 %v1733_v61, %v1732_v33  ;;  %v1744_v8 = vshrl.u32 %v1688_v59, 16  ;;  %v1747_v29 = vshll.u32 %v1688_v59, 16 }
 0x2e8   : > { %v1725_v41 = vrot.slane %v1723_v26, 7  ;;  %v1661_v44 = vpop.permute.xlu0 %1660  ;;  %v1722_v50 = vsel %vm1360_vm5, %v1711_v23, %v1721_v27 }
 0x2e9   : > { %v1686_v48 = vsel %vm580_vm2, %v6141_v9, %v1661_v44  ;;  %v1623_v42 = vpop.permute.xlu1 %1622  ;;  %v5254_v9 = vld [vmem:[%s7292_s3 + $0x70] sm:$0xff]   ;;  %v1746_v10 = vrot.slane %v1744_v8, 7 }
 0x2ea   : > { %v1728_v37 = vor.u32 %v1726_v43, %v1725_v41  ;;  %v1737_v39 = vshrl.u32 %v1686_v48, 16  ;;  %4927 = vmatmul.mubr.msk.bf16.vlgmr.msra.gmra.mrb[4].mxu0 %vm1456_vm6, %v1722_v50  ;;  %v1740_v31 = vshll.u32 %v1686_v48, 16  ;;  %v1736_v18 = vsel %vm1360_vm5, %v1725_v41, %v1735_v2 }
 0x2eb   : > { %4943 = vmatpush3.bf16.msra.mxu0 %v5252_v54  ;;  %v1674_v13 = vsel %vm575_vm1, %v6058_v0, %v1623_v42  ;;  %v1749_v52 = vor.u32 %v1747_v29, %v1746_v10 }
 0x2ec   : > { %v1739_v60 = vrot.slane %v1737_v39, 7  ;;  %v1665_v40 = vpop.permute.xlu0 %1664  ;;  %v1729_v28 = vsel %vm1360_vm5, %v1718_v51, %v1728_v37  ;;  %4944 = vmatprep.subr.bf16.mxu0 %v5253_v14  ;;  %v1938_v51 = vld [vmem:[#allocation2 + $0x10] sm:$0x80] }
 0x2ed   : > { %4930 = vmatprep.mubr.msk.bf16.mxu0 %vm1456_vm6, %v1729_v28  ;;  %v1667_v63 = vpop.permute.xlu1 %1666 }
 0x2ee   : > { %v1742_v62 = vor.u32 %v1740_v31, %v1739_v60  ;;  %v1692_v30 = vsel %vm580_vm2, %v1674_v13, %v1667_v63  ;;  %v1750_v21 = vsel %vm1360_vm5, %v1739_v60, %v1749_v52 }
 0x2ef   : > { %4945 = vmatpush3.bf16.msra.mxu0 %v5253_v14  ;;  %v1758_v15 = vshrl.u32 %v1692_v30, 16  ;;  %v1761_v14 = vshll.u32 %v1692_v30, 16 }
 0x2f0   : > { %v1621_v54 = vpop.permute.xlu0 %1620  ;;  %4946 = vmatprep.subr.bf16.mxu0 %v5254_v9  ;;  %v1743_v22 = vsel %vm1360_vm5, %v1732_v33, %v1742_v62 }
 0x2f1   : > { %v1672_v34 = vsel %vm575_vm1, %v6038_v53, %v1621_v54  ;;  %v2005_v17 = vpop.permute.xlu1 %2004  ;;  %v1760_v26 = vrot.slane %v1758_v15, 7 }
 0x2f2   : > { %v1690_v46 = vsel %vm580_vm2, %v1672_v34, %v1665_v40  ;;  %4931 = vmatmul.mubr.msk.bf16.gmra.mrb[8].mxu0 %vm1456_vm6, %v1736_v18  ;;  %v2068_v4 = vsel %vm575_vm1, %v1938_v51, %v2005_v17 }
 0x2f3   : > { %v1751_v11 = vshrl.u32 %v1690_v46, 16  ;;  %4934 = vmatprep.mubr.msk.bf16.mxu0 %vm1456_vm6, %v1743_v22  ;;  %4947 = vmatpush3.bf16.msra.mxu0 %v5254_v9  ;;  %v1754_v7 = vshll.u32 %v1690_v46, 16  ;;  %v1763_v33 = vor.u32 %v1761_v14, %v1760_v26 }
 0x2f4   : > { %v2051_v23 = vpop.permute.xlu0 %2050  ;;  %4948 = vmatprep.subr.bf16.mxu0 %v5255_v38 }
 0x2f5   : > { %v1753_v5 = vrot.slane %v1751_v11, 7  ;;  %v2009_v36 = vpop.permute.xlu1 %2008 }
 0x2f7   : > { %v1756_v16 = vor.u32 %v1754_v7, %v1753_v5  ;;  %4949 = vmatpush3.bf16.msra.mxu0 %v5255_v38 }
 0x2f8   : > { %v2007_v19 = vpop.permute.xlu0 %2006  ;;  %4950 = vmatprep.subr.bf16.mxu0 %v5256_v24 }
 0x2f9   : > { %v2070_v20 = vsel %vm575_vm1, %v5942_v45, %v2007_v19  ;;  %v1757_v25 = vsel %vm1360_vm5, %v1746_v10, %v1756_v16  ;;  %v2049_v27 = vpop.permute.xlu1 %2048  ;;  %v2072_v45 = vsel %vm575_vm1, %v5957_v56, %v2009_v36  ;;  %v1764_v56 = vsel %vm1360_vm5, %v1753_v5, %v1763_v33 }
 0x2fa   : > { %v2088_v58 = vsel %vm580_vm2, %v2070_v20, %v2051_v23  ;;  %4935 = vmatmul.mubr.msk.bf16.gmra.mrb[12].mxu0 %vm1456_vm6, %v1750_v21  ;;  %v2086_v32 = vsel %vm580_vm2, %v2068_v4, %v2049_v27 }
 0x2fb   : > { %v2119_v41 = vshrl.u32 %v2088_v58, 16  ;;  %4938 = vmatprep.mubr.msk.bf16.mxu0 %vm1456_vm6, %v1757_v25  ;;  %4951 = vmatpush3.bf16.msra.mxu0 %v5256_v24  ;;  %v2116_v43 = vshrl.u32 %v2086_v32, 16  ;;  %v2122_v50 = vshll.u32 %v2088_v58, 16 }
 0x2fc   : > { %v2053_v44 = vpop.permute.xlu0 %2052  ;;  %4952 = vmatprep.subr.bf16.mxu0 %v5257_v35 }
 0x2fd   : > { %v2121_v48 = vrot.slane %v2119_v41, 7  ;;  %v2090_v37 = vsel %vm580_vm2, %v2072_v45, %v2053_v44  ;;  %v2013_v42 = vpop.permute.xlu1 %2012  ;;  %v2118_v59 = vrot.slane %v2116_v43, 7 }
 0x2fe   : > { %v2126_v39 = vshrl.u32 %v2090_v37, 16  ;;  %v2076_v61 = vsel %vm575_vm1, %v5980_v57, %v2013_v42  ;;  %v2129_v62 = vshll.u32 %v2090_v37, 16 }
 0x2ff   : > { %v2124_v60 = vor.u32 %v2122_v50, %v2121_v48  ;;  %4953 = vmatpush3.bf16.msra.mxu0 %v5257_v35 }
 0x300   : > { %v2011_v31 = vpop.permute.xlu0 %2010  ;;  %3870 = vmatprep.subr.bf16.mxu0 %v5495_v47  ;;  %v2128_v40 = vrot.slane %v2126_v39, 7 }
 0x301   : > { %v2125_v28 = vsel %vm1360_vm5, %v2118_v59, %v2124_v60  ;;  %v2057_v9 = vpop.permute.xlu1 %2056  ;;  %v2074_v2 = vsel %vm575_vm1, %v5968_v49, %v2011_v31  ;;  %v2364_v60 = vld [vmem:[%s7300_s11] sm:$0xff]  ;;  %v2365_v31 = vld [vmem:[%s7300_s11 + $0x8] sm:$0xff] }
 0x302   : > { %4939 = vmatmul.mubr.msk.bf16.gmra.mrb[16].mxu0 %vm1456_vm6, %v1764_v56  ;;  %v2094_v63 = vsel %vm580_vm2, %v2076_v61, %v2057_v9  ;;  %v2131_v54 = vor.u32 %v2129_v62, %v2128_v40  ;;  %v6291_v56 = vpack.c.bf16 %v2365_v31, %v2364_v60  ;;  %v2368_v61 = vld [vmem:[%s7300_s11 + $0x20] sm:$0xff]  ;;  %v2369_v62 = vld [vmem:[%s7300_s11 + $0x28] sm:$0xff] }
 0x303   : > { %4954 = vmatprep.mubr.msk.bf16.mxu0 %vm1456_vm6, %v2125_v28  ;;  %v2140_v17 = vshrl.u32 %v2094_v63, 16  ;;  %v2143_v7 = vshll.u32 %v2094_v63, 16  ;;  %v2367_v28 = vld [vmem:[%s7300_s11 + $0x18] sm:$0xff]  ;;  %v6307_v63 = vpack.c.bf16 %v2369_v62, %v2368_v61 }
 0x304   : > { %v2055_v8 = vpop.permute.xlu0 %2054  ;;  %v2132_v57 = vsel %vm1360_vm5, %v2121_v48, %v2131_v54  ;;  %5076 = vmatpush3.bf16.msra.mxu1 %v6291_v56 }
 0x305   : > { %v2092_v38 = vsel %vm580_vm2, %v2074_v2, %v2055_v8  ;;  %v2017_v34 = vpop.permute.xlu1 %2016  ;;  %v2142_v30 = vrot.slane %v2140_v17, 7  ;;  %5077 = vmatprep.subr.bf16.mxu1 %v5492_v3  ;;  %v2370_v2 = vld [vmem:[%s7300_s11 + $0x30] sm:$0xff]  ;;  %v2371_v8 = vld [vmem:[%s7300_s11 + $0x38] sm:$0xff] }
 0x306   : > { %v2133_v18 = vshrl.u32 %v2092_v38, 16  ;;  %v2136_v22 = vshll.u32 %v2092_v38, 16  ;;  %v2080_v49 = vsel %vm575_vm1, %v6038_v53, %v2017_v34  ;;  %v6317_v54 = vpack.c.bf16 %v2371_v8, %v2370_v2  ;;  %v6325_v38 = vld [vmem:[%s7293_s4] ss:$0 sm:$0xff] }
 0x307   : > { %v2145_v16 = vor.u32 %v2143_v7, %v2142_v30 }
 0x308   : > { %v2135_v46 = vrot.slane %v2133_v18, 7  ;;  %v2015_v10 = vpop.permute.xlu0 %2014 }
 0x309   : > { %v2061_v11 = vpop.permute.xlu1 %2060  ;;  %v2078_v24 = vsel %vm575_vm1, %v5990_v1, %v2015_v10 }
 0x30a   : > { %v2138_v13 = vor.u32 %v2136_v22, %v2135_v46  ;;  %4955 = vmatmul.mubr.msk.bf16.vlgmr.msra.gmra.mrb[4].mxu0 %vm1456_vm6, %v2132_v57  ;;  %v2098_v23 = vsel %vm580_vm2, %v2080_v49, %v2061_v11  ;;  %v2146_v1 = vsel %vm1360_vm5, %v2135_v46, %v2145_v16 }
 0x30b   : > { %v2154_v19 = vshrl.u32 %v2098_v23, 16  ;;  %v2157_v41 = vshll.u32 %v2098_v23, 16 }
 0x30c   : > { %v2059_v29 = vpop.permute.xlu0 %2058  ;;  %v2139_v5 = vsel %vm1360_vm5, %v2128_v40, %v2138_v13  ;;  %v2366_v40 = vld [vmem:[%s7300_s11 + $0x10] sm:$0xff] }
 0x30d   : > { %v2096_v36 = vsel %vm580_vm2, %v2078_v24, %v2059_v29  ;;  %4958 = vmatprep.mubr.msk.bf16.mxu0 %vm1456_vm6, %v2139_v5  ;;  %v2021_v15 = vpop.permute.xlu1 %2020  ;;  %v2156_v4 = vrot.slane %v2154_v19, 7  ;;  %v6297_v9 = vpack.c.bf16 %v2367_v28, %v2366_v40 }
 0x30e   : > { %v2147_v52 = vshrl.u32 %v2096_v36, 16  ;;  %v2150_v51 = vshll.u32 %v2096_v36, 16  ;;  %v2084_v53 = vsel %vm575_vm1, %v6092_v12, %v2021_v15 }
 0x30f   : > { %v2159_v44 = vor.u32 %v2157_v41, %v2156_v4  ;;  %5079 = vmatpush3.bf16.msra.mxu1 %v6297_v9 }
 0x310   : > { %v2149_v35 = vrot.slane %v2147_v52, 7  ;;  %v2019_v20 = vpop.permute.xlu0 %2018  ;;  %5080 = vmatprep.subr.bf16.mxu1 %v5492_v3 }
 0x311   : > { %v2065_v25 = vpop.permute.xlu1 %2064  ;;  %v2082_v58 = vsel %vm575_vm1, %v6058_v0, %v2019_v20 }
 0x312   : > { %v2152_v21 = vor.u32 %v2150_v51, %v2149_v35  ;;  %4959 = vmatmul.mubr.msk.bf16.gmra.mrb[8].mxu0 %vm1456_vm6, %v2146_v1  ;;  %v2102_v27 = vsel %vm580_vm2, %v2084_v53, %v2065_v25  ;;  %v2160_v42 = vsel %vm1360_vm5, %v2149_v35, %v2159_v44 }
 0x313   : > { %v2168_v45 = vshrl.u32 %v2102_v27, 16  ;;  %v2171_v37 = vshll.u32 %v2102_v27, 16  ;;  %5082 = vmatpush3.bf16.msra.mxu1 %v6307_v63 }
 0x314   : > { %v2063_v26 = vpop.permute.xlu0 %2062  ;;  %v2153_v32 = vsel %vm1360_vm5, %v2142_v30, %v2152_v21  ;;  %5083 = vmatprep.subr.bf16.mxu1 %v5492_v3 }
 0x315   : > { %v2100_v12 = vsel %vm580_vm2, %v2082_v58, %v2063_v26  ;;  %4962 = vmatprep.mubr.msk.bf16.mxu0 %vm1456_vm6, %v2153_v32  ;;  %v2170_v50 = vrot.slane %v2168_v45, 7 }
 0x316   : > { %v2161_v43 = vshrl.u32 %v2100_v12, 16  ;;  %v2164_v48 = vshll.u32 %v2100_v12, 16 }
 0x317   : > { %v2173_v33 = vor.u32 %v2171_v37, %v2170_v50  ;;  %5085 = vmatpush3.bf16.msra.mxu1 %v6317_v54 }
 0x318   : > { %v2163_v14 = vrot.slane %v2161_v43, 7  ;;  %5086 = vmatprep.subr.bf16.mxu1 %v5492_v3 }
 0x31a   : > { %v2166_v39 = vor.u32 %v2164_v48, %v2163_v14  ;;  %4963 = vmatmul.mubr.msk.bf16.gmra.mrb[12].mxu0 %vm1456_vm6, %v2160_v42  ;;  %v2174_v59 = vsel %vm1360_vm5, %v2163_v14, %v2173_v33 }
 0x31c   : > { %v2167_v0 = vsel %vm1360_vm5, %v2156_v4, %v2166_v39 }
 0x31d   : > { %4966 = vmatprep.mubr.msk.bf16.mxu0 %vm1456_vm6, %v2167_v0 }
 0x322   : > { %4967 = vmatmul.mubr.msk.bf16.gmra.mrb[16].mxu0 %vm1456_vm6, %v2174_v59 }
 0x3dd   : > { %v4956_v34 = vpop.f32.mrb[4].mxu0 }
 0x3de   : > { %v2269_v18 = vpop.f32.mrb[5].mxu0  ;;  %v6331_v22 = vadd.f32 %v4956_v34, %v6325_v38 }
 0x3df   : > { %v6328_v17 = vadd.f32 %v6325_v38, %v2269_v18  ;;  %v4957_v46 = vpop.f32.mrb[6].mxu0 }
 0x3e0   : > { %v5136_v10 = vadd.f32 %v4957_v46, %v6325_v38  ;;  %v2272_v57 = vpop.f32.mrb[7].mxu0  ;;  %v2417_v23 = vmul.f32 %v6331_v22, %v6331_v22  ;;  %v2381_v36 = vsel %vm580_vm2, %v6331_v22, 0.0 }
 0x3e1   : > { %v5137_v13 = vadd.f32 %v6325_v38, %v2272_v57  ;;  %v2415_v11 = vmul.f32 %v6328_v17, %v6328_v17  ;;  %v2378_v24 = vsel %vm580_vm2, %v6328_v17, 0.0 }
 0x3e2   : > { %v6337_v30 = vmul.f32 0.0, %v5136_v10  ;;  %v2434_v20 = vsel %vm580_vm2, %v2417_v23, 0.0 }
 0x3e3   : > { %v6339_v49 = vmul.f32 0.0, %v5137_v13  ;;  %v2431_v16 = vsel %vm580_vm2, %v2415_v11, 0.0 }
 0x3e4   : > { %v2418_v19 = vmul.f32 %v6337_v30, %v6337_v30  ;;  %v2383_v27 = vsel %vm580_vm2, %v6337_v30, 0.0 }
 0x3e5   : > { %v2379_v29 = vsel %vm580_vm2, %v6339_v49, 0.0  ;;  %v2416_v5 = vmul.f32 %v6339_v49, %v6339_v49  ;;  %v4960_v7 = vpop.f32.mrb[8].mxu0 }
 0x3e6   : > { %v2380_v52 = vadd.f32 %v2379_v29, %v2378_v24  ;;  %v2285_v15 = vpop.f32.mrb[9].mxu0  ;;  %v6360_v25 = vadd.f32 %v4960_v7, %v6325_v38  ;;  %v2436_v12 = vsel %vm580_vm2, %v2418_v19, 0.0 }
 0x3e7   : > { %v2432_v35 = vsel %vm580_vm2, %v2416_v5, 0.0  ;;  %v6356_v51 = vadd.f32 %v6325_v38, %v2285_v15  ;;  %v4961_v53 = vpop.f32.mrb[10].mxu0 }
 0x3e8   : > { %v2382_v1 = vadd.f32 %v2381_v36, %v2380_v52  ;;  %v2433_v21 = vadd.f32 %v2432_v35, %v2431_v16  ;;  %v2288_v4 = vpop.f32.mrb[11].mxu0  ;;  %v5140_v26 = vadd.f32 %v4961_v53, %v6325_v38  ;;  %v2421_v48 = vmul.f32 %v6360_v25, %v6360_v25 }
 0x3e9   : > { %v2419_v58 = vmul.f32 %v6356_v51, %v6356_v51  ;;  %v5141_v32 = vadd.f32 %v6325_v38, %v2288_v4  ;;  %v2385_v43 = vsel %vm580_vm2, %v6356_v51, 0.0  ;;  %v2389_v40 = vsel %vm580_vm2, %v6360_v25, 0.0 }
 0x3ea   : > { %v2435_v41 = vadd.f32 %v2434_v20, %v2433_v21  ;;  %v2384_v45 = vadd.f32 %v2383_v27, %v2382_v1  ;;  %v6371_v44 = vmul.f32 0.0, %v5140_v26  ;;  %v2442_v8 = vsel %vm580_vm2, %v2421_v48, 0.0 }
 0x3eb   : > { %v6373_v14 = vmul.f32 0.0, %v5141_v32  ;;  %v2438_v42 = vsel %vm580_vm2, %v2419_v58, 0.0 }
 0x3ec   : > { %v2386_v50 = vadd.f32 %v2385_v43, %v2384_v45  ;;  %v2437_v37 = vadd.f32 %v2436_v12, %v2435_v41  ;;  %v2422_v28 = vmul.f32 %v6371_v44, %v6371_v44  ;;  %v2391_v57 = vsel %vm580_vm2, %v6371_v44, 0.0 }
 0x3ed   : > { %v2387_v39 = vsel %vm580_vm2, %v6373_v14, 0.0  ;;  %v2420_v0 = vmul.f32 %v6373_v14, %v6373_v14  ;;  %v4964_v33 = vpop.f32.mrb[12].mxu0 }
 0x3ee   : > { %v2439_v59 = vadd.f32 %v2438_v42, %v2437_v37  ;;  %v2388_v60 = vadd.f32 %v2387_v39, %v2386_v50  ;;  %v2301_v31 = vpop.f32.mrb[13].mxu0  ;;  %v6392_v46 = vadd.f32 %v4964_v33, %v6325_v38  ;;  %v2444_v5 = vsel %vm580_vm2, %v2422_v28, 0.0 }
 0x3ef   : > { %v2440_v61 = vsel %vm580_vm2, %v2420_v0, 0.0  ;;  %v6388_v62 = vadd.f32 %v6325_v38, %v2301_v31  ;;  %v4965_v2 = vpop.f32.mrb[14].mxu0 }
 0x3f0   : > { %v2390_v34 = vadd.f32 %v2389_v40, %v2388_v60  ;;  %v2441_v18 = vadd.f32 %v2440_v61, %v2439_v59  ;;  %v2304_v10 = vpop.f32.mrb[15].mxu0  ;;  %v5144_v11 = vadd.f32 %v4965_v2, %v6325_v38  ;;  %v2425_v15 = vmul.f32 %v6392_v46, %v6392_v46 }
 0x3f1   : > { %v2423_v13 = vmul.f32 %v6388_v62, %v6388_v62  ;;  %v5145_v23 = vadd.f32 %v6325_v38, %v2304_v10  ;;  %v2393_v7 = vsel %vm580_vm2, %v6388_v62, 0.0  ;;  %v2397_v58 = vsel %vm580_vm2, %v6392_v46, 0.0 }
 0x3f2   : > { %v2443_v24 = vadd.f32 %v2442_v8, %v2441_v18  ;;  %v2392_v29 = vadd.f32 %v2391_v57, %v2390_v34  ;;  %v6403_v36 = vmul.f32 0.0, %v5144_v11  ;;  %v2450_v12 = vsel %vm580_vm2, %v2425_v15, 0.0 }
 0x3f3   : > { %v6405_v52 = vmul.f32 0.0, %v5145_v23  ;;  %v2446_v35 = vsel %vm580_vm2, %v2423_v13, 0.0 }
 0x3f4   : > { %v2394_v16 = vadd.f32 %v2393_v7, %v2392_v29  ;;  %v2445_v19 = vadd.f32 %v2444_v5, %v2443_v24  ;;  %v2426_v26 = vmul.f32 %v6403_v36, %v6403_v36  ;;  %v2399_v42 = vsel %vm580_vm2, %v6403_v36, 0.0 }
 0x3f5   : > { %v2395_v53 = vsel %vm580_vm2, %v6405_v52, 0.0  ;;  %v2424_v20 = vmul.f32 %v6405_v52, %v6405_v52  ;;  %v4968_v1 = vpop.f32.mrb[16].mxu0 }
 0x3f6   : > { %v2447_v21 = vadd.f32 %v2446_v35, %v2445_v19  ;;  %v2396_v4 = vadd.f32 %v2395_v53, %v2394_v16  ;;  %v2317_v27 = vpop.f32.mrb[17].mxu0  ;;  %v6424_v50 = vadd.f32 %v4968_v1, %v6325_v38  ;;  %v2452_v31 = vsel %vm580_vm2, %v2426_v26, 0.0 }
 0x3f7   : > { %v2448_v32 = vsel %vm580_vm2, %v2424_v20, 0.0  ;;  %v6420_v41 = vadd.f32 %v6325_v38, %v2317_v27  ;;  %v4969_v45 = vpop.f32.mrb[18].mxu0 }
 0x3f8   : > { %v2398_v43 = vadd.f32 %v2397_v58, %v2396_v4  ;;  %v2449_v48 = vadd.f32 %v2448_v32, %v2447_v21  ;;  %v2320_v37 = vpop.f32.mrb[19].mxu0  ;;  %v5148_v0 = vadd.f32 %v4969_v45, %v6325_v38  ;;  %v2429_v61 = vmul.f32 %v6424_v50, %v6424_v50 }
 0x3f9   : > { %v2427_v39 = vmul.f32 %v6420_v41, %v6420_v41  ;;  %v5149_v33 = vadd.f32 %v6325_v38, %v2320_v37  ;;  %v2401_v40 = vsel %vm580_vm2, %v6420_v41, 0.0  ;;  %v2405_v11 = vsel %vm580_vm2, %v6424_v50, 0.0 }
 0x3fa   : > { %v2451_v59 = vadd.f32 %v2450_v12, %v2449_v48  ;;  %v2400_v60 = vadd.f32 %v2399_v42, %v2398_v43  ;;  %v6440_v18 = vmul.f32 0.0, %v5148_v0  ;;  %v2458_v5 = vsel %vm580_vm2, %v2429_v61, 0.0  ;;  %v2373_v48 = vld [vmem:[%s7301_s12 + $0x8] sm:$0xff] }
 0x3fb   : > { %v6435_v28 = vmul.f32 0.0, %v5149_v33  ;;  %v2454_v34 = vsel %vm580_vm2, %v2427_v39, 0.0 }
 0x3fc   : > { %v2402_v2 = vadd.f32 %v2401_v40, %v2400_v60  ;;  %v2453_v8 = vadd.f32 %v2452_v31, %v2451_v59  ;;  %v2407_v7 = vsel %vm580_vm2, %v6440_v18, 0.0  ;;  %v2430_v15 = vmul.f32 %v6440_v18, %v6440_v18 }
 0x3fd   : > { %v2403_v38 = vsel %vm580_vm2, %v6435_v28, 0.0  ;;  %v2428_v10 = vmul.f32 %v6435_v28, %v6435_v28 }
 0x3fe   : > { %v2455_v57 = vadd.f32 %v2454_v34, %v2453_v8  ;;  %v2404_v13 = vadd.f32 %v2403_v38, %v2402_v2  ;;  %v2460_v53 = vsel %vm580_vm2, %v2430_v15, 0.0  ;;  %v2940_v38 = vld [vmem:[%s5654_s17] sm:$0xff] }
 0x3ff   : > { %v2456_v23 = vsel %vm580_vm2, %v2428_v10, 0.0  ;;  %v2941_v10 = vld [vmem:[%s5654_s17 + $0x8] sm:$0xff] }
 0x400   : > { %v2406_v24 = vadd.f32 %v2405_v11, %v2404_v13  ;;  %v2457_v29 = vadd.f32 %v2456_v23, %v2455_v57  ;;  %v2956_v57 = vpack.c.bf16 %v2941_v10, %v2940_v38  ;;  %v2942_v13 = vld [vmem:[%s5654_s17 + $0x10] sm:$0xff]  ;;  %v2943_v11 = vld [vmem:[%s5654_s17 + $0x18] sm:$0xff]  ;;  %v2944_v23 = vld [vmem:[%s5654_s17 + $0x20] sm:$0xff] }
 0x402   : > { %v2408_v16 = vadd.f32 %v2407_v7, %v2406_v24  ;;  %v2459_v19 = vadd.f32 %v2458_v5, %v2457_v29  ;;  %v2945_v24 = vld [vmem:[%s5654_s17 + $0x28] sm:$0xff]  ;;  %v2957_v7 = vpack.c.bf16 %v2943_v11, %v2942_v13 }
 0x403   : > { %v6501_v29 = vld [vmem:[#allocation3 + $0x8] sm:$0xff]  ;;  %v2958_v15 = vpack.c.bf16 %v2945_v24, %v2944_v23  ;;  %v5275_v23 = vld [vmem:[%s7296_s7 + $0x90] sm:$0xff]  }
 0x404   : > { %v2409_v35 = vrot.slane %v2408_v16, 4  ;;  %v2461_v1 = vadd.f32 %v2460_v53, %v2459_v19  ;;  %v3126_v5 = vshll.u32 %v6501_v29, 16  ;;  %v2946_v19 = vld [vmem:[%s5654_s17 + $0x30] sm:$0xff]  ;;  %v2948_v53 = vld [vmem:[%s5654_s17 + $0x40] sm:$0xff] }
 0x406   : > { %v2410_v20 = vadd.f32 %v2409_v35, %v2408_v16  ;;  %v2462_v4 = vrot.slane %v2461_v1, 4  ;;  %v6504_v16 = vrot.slane %v3126_v5, 1  ;;  %v2947_v35 = vld [vmem:[%s5654_s17 + $0x38] sm:$0xff] }
 0x408   : > { %v2411_v21 = vrot.slane %v2410_v20, 2  ;;  %v2463_v26 = vadd.f32 %v2462_v4, %v2461_v1  ;;  %3188 = vrot.lane.b32.xlu1 %v6504_v16, %s7316_s20  ;;  %v2959_v1 = vpack.c.bf16 %v2947_v35, %v2946_v19  ;;  %v2950_v4 = vld [vmem:[%s5654_s17 + $0x50] sm:$0xff] }
 0x40a   : > { %v2412_v27 = vadd.f32 %v2411_v21, %v2410_v20  ;;  %v2464_v45 = vrot.slane %v2463_v26, 2  ;;  %v2949_v20 = vld [vmem:[%s5654_s17 + $0x48] sm:$0xff] }
 0x40b   : > { %v2960_v21 = vpack.c.bf16 %v2949_v20, %v2948_v53 }
 0x40c   : > { %v2413_v58 = vrot.slane %v2412_v27, 1  ;;  %v2465_v12 = vadd.f32 %v2464_v45, %v2463_v26  ;;  %v2952_v26 = vld [vmem:[%s5654_s17 + $0x60] sm:$0xff]  ;;  %v2954_v45 = vld [vmem:[%s5654_s17 + $0x70] sm:$0xff] }
 0x40e   : > { %v2414_v32 = vadd.f32 %v2413_v58, %v2412_v27  ;;  %v2466_v43 = vrot.slane %v2465_v12, 1  ;;  %v2951_v27 = vld [vmem:[%s5654_s17 + $0x58] sm:$0xff] }
 0x40f   : > { %v2961_v58 = vpack.c.bf16 %v2951_v27, %v2950_v4 }
 0x410   : > { %4987 = vmatmul.mubr.msk.f32.vlgmr.msra.gmra.mrb[4].mxu1 %vm580_vm2, %v2414_v32  ;;  %v2953_v32 = vld [vmem:[%s5654_s17 + $0x68] sm:$0xff] }
 0x411   : > { %5088 = vmatpush3.bf16.msra.mxu1 %v6291_v56  ;;  %5005 = vmatprep.mubr.msk.f32.mxu1 %vm5493_vm0, %v5494_v6  ;;  %v2372_v56 = vld [vmem:[%s7301_s12] sm:$0xff] }
 0x412   : > { %5089 = vmatprep.subr.bf16.mxu1 %v5492_v3  ;;  %v5099_v37 = vpack.c.bf16 %v2373_v48, %v2372_v56 }
 0x415   : > { %5091 = vmatpush3.bf16.msra.mxu1 %v6297_v9  ;;  %v2467_v9 = vadd.f32 %v2466_v43, %v2465_v12  ;;  %v2962_v12 = vpack.c.bf16 %v2953_v32, %v2952_v26  ;;  %v2955_v43 = vld [vmem:[%s5654_s17 + $0x78] sm:$0xff]  ;;  %v5274_v26 = vld [vmem:[%s7296_s7 + $0x40] sm:$0xff]   ;;  %s7217_s17 = scalar_lea.vmem [#allocation4], %s4537_s0  ;;  %s5498_s0 = smov [#allocation4]  }
 0x416   : > { %5092 = vmatprep.subr.bf16.mxu1 %v5492_v3  ;;  %v2963_v56 = vpack.c.bf16 %v2955_v43, %v2954_v45  ;;  %s4471_s27 = sshll.u32 %s7217_s17, 4  ;;  %s5432_s26 = sshll.u32 %s5498_s0, 4  ;;  %s7242_s27 = int_to_ptr.vmem [resolvable:$true] %s4471_s27  ;;  %s5433_s26 = int_to_ptr.vmem [resolvable:$false] %s5432_s26 }
 0x417   : > { %s5434_s23 = scalar_lea.vmem %s5433_s26, 2048  ;;  %p5435_p0 = scmp.lt.s32.totalorder %s7242_s27, %s5433_s26 }
 0x419   : > { %5094 = vmatpush3.bf16.msra.mxu1 %v6307_v63  ;;  %v2374_v63 = vld [vmem:[%s7301_s12 + $0x10] sm:$0xff] }
 0x41a   : > { %5095 = vmatprep.subr.bf16.mxu1 %v5492_v3 }
 0x41d   : > { %5097 = vmatpush3.bf16.msra.mxu1 %v6317_v54  ;;  %v2375_v54 = vld [vmem:[%s7301_s12 + $0x18] sm:$0xff] }
 0x41e   : > { %5098 = vmatprep.subr.bf16.mxu1 %v5492_v3  ;;  %v5102_v42 = vpack.c.bf16 %v2375_v54, %v2374_v63  ;;  %v5263_v63 = vld [vmem:[%s7296_s7 + $0x60] sm:$0xff]   ;;  %v5261_v54 = vld [vmem:[%s7296_s7 + $0x8] sm:$0xff]  }
 0x41f   : > { %3871 = vmatpush1.bf16.msra.mxu0 %v5263_v63 }
 0x420   : > { %5006 = vmatmul.mubr.msk.f32.vlgmr.msra.gmra.mrb[6].mxu1 %vm580_vm2, %v2467_v9  ;;  %v5260_v9 = vld [vmem:[%s7296_s7] sm:$0xff]   ;;  %3872 = vmatprep.subr.bf16.mxu0 %v5495_v47 }
 0x421   : > { %5100 = vmatpush3.bf16.msra.mxu1 %v5099_v37  ;;  %5016 = vmatprep.mubr.msk.f32.mxu1 %vm5493_vm0, %v5494_v6 }
 0x422   : > { %5101 = vmatprep.subr.bf16.mxu1 %v5492_v3 }
 0x425   : > { %5103 = vmatpush3.bf16.msra.mxu1 %v5102_v42 }
 0x426   : > { %5104 = vmatprep.subr.bf16.mxu1 %v5492_v3 }
 0x4e3   : > { %v2537_v39 = vpop.f32.mrb[4].mxu1 }
 0x4e4   : > { %v2541_v0 = vmul.f32 0.0078125, %v2537_v39  ;;  %v4988_v33 = vpop.f32.mrb[5].mxu1  ;;  %v5262_v39 = vld [vmem:[%s7296_s7 + $0x10] sm:$0xff]  }
 0x4e5   : > { %v5264_v33 = vld [vmem:[%s7296_s7 + $0x18] sm:$0xff]  }
 0x4e6   : > { %5017 = vmatmul.mubr.msk.f32.vlgmr.msra.gmra.mrb[8].mxu1 %vm575_vm1, %v2541_v0  ;;  %v2616_v60 = vmul.f32 %v2541_v0, %v2541_v0  ;;  %v5267_v0 = vld [vmem:[%s7296_s7 + $0x70] sm:$0xff]  }
 0x4e7   : > { %5106 = vmatpush3.bf16.msra.mxu1 %v5099_v37  ;;  %5027 = vmatprep.mubr.msk.f32.mxu1 %vm5493_vm0, %v5494_v6  ;;  %v5259_v6 = vld [vmem:[%s7302_s13 + $0x8] sm:$0xff]  }
 0x4e8   : > { %5107 = vmatprep.subr.bf16.mxu1 %v5492_v3  ;;  %v5258_v3 = vld [vmem:[%s7302_s13] sm:$0xff]  }
 0x4eb   : > { %5109 = vmatpush3.bf16.msra.mxu1 %v5102_v42  ;;  %v5265_v42 = vld [vmem:[%s7296_s7 + $0x68] sm:$0xff]  }
 0x4ec   : > { %5030 = vmatprep.subr.bf16.mxu1 %v5258_v3  ;;  %3873 = vmatpush1.bf16.msra.mxu0 %v5265_v42 }
 0x4ed   : > { %3874 = vmatprep.subr.bf16.mxu0 %v5495_v47 }
 0x4f0   : > { %3875 = vmatpush1.bf16.msra.mxu0 %v5267_v0 }
 0x4f1   : > { %3876 = vmatprep.subr.bf16.mxu0 %v5495_v47 }
 0x4f3   : > { %v2611_v59 = vpop.f32.mrb[6].mxu1 }
 0x4f4   : > { %v2615_v31 = vmul.f32 0.0078125, %v2611_v59  ;;  %v5007_v40 = vpop.f32.mrb[7].mxu1  ;;  %v5269_v59 = vld [vmem:[%s7296_s7 + $0x78] sm:$0xff]  }
 0x4f5   : > { %3877 = vmatpush1.bf16.msra.mxu0 %v5269_v59  ;;  %v2376_v40 = vld [vmem:[%s7294_s5] sm:$0x1]  ;;  %v5276_v59 = vld [vmem:[%s7296_s7 + $0x48] sm:$0xff]  }
 0x4f6   : > { %v2617_v61 = vsub.f32 %v2615_v31, %v2616_v60  ;;  %v5266_v60 = vld [vmem:[%s7296_s7 + $0x20] sm:$0xff]   ;;  %3878 = vmatprep.subr.bf16.mxu0 %v5495_v47 }
 0x4f7   : > { %v5271_v31 = vld [vmem:[%s7296_s7 + $0x80] sm:$0xff]  }
 0x4f8   : > { %v2618_v2 = vmax.f32 %v2617_v61, 0.0  ;;  %v5268_v61 = vld [vmem:[%s7296_s7 + $0x28] sm:$0xff]  }
 0x4f9   : > { %3879 = vmatpush1.bf16.msra.mxu0 %v5271_v31 }
 0x4fa   : > { %v2619_v8 = vadd.f32 1e-05, %v2618_v2  ;;  %3880 = vmatprep.subr.bf16.mxu0 %v5495_v47 }
 0x4fc   : > { %5362 = vrsqrt.f32 %v2619_v8  ;;  %v5273_v8 = vld [vmem:[%s7296_s7 + $0x88] sm:$0xff]  }
 0x4fd   : > { %3881 = vmatpush1.bf16.msra.mxu0 %v5273_v8 }
 0x4fe   : > { %3882 = vmatprep.subr.bf16.mxu0 %v5495_v47 }
 0x501   : > { %3883 = vmatpush1.bf16.msra.mxu0 %v5275_v23 }
 0x502   : > { %3884 = vmatprep.subr.bf16.mxu0 %v5495_v47 }
 0x506   : > { %v5363_v34 = vpop.eup %5362 }
 0x507   : > { %5028 = vmatmul.mubr.msk.f32.vlgmr.msra.gmra.mrb[10].mxu1 %vm575_vm1, %v5363_v34 }
 0x508   : > { %5031 = vmatpush3.bf16.msra.mxu1 %v5258_v3  ;;  %5034 = vmatprep.mubr.msk.bf16.mxu1 %vm575_vm1, %v2956_v57  ;;  %v5270_v57 = vld [vmem:[%s7296_s7 + $0x30] sm:$0xff]  }
 0x509   : > { %5032 = vmatprep.subr.bf16.mxu1 %v5259_v6 }
 0x50c   : > { %5033 = vmatpush3.bf16.msra.mxu1 %v5259_v6  ;;  %v2377_v6 = vld [vmem:[%s7295_s6] sm:$0x1] }
 0x50d   : > { %3506 = vmatprep.subr.bf16.mxu1 %v5495_v47 }
 0x50f   : > { %5035 = vmatmul.mubr.msk.bf16.vlgmr.msra.gmra.mrb[12].mxu1 %vm575_vm1, %v2957_v7 }
 0x510   : > { %5038 = vmatprep.mubr.msk.bf16.mxu1 %vm575_vm1, %v2958_v15  ;;  %3507 = vmatpush1.bf16.msra.mxu1 %v5260_v9 }
 0x511   : > { %3508 = vmatprep.subr.bf16.mxu1 %v5495_v47 }
 0x514   : > { %3509 = vmatpush1.bf16.msra.mxu1 %v5261_v54 }
 0x515   : > { %3510 = vmatprep.subr.bf16.mxu1 %v5495_v47 }
 0x517   : > { %5039 = vmatmul.mubr.msk.bf16.gmra.mrb[16].mxu1 %vm575_vm1, %v2959_v1 }
 0x518   : > { %5042 = vmatprep.mubr.msk.bf16.mxu1 %vm575_vm1, %v2960_v21  ;;  %3511 = vmatpush1.bf16.msra.mxu1 %v5262_v39 }
 0x519   : > { %3512 = vmatprep.subr.bf16.mxu1 %v5495_v47 }
 0x51c   : > { %3513 = vmatpush1.bf16.msra.mxu1 %v5264_v33 }
 0x51d   : > { %3514 = vmatprep.subr.bf16.mxu1 %v5495_v47 }
 0x51f   : > { %5043 = vmatmul.mubr.msk.bf16.gmra.mrb[20].mxu1 %vm575_vm1, %v2961_v58 }
 0x520   : > { %5046 = vmatprep.mubr.msk.bf16.mxu1 %vm575_vm1, %v2962_v12  ;;  %3515 = vmatpush1.bf16.msra.mxu1 %v5266_v60 }
 0x521   : > { %3516 = vmatprep.subr.bf16.mxu1 %v5495_v47 }
 0x524   : > { %3517 = vmatpush1.bf16.msra.mxu1 %v5268_v61 }
 0x525   : > { %3518 = vmatprep.subr.bf16.mxu1 %v5495_v47 }
 0x527   : > { %5047 = vmatmul.mubr.msk.bf16.gmra.mrb[24].mxu1 %vm575_vm1, %v2963_v56 }
 0x528   : > { %3519 = vmatpush1.bf16.msra.mxu1 %v5270_v57 }
 0x529   : > { %3520 = vmatprep.subr.bf16.mxu1 %v5495_v47 }
 0x5b9   : > { %v2690_v48 = vpop.f32.mrb[8].mxu1 }
 0x5ba   : > { %v5018_v37 = vpop.f32.mrb[9].mxu1 }
 0x5da   : > { %v2763_v2 = vpop.f32.mrb[10].mxu1 }
 0x5db   : > { %v2767_v34 = vmul.f32 %v2763_v2, %v2376_v40  ;;  %v5029_v3 = vpop.f32.mrb[11].mxu1 }
 0x5dd   : > { %v2768_v38 = vmul.f32 %v2767_v34, %v2690_v48  ;;  %v6579_v10 = vrot.slane %v2767_v34, %v5829_v55 }
 0x5df   : > { %v2769_v13 = vsub.f32 %v2377_v6, %v2768_v38  ;;  %v2774_v11 = vmul.f32 %v6328_v17, %v6579_v10  ;;  %v2775_v24 = vmul.f32 %v6579_v10, %v6339_v49  ;;  %v2776_v5 = vmul.f32 %v6331_v22, %v6579_v10  ;;  %v5272_v22 = vld [vmem:[%s7296_s7 + $0x38] sm:$0xff]  }
 0x5e0   : > { %v2777_v7 = vmul.f32 %v6579_v10, %v6337_v30  ;;  %v2778_v15 = vmul.f32 %v6356_v51, %v6579_v10  ;;  %v2779_v19 = vmul.f32 %v6579_v10, %v6373_v14  ;;  %v2780_v35 = vmul.f32 %v6360_v25, %v6579_v10  ;;  %3521 = vmatpush1.bf16.msra.mxu1 %v5272_v22 }
 0x5e1   : > { %v6600_v17 = vrot.slane %v2769_v13, %v5829_v55  ;;  %v2781_v49 = vmul.f32 %v6579_v10, %v6371_v44  ;;  %v2782_v30 = vmul.f32 %v6388_v62, %v6579_v10  ;;  %v2783_v55 = vmul.f32 %v6579_v10, %v6405_v52  ;;  %3522 = vmatprep.subr.bf16.mxu1 %v5495_v47 }
 0x5e2   : > { %v2784_v51 = vmul.f32 %v6392_v46, %v6579_v10  ;;  %v2785_v25 = vmul.f32 %v6579_v10, %v6403_v36  ;;  %v5277_v46 = vld [vmem:[%s7296_s7 + $0x98] sm:$0xff]   ;;  %v2786_v40 = vmul.f32 %v6420_v41, %v6579_v10  ;;  %v2787_v8 = vmul.f32 %v6579_v10, %v6435_v28 }
 0x5e3   : > { %v6621_v44 = vadd.f32 %v6600_v17, %v2774_v11  ;;  %v6624_v14 = vadd.f32 %v6600_v17, %v2775_v24  ;;  %v6627_v53 = vadd.f32 %v6600_v17, %v2776_v5  ;;  %v6630_v62 = vadd.f32 %v6600_v17, %v2777_v7  ;;  %3885 = vmatpush1.bf16.msra.mxu0 %v5277_v46 }
 0x5e4   : > { %v6636_v36 = vadd.f32 %v6600_v17, %v2778_v15  ;;  %v6639_v52 = vadd.f32 %v6600_v17, %v2779_v19  ;;  %v6642_v20 = vadd.f32 %v6600_v17, %v2780_v35  ;;  %v6645_v1 = vadd.f32 %v6600_v17, %v2781_v49  ;;  %3886 = vmatprep.subr.bf16.mxu0 %v5495_v47 }
 0x5e5   : > { %v2812_v21 = vsub.f32 0.0, %v6621_v44  ;;  %v2813_v4 = vsub.f32 0.0, %v6624_v14  ;;  %v2814_v27 = vsub.f32 0.0, %v6627_v53  ;;  %v2815_v58 = vsub.f32 0.0, %v6630_v62  ;;  %3523 = vmatpush1.bf16.msra.mxu1 %v5274_v26 }
 0x5e6   : > { %v2816_v32 = vsub.f32 0.0, %v6636_v36  ;;  %v2817_v45 = vsub.f32 0.0, %v6639_v52  ;;  %v6658_v12 = vadd.f32 %v6600_v17, %v2782_v30  ;;  %v6661_v43 = vadd.f32 %v6600_v17, %v2783_v55  ;;  %3524 = vmatprep.subr.bf16.mxu1 %v5495_v47 }
 0x5e7   : > { %v2828_v56 = vmul.f32 1.442695, %v2812_v21  ;;  %v2830_v48 = vmul.f32 1.442695, %v2813_v4  ;;  %v2832_v37 = vmul.f32 1.442695, %v2814_v27  ;;  %v6665_v9 = vadd.f32 %v6600_v17, %v2784_v51 }
 0x5e8   : > { %v2834_v63 = vmul.f32 1.442695, %v2815_v58  ;;  %v2836_v54 = vmul.f32 1.442695, %v2816_v32  ;;  %v6668_v42 = vadd.f32 %v6600_v17, %v2785_v25  ;;  %v2818_v39 = vsub.f32 0.0, %v6642_v20 }
 0x5e9   : > { %5364 = vpow2.f32 %v2828_v56  ;;  %v2819_v0 = vsub.f32 0.0, %v6645_v1  ;;  %v2820_v33 = vsub.f32 0.0, %v6658_v12  ;;  %v2838_v60 = vmul.f32 1.442695, %v2817_v45  ;;  %3525 = vmatpush1.bf16.msra.mxu1 %v5276_v59 }
 0x5ea   : > { %5366 = vpow2.f32 %v2830_v48  ;;  %v2821_v31 = vsub.f32 0.0, %v6661_v43  ;;  %v2840_v61 = vmul.f32 1.442695, %v2818_v39  ;;  %v2822_v2 = vsub.f32 0.0, %v6665_v9  ;;  %3526 = vmatprep.subr.bf16.mxu1 %v5495_v47 }
 0x5eb   : > { %5368 = vpow2.f32 %v2832_v37  ;;  %v2842_v34 = vmul.f32 1.442695, %v2819_v0  ;;  %v2844_v3 = vmul.f32 1.442695, %v2820_v33  ;;  %v2823_v6 = vsub.f32 0.0, %v6668_v42 }
 0x5ec   : > { %5370 = vpow2.f32 %v2834_v63  ;;  %v6686_v38 = vadd.f32 %v6600_v17, %v2786_v40  ;;  %v6689_v41 = vadd.f32 %v6600_v17, %v2787_v8  ;;  %v2788_v57 = vmul.f32 %v6424_v50, %v6579_v10 }
 0x5ed   : > { %5372 = vpow2.f32 %v2836_v54  ;;  %v2846_v13 = vmul.f32 1.442695, %v2821_v31  ;;  %v2789_v28 = vmul.f32 %v6579_v10, %v6440_v18  ;;  %v2848_v11 = vmul.f32 1.442695, %v2822_v2 }
 0x5ee   : > { %5374 = vpow2.f32 %v2838_v60  ;;  %v2824_v23 = vsub.f32 0.0, %v6686_v38  ;;  %v6698_v24 = vadd.f32 %v6600_v17, %v2788_v57  ;;  %v2850_v5 = vmul.f32 1.442695, %v2823_v6 }
 0x5ef   : > { %5376 = vpow2.f32 %v2840_v61  ;;  %v6701_v7 = vadd.f32 %v6600_v17, %v2789_v28  ;;  %v2825_v27 = vsub.f32 0.0, %v6689_v41 }
 0x5f0   : > { %5378 = vpow2.f32 %v2842_v34  ;;  %v2852_v50 = vmul.f32 1.442695, %v2824_v23  ;;  %v2826_v37 = vsub.f32 0.0, %v6698_v24 }
 0x5f1   : > { %5380 = vpow2.f32 %v2844_v3  ;;  %v2854_v39 = vmul.f32 1.442695, %v2825_v27  ;;  %v2827_v0 = vsub.f32 0.0, %v6701_v7 }
 0x5f2   : > { %5382 = vpow2.f32 %v2846_v13  ;;  %v2856_v40 = vmul.f32 1.442695, %v2826_v37 }
 0x5f3   : > { %v5365_v15 = vpop.eup %5364  ;;  %5384 = vpow2.f32 %v2848_v11  ;;  %v2858_v8 = vmul.f32 1.442695, %v2827_v0 }
 0x5f4   : > { %v5367_v18 = vpop.eup %5366  ;;  %v2860_v10 = vadd.f32 1.0, %v5365_v15  ;;  %5386 = vpow2.f32 %v2850_v5 }
 0x5f5   : > { %v5369_v19 = vpop.eup %5368  ;;  %v2861_v35 = vadd.f32 1.0, %v5367_v18  ;;  %5388 = vpow2.f32 %v2852_v50 }
 0x5f6   : > { %v5371_v49 = vpop.eup %5370  ;;  %5390 = vrcp.f32 %v2860_v10  ;;  %v2862_v22 = vadd.f32 1.0, %v5369_v19 }
 0x5f7   : > { %v5373_v30 = vpop.eup %5372  ;;  %5392 = vrcp.f32 %v2861_v35  ;;  %v2863_v55 = vadd.f32 1.0, %v5371_v49 }
 0x5f8   : > { %v5375_v51 = vpop.eup %5374  ;;  %v2864_v17 = vadd.f32 1.0, %v5373_v30  ;;  %5394 = vrcp.f32 %v2862_v22 }
 0x5f9   : > { %v5377_v25 = vpop.eup %5376  ;;  %v2865_v46 = vadd.f32 1.0, %v5375_v51  ;;  %5396 = vrcp.f32 %v2863_v55 }
 0x5fa   : > { %v5379_v21 = vpop.eup %5378  ;;  %5398 = vrcp.f32 %v2864_v17  ;;  %v2866_v4 = vadd.f32 1.0, %v5377_v25  ;;  %v3129_v17 = vshrl.u32 %v6501_v29, 16 }
 0x5fb   : > { %v5381_v58 = vpop.eup %5380  ;;  %5400 = vrcp.f32 %v2865_v46  ;;  %v2867_v26 = vadd.f32 1.0, %v5379_v21 }
 0x5fc   : > { %v5383_v32 = vpop.eup %5382  ;;  %v2868_v45 = vadd.f32 1.0, %v5381_v58  ;;  %5402 = vrcp.f32 %v2866_v4 }
 0x5fd   : > { %v5385_v56 = vpop.eup %5384  ;;  %v2869_v48 = vadd.f32 1.0, %v5383_v32  ;;  %5404 = vrcp.f32 %v2867_v26 }
 0x5fe   : > { %v5387_v63 = vpop.eup %5386  ;;  %5406 = vrcp.f32 %v2868_v45  ;;  %v2870_v54 = vadd.f32 1.0, %v5385_v56  ;;  %v3131_v56 = vor.u32 %v3129_v17, %v6504_v16  ;;  %v5280_v16 = vld [vmem:[%s7296_s7 + $0x58] sm:$0xff]  }
 0x5ff   : > { %v5389_v33 = vpop.eup %5388  ;;  %5408 = vrcp.f32 %v2869_v48  ;;  %v2871_v59 = vadd.f32 1.0, %v5387_v63 }
 0x600   : > { %v5391_v60 = vpop.eup %5390  ;;  %5410 = vrcp.f32 %v2870_v54  ;;  %v2872_v49 = vadd.f32 1.0, %v5389_v33 }
 0x601   : > { %v5393_v31 = vpop.eup %5392  ;;  %5412 = vrcp.f32 %v2871_v59  ;;  %v2892_v6 = vmul.f32 %v5391_v60, %v6621_v44 }
 0x602   : > { %v5395_v61 = vpop.eup %5394  ;;  %v2893_v2 = vmul.f32 %v5393_v31, %v6624_v14  ;;  %5414 = vpow2.f32 %v2854_v39  ;;  %v5279_v39 = vld [vmem:[%s7296_s7 + $0xa0] sm:$0xff]  }
 0x603   : > { %v5397_v34 = vpop.eup %5396  ;;  %v2894_v11 = vmul.f32 %v5395_v61, %v6627_v53  ;;  %5416 = vpow2.f32 %v2856_v40  ;;  %3887 = vmatpush1.bf16.msra.mxu0 %v5279_v39 }
 0x604   : > { %v5399_v3 = vpop.eup %5398  ;;  %v2909_v57 = vmul.f32 0.0, %v2893_v2  ;;  %v2895_v13 = vmul.f32 %v5397_v34, %v6630_v62  ;;  %5418 = vpow2.f32 %v2858_v8  ;;  %3888 = vmatprep.subr.bf16.mxu0 %v5495_v47 }
 0x605   : > { %v5401_v28 = vpop.eup %5400  ;;  %v2896_v10 = vmul.f32 %v5399_v3, %v6636_v36  ;;  %v3215_v36 = vrot.slane %v6501_v29, 1  ;;  %5420 = vrcp.f32 %v2872_v49 }
 0x606   : > { %v5403_v23 = vpop.eup %5402  ;;  %v2924_v5 = vpack.c.bf16 %v2909_v57, %v2892_v6  ;;  %v2897_v50 = vmul.f32 %v5401_v28, %v6639_v52  ;;  %v2911_v15 = vmul.f32 0.0, %v2895_v13 }
 0x607   : > { %v5405_v14 = vpop.eup %5404  ;;  %v2898_v52 = vmul.f32 %v5403_v23, %v6642_v20  ;;  %v6722_v27 = vshrl.u32 %v3215_v36, 16 }
 0x608   : > { %v5407_v18 = vpop.eup %5406  ;;  %2932 = vst.msk [vmem:[#allocation3 + $0x10] sm:$0xff] %vm580_vm2, %v2924_v5  ;;  %v2913_v44 = vmul.f32 0.0, %v2897_v50  ;;  %v2925_v19 = vpack.c.bf16 %v2911_v15, %v2894_v11  ;;  %v2899_v62 = vmul.f32 %v5405_v14, %v6645_v1 }
 0x609   : > { %v5409_v35 = vpop.eup %5408  ;;  %v2900_v1 = vmul.f32 %v5407_v18, %v6658_v12  ;;  %v3288_v54 = vrot.slane %v6722_v27, 7 }
 0x60a   : > { %v5411_v53 = vpop.eup %5410  ;;  %v2926_v22 = vpack.c.bf16 %v2913_v44, %v2896_v10  ;;  %2933 = vst.msk [vmem:[#allocation3 + $0x18] sm:$0xff] %vm580_vm2, %v2925_v19  ;;  %v2901_v30 = vmul.f32 %v5409_v35, %v6661_v43  ;;  %v2915_v55 = vmul.f32 0.0, %v2899_v62  ;;  %v5278_v43 = vld [vmem:[%s7296_s7 + $0x50] sm:$0xff]   ;;  %v5281_v10 = vld [vmem:[%s7296_s7 + $0xa8] sm:$0xff]  }
 0x60b   : > { %v5413_v51 = vpop.eup %5412  ;;  %v2902_v26 = vmul.f32 %v5411_v53, %v6665_v9  ;;  %3527 = vmatpush1.bf16.msra.mxu1 %v5278_v43  ;;  %3889 = vmatpush1.bf16.msra.mxu0 %v5281_v10  ;;  %v5283_v43 = vld [vmem:[%s7296_s7 + $0xb0] sm:$0xff]  }
 0x60c   : > { %v5415_v25 = vpop.eup %5414  ;;  %2934 = vst.msk [vmem:[#allocation3 + $0x20] sm:$0xff] %vm580_vm2, %v2926_v22  ;;  %v2917_v46 = vmul.f32 0.0, %v2901_v30  ;;  %v2927_v21 = vpack.c.bf16 %v2915_v55, %v2898_v52  ;;  %v2903_v4 = vmul.f32 %v5413_v51, %v6668_v42  ;;  %3528 = vmatprep.subr.bf16.mxu1 %v5495_v47  ;;  %3890 = vmatprep.subr.bf16.mxu0 %v5495_v47 }
 0x60d   : > { %v2873_v20 = vadd.f32 1.0, %v5415_v25  ;;  %v5417_v45 = vpop.eup %5416 }
 0x60e   : > { %v2928_v58 = vpack.c.bf16 %v2917_v46, %v2900_v1  ;;  %2935 = vst.msk [vmem:[#allocation3 + $0x28] sm:$0xff] %vm580_vm2, %v2927_v21  ;;  %v2919_v32 = vmul.f32 0.0, %v2903_v4  ;;  %v5419_v42 = vpop.eup %5418  ;;  %v2874_v60 = vadd.f32 1.0, %v5417_v45 }
 0x60f   : > { %v6729_v12 = vld [vmem:[#allocation3 + $0x10] sm:$0xff]  ;;  %5422 = vrcp.f32 %v2873_v20  ;;  %v2875_v8 = vadd.f32 1.0, %v5419_v42  ;;  %3529 = vmatpush1.bf16.msra.mxu1 %v5280_v16  ;;  %v5421_v53 = vpop.eup %5420  ;;  %3891 = vmatpush1.bf16.msra.mxu0 %v5283_v43 }
 0x610   : > { %v3133_v48 = vshll.u32 %v6729_v12, 16  ;;  %v3216_v37 = vrot.slane %v6729_v12, 1  ;;  %2936 = vst.msk [vmem:[#allocation3 + $0x30] sm:$0xff] %vm580_vm2, %v2928_v58  ;;  %v2929_v63 = vpack.c.bf16 %v2919_v32, %v2902_v26  ;;  %v3137_v40 = vshrl.u32 %v6729_v12, 16  ;;  %5110 = vmatprep.subr.bf16.mxu1 %v5495_v47  ;;  %3892 = vmatprep.subr.bf16.mxu0 %v5495_v47 }
 0x611   : > { %v6736_v9 = vld [vmem:[#allocation3 + $0x18] sm:$0xff]  ;;  %5424 = vrcp.f32 %v2874_v60 }
 0x612   : > { %v6745_v0 = vrot.slane %v3133_v48, 1  ;;  %v3141_v33 = vshll.u32 %v6736_v9, 16  ;;  %v3217_v59 = vsel %vm1275_vm3, %v3215_v36, %v3216_v37  ;;  %2937 = vst.msk [vmem:[#allocation3 + $0x38] sm:$0xff] %vm580_vm2, %v2929_v63  ;;  %v3637_v2 = vrot.slane %v6736_v9, 1 }
 0x613   : > { %v6750_v31 = vld [vmem:[#allocation3 + $0x20] sm:$0xff]  ;;  %v3290_v61 = vshrl.u32 %v3217_v59, 16  ;;  %v3145_v6 = vshrl.u32 %v6736_v9, 16  ;;  %v3293_v11 = vshll.u32 %v3217_v59, 16  ;;  %v3690_v14 = vshrl.u32 %v3216_v37, 16 }
 0x614   : > { %v3136_v34 = vsel %vm1184_vm4, %v3131_v56, %v6745_v0  ;;  %v6756_v3 = vrot.slane %v3141_v33, 1  ;;  %v3149_v57 = vshll.u32 %v6750_v31, 16  ;;  %v3139_v13 = vor.u32 %v3137_v40, %v6745_v0 }
 0x615   : > { %3190 = vrot.lane.b32.xlu0 %v3136_v34, %s7316_s20  ;;  %v3292_v28 = vrot.slane %v3290_v61, 7  ;;  %v3638_v23 = vsel %vm1275_vm3, %v3216_v37, %v3637_v2  ;;  %v6767_v5 = vld [vmem:[#allocation3 + $0x28] sm:$0xff]  ;;  %v3220_v44 = vrot.slane %v6750_v31, 1  ;;  %v3153_v1 = vshrl.u32 %v6750_v31, 16 }
 0x616   : > { %v3147_v50 = vor.u32 %v3145_v6, %v6756_v3  ;;  %v3151_v15 = vrot.slane %v3149_v57, 1  ;;  %v3694_v18 = vshrl.u32 %v3638_v23, 16  ;;  %v3697_v62 = vshll.u32 %v3638_v23, 16  ;;  %v5285_v57 = vld [vmem:[%s7296_s7 + $0xb8] sm:$0xff]  }
 0x617   : > { %v3295_v19 = vor.u32 %v3293_v11, %v3292_v28  ;;  %v6774_v35 = vld [vmem:[#allocation3 + $0x30] sm:$0xff]  ;;  %v3157_v49 = vshll.u32 %v6767_v5, 16  ;;  %v3144_v52 = vsel %vm1184_vm4, %v3139_v13, %v6756_v3  ;;  %v3161_v25 = vshrl.u32 %v6767_v5, 16  ;;  %3893 = vmatpush1.bf16.msra.mxu0 %v5285_v57 }
 0x618   : > { %v6778_v22 = vsel %vm1184_vm4, %v3147_v50, %v3151_v15  ;;  %v3696_v30 = vrot.slane %v3694_v18, 7  ;;  %v3165_v55 = vshll.u32 %v6774_v35, 16  ;;  %v3692_v21 = vrot.slane %v3690_v14, 7  ;;  %4352 = vmatprep.subr.bf16.mxu0 %v5495_v47 }
 0x619   : > { %v5423_v51 = vpop.eup %5422  ;;  %3194 = vrot.lane.b32.xlu1 %v6778_v22, %s7316_s20  ;;  %3192 = vrot.lane.b32.xlu0 %v3144_v52, %s7316_s20  ;;  %v3296_v17 = vsel %vm1360_vm5, %v3288_v54, %v3295_v19  ;;  %v3159_v36 = vrot.slane %v3157_v49, 1  ;;  %v6789_v46 = vld [vmem:[#allocation3 + $0x38] sm:$0xff]  ;;  %v3169_v20 = vshrl.u32 %v6774_v35, 16  ;;  %v3155_v26 = vor.u32 %v3153_v1, %v3151_v15  ;;  %v6847_v49 = vld [vmem:[#allocation3 + $0x50] sm:$0xff]  ;;  %v6864_v1 = vpop.f32.mrb[12].mxu1 }
 0x61a   : > { %4639 = vmatprep.mubr.msk.bf16.mxu1 %vm580_vm2, %v3296_v17  ;;  %v3699_v4 = vor.u32 %v3697_v62, %v3696_v30  ;;  %v3167_v27 = vrot.slane %v3165_v55, 1  ;;  %v3173_v32 = vshll.u32 %v6789_v46, 16  ;;  %v2905_v45 = vmul.f32 %v5423_v51, %v6689_v41 }
 0x61b   : > { %v3163_v58 = vor.u32 %v3161_v25, %v3159_v36  ;;  %v2904_v48 = vmul.f32 %v5421_v53, %v6686_v38  ;;  %v3160_v63 = vsel %vm1184_vm4, %v3155_v26, %v3159_v36  ;;  %5426 = vrcp.f32 %v2875_v8  ;;  %v5425_v8 = vpop.eup %5424 }
 0x61c   : > { %v3700_v42 = vsel %vm1360_vm5, %v3692_v21, %v3699_v4  ;;  %v3171_v56 = vor.u32 %v3169_v20, %v3167_v27  ;;  %v2921_v54 = vmul.f32 0.0, %v2905_v45  ;;  %v3175_v41 = vrot.slane %v3173_v32, 1  ;;  %v6866_v21 = vpop.f32.mrb[13].mxu1 }
 0x61d   : > { %4683 = vmatprep.mubr.msk.bf16.mxu0 %vm580_vm2, %v3700_v42  ;;  %v3168_v37 = vsel %vm1184_vm4, %v3163_v58, %v3167_v27  ;;  %3196 = vrot.lane.b32.xlu0 %v3160_v63, %s7316_s20  ;;  %v6808_v38 = vsel %vm1360_vm5, %v3292_v28, %v3699_v4  ;;  %v3221_v16 = vsel %vm1275_vm3, %v3637_v2, %v3220_v44  ;;  %v3177_v6 = vshrl.u32 %v6789_v46, 16  ;;  %v5037_v4 = vpop.f32.mrb[14].mxu1 }
 0x61e   : > { %3198 = vrot.lane.b32.xlu1 %v3168_v37, %s7316_s20  ;;  %v2930_v39 = vpack.c.bf16 %v2921_v54, %v2904_v48  ;;  %v3320_v33 = vshrl.u32 %v3221_v16, 16  ;;  %v3176_v59 = vsel %vm1184_vm4, %v3171_v56, %v3175_v41  ;;  %v3323_v40 = vshll.u32 %v3221_v16, 16  ;;  %v3048_v27 = vpop.f32.mrb[15].mxu1  ;;  %v3189_v56 = vpop.permute.xlu1 %3188 }
 0x61f   : > { %v3179_v11 = vor.u32 %v3177_v6, %v3175_v41  ;;  %v2906_v23 = vmul.f32 %v5425_v8, %v6698_v24  ;;  %v4026_v53 = vshll.u32 %v6847_v49, 16  ;;  %v4030_v17 = vshrl.u32 %v6847_v49, 16  ;;  %v6868_v20 = vpop.f32.mrb[16].mxu1 }
 0x620   : > { %2938 = vst.msk [vmem:[#allocation3 + $0x40] sm:$0xff] %vm580_vm2, %v2930_v39  ;;  %v6820_v60 = vrot.slane %v3320_v33, 7  ;;  %v6870_v43 = vpop.f32.mrb[17].mxu1  ;;  %v3641_v57 = vrot.slane %v6767_v5, 1 }
 0x621   : > { %3621 = vrot.lane.b32.xlu0 %v6745_v0, %s7316_s20  ;;  %v4028_v51 = vrot.slane %v4026_v53, 1  ;;  %v5041_v58 = vpop.f32.mrb[18].mxu1 }
 0x622   : > { %3200 = vrot.lane.b32.xlu1 %v3176_v59, %s7316_s20  ;;  %v3325_v61 = vor.u32 %v3323_v40, %v6820_v60  ;;  %v3062_v26 = vpop.f32.mrb[19].mxu1  ;;  %v5287_v58 = vld [vmem:[%s7296_s7 + $0xd8] sm:$0xff]  }
 0x623   : > { %v4032_v25 = vor.u32 %v4030_v17, %v4028_v51  ;;  %v6872_v32 = vpop.f32.mrb[20].mxu1 }
 0x624   : > { %v6824_v34 = vsel %vm1360_vm5, %v3696_v30, %v3325_v61  ;;  %v6874_v45 = vpop.f32.mrb[21].mxu1 }
 0x625   : > { %v5427_v2 = vpop.eup %5426  ;;  %v5045_v42 = vpop.f32.mrb[22].mxu1 }
 0x626   : > { %v2907_v0 = vmul.f32 %v5427_v2, %v6701_v7 }
 0x627   : > { %v6830_v13 = vld [vmem:[#allocation3 + $0x40] sm:$0xff] }
 0x628   : > { %v3181_v28 = vshll.u32 %v6830_v13, 16  ;;  %v2923_v50 = vmul.f32 0.0, %v2907_v0  ;;  %v3185_v14 = vshrl.u32 %v6830_v13, 16 }
 0x62a   : > { %v3183_v15 = vrot.slane %v3181_v28, 1  ;;  %v2931_v18 = vpack.c.bf16 %v2923_v50, %v2906_v23  ;;  %v5282_v23 = vld [vmem:[%s7296_s7 + $0xc0] sm:$0xff]  }
 0x62c   : > { %v3187_v10 = vor.u32 %v3185_v14, %v3183_v15  ;;  %v3184_v19 = vsel %vm1184_vm4, %v3179_v11, %v3183_v15  ;;  %2939 = vst.msk [vmem:[#allocation3 + $0x48] sm:$0xff] %vm580_vm2, %v2931_v18 }
 0x62d   : > { %3202 = vrot.lane.b32.xlu0 %v3184_v19, %s7316_s20 }
 0x62e   : > { %3204 = vrot.lane.b32.xlu1 %v3187_v10, %s7316_s20 }
 0x631   : > { %4039 = vrot.lane.b32.xlu0 %v3168_v37, %s7316_s20 }
 0x632   : > { %4037 = vrot.lane.b32.xlu1 %v3160_v63, %s7316_s20 }
 0x633   : > { %v6843_v24 = vld [vmem:[#allocation3 + $0x48] sm:$0xff] }
 0x634   : > { %v3614_v7 = vshll.u32 %v6843_v24, 16  ;;  %v3618_v30 = vshrl.u32 %v6843_v24, 16 }
 0x635   : > { %4041 = vrot.lane.b32.xlu0 %v3176_v59, %s7316_s20 }
 0x636   : > { %v3616_v62 = vrot.slane %v3614_v7, 1 }
 0x638   : > { %v3617_v52 = vsel %vm1184_vm4, %v3187_v10, %v3616_v62  ;;  %v3620_v55 = vor.u32 %v3618_v30, %v3616_v62  ;;  %v3223_v10 = vsel %vm1275_vm3, %v3220_v44, %v3641_v57  ;;  %v3224_v30 = vrot.slane %v6774_v35, 1 }
 0x639   : > { %4043 = vrot.lane.b32.xlu0 %v3184_v19, %s7316_s20  ;;  %3623 = vrot.lane.b32.xlu1 %v3617_v52, %s7316_s20  ;;  %v3603_v19 = vld [vmem:[#allocation3 + $0x8] sm:$0x80] }
 0x63a   : > { %v4029_v36 = vsel %vm1184_vm4, %v3620_v55, %v4028_v51  ;;  %v5286_v51 = vld [vmem:[%s7296_s7 + $0xd0] sm:$0xff]   ;;  %v3225_v26 = vsel %vm1275_vm3, %v3641_v57, %v3224_v30 }
 0x63b   : > { %v3353_v57 = vshll.u32 %v3225_v26, 16 }
 0x63d   : > { %4045 = vrot.lane.b32.xlu0 %v3617_v52, %s7316_s20  ;;  %3625 = vrot.lane.b32.xlu1 %v3620_v55, %s7316_s20  ;;  %v3335_v52 = vshrl.u32 %v3223_v10, 16 }
 0x641   : > { %4047 = vrot.lane.b32.xlu0 %v4029_v36, %s7316_s20  ;;  %4035 = vrot.lane.b32.xlu1 %v6778_v22, %s7316_s20  ;;  %v3115_v22 = vld [vmem:[#allocation3] sm:$0x80] }
 0x642   : > { %v3234_v48 = vsel %vm580_vm2, %v3115_v22, %v3189_v56  ;;  %v3338_v22 = vshll.u32 %v3223_v10, 16 }
 0x643   : > { %v3275_v41 = vshrl.u32 %v3234_v48, 16 }
 0x645   : > { %4049 = vrot.lane.b32.xlu0 %v4032_v25, %s7316_s20  ;;  %4033 = vrot.lane.b32.xlu1 %v6756_v3, %s7316_s20  ;;  %v3076_v3 = vpop.f32.mrb[23].mxu1  ;;  %v3277_v40 = vrot.slane %v3275_v41, 7  ;;  %v3337_v25 = vrot.slane %v3335_v52, 7  ;;  %v3226_v41 = vrot.slane %v6789_v46, 1  ;;  %v3124_v52 = vld [vmem:[#allocation3 + $0x48] sm:$0x1] }
 0x646   : > { %v6877_v37 = vpop.f32.mrb[24].mxu1  ;;  %s5428_s20 = scalar_lea.vmem %s7242_s27, 1024 }
 0x647   : > { %v6879_v63 = vpop.f32.mrb[25].mxu1  ;;  %v3340_v48 = vor.u32 %v3338_v22, %v3337_v25  ;;  %p5429_p11 = scmp.ne.s32.totalorder %s7242_s27, %s5428_s20  ;;  %p5436_p1 = scmp.lt.s32.totalorder %s5434_s23, %s5428_s20 }
 0x648   : > { %v5049_v54 = vpop.f32.mrb[26].mxu1 }
 0x649   : > { %v3090_v16 = vpop.f32.mrb[27].mxu1  ;;  %v3350_v54 = vshrl.u32 %v3225_v26, 16  ;;  %p5430_p12 = pnand %p5429_p11, %p5619_p5  ;;  %p5437_p2 = por %p5436_p1, %p5435_p0 }
 0x64a   : > { %v5288_v16 = vld [vmem:[%s7296_s7 + $0xe0] sm:$0xff]  }
 0x64b   : > { %p5431_p13 = pneg %p5430_p12 }
 0x64d   : > { %p5438_p3 = pnand %p5437_p2, %p5431_p13 }
 0x687   : > { %v3191_v39 = vpop.permute.xlu0 %3190 }
 0x688   : > { %v3236_v33 = vsel %vm580_vm2, %v6501_v29, %v3191_v39 }
 0x689   : > { %v3278_v59 = vshrl.u32 %v3236_v33, 16  ;;  %v3281_v8 = vshll.u32 %v3236_v33, 16 }
 0x68b   : > { %v3280_v61 = vrot.slane %v3278_v59, 7  ;;  %v3193_v2 = vpop.permute.xlu0 %3192  ;;  %v3195_v28 = vpop.permute.xlu1 %3194 }
 0x68c   : > { %v3238_v6 = vsel %vm580_vm2, %v6729_v12, %v3193_v2  ;;  %v3240_v15 = vsel %vm580_vm2, %v6736_v9, %v3195_v28  ;;  %v5284_v12 = vld [vmem:[%s7296_s7 + $0xc8] sm:$0xff]  }
 0x68d   : > { %v3283_v0 = vor.u32 %v3281_v8, %v3280_v61  ;;  %v3297_v11 = vshrl.u32 %v3238_v6, 16  ;;  %v3300_v18 = vshll.u32 %v3238_v6, 16  ;;  %v3312_v7 = vshrl.u32 %v3240_v15, 16  ;;  %v6935_v2 = vld [vmem:[%s7296_s7 + $0xe8] sm:$0xff]  }
 0x68e   : > { %v3315_v4 = vshll.u32 %v3240_v15, 16  ;;  %v3227_v6 = vsel %vm1275_vm3, %v3224_v30, %v3226_v41 }
 0x68f   : > { %v3299_v50 = vrot.slane %v3297_v11, 7  ;;  %v3284_v29 = vsel %vm1360_vm5, %v3277_v40, %v3283_v0  ;;  %v3197_v14 = vpop.permute.xlu0 %3196  ;;  %v3314_v44 = vrot.slane %v3312_v7, 7  ;;  %v3365_v11 = vshrl.u32 %v3227_v6, 16  ;;  %v6965_v7 = vld [vmem:[%s7296_s7 + $0xf8] sm:$0xff]  }
 0x690   : > { %3539 = vmatmul.mubr.bf16.vlgmr.msra.gmra.mrb[28].mxu1 %v3284_v29  ;;  %v3242_v36 = vsel %vm580_vm2, %v6750_v31, %v3197_v14  ;;  %v3199_v39 = vpop.permute.xlu1 %3198  ;;  %v6948_v29 = vld [vmem:[%s7296_s7 + $0xf0] sm:$0xff]  }
 0x691   : > { %5122 = vmatpush1.bf16.msra.mxu1 %v5282_v23  ;;  %4640 = vmatprep.mubr.msk.bf16.mxu1 %vm580_vm2, %v6808_v38  ;;  %v3302_v62 = vor.u32 %v3300_v18, %v3299_v50  ;;  %v3317_v42 = vor.u32 %v3315_v4, %v3314_v44  ;;  %v3327_v56 = vshrl.u32 %v3242_v36, 16  ;;  %v3244_v40 = vsel %vm580_vm2, %v6767_v5, %v3199_v39 }
 0x692   : > { %5111 = vmatprep.subr.bf16.mxu1 %v5495_v47  ;;  %v3330_v8 = vshll.u32 %v3242_v36, 16  ;;  %v3342_v0 = vshrl.u32 %v3244_v40, 16  ;;  %v6958_v10 = vrot.slane %v3365_v11, 7  ;;  %v6978_v36 = vld [vmem:[%s7296_s7 + $0x100] sm:$0xff]  }
 0x693   : > { %v3622_v53 = vpop.permute.xlu0 %3621  ;;  %v3303_v17 = vsel %vm1360_vm5, %v3280_v61, %v3302_v62  ;;  %v3329_v33 = vrot.slane %v3327_v56, 7  ;;  %v3318_v59 = vsel %vm1360_vm5, %v3299_v50, %v3317_v42  ;;  %v3352_v61 = vrot.slane %v3350_v54, 7  ;;  %v6990_v42 = vld [vmem:[#allocation3 + $0x28] sm:$0xff]  ;;  %v6992_v56 = vld [vmem:[#allocation3 + $0x30] sm:$0xff] }
 0x694   : > { %v3655_v55 = vsel %vm580_vm2, %v3603_v19, %v3622_v53  ;;  %v3201_v50 = vpop.permute.xlu1 %3200  ;;  %v6951_v15 = vrot.slane %v3342_v0, 7  ;;  %v3345_v19 = vshll.u32 %v3244_v40, 16  ;;  %v3368_v53 = vshll.u32 %v3227_v6, 16  ;;  %v7020_v6 = vld [vmem:[%s7296_s7 + $0x110] sm:$0xff]  }
 0x695   : > { %5123 = vmatpush1.bf16.msra.mxu1 %v5284_v12  ;;  %v3685_v38 = vshrl.u32 %v3655_v55, 16  ;;  %v3332_v28 = vor.u32 %v3330_v8, %v3329_v33  ;;  %v3246_v18 = vsel %vm580_vm2, %v6774_v35, %v3201_v50  ;;  %v4063_v40 = vrot.slane %v6990_v42, 1  ;;  %v7064_v42 = vld [vmem:[#allocation3 + $0x18] sm:$0xff] }
 0x696   : > { %5112 = vmatprep.subr.bf16.mxu1 %v5495_v47  ;;  %v3347_v30 = vor.u32 %v3345_v19, %v6951_v15  ;;  %v3357_v55 = vshrl.u32 %v3246_v18, 16 }
 0x697   : > { %v3687_v27 = vrot.slane %v3685_v38, 7  ;;  %v3333_v14 = vsel %vm1360_vm5, %v3314_v44, %v3332_v28 }
 0x698   : > { %3546 = vmatmul.mubr.bf16.gmra.mrb[32].mxu1 %v3303_v17  ;;  %v6981_v4 = vrot.slane %v3357_v55, 7 }
 0x699   : > { %4641 = vmatprep.mubr.msk.bf16.mxu1 %vm580_vm2, %v6824_v34  ;;  %5124 = vmatpush1.bf16.msra.mxu1 %v5286_v51  ;;  %v3688_v3 = vsel %vm1360_vm5, %v3687_v27, %v3302_v62  ;;  %v3348_v27 = vsel %vm1360_vm5, %v3329_v33, %v3347_v30 }
 0x69a   : > { %5113 = vmatprep.subr.bf16.mxu1 %v5495_v47  ;;  %3903 = vmatmul.mubr.bf16.vlgmr.msra.gmra.mrb[20].mxu0 %v3688_v3  ;;  %v3360_v3 = vshll.u32 %v3246_v18, 16  ;;  %v7036_v18 = vld [vmem:[#allocation3 + $0x38] sm:$0xff] }
 0x69b   : > { %4684 = vmatprep.mubr.msk.bf16.mxu0 %vm580_vm2, %v6824_v34  ;;  %4353 = vmatpush1.bf16.msra.mxu0 %v5282_v23  ;;  %v3341_v34 = vsel %vm1360_vm5, %v6820_v60, %v3340_v48  ;;  %v3355_v60 = vor.u32 %v3353_v57, %v3352_v61  ;;  %v6941_v23 = vrot.slane %v6830_v13, 1  ;;  %v6999_v48 = vld [vmem:[%s7296_s7 + $0x108] sm:$0xff]   ;;  %v3612_v57 = vld [vmem:[#allocation3 + $0x50] sm:$0x1] }
 0x69c   : > { %4354 = vmatprep.subr.bf16.mxu0 %v5495_v47 }
 0x69d   : > { %5125 = vmatpush1.bf16.msra.mxu1 %v5287_v58  ;;  %v3229_v62 = vsel %vm1275_vm3, %v3226_v41, %v6941_v23  ;;  %v3649_v41 = vrot.slane %v6843_v24, 1 }
 0x69e   : > { %5114 = vmatprep.subr.bf16.mxu1 %v5495_v47  ;;  %v3380_v44 = vshrl.u32 %v3229_v62, 16  ;;  %v3383_v39 = vshll.u32 %v3229_v62, 16  ;;  %v7043_v62 = vld [vmem:[%s7296_s7 + $0x118] sm:$0xff]  }
 0x69f   : > { %4355 = vmatpush1.bf16.msra.mxu0 %v5284_v12  ;;  %v3356_v12 = vsel %vm1360_vm5, %v3337_v25, %v3355_v60  ;;  %v3203_v17 = vpop.permute.xlu0 %3202  ;;  %v3230_v25 = vrot.slane %v3124_v52, 1  ;;  %v7029_v60 = vld [vmem:[#allocation3 + $0x20] sm:$0xff] }
 0x6a0   : > { %3553 = vmatmul.mubr.bf16.gmra.mrb[36].mxu1 %v3318_v59  ;;  %4356 = vmatprep.subr.bf16.mxu0 %v5495_v47  ;;  %v3205_v38 = vpop.permute.xlu1 %3204  ;;  %v6988_v22 = vrot.slane %v3380_v44, 7 }
 0x6a1   : > { %4642 = vmatprep.mubr.msk.bf16.mxu1 %vm580_vm2, %v3341_v34  ;;  %5126 = vmatpush1.bf16.msra.mxu1 %v5288_v16  ;;  %v3231_v54 = vsel %vm1275_vm3, %v6941_v23, %v3230_v25 }
 0x6a2   : > { %5115 = vmatprep.subr.bf16.mxu1 %v5495_v47  ;;  %3910 = vmatmul.mubr.bf16.gmra.mrb[24].mxu0 %v3318_v59  ;;  %v3395_v8 = vshrl.u32 %v3231_v54, 16 }
 0x6a3   : > { %4685 = vmatprep.mubr.msk.bf16.mxu0 %vm580_vm2, %v3341_v34  ;;  %4357 = vmatpush1.bf16.msra.mxu0 %v5286_v51  ;;  %v3370_v51 = vor.u32 %v3368_v53, %v6958_v10  ;;  %v4065_v34 = vrot.slane %v6992_v56, 1  ;;  %v3398_v53 = vshll.u32 %v3231_v54, 16 }
 0x6a4   : > { %4358 = vmatprep.subr.bf16.mxu0 %v5495_v47  ;;  %v7007_v59 = vpop.permute.xlu1 %4037 }
 0x6a5   : > { %5127 = vmatpush1.bf16.msra.mxu1 %v6935_v2  ;;  %v3371_v26 = vsel %vm1360_vm5, %v3352_v61, %v3370_v51  ;;  %v3385_v61 = vor.u32 %v3383_v39, %v6988_v22  ;;  %v4066_v11 = vsel %vm1275_vm3, %v4063_v40, %v4065_v34  ;;  %v4067_v51 = vrot.slane %v7036_v18, 1 }
 0x6a6   : > { %5116 = vmatprep.subr.bf16.mxu1 %v5495_v47  ;;  %v4166_v52 = vshrl.u32 %v4066_v11, 16 }
 0x6a7   : > { %4359 = vmatpush1.bf16.msra.mxu0 %v5287_v58  ;;  %v3248_v58 = vsel %vm580_vm2, %v6789_v46, %v3203_v17  ;;  %v3386_v50 = vsel %vm1360_vm5, %v6958_v10, %v3385_v61  ;;  %v4061_v10 = vrot.slane %v7029_v60, 1 }
 0x6a8   : > { %3560 = vmatmul.mubr.bf16.gmra.mrb[40].mxu1 %v3333_v14  ;;  %4360 = vmatprep.subr.bf16.mxu0 %v5495_v47  ;;  %v3372_v33 = vshrl.u32 %v3248_v58, 16 }
 0x6a9   : > { %4643 = vmatprep.mubr.msk.bf16.mxu1 %vm580_vm2, %v3356_v12  ;;  %5128 = vmatpush1.bf16.msra.mxu1 %v6948_v29 }
 0x6aa   : > { %5117 = vmatprep.subr.bf16.mxu1 %v5495_v47  ;;  %3917 = vmatmul.mubr.bf16.gmra.mrb[28].mxu0 %v3333_v14  ;;  %v7024_v0 = vrot.slane %v3372_v33, 7 }
 0x6ab   : > { %4686 = vmatprep.mubr.msk.bf16.mxu0 %vm580_vm2, %v3356_v12  ;;  %4361 = vmatpush1.bf16.msra.mxu0 %v5288_v16  ;;  %v3362_v16 = vor.u32 %v3360_v3, %v6981_v4  ;;  %v3375_v12 = vshll.u32 %v3248_v58, 16  ;;  %v3624_v19 = vpop.permute.xlu1 %3623  ;;  %v7059_v58 = vsel %vm1275_vm3, %v4061_v10, %v4063_v40 }
 0x6ac   : > { %4362 = vmatprep.subr.bf16.mxu0 %v5495_v47  ;;  %v3657_v44 = vsel %vm580_vm2, %v6830_v13, %v3624_v19 }
 0x6ad   : > { %5129 = vmatpush1.bf16.msra.mxu1 %v6965_v7  ;;  %v3363_v28 = vsel %vm1360_vm5, %v6951_v15, %v3362_v16  ;;  %v3651_v15 = vrot.slane %v3612_v57, 1  ;;  %v3377_v55 = vor.u32 %v3375_v12, %v7024_v0  ;;  %v3741_v3 = vshrl.u32 %v3657_v44, 16 }
 0x6ae   : > { %5118 = vmatprep.subr.bf16.mxu1 %v5495_v47 }
 0x6af   : > { %4363 = vmatpush1.bf16.msra.mxu0 %v6935_v2  ;;  %v3650_v2 = vsel %vm1275_vm3, %v6941_v23, %v3649_v41  ;;  %v3250_v23 = vsel %vm580_vm2, %v6830_v13, %v3205_v38  ;;  %v3652_v25 = vsel %vm1275_vm3, %v3649_v41, %v3651_v15  ;;  %v3378_v54 = vsel %vm1360_vm5, %v6981_v4, %v3377_v55  ;;  %v3626_v61 = vpop.permute.xlu1 %3625 }
 0x6b0   : > { %3567 = vmatmul.mubr.bf16.gmra.mrb[44].mxu1 %v3348_v27  ;;  %4364 = vmatprep.subr.bf16.mxu0 %v5495_v47  ;;  %v3749_v14 = vshrl.u32 %v3650_v2, 16  ;;  %v3387_v30 = vshrl.u32 %v3250_v23, 16  ;;  %v4068_v41 = vsel %vm1275_vm3, %v4065_v34, %v4067_v51  ;;  %v3764_v33 = vshrl.u32 %v3652_v25, 16 }
 0x6b1   : > { %4644 = vmatprep.mubr.msk.bf16.mxu1 %vm580_vm2, %v3371_v26  ;;  %5130 = vmatpush1.bf16.msra.mxu1 %v6978_v36  ;;  %v3390_v40 = vshll.u32 %v3250_v23, 16  ;;  %v4151_v4 = vshrl.u32 %v7059_v58, 16  ;;  %v4181_v34 = vshrl.u32 %v4068_v41, 16  ;;  %v7083_v60 = vrot.slane %v3741_v3, 7 }
 0x6b2   : > { %5119 = vmatprep.subr.bf16.mxu1 %v5495_v47  ;;  %3924 = vmatmul.mubr.bf16.gmra.mrb[32].mxu0 %v3348_v27  ;;  %v7053_v17 = vrot.slane %v3749_v14, 7  ;;  %v3752_v27 = vshll.u32 %v3650_v2, 16  ;;  %v3389_v56 = vrot.slane %v3387_v30, 7  ;;  %v4169_v2 = vshll.u32 %v4066_v11, 16 }
 0x6b3   : > { %4687 = vmatprep.mubr.msk.bf16.mxu0 %vm580_vm2, %v3371_v26  ;;  %4365 = vmatpush1.bf16.msra.mxu0 %v6948_v29  ;;  %v3397_v29 = vrot.slane %v3395_v8, 7  ;;  %v7061_v26 = vrot.slane %v4166_v52, 7  ;;  %v4060_v8 = vrot.slane %v7064_v42, 1  ;;  %v3659_v23 = vsel %vm580_vm2, %v6843_v24, %v3626_v61 }
 0x6b4   : > { %4366 = vmatprep.subr.bf16.mxu0 %v5495_v47  ;;  %v3754_v16 = vor.u32 %v3752_v27, %v7053_v17  ;;  %v3392_v57 = vor.u32 %v3390_v40, %v3389_v56  ;;  %v7092_v12 = vrot.slane %v4151_v4, 7  ;;  %v3767_v52 = vshll.u32 %v3652_v25, 16 }
 0x6b5   : > { %5131 = vmatpush1.bf16.msra.mxu1 %v6999_v48  ;;  %v3400_v38 = vor.u32 %v3398_v53, %v3397_v29  ;;  %v4171_v11 = vor.u32 %v4169_v2, %v7061_v26  ;;  %v3766_v29 = vrot.slane %v3764_v33, 7  ;;  %v4062_v19 = vsel %vm1275_vm3, %v4060_v8, %v4061_v10 }
 0x6b6   : > { %5120 = vmatprep.subr.bf16.mxu1 %v5495_v47  ;;  %v7099_v53 = vsel %vm580_vm2, %v6750_v31, %v7007_v59  ;;  %v4184_v30 = vshll.u32 %v4068_v41, 16  ;;  %v3393_v10 = vsel %vm1360_vm5, %v7024_v0, %v3392_v57  ;;  %v4132_v2 = vshrl.u32 %v4060_v8, 16  ;;  %v3967_v57 = vld [vmem:[#allocation3 + $0x10] sm:$0x80] }
 0x6b7   : > { %4367 = vmatpush1.bf16.msra.mxu0 %v6965_v7  ;;  %v4040_v7 = vpop.permute.xlu0 %4039  ;;  %v4172_v59 = vsel %vm1360_vm5, %v7092_v12, %v4171_v11  ;;  %v3769_v25 = vor.u32 %v3767_v52, %v3766_v29  ;;  %v4143_v27 = vshrl.u32 %v7099_v53, 16 }
 0x6b8   : > { %3574 = vmatmul.mubr.bf16.gmra.mrb[48].mxu1 %v3363_v28  ;;  %4368 = vmatprep.subr.bf16.mxu0 %v5495_v47  ;;  %v4085_v39 = vsel %vm580_vm2, %v6767_v5, %v4040_v7  ;;  %v7081_v5 = vld [vmem:[#allocation3 + $0x40] sm:$0xff]  ;;  %v4036_v7 = vpop.permute.xlu1 %4035 }
 0x6b9   : > { %4645 = vmatprep.mubr.msk.bf16.mxu1 %vm580_vm2, %v3386_v50  ;;  %5132 = vmatpush1.bf16.msra.mxu1 %v7020_v6  ;;  %v4069_v15 = vrot.slane %v7081_v5, 1  ;;  %v4161_v42 = vshll.u32 %v4085_v39, 16  ;;  %v7126_v33 = vrot.slane %v4143_v27, 7  ;;  %v4081_v4 = vsel %vm580_vm2, %v6736_v9, %v4036_v7 }
 0x6ba   : > { %5121 = vmatprep.subr.bf16.mxu1 %v5495_v47  ;;  %3931 = vmatmul.mubr.bf16.gmra.mrb[36].mxu0 %v3363_v28  ;;  %v4158_v28 = vshrl.u32 %v4085_v39, 16  ;;  %v3770_v39 = vsel %vm1360_vm5, %v7053_v17, %v3769_v25  ;;  %v4124_v8 = vshrl.u32 %v4081_v4, 16 }
 0x6bb   : > { %4688 = vmatprep.mubr.msk.bf16.mxu0 %vm580_vm2, %v3386_v50  ;;  %4369 = vmatpush1.bf16.msra.mxu0 %v6978_v36  ;;  %v3401_v36 = vsel %vm1360_vm5, %v6988_v22, %v3400_v38  ;;  %v3755_v50 = vsel %vm1360_vm5, %v6988_v22, %v3754_v16  ;;  %v4042_v14 = vpop.permute.xlu0 %4041  ;;  %v7101_v22 = vrot.slane %v4181_v34, 7  ;;  %v3756_v38 = vshrl.u32 %v3659_v23, 16 }
 0x6bc   : > { %4370 = vmatprep.subr.bf16.mxu0 %v5495_v47  ;;  %v7104_v55 = vrot.slane %v4158_v28, 7  ;;  %v4087_v31 = vsel %vm580_vm2, %v6774_v35, %v4042_v14  ;;  %v4070_v56 = vsel %vm1275_vm3, %v4067_v51, %v4069_v15  ;;  %v3975_v35 = vld [vmem:[#allocation3 + $0x48] sm:$0xff]  ;;  %v3759_v51 = vshll.u32 %v3659_v23, 16  ;;  %v4034_v61 = vpop.permute.xlu1 %4033 }
 0x6bd   : > { %5133 = vmatpush1.bf16.msra.mxu1 %v7043_v62  ;;  %v3758_v41 = vrot.slane %v3756_v38, 7  ;;  %v4196_v18 = vshrl.u32 %v4070_v56, 16  ;;  %v4139_v34 = vshll.u32 %v4062_v19, 16  ;;  %v4176_v9 = vshll.u32 %v4087_v31, 16 }
 0x6be   : > { %v4163_v3 = vor.u32 %v4161_v42, %v7104_v55  ;;  %v4134_v14 = vrot.slane %v4132_v2, 7 }
 0x6bf   : > { %4371 = vmatpush1.bf16.msra.mxu0 %v6999_v48  ;;  %v3744_v48 = vshll.u32 %v3657_v44, 16  ;;  %v4044_v40 = vpop.permute.xlu0 %4043  ;;  %v3761_v5 = vor.u32 %v3759_v51, %v3758_v41  ;;  %v4198_v29 = vrot.slane %v4196_v18, 7 }
 0x6c0   : > { %3581 = vmatmul.mubr.bf16.gmra.mrb[52].mxu1 %v3378_v54  ;;  %4372 = vmatprep.subr.bf16.mxu0 %v5495_v47  ;;  %v4164_v17 = vsel %vm1360_vm5, %v7126_v33, %v4163_v3  ;;  %v4089_v23 = vsel %vm580_vm2, %v6789_v46, %v4044_v40 }
 0x6c1   : > { %4646 = vmatprep.mubr.msk.bf16.mxu1 %vm580_vm2, %v3401_v36  ;;  %v3746_v44 = vor.u32 %v3744_v48, %v7083_v60  ;;  %v4191_v3 = vshll.u32 %v4089_v23, 16 }
 0x6c2   : > { %3938 = vmatmul.mubr.bf16.gmra.mrb[40].mxu0 %v3378_v54  ;;  %v4173_v54 = vshrl.u32 %v4087_v31, 16 }
 0x6c3   : > { %4689 = vmatprep.mubr.msk.bf16.mxu0 %vm580_vm2, %v3755_v50  ;;  %4373 = vmatpush1.bf16.msra.mxu0 %v7020_v6  ;;  %v4136_v6 = vshrl.u32 %v4062_v19, 16  ;;  %v3747_v36 = vsel %vm1360_vm5, %v7024_v0, %v3746_v44  ;;  %v4079_v50 = vsel %vm580_vm2, %v3967_v57, %v4034_v61  ;;  %v4199_v19 = vshll.u32 %v4070_v56, 16  ;;  %v4046_v31 = vpop.permute.xlu0 %4045 }
 0x6c4   : > { %4374 = vmatprep.subr.bf16.mxu0 %v5495_v47  ;;  %v4186_v47 = vor.u32 %v4184_v30, %v7101_v22  ;;  %v4175_v0 = vrot.slane %v4173_v54, 7  ;;  %v4188_v30 = vshrl.u32 %v4089_v23, 16  ;;  %v4121_v44 = vshrl.u32 %v4079_v50, 16 }
 0x6c5   : > { %v4138_v16 = vrot.slane %v4136_v6, 7  ;;  %v4201_v38 = vor.u32 %v4199_v19, %v4198_v29  ;;  %v4127_v6 = vshll.u32 %v4081_v4, 16  ;;  %v4146_v61 = vshll.u32 %v7099_v53, 16 }
 0x6c6   : > { %v4187_v28 = vsel %vm1360_vm5, %v7061_v26, %v4186_v47  ;;  %v4178_v52 = vor.u32 %v4176_v9, %v4175_v0  ;;  %v3762_v26 = vsel %vm1360_vm5, %v7083_v60, %v3761_v5  ;;  %v4190_v25 = vrot.slane %v4188_v30, 7 }
 0x6c7   : > { %4375 = vmatpush1.bf16.msra.mxu0 %v7043_v62  ;;  %v4071_v62 = vrot.slane %v3975_v35, 1  ;;  %v4141_v11 = vor.u32 %v4139_v34, %v4138_v16  ;;  %v4123_v27 = vrot.slane %v4121_v44, 7  ;;  %v4091_v60 = vsel %vm580_vm2, %v6830_v13, %v4046_v31  ;;  %v4048_v40 = vpop.permute.xlu0 %4047  ;;  %v7179_v31 = vld [vmem:[%s7303_s14] ss:$0 sm:$0xff] }
 0x6c8   : > { %3588 = vmatmul.mubr.bf16.gmra.mrb[56].mxu1 %v3393_v10  ;;  %v4126_v10 = vrot.slane %v4124_v8, 7  ;;  %v4179_v42 = vsel %vm1360_vm5, %v7104_v55, %v4178_v52  ;;  %v4202_v56 = vsel %vm1360_vm5, %v7101_v22, %v4201_v38  ;;  %v4203_v55 = vshrl.u32 %v4091_v60, 16 }
 0x6c9   : > { %4729 = vmatprep.mubr.msk.bf16.mxu1 %vm580_vm2, %v4172_v59  ;;  %v4072_v48 = vsel %vm1275_vm3, %v4069_v15, %v4071_v62  ;;  %v4142_v46 = vsel %vm1360_vm5, %v4134_v14, %v4141_v11  ;;  %v4073_v59 = vrot.slane %v6847_v49, 1  ;;  %v4154_v15 = vshll.u32 %v7059_v58, 16 }
 0x6ca   : > { %3945 = vmatmul.mubr.bf16.gmra.mrb[44].mxu0 %v3747_v36  ;;  %v4211_v7 = vshrl.u32 %v4072_v48, 16  ;;  %v4129_v54 = vor.u32 %v4127_v6, %v4126_v10  ;;  %v4214_v41 = vshll.u32 %v4072_v48, 16  ;;  %v3976_v36 = vld [vmem:[#allocation3 + $0x58] sm:$0x1]  ;;  %v4205_v4 = vrot.slane %v4203_v55, 7 }
 0x6cb   : > { %4690 = vmatprep.mubr.msk.bf16.mxu0 %vm580_vm2, %v3770_v39  ;;  %v4156_v47 = vor.u32 %v4154_v15, %v7092_v12  ;;  %v4074_v58 = vsel %vm1275_vm3, %v4071_v62, %v4073_v59  ;;  %v4193_v39 = vor.u32 %v4191_v3, %v4190_v25  ;;  %v4075_v12 = vrot.slane %v3976_v36, 1  ;;  %v7186_v15 = vld [vmem:[%s7297_s8] ss:$0 sm:$0xff] }
 0x6cc   : > { %v4213_v35 = vrot.slane %v4211_v7, 7  ;;  %v4130_v18 = vsel %vm1360_vm5, %v4123_v27, %v4129_v54  ;;  %v4226_v22 = vshrl.u32 %v4074_v58, 16  ;;  %v4093_v2 = vsel %vm580_vm2, %v6843_v24, %v4048_v40  ;;  %v4050_v24 = vpop.permute.xlu0 %4049 }
 0x6cd   : > { %v4157_v13 = vsel %vm1360_vm5, %v4138_v16, %v4156_v47  ;;  %v4194_v62 = vsel %vm1360_vm5, %v4175_v0, %v4193_v39  ;;  %v4148_v16 = vor.u32 %v4146_v61, %v7126_v33  ;;  %v4206_v57 = vshll.u32 %v4091_v60, 16 }
 0x6ce   : > { %v4216_v51 = vor.u32 %v4214_v41, %v4213_v35  ;;  %v4228_v5 = vrot.slane %v4226_v22, 7  ;;  %v4218_v53 = vshrl.u32 %v4093_v2, 16  ;;  %v4095_v33 = vsel %vm580_vm2, %v6847_v49, %v4050_v24 }
 0x6cf   : > { %v4208_v23 = vor.u32 %v4206_v57, %v4205_v4  ;;  %v4149_v50 = vsel %vm1360_vm5, %v4126_v10, %v4148_v16  ;;  %v4221_v19 = vshll.u32 %v4093_v2, 16  ;;  %v4233_v30 = vshrl.u32 %v4095_v33, 16 }
 0x6d0   : > { %4399 = vmatmul.mubr.bf16.vlgmr.msra.gmra.mrb[60].mxu1 %v4164_v17  ;;  %v4217_v34 = vsel %vm1360_vm5, %v4198_v29, %v4216_v51  ;;  %v4076_v17 = vsel %vm1275_vm3, %v4073_v59, %v4075_v12  ;;  %v4220_v9 = vrot.slane %v4218_v53, 7  ;;  %v3046_v59 = vadd.f32 %v7179_v31, %v6866_v21 }
 0x6d1   : > { %4730 = vmatprep.mubr.msk.bf16.mxu1 %vm580_vm2, %v4187_v28  ;;  %v4229_v28 = vshll.u32 %v4074_v58, 16  ;;  %v4241_v11 = vshrl.u32 %v4076_v17, 16  ;;  %v4209_v29 = vsel %vm1360_vm5, %v4190_v25, %v4208_v23  ;;  %v4244_v14 = vshll.u32 %v4076_v17, 16 }
 0x6d2   : > { %3952 = vmatmul.mubr.bf16.gmra.mrb[48].mxu0 %v3762_v26  ;;  %v4223_v52 = vor.u32 %v4221_v19, %v4220_v9  ;;  %v4235_v26 = vrot.slane %v4233_v30, 7  ;;  %v3107_v25 = vadd.f32 %v7186_v15, %v3046_v59  ;;  %v3060_v41 = vadd.f32 %v7179_v31, %v6870_v43 }
 0x6d3   : > { %4727 = vmatprep.mubr.msk.bf16.mxu0 %vm580_vm2, %v4142_v46  ;;  %v4231_v0 = vor.u32 %v4229_v28, %v4228_v5  ;;  %v4243_v48 = vrot.slane %v4241_v11, 7  ;;  %v4236_v46 = vshll.u32 %v4095_v33, 16  ;;  %v3074_v57 = vadd.f32 %v7179_v31, %v6874_v45 }
 0x6d4   : > { %v4224_v38 = vsel %vm1360_vm5, %v4205_v4, %v4223_v52  ;;  %v3109_v39 = vadd.f32 %v7186_v15, %v3060_v41  ;;  %v3081_v33 = vadd.f32 %v6872_v32, %v7179_v31 }
 0x6d5   : > { %v4232_v8 = vsel %vm1360_vm5, %v4213_v35, %v4231_v0  ;;  %v4246_v44 = vor.u32 %v4244_v14, %v4243_v48  ;;  %v4238_v49 = vor.u32 %v4236_v46, %v4235_v26  ;;  %v3111_v0 = vadd.f32 %v7186_v15, %v3074_v57 }
 0x6d6   : > { %v3112_v30 = vadd.f32 %v7186_v15, %v3081_v33 }
 0x6d7   : > { %v4247_v7 = vsel %vm1360_vm5, %v4228_v5, %v4246_v44  ;;  %v4239_v10 = vsel %vm1360_vm5, %v4220_v9, %v4238_v49 }
 0x6d8   : > { %4406 = vmatmul.mubr.bf16.gmra.mrb[64].mxu1 %v4179_v42 }
 0x6d9   : > { %4731 = vmatprep.mubr.msk.bf16.mxu1 %vm580_vm2, %v4202_v56  ;;  %v3053_v56 = vadd.f32 %v6864_v1, %v7179_v31  ;;  %v3067_v1 = vadd.f32 %v6868_v20, %v7179_v31 }
 0x6da   : > { %4385 = vmatmul.mubr.bf16.vlgmr.msra.gmra.mrb[20].mxu0 %v4130_v18 }
 0x6db   : > { %4728 = vmatprep.mubr.msk.bf16.mxu0 %vm580_vm2, %v4157_v13  ;;  %v3108_v35 = vadd.f32 %v7186_v15, %v3053_v56  ;;  %v3110_v2 = vadd.f32 %v7186_v15, %v3067_v1 }
 0x6e0   : > { %4413 = vmatmul.mubr.bf16.gmra.mrb[68].mxu1 %v4194_v62 }
 0x6e1   : > { %4732 = vmatprep.mubr.msk.bf16.mxu1 %vm580_vm2, %v4217_v34 }
 0x6e2   : > { %4392 = vmatmul.mubr.bf16.gmra.mrb[52].mxu0 %v4149_v50 }
 0x6e8   : > { %4420 = vmatmul.mubr.bf16.gmra.mrb[72].mxu1 %v4209_v29 }
 0x6e9   : > { %4733 = vmatprep.mubr.msk.bf16.mxu1 %vm580_vm2, %v4232_v8 }
 0x6f0   : > { %4427 = vmatmul.mubr.bf16.gmra.mrb[76].mxu1 %v4224_v38 }
 0x6f1   : > { %4734 = vmatprep.mubr.msk.bf16.mxu1 %vm580_vm2, %v4247_v7  ;;  %v3088_v7 = vadd.f32 %v7179_v31, %v6879_v63 }
 0x6f8   : > { %4434 = vmatmul.mubr.bf16.gmra.mrb[80].mxu1 %v4239_v10 }
 0x763   : > { %v3540_v6 = vpop.f32.mrb[28].mxu1 }
 0x764   : > { %v7189_v27 = vadd.f32 %v3540_v6, %v3107_v25  ;;  %v3542_v42 = vpop.f32.mrb[29].mxu1 }
 0x765   : > { %v3543_v60 = vpop.f32.mrb[30].mxu1  ;;  %v3113_v42 = vadd.f32 %v7186_v15, %v3088_v7 }
 0x766   : > { %v3544_v47 = vpop.f32.mrb[31].mxu1 }
 0x76b   : > { %v3547_v3 = vpop.f32.mrb[32].mxu1 }
 0x76c   : > { %v3596_v21 = vadd.f32 %v3547_v3, %v3108_v35  ;;  %v3549_v54 = vpop.f32.mrb[33].mxu1  ;;  %v3095_v3 = vadd.f32 %v6877_v37, %v7179_v31 }
 0x76d   : > { %v3550_v58 = vpop.f32.mrb[34].mxu1 }
 0x76e   : > { %v3551_v36 = vpop.f32.mrb[35].mxu1 }
 0x773   : > { %v3554_v55 = vpop.f32.mrb[36].mxu1 }
 0x774   : > { %v3597_v18 = vadd.f32 %v3554_v55, %v3109_v39  ;;  %v3556_v13 = vpop.f32.mrb[37].mxu1  ;;  %v3114_v39 = vadd.f32 %v7186_v15, %v3095_v3 }
 0x775   : > { %v3557_v51 = vpop.f32.mrb[38].mxu1  ;;  %v3911_v40 = vpop.f32.mrb[24].mxu0 }
 0x776   : > { %v3558_v22 = vpop.f32.mrb[39].mxu1  ;;  %v7199_v12 = vadd.f32 %v3911_v40, %v3596_v21  ;;  %v3913_v61 = vpop.f32.mrb[25].mxu0 }
 0x777   : > { %v3914_v4 = vpop.f32.mrb[26].mxu0 }
 0x778   : > { %v3915_v62 = vpop.f32.mrb[27].mxu0 }
 0x77b   : > { %v3561_v43 = vpop.f32.mrb[40].mxu1 }
 0x77c   : > { %v3598_v34 = vadd.f32 %v3561_v43, %v3110_v2  ;;  %v3563_v5 = vpop.f32.mrb[41].mxu1 }
 0x77d   : > { %v3564_v16 = vpop.f32.mrb[42].mxu1  ;;  %v3918_v28 = vpop.f32.mrb[28].mxu0 }
 0x77e   : > { %v3565_v17 = vpop.f32.mrb[43].mxu1  ;;  %v3961_v23 = vadd.f32 %v3918_v28, %v3597_v18  ;;  %v3920_v20 = vpop.f32.mrb[29].mxu0 }
 0x77f   : > { %v3921_v53 = vpop.f32.mrb[30].mxu0 }
 0x780   : > { %v3922_v50 = vpop.f32.mrb[31].mxu0 }
 0x783   : > { %v3568_v11 = vpop.f32.mrb[44].mxu1 }
 0x784   : > { %v3599_v24 = vadd.f32 %v3568_v11, %v3111_v0  ;;  %v3570_v9 = vpop.f32.mrb[45].mxu1 }
 0x785   : > { %v3571_v29 = vpop.f32.mrb[46].mxu1  ;;  %v3925_v48 = vpop.f32.mrb[32].mxu0 }
 0x786   : > { %v3572_v8 = vpop.f32.mrb[47].mxu1  ;;  %v3962_v14 = vadd.f32 %v3925_v48, %v3598_v34  ;;  %v3927_v19 = vpop.f32.mrb[33].mxu0 }
 0x787   : > { %v3928_v45 = vpop.f32.mrb[34].mxu0 }
 0x788   : > { %v3929_v52 = vpop.f32.mrb[35].mxu0 }
 0x78b   : > { %v3575_v44 = vpop.f32.mrb[48].mxu1 }
 0x78c   : > { %v3600_v26 = vadd.f32 %v3575_v44, %v3112_v30  ;;  %v3577_v46 = vpop.f32.mrb[49].mxu1 }
 0x78d   : > { %v3578_v38 = vpop.f32.mrb[50].mxu1  ;;  %v3932_v10 = vpop.f32.mrb[36].mxu0 }
 0x78e   : > { %v3579_v49 = vpop.f32.mrb[51].mxu1  ;;  %v3963_v59 = vadd.f32 %v3932_v10, %v3599_v24  ;;  %v3934_v25 = vpop.f32.mrb[37].mxu0 }
 0x78f   : > { %v3935_v32 = vpop.f32.mrb[38].mxu0 }
 0x790   : > { %v3936_v6 = vpop.f32.mrb[39].mxu0 }
 0x793   : > { %v3582_v60 = vpop.f32.mrb[52].mxu1 }
 0x794   : > { %v3601_v56 = vadd.f32 %v3582_v60, %v3113_v42  ;;  %v3584_v47 = vpop.f32.mrb[53].mxu1 }
 0x795   : > { %v3585_v35 = vpop.f32.mrb[54].mxu1  ;;  %v3939_v54 = vpop.f32.mrb[40].mxu0 }
 0x796   : > { %v3586_v21 = vpop.f32.mrb[55].mxu1  ;;  %v3964_v63 = vadd.f32 %v3939_v54, %v3600_v26  ;;  %v3941_v58 = vpop.f32.mrb[41].mxu0 }
 0x797   : > { %v3942_v41 = vpop.f32.mrb[42].mxu0 }
 0x798   : > { %v3943_v36 = vpop.f32.mrb[43].mxu0 }
 0x79b   : > { %v3589_v55 = vpop.f32.mrb[56].mxu1 }
 0x79c   : > { %v3602_v18 = vadd.f32 %v3589_v55, %v3114_v39  ;;  %v3591_v13 = vpop.f32.mrb[57].mxu1 }
 0x79d   : > { %v3592_v51 = vpop.f32.mrb[58].mxu1  ;;  %v3946_v22 = vpop.f32.mrb[44].mxu0 }
 0x79e   : > { %v3593_v1 = vpop.f32.mrb[59].mxu1  ;;  %v3965_v40 = vadd.f32 %v3946_v22, %v3601_v56  ;;  %v3948_v61 = vpop.f32.mrb[45].mxu0 }
 0x79f   : > { %v3949_v37 = vpop.f32.mrb[46].mxu0 }
 0x7a0   : > { %v3950_v31 = vpop.f32.mrb[47].mxu0 }
 0x7a3   : > { %v4400_v4 = vpop.f32.mrb[60].mxu1 }
 0x7a4   : > { %v4443_v62 = vadd.f32 %v4400_v4, %v3961_v23  ;;  %v4402_v2 = vpop.f32.mrb[61].mxu1 }
 0x7a5   : > { %v4403_v43 = vpop.f32.mrb[62].mxu1  ;;  %v3953_v34 = vpop.f32.mrb[48].mxu0 }
 0x7a6   : > { %4451 = vst.msk [vmem:[%s7217_s17 + $0x10] sm:$0xff] %vm580_vm2, %v4443_v62  ;;  %v4404_v15 = vpop.f32.mrb[63].mxu1  ;;  %v3966_v5 = vadd.f32 %v3953_v34, %v3602_v18  ;;  %v3955_v16 = vpop.f32.mrb[49].mxu0 }
 0x7a7   : > { %v3956_v57 = vpop.f32.mrb[50].mxu0 }
 0x7a8   : > { %v3957_v17 = vpop.f32.mrb[51].mxu0 }
 0x7ab   : > { %v4407_v28 = vpop.f32.mrb[64].mxu1 }
 0x7ac   : > { %v4444_v20 = vadd.f32 %v4407_v28, %v3962_v14  ;;  %v4409_v53 = vpop.f32.mrb[65].mxu1 }
 0x7ad   : > { %v4410_v23 = vpop.f32.mrb[66].mxu1  ;;  %v4386_v0 = vpop.f32.mrb[20].mxu0 }
 0x7ae   : > { %4452 = vst.msk [vmem:[%s7217_s17 + $0x18] sm:$0xff] %vm580_vm2, %v4444_v20  ;;  %v4411_v50 = vpop.f32.mrb[67].mxu1  ;;  %v5150_v11 = vadd.f32 %v4386_v0, %v7189_v27  ;;  %v4388_v24 = vpop.f32.mrb[21].mxu0 }
 0x7af   : > { %v4389_v9 = vpop.f32.mrb[22].mxu0 }
 0x7b0   : > { %4449 = vst.msk [vmem:[%s7217_s17] sm:$0xff] %vm580_vm2, %v5150_v11  ;;  %v4390_v29 = vpop.f32.mrb[23].mxu0 }
 0x7b3   : > { %v4414_v33 = vpop.f32.mrb[68].mxu1 }
 0x7b4   : > { %v4445_v8 = vadd.f32 %v4414_v33, %v3963_v59  ;;  %v4416_v48 = vpop.f32.mrb[69].mxu1 }
 0x7b5   : > { %v4417_v19 = vpop.f32.mrb[70].mxu1  ;;  %v4393_v45 = vpop.f32.mrb[52].mxu0 }
 0x7b6   : > { %4453 = vst.msk [vmem:[%s7217_s17 + $0x20] sm:$0xff] %vm580_vm2, %v4445_v8  ;;  %v4418_v14 = vpop.f32.mrb[71].mxu1  ;;  %v4442_v52 = vadd.f32 %v4393_v45, %v7199_v12  ;;  %v4395_v30 = vpop.f32.mrb[53].mxu0 }
 0x7b7   : > { %v4396_v27 = vpop.f32.mrb[54].mxu0 }
 0x7b8   : > { %4450 = vst.msk [vmem:[%s7217_s17 + $0x8] sm:$0xff] %vm580_vm2, %v4442_v52  ;;  %v4397_v44 = vpop.f32.mrb[55].mxu0 }
 0x7bb   : > { %v4421_v26 = vpop.f32.mrb[72].mxu1 }
 0x7bc   : > { %v4446_v46 = vadd.f32 %v4421_v26, %v3964_v63  ;;  %v4423_v38 = vpop.f32.mrb[73].mxu1 }
 0x7bd   : > { %v4424_v7 = vpop.f32.mrb[74].mxu1 }
 0x7be   : > { %4454 = vst.msk [vmem:[%s7217_s17 + $0x28] sm:$0xff] %vm580_vm2, %v4446_v46  ;;  %v4425_v49 = vpop.f32.mrb[75].mxu1 }
 0x7c3   : > { %v4428_v10 = vpop.f32.mrb[76].mxu1 }
 0x7c4   : > { %v4447_v59 = vadd.f32 %v4428_v10, %v3965_v40  ;;  %v4430_v25 = vpop.f32.mrb[77].mxu1 }
 0x7c5   : > { %v4431_v12 = vpop.f32.mrb[78].mxu1 }
 0x7c6   : > { %4455 = vst.msk [vmem:[%s7217_s17 + $0x30] sm:$0xff] %vm580_vm2, %v4447_v59  ;;  %v4432_v32 = vpop.f32.mrb[79].mxu1 }
 0x7cb   : > { %v4435_v6 = vpop.f32.mrb[80].mxu1 }
 0x7cc   : > { %v4448_v42 = vadd.f32 %v4435_v6, %v3966_v5  ;;  %v4437_v60 = vpop.f32.mrb[81].mxu1 }
 0x7cd   : > { %v4438_v56 = vpop.f32.mrb[82].mxu1 }
 0x7ce   : > { %4456 = vst.msk [vmem:[%s7217_s17 + $0x38] sm:$0xff] %vm580_vm2, %v4448_v42  ;;  %v4439_v47 = vpop.f32.mrb[83].mxu1 }
 0x7cf   : > { %5441 = shalt.err (!%p5438_p3)
}
 0x7d0   : > { %s5442_s16 = scalar_lea.hbm %s7240_s25, 1024  ;;  %s5446_s0 = scalar_lea.hbm %s7304_s15, 2048 }
 0x7d1   : > { %p5443_p4 = scmp.ne.s32.totalorder %s7240_s25, %s5442_s16  ;;  %p5447_p9 = scmp.lt.u32.totalorder %s7240_s25, %s7304_s15 }
 0x7d2   : > { %p5448_p10 = scmp.lt.u32.totalorder %s5446_s0, %s5442_s16  ;;  %p5450_p12 = scmp.lt.u32.totalorder %s5442_s16, %s7240_s25 }
 0x7d3   : > { %p5444_p7 = pnand %p5443_p4, %p5619_p5 }
 0x7d4   : > { %p5449_p11 = por %p5448_p10, %p5447_p9 }
 0x7d5   : > { %p5445_p8 = pneg %p5444_p7 }
 0x7d6   : > { %p5451_p13 = por %p5450_p12, %p5449_p11 }
 0x7d8   : > { %p5452_p0 = pnand %p5451_p13, %p5445_p8 }
 0x7da   : > { %5455 = shalt.err (!%p5452_p0)
}
 0x7db   : > { %s5499_s20 = smov 128   ;;  %s5500_s23 = smov 8  }
 0x7dc   : > { %5193 = dma.vmem_to_hbm [thread:$0]  (%p5619_p5), %s7242_s27, 1024, %s7240_s25, %s7248_s22, %s5499_s20, %s5499_s20, %s5500_s23  }
 0x7dd PF: > { %p5199_p1 = scmp.ge.s32.totalorder %s5490_s21, 2  ;;  %s4486_s1 = sand.u32 1, %s5478_s18  }
 0x7de   : > { %s4487_s16 = scalar_lea.sflag [#allocation5], %s4486_s1 }
 0x7df   : > { %p5196_p2 = pnand %p5199_p1, %p5623_p6 }
 0x7e1   : > { %5473 = dma.done.wait (!%p5196_p2), %s4487_s16, 1024  }
 0x7e2   : > { %5475 = vsyncadd (!%p5196_p2), %s4487_s16, 4294966272  ;;  %s7317_s17 = sld [smem:[#allocation7_spill]]  ;;  %s7318_s20 = sld [smem:[#allocation8_spill]] }
 0x7e3   : > { %p25_p3 = scmp.ge.s32.totalorder %s5606_s24, 4   ;;  %s7319_s18 = smov %s5482_s19 }
 0x7e4   : > { %s7321_s21 = smov %s5606_s24 }
 0x7e5   :  { %27 = sbr.rel (!%p25_p3) target bundleno = 6 (0x6), region = 119 }
 0x7e8   : > { %s7320_s19 = smov %s7317_s17 }
 0x7ec   :  { %4492 = vsyncpa [#allocation5], 1 }
 0x7ed   :  { %4494 = vsyncpa [#allocation5 + $0x1], 1 }

// kernel: tpu_custom_call.1
= control target key start
LH: loop header
LB: loop body
LE: loop exit
PB: predicated region body
PF: predicated region fallthrough
CT: control target
= control target key end

     0   :  { %s8820_s0 = inlined_call_operand.vmem [shape: f32[2,128,32], index: 0, kind: input, shape index: {}]   ;;  %s8821_s1 = inlined_call_operand.vmem [shape: f32[1,32], index: 1, kind: input, shape index: {}]   ;;  %s8822_s2 = inlined_call_operand.vmem [shape: f32[1,32], index: 2, kind: input, shape index: {}]   ;;  %s8823_s3 = inlined_call_operand.vmem [shape: bf16[3,96,64], index: 3, kind: input, shape index: {}]   ;;  %s8824_s4 = inlined_call_operand.vmem [shape: f32[1,64], index: 4, kind: input, shape index: {}]   ;;  %s8825_s5 = inlined_call_operand.vmem [shape: f32[1,64], index: 5, kind: input, shape index: {}]   ;;  %s8826_s6 = inlined_call_operand.vmem [shape: f32[1,64], index: 6, kind: input, shape index: {}]   ;;  %s8827_s7 = inlined_call_operand.vmem [shape: bf16[3,192,64], index: 7, kind: input, shape index: {}]   ;;  %s8828_s8 = inlined_call_operand.vmem [shape: f32[1,64], index: 8, kind: input, shape index: {}]   ;;  %s8829_s9 = inlined_call_operand.vmem [shape: f32[32,32], index: 9, kind: input, shape index: {}]   ;;  %s8830_s10 = inlined_call_operand.vmem [shape: f32[32,32], index: 10, kind: input, shape index: {}]   ;;  %s8831_s11 = inlined_call_operand.vmem [shape: f32[64,32], index: 11, kind: input, shape index: {}]   ;;  %s8832_s12 = inlined_call_operand.vmem [shape: f32[32,64], index: 12, kind: input, shape index: {}]   ;;  %s8833_s13 = inlined_call_operand.vmem [shape: bf16[32,64], index: 13, kind: input, shape index: {}]   ;;  %s8834_s14 = inlined_call_operand.vmem [shape: f32[1,64], index: 14, kind: input, shape index: {}]   ;;  %s8835_s15 = inlined_call_operand.hbm [shape: f32[2,8,8,64], index: 15, kind: output, shape index: {}]  }
   0x1   :  { %8837 = sst [smem:[#allocation9_spill]] %s8820_s0 }
   0x2   :  { %8838 = sst [smem:[#allocation10_spill]] %s8821_s1 }
   0x3   :  { %20 = vsyncpa [#allocation5], 0 }
   0x4   :  { %22 = vsyncpa [#allocation5 + $0x1], 0  ;;  %s7312_s18 = smov 0   ;;  %s7314_s19 = smov 0  }
   0x5   :  { %s7316_s20 = smov 0   ;;  %s7318_s21 = smov 0  }
   0x6 LB: > { %8839 = sst [smem:[#allocation7_spill]] %s7219_s20  ;;  %s7333_s22 = sadd.s32 4294967295, %s7223_s21   ;;  %s7223_s21 = sphi %s7318_s21, %s8849_s21   ;;  %s7219_s20 = sphi %s7316_s20, %s8846_s20   ;;  %s7215_s19 = sphi %s7314_s19, %s8848_s19   ;;  %s7211_s18 = sphi %s7312_s18, %s8847_s18  }
   0x7   : > { %s5499_s23 = sadd.s32 4294967294, %s7223_s21   ;;  %s7337_s24 = sadd.s32 1, %s7223_s21  }
   0x8   : > { %s355_s25 = sadd.s32 1, %s7219_s20  ;;  %s352_s26 = ssub.s32 %s7223_s21, %s7337_s24 }
   0x9   : > { %p365_p0 = scmp.ne.s32.totalorder %s7219_s20, %s7215_s19  ;;  %p353_p1 = scmp.eq.s32.totalorder %s352_s26, 0 }
   0xa   : > { %p366_p2 = scmp.eq.s32.totalorder %s7333_s22, 1  ;;  %p371_p3 = scmp.ne.s32.totalorder %s7215_s19, %s7211_s18 }
   0xb   : > { %p372_p4 = scmp.eq.s32.totalorder %s5499_s23, 1  ;;  %p5502_p7 = scmp.ge.s32.totalorder %s7223_s21, 1 }
   0xc   : > { %s7348_s27 = scalar_select %p353_p1, %s7219_s20, %s355_s25  }
   0xd   : > { %p7350_p5 = por %p366_p2, %p365_p0  ;;  %p7354_p6 = por %p372_p4, %p371_p3 }
   0xe   : > { %8840 = sst [smem:[#allocation8_spill]] %s7348_s27  ;;  %p440_p8 = scmp.lt.s32.totalorder %s7223_s21, 3 }
  0x10   : > { %p441_p9 = pnand %p5502_p7, %p440_p8 }
  0x11   : > { %v601_v0 = vld [vmem:[%s8829_s9] sm:$0xff] (!%p441_p9)  ;;  %v602_v1 = vld [vmem:[%s8829_s9 + $0x8] sm:$0xff] (!%p441_p9)  ;;  %v603_v2 = vld [vmem:[%s8829_s9 + $0x10] sm:$0xff] (!%p441_p9)  ;;  %v7225_v3 = vmov (!%p441_p9), 0.0|0.0   ;;  %vm7226_vm0 = vmmov (!%p441_p9), 0   ;;  %v7227_v6 = vmov (!%p441_p9), 0.0  }
  0x12   : > { %444 = sbr.rel (%p441_p9) target bundleno = 2093 (0x82d), region = 80  ;;  %6580 = vmatprep.subr.bf16.mxu0 (!%p441_p9), %v7225_v3  ;;  %v7370_v4 = vpack.c.bf16 (!%p441_p9), %v602_v1, %v601_v0  ;;  %v604_v5 = vld [vmem:[%s8829_s9 + $0x18] sm:$0xff] (!%p441_p9)  ;;  %6068 = vmatprep.mubr.msk.f32.mxu0 (!%p441_p9), %vm7226_vm0, %v7227_v6  ;;  %p488_p10 = scmp.lt.s32.totalorder (!%p441_p9), %s7333_s22, 1  ;;  %v605_v7 = vld [vmem:[%s8830_s10] sm:$0xff] (!%p441_p9)  ;;  %v606_v8 = vld [vmem:[%s8830_s10 + $0x8] sm:$0xff] (!%p441_p9)  ;;  %vm575_vm1 = vcmask (!%p441_p9), 261120  }
  0x13   : > { %v7384_v9 = vpack.c.bf16 (!%p441_p9), %v606_v8, %v605_v7  ;;  %6598 = vmatprep.subr.bf16.mxu1 (!%p441_p9), %v7225_v3  ;;  %6101 = vmatprep.mubr.msk.f32.mxu1 (!%p441_p9), %vm7226_vm0, %v7227_v6  ;;  %v7390_v10 = vpack.c.bf16 (!%p441_p9), %v604_v5, %v603_v2  ;;  %s8843_s0 = sld [smem:[#allocation9_spill]] (!%p441_p9)  ;;  %vm1187_vm2 = vsmask.f32 (!%p441_p9), 256  ;;  %s8844_s1 = sld [smem:[#allocation10_spill]] (!%p441_p9)  ;;  %vm1569_vm3 = vsmask.f32 (!%p441_p9), 7424 }
  0x14   : > { %6582 = vmatpush3.bf16.msra.mxu0 (!%p441_p9), %v7370_v4  ;;  %vm580_vm4 = vcmask (!%p441_p9), 523264   ;;  %s485_s17 = sand.u32 (!%p441_p9), 1, %s7215_s19  }
  0x15   : > { %6583 = vmatprep.subr.bf16.mxu0 (!%p441_p9), %v7225_v3  ;;  %6600 = vmatpush3.bf16.msra.mxu1 (!%p441_p9), %v7384_v9 }
  0x16   : > { %6601 = vmatprep.subr.bf16.mxu1 (!%p441_p9), %v7225_v3 }
  0x18   : > { %6585 = vmatpush3.bf16.msra.mxu0 (!%p441_p9), %v7390_v10 }
  0x19   : > { %s489_s20 = scalar_select %p488_p10, %s7333_s22, 1  ;;  %6586 = vmatprep.subr.bf16.mxu0 %v7225_v3 }
  0x1b   : > { %s5802_s27 = sshll.u32 %s489_s20, 7  ;;  %s5803_s20 = sshll.u32 %s7333_s22, 10 }
  0x1c   : > { %s7399_s30 = scalar_lea.vmem %s8843_s0, %s5802_s27  ;;  %s8769_s26 = scalar_lea.hbm %s8835_s15, %s5803_s20 }
  0x1d   : > { %v7403_v11 = vld [vmem:[%s7399_s30] sm:$0xff]  ;;  %v7406_v12 = vld [vmem:[%s7399_s30 + $0x8] sm:$0xff]  ;;  %v7409_v13 = vld [vmem:[%s7399_s30 + $0x10] sm:$0xff]  ;;  %s8779_s22 = scalar_lea.sflag [#allocation5], %s485_s17 }
  0x1e   : > { %v7413_v14 = vld [vmem:[%s7399_s30 + $0x18] sm:$0xff]  ;;  %v7416_v15 = vld [vmem:[%s7399_s30 + $0x20] sm:$0xff]  ;;  %v7419_v16 = vld [vmem:[%s7399_s30 + $0x28] sm:$0xff]  ;;  %v611_v17 = vsel %vm575_vm1, %v7403_v11, 0.0  ;;  %v612_v18 = vsel %vm575_vm1, %v7406_v12, 0.0  ;;  %v614_v19 = vsel %vm575_vm1, %v7409_v13, 0.0  ;;  %v648_v31 = vmul.f32 %v7403_v11, %v7403_v11 }
  0x1f   : > { %v7428_v20 = vld [vmem:[%s7399_s30 + $0x30] sm:$0xff]  ;;  %v7431_v21 = vld [vmem:[%s7399_s30 + $0x38] sm:$0xff]  ;;  %v7434_v22 = vld [vmem:[%s7399_s30 + $0x40] sm:$0xff]  ;;  %v613_v23 = vadd.f32 %v612_v18, %v611_v17  ;;  %v616_v24 = vsel %vm575_vm1, %v7413_v14, 0.0  ;;  %v618_v28 = vsel %vm575_vm1, %v7416_v15, 0.0  ;;  %v620_v29 = vsel %vm575_vm1, %v7419_v16, 0.0 }
  0x20   : > { %v7439_v25 = vld [vmem:[%s7399_s30 + $0x48] sm:$0xff]  ;;  %v7442_v26 = vld [vmem:[%s7399_s30 + $0x50] sm:$0xff]  ;;  %v7445_v27 = vld [vmem:[%s7399_s30 + $0x58] sm:$0xff]  ;;  %v622_v30 = vsel %vm575_vm1, %v7428_v20, 0.0  ;;  %v624_v36 = vsel %vm575_vm1, %v7431_v21, 0.0  ;;  %v626_v37 = vsel %vm575_vm1, %v7434_v22, 0.0  ;;  %v649_v38 = vmul.f32 %v7406_v12, %v7406_v12 }
  0x21   : > { %v7456_v32 = vld [vmem:[%s7399_s30 + $0x60] sm:$0xff]  ;;  %v7459_v33 = vld [vmem:[%s7399_s30 + $0x68] sm:$0xff]  ;;  %v7462_v34 = vld [vmem:[%s7399_s30 + $0x70] sm:$0xff]  ;;  %v615_v35 = vadd.f32 %v614_v19, %v613_v23  ;;  %v628_v39 = vsel %vm575_vm1, %v7439_v25, 0.0  ;;  %v630_v40 = vsel %vm575_vm1, %v7442_v26, 0.0  ;;  %v632_v41 = vsel %vm575_vm1, %v7445_v27, 0.0 }
  0x22   : > { %v634_v42 = vsel %vm575_vm1, %v7456_v32, 0.0  ;;  %v7479_v43 = vld [vmem:[%s7399_s30 + $0x78] sm:$0xff]  ;;  %v636_v45 = vsel %vm575_vm1, %v7459_v33, 0.0  ;;  %v638_v46 = vsel %vm575_vm1, %v7462_v34, 0.0  ;;  %v650_v47 = vmul.f32 %v7409_v13, %v7409_v13 }
  0x23   : > { %v617_v44 = vadd.f32 %v616_v24, %v615_v35  ;;  %v651_v48 = vmul.f32 %v7413_v14, %v7413_v14  ;;  %v652_v49 = vmul.f32 %v7416_v15, %v7416_v15  ;;  %v653_v51 = vmul.f32 %v7419_v16, %v7419_v16 }
  0x24   : > { %v654_v52 = vmul.f32 %v7428_v20, %v7428_v20  ;;  %v655_v53 = vmul.f32 %v7431_v21, %v7431_v21  ;;  %v656_v54 = vmul.f32 %v7434_v22, %v7434_v22  ;;  %v657_v55 = vmul.f32 %v7439_v25, %v7439_v25 }
  0x25   : > { %v619_v50 = vadd.f32 %v618_v28, %v617_v44  ;;  %v658_v56 = vmul.f32 %v7442_v26, %v7442_v26  ;;  %v659_v57 = vmul.f32 %v7445_v27, %v7445_v27  ;;  %v664_v59 = vsel %vm575_vm1, %v648_v31, 0.0 }
  0x26   : > { %v665_v60 = vsel %vm575_vm1, %v649_v38, 0.0  ;;  %v667_v61 = vsel %vm575_vm1, %v650_v47, 0.0  ;;  %v640_v62 = vsel %vm575_vm1, %v7479_v43, 0.0  ;;  %v660_v63 = vmul.f32 %v7456_v32, %v7456_v32 }
  0x27   : > { %v621_v58 = vadd.f32 %v620_v29, %v619_v50  ;;  %v661_v0 = vmul.f32 %v7459_v33, %v7459_v33  ;;  %v666_v1 = vadd.f32 %v665_v60, %v664_v59  ;;  %v669_v5 = vsel %vm575_vm1, %v651_v48, 0.0 }
  0x28   : > { %v671_v7 = vsel %vm575_vm1, %v652_v49, 0.0  ;;  %v673_v8 = vsel %vm575_vm1, %v653_v51, 0.0  ;;  %v675_v18 = vsel %vm575_vm1, %v654_v52, 0.0  ;;  %v677_v19 = vsel %vm575_vm1, %v655_v53, 0.0 }
  0x29   : > { %v623_v2 = vadd.f32 %v622_v30, %v621_v58  ;;  %v668_v17 = vadd.f32 %v667_v61, %v666_v1  ;;  %v679_v23 = vsel %vm575_vm1, %v656_v54, 0.0  ;;  %v681_v28 = vsel %vm575_vm1, %v657_v55, 0.0 }
  0x2a   : > { %v683_v29 = vsel %vm575_vm1, %v658_v56, 0.0  ;;  %v685_v30 = vsel %vm575_vm1, %v659_v57, 0.0  ;;  %v687_v35 = vsel %vm575_vm1, %v660_v63, 0.0  ;;  %v689_v38 = vsel %vm575_vm1, %v661_v0, 0.0 }
  0x2b   : > { %v625_v24 = vadd.f32 %v624_v36, %v623_v2  ;;  %v670_v31 = vadd.f32 %v669_v5, %v668_v17  ;;  %v662_v57 = vmul.f32 %v7462_v34, %v7462_v34 }
  0x2d   : > { %v627_v44 = vadd.f32 %v626_v37, %v625_v24  ;;  %v672_v47 = vadd.f32 %v671_v7, %v670_v31  ;;  %v663_v37 = vmul.f32 %v7479_v43, %v7479_v43 }
  0x2f   : > { %v629_v48 = vadd.f32 %v628_v39, %v627_v44  ;;  %v674_v49 = vadd.f32 %v673_v8, %v672_v47  ;;  %v691_v39 = vsel %vm575_vm1, %v662_v57, 0.0 }
  0x31   : > { %v631_v50 = vadd.f32 %v630_v40, %v629_v48  ;;  %v676_v51 = vadd.f32 %v675_v18, %v674_v49 }
  0x33   : > { %v633_v52 = vadd.f32 %v632_v41, %v631_v50  ;;  %v678_v53 = vadd.f32 %v677_v19, %v676_v51  ;;  %v6973_v50 = vld [vmem:[%s8823_s3] sm:$0xff]   ;;  %v6974_v51 = vld [vmem:[%s8823_s3 + $0x8] sm:$0xff]  }
  0x35   : > { %v635_v36 = vadd.f32 %v634_v42, %v633_v52  ;;  %v680_v54 = vadd.f32 %v679_v23, %v678_v53  ;;  %v7228_v52 = vmov 0   ;;  %v7571_v53 = vld [vmem:[%s8823_s3 + $0x10] sm:$0xff]  }
  0x36   : > { %576 = vst.msk [vmem:[#allocation2] sm:$0xff] %vm575_vm1, %v7228_v52  ;;  %577 = vst.msk [vmem:[#allocation2 + $0x8] sm:$0xff] %vm575_vm1, %v7228_v52 }
  0x37   : > { %v637_v55 = vadd.f32 %v636_v45, %v635_v36  ;;  %v682_v58 = vadd.f32 %v681_v28, %v680_v54  ;;  %v693_v45 = vsel %vm575_vm1, %v663_v37, 0.0  ;;  %578 = vst.msk [vmem:[#allocation2 + $0x50] sm:$0xff] %vm575_vm1, %v7228_v52  ;;  %579 = vst.msk [vmem:[#allocation2 + $0x58] sm:$0xff] %vm575_vm1, %v7228_v52 }
  0x38   : > { %581 = vst.msk [vmem:[#allocation3] sm:$0xff] %vm580_vm4, %v7228_v52  ;;  %582 = vst.msk [vmem:[#allocation3 + $0x8] sm:$0xff] %vm580_vm4, %v7228_v52 }
  0x39   : > { %v639_v56 = vadd.f32 %v638_v46, %v637_v55  ;;  %v684_v59 = vadd.f32 %v683_v29, %v682_v58  ;;  %583 = vst.msk [vmem:[#allocation3 + $0x50] sm:$0xff] %vm580_vm4, %v7228_v52  ;;  %584 = vst.msk [vmem:[#allocation3 + $0x58] sm:$0xff] %vm580_vm4, %v7228_v52 }
  0x3b   : > { %v641_v60 = vadd.f32 %v640_v62, %v639_v56  ;;  %v686_v61 = vadd.f32 %v685_v30, %v684_v59 }
  0x3d   : > { %v642_v63 = vrot.slane %v641_v60, 4  ;;  %v688_v40 = vadd.f32 %v687_v35, %v686_v61  ;;  %v1174_v36 = vld [vmem:[#allocation2] sm:$0x80]  ;;  %v7573_v54 = vld [vmem:[#allocation2 + $0x8] sm:$0xff] }
  0x3e   : > { %v1189_v55 = vshrl.u32 %v1174_v36, 16  ;;  %v1193_v58 = vshrl.u32 %v7573_v54, 16  ;;  %v1196_v59 = vshll.u32 %v7573_v54, 16  ;;  %v2129_v52 = vld [vmem:[#allocation2 + $0x50] sm:$0x1] }
  0x3f   : > { %v643_v41 = vadd.f32 %v642_v63, %v641_v60  ;;  %v690_v0 = vadd.f32 %v689_v38, %v688_v40 }
  0x40   : > { %v1191_v56 = vrot.slane %v1189_v55, 7  ;;  %v7577_v57 = vrot.slane %v1193_v58, 7  ;;  %v1575_v63 = vrot.slane %v1196_v59, 1 }
  0x41   : > { %v644_v42 = vrot.slane %v643_v41, 2  ;;  %v692_v1 = vadd.f32 %v691_v39, %v690_v0 }
  0x42   : > { %v1198_v60 = vor.u32 %v1196_v59, %v7577_v57  ;;  %v7583_v37 = vor.u32 %v1575_v63, %v1193_v58 }
  0x43   : > { %v645_v46 = vadd.f32 %v644_v42, %v643_v41  ;;  %v694_v2 = vadd.f32 %v693_v45, %v692_v1  ;;  %v1003_v41 = vlaneseq  ;;  %v609_v42 = vld [vmem:[%s8844_s1] sm:$0x1] }
  0x44   : > { %v1199_v61 = vsel %vm1187_vm2, %v1191_v56, %v1198_v60 }
  0x45   : > { %v646_v5 = vrot.slane %v645_v46, 1  ;;  %v695_v7 = vrot.slane %v694_v2, 4  ;;  %v1004_v0 = vshrl.u32 %v1003_v41, 7 }
  0x47   : > { %v647_v8 = vadd.f32 %v646_v5, %v645_v46  ;;  %v696_v62 = vadd.f32 %v695_v7, %v694_v2  ;;  %v7588_v45 = vsub.s32 0, %v1004_v0  ;;  %v610_v5 = vld [vmem:[%s8822_s2] sm:$0x1] }
  0x49   : > { %6069 = vmatmul.mubr.msk.f32.vlgmr.msra.gmra.mrb[0].mxu0 %vm575_vm1, %v647_v8  ;;  %v697_v17 = vrot.slane %v696_v62, 2 }
  0x4a   : > { %6588 = vmatpush3.bf16.msra.mxu0 %v7370_v4  ;;  %6079 = vmatprep.mubr.msk.f32.mxu0 %vm7226_vm0, %v7227_v6  ;;  %v607_v4 = vld [vmem:[%s8830_s10 + $0x10] sm:$0xff] }
  0x4b   : > { %6589 = vmatprep.subr.bf16.mxu0 %v7225_v3  ;;  %v698_v18 = vadd.f32 %v697_v17, %v696_v62 }
  0x4d   : > { %v699_v19 = vrot.slane %v698_v18, 1 }
  0x4e   : > { %6591 = vmatpush3.bf16.msra.mxu0 %v7390_v10  ;;  %v608_v10 = vld [vmem:[%s8830_s10 + $0x18] sm:$0xff] }
  0x4f   : > { %6592 = vmatprep.subr.bf16.mxu0 %v7225_v3  ;;  %v700_v23 = vadd.f32 %v699_v19, %v698_v18  ;;  %v6596_v24 = vpack.c.bf16 %v608_v10, %v607_v4 }
  0x51   : > { %6080 = vmatmul.mubr.msk.f32.vlgmr.msra.gmra.mrb[2].mxu0 %vm575_vm1, %v700_v23  ;;  %6603 = vmatpush3.bf16.msra.mxu1 %v6596_v24 }
  0x52   : > { %6594 = vmatpush3.bf16.msra.mxu0 %v7384_v9  ;;  %6090 = vmatprep.mubr.msk.f32.mxu0 %vm7226_vm0, %v7227_v6 }
  0x53   : > { %6595 = vmatprep.subr.bf16.mxu0 %v7225_v3  ;;  %6604 = vmatprep.subr.bf16.mxu1 %v7225_v3 }
  0x56   : > { %6597 = vmatpush3.bf16.msra.mxu0 %v6596_v24 }
  0x57   : > { %6104 = vmatprep.subr.bf16.mxu0 %v6973_v50 }
 0x11c   : > { %v770_v28 = vpop.f32.mrb[0].mxu0 }
 0x11d   : > { %v774_v9 = vmul.f32 0.015625, %v770_v28  ;;  %v6070_v29 = vpop.f32.mrb[1].mxu0 }
 0x11f   : > { %6091 = vmatmul.mubr.msk.f32.vlgmr.msra.gmra.mrb[4].mxu0 %vm575_vm1, %v774_v9  ;;  %v849_v31 = vmul.f32 %v774_v9, %v774_v9 }
 0x120   : > { %6105 = vmatpush3.bf16.msra.mxu0 %v6973_v50  ;;  %6108 = vmatprep.mubr.msk.bf16.mxu0 %vm575_vm1, %v1199_v61 }
 0x121   : > { %6106 = vmatprep.subr.bf16.mxu0 %v6974_v51 }
 0x124   : > { %v844_v30 = vpop.f32.mrb[2].mxu0  ;;  %6107 = vmatpush3.bf16.msra.mxu0 %v6974_v51 }
 0x125   : > { %v848_v35 = vmul.f32 0.015625, %v844_v30  ;;  %v6081_v38 = vpop.f32.mrb[3].mxu0  ;;  %6124 = vmatprep.subr.bf16.mxu0 %v7571_v53 }
 0x127   : > { %v850_v44 = vsub.f32 %v848_v35, %v849_v31 }
 0x129   : > { %v851_v47 = vmax.f32 %v850_v44, 0.0 }
 0x12b   : > { %v852_v48 = vadd.f32 1e-05, %v851_v47 }
 0x12d   : > { %7029 = vrsqrt.f32 %v852_v48 }
 0x137   : > { %v7030_v49 = vpop.eup %7029 }
 0x138   : > { %6102 = vmatmul.mubr.msk.f32.vlgmr.msra.gmra.mrb[0].mxu1 %vm575_vm1, %v7030_v49 }
 0x139   : > { %6300 = vmatprep.mubr.msk.f32.mxu1 %vm7226_vm0, %v7227_v6 }
 0x1f2   : > { %v923_v39 = vpop.f32.mrb[4].mxu0 }
 0x1f3   : > { %v6092_v40 = vpop.f32.mrb[5].mxu0 }
 0x20b   : > { %v996_v1 = vpop.f32.mrb[0].mxu1 }
 0x20c   : > { %v1000_v46 = vmul.f32 %v996_v1, %v609_v42  ;;  %v6103_v2 = vpop.f32.mrb[1].mxu1 }
 0x20e   : > { %v1001_v7 = vmul.f32 %v1000_v46, %v923_v39  ;;  %v1006_v8 = vrot.slane %v1000_v46, %v7588_v45 }
 0x210   : > { %v1002_v62 = vsub.f32 %v610_v5, %v1001_v7  ;;  %v1007_v17 = vmul.f32 %v1006_v8, %v7403_v11  ;;  %v1008_v18 = vmul.f32 %v1006_v8, %v7406_v12  ;;  %v1009_v19 = vmul.f32 %v1006_v8, %v7409_v13 }
 0x211   : > { %v1010_v23 = vmul.f32 %v1006_v8, %v7413_v14  ;;  %v1011_v4 = vmul.f32 %v1006_v8, %v7416_v15  ;;  %v1012_v24 = vmul.f32 %v1006_v8, %v7419_v16  ;;  %v1013_v28 = vmul.f32 %v1006_v8, %v7428_v20 }
 0x212   : > { %v1027_v10 = vrot.slane %v1002_v62, %v7588_v45  ;;  %v1014_v9 = vmul.f32 %v1006_v8, %v7431_v21  ;;  %v1015_v29 = vmul.f32 %v1006_v8, %v7434_v22  ;;  %v1016_v11 = vmul.f32 %v1006_v8, %v7439_v25 }
 0x213   : > { %v1017_v12 = vmul.f32 %v1006_v8, %v7442_v26  ;;  %v1018_v13 = vmul.f32 %v1006_v8, %v7445_v27  ;;  %v1019_v48 = vmul.f32 %v1006_v8, %v7456_v32  ;;  %v1020_v59 = vmul.f32 %v1006_v8, %v7459_v33 }
 0x214   : > { %v7607_v30 = vadd.f32 %v1027_v10, %v1007_v17  ;;  %v7609_v14 = vadd.f32 %v1027_v10, %v1008_v18  ;;  %v7611_v15 = vadd.f32 %v1027_v10, %v1009_v19  ;;  %v7613_v31 = vadd.f32 %v1027_v10, %v1010_v23 }
 0x215   : > { %v7615_v16 = vadd.f32 %v1027_v10, %v1011_v4  ;;  %v7617_v20 = vadd.f32 %v1027_v10, %v1012_v24  ;;  %v7619_v21 = vadd.f32 %v1027_v10, %v1013_v28  ;;  %v7621_v22 = vadd.f32 %v1027_v10, %v1014_v9 }
 0x216   : > { %v1045_v25 = vsub.f32 0.0, %v7607_v30  ;;  %v1046_v26 = vsub.f32 0.0, %v7609_v14  ;;  %v1047_v27 = vsub.f32 0.0, %v7611_v15  ;;  %v1048_v35 = vsub.f32 0.0, %v7613_v31 }
 0x217   : > { %v1049_v38 = vsub.f32 0.0, %v7615_v16  ;;  %v1050_v44 = vsub.f32 0.0, %v7617_v20  ;;  %v1051_v47 = vsub.f32 0.0, %v7619_v21  ;;  %v7631_v36 = vadd.f32 %v1027_v10, %v1015_v29 }
 0x218   : > { %v1061_v49 = vmul.f32 1.442695, %v1045_v25  ;;  %v1063_v50 = vmul.f32 1.442695, %v1046_v26  ;;  %v1065_v51 = vmul.f32 1.442695, %v1047_v27  ;;  %v7634_v56 = vadd.f32 %v1027_v10, %v1016_v11 }
 0x219   : > { %v1067_v55 = vmul.f32 1.442695, %v1048_v35  ;;  %v1052_v58 = vsub.f32 0.0, %v7621_v22  ;;  %v1069_v60 = vmul.f32 1.442695, %v1049_v38  ;;  %v1053_v63 = vsub.f32 0.0, %v7631_v36 }
 0x21a   : > { %7031 = vpow2.f32 %v1061_v49  ;;  %v1071_v61 = vmul.f32 1.442695, %v1050_v44  ;;  %v1054_v32 = vsub.f32 0.0, %v7634_v56  ;;  %v7639_v39 = vadd.f32 %v1027_v10, %v1017_v12 }
 0x21b   : > { %7033 = vpow2.f32 %v1063_v50  ;;  %v7641_v40 = vadd.f32 %v1027_v10, %v1018_v13  ;;  %v1073_v41 = vmul.f32 1.442695, %v1051_v47  ;;  %v7643_v0 = vadd.f32 %v1027_v10, %v1019_v48 }
 0x21c   : > { %7035 = vpow2.f32 %v1065_v51  ;;  %v7645_v42 = vadd.f32 %v1027_v10, %v1020_v59  ;;  %v1075_v33 = vmul.f32 1.442695, %v1052_v58  ;;  %v1055_v1 = vsub.f32 0.0, %v7639_v39 }
 0x21d   : > { %7037 = vpow2.f32 %v1067_v55  ;;  %v1056_v46 = vsub.f32 0.0, %v7641_v40  ;;  %v1077_v2 = vmul.f32 1.442695, %v1053_v63  ;;  %v1057_v5 = vsub.f32 0.0, %v7643_v0 }
 0x21e   : > { %7039 = vpow2.f32 %v1069_v60  ;;  %v1021_v7 = vmul.f32 %v1006_v8, %v7462_v34  ;;  %v1079_v62 = vmul.f32 1.442695, %v1054_v32  ;;  %v1022_v17 = vmul.f32 %v1006_v8, %v7479_v43 }
 0x21f   : > { %7041 = vpow2.f32 %v1071_v61  ;;  %v1081_v18 = vmul.f32 1.442695, %v1055_v1  ;;  %v1083_v23 = vmul.f32 1.442695, %v1056_v46  ;;  %v1085_v24 = vmul.f32 1.442695, %v1057_v5 }
 0x220   : > { %7043 = vpow2.f32 %v1073_v41  ;;  %v7652_v19 = vadd.f32 %v1027_v10, %v1021_v7  ;;  %v7654_v4 = vadd.f32 %v1027_v10, %v1022_v17  ;;  %v1058_v44 = vsub.f32 0.0, %v7645_v42 }
 0x221   : > { %7045 = vpow2.f32 %v1075_v33 }
 0x222   : > { %7047 = vpow2.f32 %v1077_v2  ;;  %v1059_v51 = vsub.f32 0.0, %v7652_v19  ;;  %v1060_v59 = vsub.f32 0.0, %v7654_v4  ;;  %v1087_v63 = vmul.f32 1.442695, %v1058_v44 }
 0x223   : > { %7049 = vpow2.f32 %v1079_v62 }
 0x224   : > { %v7032_v28 = vpop.eup %7031  ;;  %7051 = vpow2.f32 %v1081_v18  ;;  %v1089_v1 = vmul.f32 1.442695, %v1059_v51  ;;  %v1091_v2 = vmul.f32 1.442695, %v1060_v59 }
 0x225   : > { %v7034_v9 = vpop.eup %7033  ;;  %v1093_v29 = vadd.f32 1.0, %v7032_v28  ;;  %7053 = vpow2.f32 %v1083_v23 }
 0x226   : > { %v7036_v34 = vpop.eup %7035  ;;  %v1094_v11 = vadd.f32 1.0, %v7034_v9  ;;  %7055 = vpow2.f32 %v1085_v24 }
 0x227   : > { %v7038_v43 = vpop.eup %7037  ;;  %7057 = vrcp.f32 %v1093_v29  ;;  %v1095_v8 = vadd.f32 1.0, %v7036_v34 }
 0x228   : > { %v7040_v12 = vpop.eup %7039  ;;  %7059 = vrcp.f32 %v1094_v11  ;;  %v1096_v13 = vadd.f32 1.0, %v7038_v43 }
 0x229   : > { %v7042_v25 = vpop.eup %7041  ;;  %7061 = vrcp.f32 %v1095_v8  ;;  %v1097_v10 = vadd.f32 1.0, %v7040_v12 }
 0x22a   : > { %v7044_v26 = vpop.eup %7043  ;;  %7063 = vrcp.f32 %v1096_v13  ;;  %v1098_v27 = vadd.f32 1.0, %v7042_v25 }
 0x22b   : > { %v7046_v35 = vpop.eup %7045  ;;  %7065 = vrcp.f32 %v1097_v10  ;;  %v1099_v38 = vadd.f32 1.0, %v7044_v26 }
 0x22c   : > { %v7048_v47 = vpop.eup %7047  ;;  %7067 = vrcp.f32 %v1098_v27  ;;  %v1100_v48 = vadd.f32 1.0, %v7046_v35 }
 0x22d   : > { %v7050_v49 = vpop.eup %7049  ;;  %7069 = vrcp.f32 %v1099_v38  ;;  %v1101_v50 = vadd.f32 1.0, %v7048_v47 }
 0x22e   : > { %v7052_v55 = vpop.eup %7051  ;;  %7071 = vrcp.f32 %v1100_v48  ;;  %v1102_v58 = vadd.f32 1.0, %v7050_v49 }
 0x22f   : > { %v7054_v60 = vpop.eup %7053  ;;  %7073 = vrcp.f32 %v1101_v50  ;;  %v1103_v61 = vadd.f32 1.0, %v7052_v55 }
 0x230   : > { %v7056_v32 = vpop.eup %7055  ;;  %7075 = vrcp.f32 %v1102_v58  ;;  %v1104_v41 = vadd.f32 1.0, %v7054_v60 }
 0x231   : > { %v7058_v33 = vpop.eup %7057  ;;  %7077 = vrcp.f32 %v1103_v61  ;;  %v1105_v10 = vadd.f32 1.0, %v7056_v32 }
 0x232   : > { %v7060_v46 = vpop.eup %7059  ;;  %7079 = vrcp.f32 %v1104_v41  ;;  %v1125_v18 = vmul.f32 %v7058_v33, %v7607_v30 }
 0x233   : > { %v7062_v5 = vpop.eup %7061  ;;  %v1126_v7 = vmul.f32 %v7060_v46, %v7609_v14  ;;  %7081 = vpow2.f32 %v1087_v63 }
 0x234   : > { %v7064_v62 = vpop.eup %7063  ;;  %7083 = vpow2.f32 %v1089_v1  ;;  %v1127_v34 = vmul.f32 %v7062_v5, %v7611_v15 }
 0x235   : > { %v7066_v17 = vpop.eup %7065  ;;  %v1142_v23 = vmul.f32 0.0, %v1126_v7  ;;  %v1128_v24 = vmul.f32 %v7064_v62, %v7613_v31  ;;  %7085 = vpow2.f32 %v1091_v2  ;;  %v6976_v62 = vld [vmem:[%s8823_s3 + $0x18] sm:$0xff]  }
 0x236   : > { %v7068_v28 = vpop.eup %7067  ;;  %v1129_v30 = vmul.f32 %v7066_v17, %v7615_v16  ;;  %7087 = vrcp.f32 %v1105_v10 }
 0x237   : > { %v7070_v9 = vpop.eup %7069  ;;  %v1157_v29 = vpack.c.bf16 %v1142_v23, %v1125_v18  ;;  %v1144_v11 = vmul.f32 0.0, %v1128_v24  ;;  %v1130_v43 = vmul.f32 %v7068_v28, %v7617_v20 }
 0x238   : > { %v7072_v8 = vpop.eup %7071  ;;  %v1131_v15 = vmul.f32 %v7070_v9, %v7619_v21 }
 0x239   : > { %v7074_v14 = vpop.eup %7073  ;;  %1165 = vst.msk [vmem:[#allocation2 + $0x10] sm:$0xff] %vm575_vm1, %v1157_v29  ;;  %v1158_v12 = vpack.c.bf16 %v1144_v11, %v1127_v34  ;;  %v1146_v13 = vmul.f32 0.0, %v1130_v43  ;;  %v1132_v31 = vmul.f32 %v7072_v8, %v7621_v22 }
 0x23a   : > { %v7076_v25 = vpop.eup %7075  ;;  %v1133_v16 = vmul.f32 %v7074_v14, %v7631_v36 }
 0x23b   : > { %v7078_v26 = vpop.eup %7077  ;;  %1166 = vst.msk [vmem:[#allocation2 + $0x18] sm:$0xff] %vm575_vm1, %v1158_v12  ;;  %v1159_v27 = vpack.c.bf16 %v1146_v13, %v1129_v30  ;;  %v1148_v35 = vmul.f32 0.0, %v1132_v31  ;;  %v1134_v20 = vmul.f32 %v7076_v25, %v7634_v56 }
 0x23c   : > { %v7080_v38 = vpop.eup %7079  ;;  %v1135_v21 = vmul.f32 %v7078_v26, %v7639_v39 }
 0x23d   : > { %v7082_v44 = vpop.eup %7081  ;;  %1167 = vst.msk [vmem:[#allocation2 + $0x20] sm:$0xff] %vm575_vm1, %v1159_v27  ;;  %v1160_v47 = vpack.c.bf16 %v1148_v35, %v1131_v15  ;;  %v1150_v48 = vmul.f32 0.0, %v1134_v20  ;;  %v1136_v22 = vmul.f32 %v7080_v38, %v7641_v40 }
 0x23e   : > { %v1106_v49 = vadd.f32 1.0, %v7082_v44  ;;  %v7084_v50 = vpop.eup %7083 }
 0x23f   : > { %1168 = vst.msk [vmem:[#allocation2 + $0x28] sm:$0xff] %vm575_vm1, %v1160_v47  ;;  %v1161_v51 = vpack.c.bf16 %v1150_v48, %v1133_v16  ;;  %v1152_v55 = vmul.f32 0.0, %v1136_v22  ;;  %v7086_v56 = vpop.eup %7085  ;;  %v1107_v59 = vadd.f32 1.0, %v7084_v50 }
 0x240   : > { %v7675_v58 = vld [vmem:[#allocation2 + $0x10] sm:$0xff]  ;;  %7089 = vrcp.f32 %v1106_v49  ;;  %v1108_v40 = vadd.f32 1.0, %v7086_v56  ;;  %v7088_v34 = vpop.eup %7087 }
 0x241   : > { %v1201_v60 = vshrl.u32 %v7675_v58, 16  ;;  %1169 = vst.msk [vmem:[#allocation2 + $0x30] sm:$0xff] %vm575_vm1, %v1161_v51  ;;  %v1162_v36 = vpack.c.bf16 %v1152_v55, %v1135_v21  ;;  %7091 = vrcp.f32 %v1107_v59  ;;  %v1204_v39 = vshll.u32 %v7675_v58, 16 }
 0x242   : > { %v7679_v61 = vld [vmem:[#allocation2 + $0x18] sm:$0xff]  ;;  %7093 = vrcp.f32 %v1108_v40  ;;  %v1137_v16 = vmul.f32 %v7088_v34, %v7643_v0 }
 0x243   : > { %v1203_v63 = vrot.slane %v1201_v60, 7  ;;  %v1209_v32 = vshrl.u32 %v7679_v61, 16  ;;  %1170 = vst.msk [vmem:[#allocation2 + $0x38] sm:$0xff] %vm575_vm1, %v1162_v36  ;;  %v1212_v41 = vshll.u32 %v7679_v61, 16  ;;  %v2139_v21 = vrot.slane %v1204_v39, 1 }
 0x244   : > { %v7687_v33 = vld [vmem:[#allocation2 + $0x20] sm:$0xff] }
 0x245   : > { %v7689_v1 = vor.u32 %v1204_v39, %v1203_v63  ;;  %v1211_v46 = vrot.slane %v1209_v32, 7  ;;  %v1217_v2 = vshrl.u32 %v7687_v33, 16  ;;  %v1220_v5 = vshll.u32 %v7687_v33, 16 }
 0x246   : > { %v7695_v7 = vld [vmem:[#allocation2 + $0x28] sm:$0xff] }
 0x247   : > { %v1207_v17 = vsel %vm1187_vm2, %v7577_v57, %v7689_v1  ;;  %v7705_v18 = vor.u32 %v1212_v41, %v1211_v46  ;;  %v1219_v23 = vrot.slane %v1217_v2, 7  ;;  %v1225_v24 = vshrl.u32 %v7695_v7, 16 }
 0x248   : > { %6109 = vmatmul.mubr.msk.bf16.vlgmr.msra.gmra.mrb[8].mxu0 %vm575_vm1, %v1207_v17  ;;  %v1228_v28 = vshll.u32 %v7695_v7, 16  ;;  %v7710_v9 = vld [vmem:[#allocation2 + $0x30] sm:$0xff]  ;;  %v1596_v29 = vrot.slane %v1220_v5, 1 }
 0x249   : > { %6125 = vmatpush3.bf16.msra.mxu0 %v7571_v53  ;;  %v7715_v57 = vsel %vm1187_vm2, %v1203_v63, %v7705_v18  ;;  %v1227_v11 = vrot.slane %v1225_v24, 7  ;;  %v1233_v43 = vshrl.u32 %v7710_v9, 16  ;;  %v1222_v14 = vor.u32 %v1220_v5, %v1219_v23  ;;  %v7726_v53 = vld [vmem:[%s8823_s3 + $0x20] sm:$0xff]  }
 0x24a   : > { %v7090_v8 = vpop.eup %7089  ;;  %6112 = vmatprep.mubr.msk.bf16.mxu0 %vm575_vm1, %v7715_v57  ;;  %6126 = vmatprep.subr.bf16.mxu0 %v6976_v62  ;;  %v1236_v12 = vshll.u32 %v7710_v9, 16  ;;  %v7721_v30 = vld [vmem:[#allocation2 + $0x38] sm:$0xff]  ;;  %v1600_v13 = vor.u32 %v1596_v29, %v1217_v2  ;;  %v1604_v31 = vrot.slane %v1228_v28, 1  ;;  %v2144_v2 = vrot.slane %v1212_v41, 1 }
 0x24b   : > { %v1230_v25 = vor.u32 %v1228_v28, %v1227_v11  ;;  %v1235_v10 = vrot.slane %v1233_v43, 7  ;;  %v1241_v26 = vshrl.u32 %v7721_v30, 16  ;;  %v7092_v27 = vpop.eup %7091  ;;  %v1244_v15 = vshll.u32 %v7721_v30, 16 }
 0x24c   : > { %v1138_v35 = vmul.f32 %v7090_v8, %v7645_v42  ;;  %v7732_v20 = vsel %vm1569_vm3, %v1600_v13, %v1604_v31  ;;  %v1608_v38 = vor.u32 %v1604_v31, %v1225_v24  ;;  %v1612_v48 = vrot.slane %v1236_v12, 1  ;;  %v7094_v22 = vpop.eup %7093 }
 0x24d   : > { %v1238_v44 = vor.u32 %v1236_v12, %v1235_v10  ;;  %6127 = vmatpush3.bf16.msra.mxu0 %v6976_v62  ;;  %v1243_v47 = vrot.slane %v1241_v26, 7  ;;  %v7736_v49 = vsel %vm1187_vm2, %v1211_v46, %v1222_v14  ;;  %v1620_v51 = vrot.slane %v1244_v15, 1 }
 0x24e   : > { %v1154_v50 = vmul.f32 0.0, %v1138_v35  ;;  %6144 = vmatprep.subr.bf16.mxu0 %v7726_v53  ;;  %v7740_v42 = vsel %vm1187_vm2, %v1219_v23, %v1230_v25  ;;  %v1616_v56 = vor.u32 %v1612_v48, %v1233_v43  ;;  %v1139_v59 = vmul.f32 %v7092_v27, %v7652_v19 }
 0x24f   : > { %v7743_v55 = vsel %vm1187_vm2, %v1227_v11, %v1238_v44  ;;  %v1624_v36 = vor.u32 %v1620_v51, %v1241_v26  ;;  %v1140_v40 = vmul.f32 %v7094_v22, %v7654_v4  ;;  %v1246_v63 = vor.u32 %v1244_v15, %v1243_v47  ;;  %v6978_v15 = vld [vmem:[%s8823_s3 + $0x28] sm:$0xff]   ;;  %v6981_v44 = vld [vmem:[%s8823_s3 + $0x40] sm:$0xff]  }
 0x250   : > { %6113 = vmatmul.mubr.msk.bf16.gmra.mrb[12].mxu0 %vm575_vm1, %v7736_v49  ;;  %v1163_v0 = vpack.c.bf16 %v1154_v50, %v1137_v16  ;;  %v7752_v39 = vsel %vm1569_vm3, %v1616_v56, %v1620_v51  ;;  %v2140_v19 = vor.u32 %v2139_v21, %v1201_v60  ;;  %v2148_v17 = vor.u32 %v2144_v2, %v1209_v32  ;;  %v6982_v56 = vld [vmem:[%s8823_s3 + $0x48] sm:$0xff]  }
 0x251   : > { %6116 = vmatprep.mubr.msk.bf16.mxu0 %vm575_vm1, %v7740_v42  ;;  %v1156_v46 = vmul.f32 0.0, %v1140_v40  ;;  %v7760_v62 = vsel %vm1187_vm2, %v1235_v10, %v1246_v63  ;;  %v7778_v41 = vsel %vm1569_vm3, %v1608_v38, %v1612_v48  ;;  %v6980_v38 = vld [vmem:[%s8823_s3 + $0x38] sm:$0xff]   ;;  %v2351_v40 = vld [vmem:[#allocation2 + $0x10] sm:$0x80] }
 0x252   : > { %1171 = vst.msk [vmem:[#allocation2 + $0x40] sm:$0xff] %vm575_vm1, %v1163_v0  ;;  %v7763_v4 = vsel %vm1569_vm3, %v2140_v19, %v2144_v2  ;;  %v7769_v23 = vsel %vm1569_vm3, %v2148_v17, %v1596_v29  ;;  %v6987_v0 = vld [vmem:[%s8823_s3 + $0x70] sm:$0xff]   ;;  %v2359_v63 = vshrl.u32 %v2351_v40, 16  ;;  %v6989_v17 = vld [vmem:[%s8823_s3 + $0x80] sm:$0xff]  }
 0x253   : > { %v1164_v5 = vpack.c.bf16 %v1156_v46, %v1139_v59  ;;  %v6983_v59 = vld [vmem:[%s8823_s3 + $0x50] sm:$0xff]  }
 0x254   : > { %v2361_v19 = vrot.slane %v2359_v63, 7 }
 0x255   : > { %1172 = vst.msk [vmem:[#allocation2 + $0x48] sm:$0xff] %vm575_vm1, %v1164_v5 }
 0x256   : > { %v2364_v5 = vsel %vm1187_vm2, %v2361_v19, %v7705_v18  ;;  %v2352_v18 = vld [vmem:[#allocation2 + $0x50] sm:$0xff] }
 0x258   : > { %6117 = vmatmul.mubr.msk.bf16.gmra.mrb[16].mxu0 %vm575_vm1, %v7743_v55 }
 0x259   : > { %6120 = vmatprep.mubr.msk.bf16.mxu0 %vm575_vm1, %v7760_v62  ;;  %v7775_v60 = vld [vmem:[#allocation2 + $0x40] sm:$0xff] }
 0x25a   : > { %v1249_v24 = vshrl.u32 %v7775_v60, 16  ;;  %v1252_v32 = vshll.u32 %v7775_v60, 16 }
 0x25c   : > { %v1251_v28 = vrot.slane %v1249_v24, 7  ;;  %v2184_v34 = vrot.slane %v1252_v32, 1  ;;  %v7782_v11 = vld [vmem:[#allocation2 + $0x48] sm:$0xff] }
 0x25d   : > { %v1820_v43 = vshrl.u32 %v7782_v11, 16  ;;  %v1823_v12 = vshll.u32 %v7782_v11, 16 }
 0x25e   : > { %v1254_v29 = vor.u32 %v1252_v32, %v1251_v28  ;;  %v7786_v8 = vsel %vm1569_vm3, %v1624_v36, %v2184_v34  ;;  %v2188_v13 = vor.u32 %v2184_v34, %v1249_v24  ;;  %v2198_v36 = vshll.u32 %v2129_v52, 16  ;;  %v2934_v34 = vld [vmem:[%s8831_s11 + $0x18] sm:$0xff] }
 0x25f   : > { %v7794_v31 = vrot.slane %v1820_v43, 7  ;;  %v2748_v10 = vrot.slane %v1823_v12, 1  ;;  %v2384_v24 = vshrl.u32 %v2352_v18, 16  ;;  %v2387_v32 = vshll.u32 %v2352_v18, 16 }
 0x260   : > { %v7789_v14 = vsel %vm1187_vm2, %v1243_v47, %v1254_v29  ;;  %v1564_v47 = vld [vmem:[#allocation2 + $0x48] sm:$0x1]  ;;  %v2200_v46 = vrot.slane %v2198_v36, 1  ;;  %v2935_v29 = vld [vmem:[%s8831_s11 + $0x20] sm:$0xff] }
 0x261   : > { %6121 = vmatmul.mubr.msk.bf16.gmra.mrb[20].mxu0 %vm575_vm1, %v7789_v14  ;;  %v2381_v25 = vor.u32 %v1823_v12, %v7794_v31  ;;  %v7802_v27 = vor.u32 %v2748_v10, %v1820_v43  ;;  %v7808_v35 = vsel %vm1569_vm3, %v2188_v13, %v2748_v10  ;;  %v1634_v48 = vshll.u32 %v1564_v47, 16  ;;  %v2936_v43 = vld [vmem:[%s8831_s11 + $0x28] sm:$0xff]  ;;  %v2938_v12 = vld [vmem:[%s8831_s11 + $0x38] sm:$0xff] }
 0x262   : > { %6128 = vmatprep.mubr.msk.bf16.mxu0 %vm575_vm1, %v7573_v54  ;;  %v6979_v54 = vld [vmem:[%s8823_s3 + $0x30] sm:$0xff]  }
 0x263   : > { %v7800_v26 = vsel %vm1187_vm2, %v1251_v28, %v2381_v25  ;;  %v1636_v50 = vrot.slane %v1634_v48, 1  ;;  %v2201_v2 = vsel %vm1569_vm3, %v7802_v27, %v2200_v46 }
 0x265   : > { %v1637_v51 = vsel %vm1569_vm3, %v2188_v13, %v1636_v50 }
 0x269   : > { %6129 = vmatmul.mubr.msk.bf16.vlgmr.msra.gmra.mrb[8].mxu0 %vm575_vm1, %v7675_v58 }
 0x26a   : > { %6145 = vmatpush3.bf16.msra.mxu0 %v7726_v53  ;;  %6132 = vmatprep.mubr.msk.bf16.mxu0 %vm575_vm1, %v7679_v61  ;;  %v1581_v53 = vsel %vm1569_vm3, %v7583_v37, %v2139_v21  ;;  %v1787_v37 = vld [vmem:[#allocation2 + $0x8] sm:$0x80] }
 0x26b   : > { %6146 = vmatprep.subr.bf16.mxu0 %v6978_v15  ;;  %v1795_v16 = vshrl.u32 %v1787_v37, 16 }
 0x26d   : > { %v1797_v22 = vrot.slane %v1795_v16, 7 }
 0x26e   : > { %6147 = vmatpush3.bf16.msra.mxu0 %v6978_v15 }
 0x26f   : > { %6164 = vmatprep.subr.bf16.mxu0 %v6979_v54  ;;  %v1800_v21 = vsel %vm1187_vm2, %v1797_v22, %v7689_v1  ;;  %v6984_v1 = vld [vmem:[%s8823_s3 + $0x58] sm:$0xff]  }
 0x271   : > { %6133 = vmatmul.mubr.msk.bf16.gmra.mrb[12].mxu0 %vm575_vm1, %v7687_v33 }
 0x272   : > { %6136 = vmatprep.mubr.msk.bf16.mxu0 %vm575_vm1, %v7695_v7 }
 0x279   : > { %6137 = vmatmul.mubr.msk.bf16.gmra.mrb[16].mxu0 %vm575_vm1, %v7710_v9 }
 0x27a   : > { %6140 = vmatprep.mubr.msk.bf16.mxu0 %vm575_vm1, %v7721_v30 }
 0x281   : > { %6141 = vmatmul.mubr.msk.bf16.gmra.mrb[20].mxu0 %vm575_vm1, %v7775_v60 }
 0x282   : > { %6148 = vmatprep.mubr.msk.bf16.mxu0 %vm575_vm1, %v1581_v53 }
 0x289   : > { %6149 = vmatmul.mubr.msk.bf16.vlgmr.msra.gmra.mrb[8].mxu0 %vm575_vm1, %v7763_v4 }
 0x28a   : > { %6165 = vmatpush3.bf16.msra.mxu0 %v6979_v54  ;;  %6152 = vmatprep.mubr.msk.bf16.mxu0 %vm575_vm1, %v7769_v23 }
 0x28b   : > { %6166 = vmatprep.subr.bf16.mxu0 %v6980_v38 }
 0x28e   : > { %6167 = vmatpush3.bf16.msra.mxu0 %v6980_v38 }
 0x28f   : > { %6184 = vmatprep.subr.bf16.mxu0 %v6981_v44 }
 0x291   : > { %6153 = vmatmul.mubr.msk.bf16.gmra.mrb[12].mxu0 %vm575_vm1, %v7732_v20 }
 0x292   : > { %6156 = vmatprep.mubr.msk.bf16.mxu0 %vm575_vm1, %v7778_v41 }
 0x299   : > { %6157 = vmatmul.mubr.msk.bf16.gmra.mrb[16].mxu0 %vm575_vm1, %v7752_v39 }
 0x29a   : > { %6160 = vmatprep.mubr.msk.bf16.mxu0 %vm575_vm1, %v7786_v8 }
 0x2a1   : > { %6161 = vmatmul.mubr.msk.bf16.gmra.mrb[20].mxu0 %vm575_vm1, %v1637_v51 }
 0x2a2   : > { %6168 = vmatprep.mubr.msk.bf16.mxu0 %vm575_vm1, %v1800_v21 }
 0x2a9   : > { %6169 = vmatmul.mubr.msk.bf16.vlgmr.msra.gmra.mrb[8].mxu0 %vm575_vm1, %v7715_v57  ;;  %v6985_v57 = vld [vmem:[%s8823_s3 + $0x60] sm:$0xff]  }
 0x2aa   : > { %6185 = vmatpush3.bf16.msra.mxu0 %v6981_v44  ;;  %6172 = vmatprep.mubr.msk.bf16.mxu0 %vm575_vm1, %v7736_v49 }
 0x2ab   : > { %6186 = vmatprep.subr.bf16.mxu0 %v6982_v56 }
 0x2ae   : > { %6187 = vmatpush3.bf16.msra.mxu0 %v6982_v56 }
 0x2af   : > { %6204 = vmatprep.subr.bf16.mxu0 %v6983_v59 }
 0x2b1   : > { %6173 = vmatmul.mubr.msk.bf16.gmra.mrb[12].mxu0 %vm575_vm1, %v7740_v42 }
 0x2b2   : > { %6176 = vmatprep.mubr.msk.bf16.mxu0 %vm575_vm1, %v7743_v55 }
 0x2b9   : > { %6177 = vmatmul.mubr.msk.bf16.gmra.mrb[16].mxu0 %vm575_vm1, %v7760_v62 }
 0x2ba   : > { %6180 = vmatprep.mubr.msk.bf16.mxu0 %vm575_vm1, %v7789_v14 }
 0x2c1   : > { %6181 = vmatmul.mubr.msk.bf16.gmra.mrb[20].mxu0 %vm575_vm1, %v7800_v26 }
 0x2c2   : > { %6188 = vmatprep.mubr.msk.bf16.mxu0 %vm575_vm1, %v7675_v58  ;;  %v6986_v58 = vld [vmem:[%s8823_s3 + $0x68] sm:$0xff]  }
 0x2c9   : > { %6189 = vmatmul.mubr.msk.bf16.vlgmr.msra.gmra.mrb[8].mxu0 %vm575_vm1, %v7679_v61 }
 0x2ca   : > { %6205 = vmatpush3.bf16.msra.mxu0 %v6983_v59  ;;  %6192 = vmatprep.mubr.msk.bf16.mxu0 %vm575_vm1, %v7687_v33 }
 0x2cb   : > { %6206 = vmatprep.subr.bf16.mxu0 %v6984_v1 }
 0x2ce   : > { %6207 = vmatpush3.bf16.msra.mxu0 %v6984_v1 }
 0x2cf   : > { %6224 = vmatprep.subr.bf16.mxu0 %v6985_v57 }
 0x2d1   : > { %6193 = vmatmul.mubr.msk.bf16.gmra.mrb[12].mxu0 %vm575_vm1, %v7695_v7 }
 0x2d2   : > { %6196 = vmatprep.mubr.msk.bf16.mxu0 %vm575_vm1, %v7710_v9 }
 0x2d9   : > { %6197 = vmatmul.mubr.msk.bf16.gmra.mrb[16].mxu0 %vm575_vm1, %v7721_v30 }
 0x2da   : > { %6200 = vmatprep.mubr.msk.bf16.mxu0 %vm575_vm1, %v7775_v60 }
 0x2e1   : > { %6201 = vmatmul.mubr.msk.bf16.gmra.mrb[20].mxu0 %vm575_vm1, %v7782_v11 }
 0x2e2   : > { %6208 = vmatprep.mubr.msk.bf16.mxu0 %vm575_vm1, %v7763_v4  ;;  %v6988_v4 = vld [vmem:[%s8823_s3 + $0x78] sm:$0xff]  }
 0x2e9   : > { %6209 = vmatmul.mubr.msk.bf16.vlgmr.msra.gmra.mrb[8].mxu0 %vm575_vm1, %v7769_v23 }
 0x2ea   : > { %6225 = vmatpush3.bf16.msra.mxu0 %v6985_v57  ;;  %6212 = vmatprep.mubr.msk.bf16.mxu0 %vm575_vm1, %v7732_v20 }
 0x2eb   : > { %6226 = vmatprep.subr.bf16.mxu0 %v6986_v58 }
 0x2ee   : > { %6227 = vmatpush3.bf16.msra.mxu0 %v6986_v58 }
 0x2ef   : > { %6244 = vmatprep.subr.bf16.mxu0 %v6987_v0 }
 0x2f1   : > { %6213 = vmatmul.mubr.msk.bf16.gmra.mrb[12].mxu0 %vm575_vm1, %v7778_v41 }
 0x2f2   : > { %6216 = vmatprep.mubr.msk.bf16.mxu0 %vm575_vm1, %v7752_v39 }
 0x2f9   : > { %6217 = vmatmul.mubr.msk.bf16.gmra.mrb[16].mxu0 %vm575_vm1, %v7786_v8 }
 0x2fa   : > { %6220 = vmatprep.mubr.msk.bf16.mxu0 %vm575_vm1, %v7808_v35 }
 0x301   : > { %6221 = vmatmul.mubr.msk.bf16.gmra.mrb[20].mxu0 %vm575_vm1, %v2201_v2 }
 0x302   : > { %6228 = vmatprep.mubr.msk.bf16.mxu0 %vm575_vm1, %v2364_v5 }
 0x309   : > { %6229 = vmatmul.mubr.msk.bf16.vlgmr.msra.gmra.mrb[8].mxu0 %vm575_vm1, %v7736_v49  ;;  %v2386_v49 = vrot.slane %v2384_v24, 7 }
 0x30a   : > { %6245 = vmatpush3.bf16.msra.mxu0 %v6987_v0  ;;  %6232 = vmatprep.mubr.msk.bf16.mxu0 %vm575_vm1, %v7740_v42 }
 0x30b   : > { %6246 = vmatprep.subr.bf16.mxu0 %v6988_v4  ;;  %v2389_v42 = vor.u32 %v2387_v32, %v2386_v49 }
 0x30d   : > { %v2390_v28 = vsel %vm1187_vm2, %v7794_v31, %v2389_v42  ;;  %v8029_v31 = vld [vmem:[%s8824_s4] ss:$0 sm:$0xff] }
 0x30e   : > { %6247 = vmatpush3.bf16.msra.mxu0 %v6988_v4 }
 0x30f   : > { %6264 = vmatprep.subr.bf16.mxu0 %v6989_v17 }
 0x311   : > { %6233 = vmatmul.mubr.msk.bf16.gmra.mrb[12].mxu0 %vm575_vm1, %v7743_v55  ;;  %v6990_v55 = vld [vmem:[%s8823_s3 + $0x88] sm:$0xff]  }
 0x312   : > { %6236 = vmatprep.mubr.msk.bf16.mxu0 %vm575_vm1, %v7760_v62 }
 0x319   : > { %6237 = vmatmul.mubr.msk.bf16.gmra.mrb[16].mxu0 %vm575_vm1, %v7789_v14  ;;  %v2937_v14 = vld [vmem:[%s8831_s11 + $0x30] sm:$0xff] }
 0x31a   : > { %6240 = vmatprep.mubr.msk.bf16.mxu0 %vm575_vm1, %v7800_v26  ;;  %v8021_v13 = vpack.c.bf16 %v2938_v12, %v2937_v14 }
 0x321   : > { %6241 = vmatmul.mubr.msk.bf16.gmra.mrb[20].mxu0 %vm575_vm1, %v2390_v28 }
 0x322   : > { %6248 = vmatprep.mubr.msk.bf16.mxu0 %vm575_vm1, %v7679_v61  ;;  %v2693_v61 = vld [vmem:[#allocation2 + $0x58] sm:$0x1] }
 0x329   : > { %6249 = vmatmul.mubr.msk.bf16.vlgmr.msra.gmra.mrb[8].mxu0 %vm575_vm1, %v7687_v33  ;;  %v2756_v33 = vrot.slane %v2387_v32, 1 }
 0x32a   : > { %6265 = vmatpush3.bf16.msra.mxu0 %v6989_v17  ;;  %6252 = vmatprep.mubr.msk.bf16.mxu0 %vm575_vm1, %v7695_v7  ;;  %v2762_v7 = vshll.u32 %v2693_v61, 16 }
 0x32b   : > { %6266 = vmatprep.subr.bf16.mxu0 %v6990_v55 }
 0x32e   : > { %6267 = vmatpush3.bf16.msra.mxu0 %v6990_v55 }
 0x331   : > { %6253 = vmatmul.mubr.msk.bf16.gmra.mrb[12].mxu0 %vm575_vm1, %v7710_v9  ;;  %v2757_v9 = vsel %vm1569_vm3, %v7802_v27, %v2756_v33 }
 0x332   : > { %6256 = vmatprep.mubr.msk.bf16.mxu0 %vm575_vm1, %v7721_v30  ;;  %v2760_v30 = vor.u32 %v2756_v33, %v2384_v24 }
 0x339   : > { %6257 = vmatmul.mubr.msk.bf16.gmra.mrb[16].mxu0 %vm575_vm1, %v7775_v60  ;;  %v2933_v60 = vld [vmem:[%s8831_s11 + $0x10] sm:$0xff] }
 0x33a   : > { %6260 = vmatprep.mubr.msk.bf16.mxu0 %vm575_vm1, %v7782_v11  ;;  %v8001_v11 = vpack.c.bf16 %v2934_v34, %v2933_v60 }
 0x341   : > { %6261 = vmatmul.mubr.msk.bf16.gmra.mrb[20].mxu0 %vm575_vm1, %v2352_v18 }
 0x342   : > { %6268 = vmatprep.mubr.msk.bf16.mxu0 %vm575_vm1, %v7769_v23  ;;  %v2932_v23 = vld [vmem:[%s8831_s11 + $0x8] sm:$0xff] }
 0x349   : > { %6269 = vmatmul.mubr.msk.bf16.vlgmr.msra.gmra.mrb[8].mxu0 %vm575_vm1, %v7732_v20  ;;  %v2764_v20 = vrot.slane %v2762_v7, 1 }
 0x34a   : > { %6272 = vmatprep.mubr.msk.bf16.mxu0 %vm575_vm1, %v7778_v41 }
 0x34b   : > { %v2765_v62 = vsel %vm1569_vm3, %v2760_v30, %v2764_v20 }
 0x351   : > { %6273 = vmatmul.mubr.msk.bf16.gmra.mrb[12].mxu0 %vm575_vm1, %v7752_v39  ;;  %v2931_v39 = vld [vmem:[%s8831_s11] sm:$0xff] }
 0x352   : > { %6276 = vmatprep.mubr.msk.bf16.mxu0 %vm575_vm1, %v7786_v8  ;;  %v7995_v41 = vpack.c.bf16 %v2932_v23, %v2931_v39  ;;  %v8011_v8 = vpack.c.bf16 %v2936_v43, %v2935_v29 }
 0x354   : > { %6606 = vmatpush3.bf16.msra.mxu1 %v7995_v41 }
 0x355   : > { %6607 = vmatprep.subr.bf16.mxu1 %v7225_v3 }
 0x358   : > { %6609 = vmatpush3.bf16.msra.mxu1 %v8001_v11 }
 0x359   : > { %6277 = vmatmul.mubr.msk.bf16.gmra.mrb[16].mxu0 %vm575_vm1, %v7808_v35  ;;  %6610 = vmatprep.subr.bf16.mxu1 %v7225_v3 }
 0x35a   : > { %6280 = vmatprep.mubr.msk.bf16.mxu0 %vm575_vm1, %v2757_v9 }
 0x35c   : > { %6612 = vmatpush3.bf16.msra.mxu1 %v8011_v8 }
 0x35d   : > { %6613 = vmatprep.subr.bf16.mxu1 %v7225_v3 }
 0x360   : > { %6615 = vmatpush3.bf16.msra.mxu1 %v8021_v13 }
 0x361   : > { %6281 = vmatmul.mubr.msk.bf16.gmra.mrb[20].mxu0 %vm575_vm1, %v2765_v62  ;;  %6616 = vmatprep.subr.bf16.mxu1 %v7225_v3 }
 0x41c   : > { %v6270_v25 = vpop.f32.mrb[8].mxu0 }
 0x41d   : > { %v2836_v10 = vpop.f32.mrb[9].mxu0  ;;  %v8035_v15 = vadd.f32 %v6270_v25, %v8029_v31 }
 0x41e   : > { %v8032_v26 = vadd.f32 %v8029_v31, %v2836_v10  ;;  %v6271_v27 = vpop.f32.mrb[10].mxu0 }
 0x41f   : > { %v6642_v35 = vadd.f32 %v6271_v27, %v8029_v31  ;;  %v2839_v54 = vpop.f32.mrb[11].mxu0  ;;  %v2984_v47 = vmul.f32 %v8035_v15, %v8035_v15  ;;  %v2948_v51 = vsel %vm580_vm4, %v8035_v15, 0.0 }
 0x420   : > { %v6643_v53 = vadd.f32 %v8029_v31, %v2839_v54  ;;  %v2982_v38 = vmul.f32 %v8032_v26, %v8032_v26  ;;  %v2945_v16 = vsel %vm580_vm4, %v8032_v26, 0.0 }
 0x421   : > { %v8041_v44 = vmul.f32 0.0, %v6642_v35  ;;  %v3001_v52 = vsel %vm580_vm4, %v2984_v47, 0.0 }
 0x422   : > { %v8043_v37 = vmul.f32 0.0, %v6643_v53  ;;  %v2998_v59 = vsel %vm580_vm4, %v2982_v38, 0.0 }
 0x423   : > { %v2985_v1 = vmul.f32 %v8041_v44, %v8041_v44  ;;  %v2950_v19 = vsel %vm580_vm4, %v8041_v44, 0.0 }
 0x424   : > { %v2946_v48 = vsel %vm580_vm4, %v8043_v37, 0.0  ;;  %v2983_v22 = vmul.f32 %v8043_v37, %v8043_v37  ;;  %v6274_v50 = vpop.f32.mrb[12].mxu0 }
 0x425   : > { %v2947_v21 = vadd.f32 %v2946_v48, %v2945_v16  ;;  %v2852_v56 = vpop.f32.mrb[13].mxu0  ;;  %v8064_v63 = vadd.f32 %v6274_v50, %v8029_v31  ;;  %v3003_v24 = vsel %vm580_vm4, %v2985_v1, 0.0 }
 0x426   : > { %v2999_v57 = vsel %vm580_vm4, %v2983_v22, 0.0  ;;  %v8060_v58 = vadd.f32 %v8029_v31, %v2852_v56  ;;  %v6275_v0 = vpop.f32.mrb[14].mxu0 }
 0x427   : > { %v2949_v36 = vadd.f32 %v2948_v51, %v2947_v21  ;;  %v3000_v40 = vadd.f32 %v2999_v57, %v2998_v59  ;;  %v2855_v46 = vpop.f32.mrb[15].mxu0  ;;  %v6646_v5 = vadd.f32 %v6275_v0, %v8029_v31  ;;  %v2988_v28 = vmul.f32 %v8064_v63, %v8064_v63 }
 0x428   : > { %v2986_v2 = vmul.f32 %v8060_v58, %v8060_v58  ;;  %v6647_v4 = vadd.f32 %v8029_v31, %v2855_v46  ;;  %v2952_v49 = vsel %vm580_vm4, %v8060_v58, 0.0  ;;  %v2956_v23 = vsel %vm580_vm4, %v8064_v63, 0.0 }
 0x429   : > { %v3002_v17 = vadd.f32 %v3001_v52, %v3000_v40  ;;  %v2951_v18 = vadd.f32 %v2950_v19, %v2949_v36  ;;  %v8075_v32 = vmul.f32 0.0, %v6646_v5  ;;  %v3009_v14 = vsel %vm580_vm4, %v2988_v28, 0.0 }
 0x42a   : > { %v8077_v42 = vmul.f32 0.0, %v6647_v4  ;;  %v3005_v33 = vsel %vm580_vm4, %v2986_v2, 0.0 }
 0x42b   : > { %v2953_v55 = vadd.f32 %v2952_v49, %v2951_v18  ;;  %v3004_v61 = vadd.f32 %v3003_v24, %v3002_v17  ;;  %v2989_v60 = vmul.f32 %v8075_v32, %v8075_v32  ;;  %v2958_v35 = vsel %vm580_vm4, %v8075_v32, 0.0 }
 0x42c   : > { %v2954_v7 = vsel %vm580_vm4, %v8077_v42, 0.0  ;;  %v2987_v9 = vmul.f32 %v8077_v42, %v8077_v42  ;;  %v6278_v30 = vpop.f32.mrb[16].mxu0 }
 0x42d   : > { %v3006_v20 = vadd.f32 %v3005_v33, %v3004_v61  ;;  %v2955_v62 = vadd.f32 %v2954_v7, %v2953_v55  ;;  %v2868_v39 = vpop.f32.mrb[17].mxu0  ;;  %v8096_v10 = vadd.f32 %v6278_v30, %v8029_v31  ;;  %v3011_v48 = vsel %vm580_vm4, %v2989_v60, 0.0 }
 0x42e   : > { %v3007_v34 = vsel %vm580_vm4, %v2987_v9, 0.0  ;;  %v8092_v29 = vadd.f32 %v8029_v31, %v2868_v39  ;;  %v6279_v43 = vpop.f32.mrb[18].mxu0 }
 0x42f   : > { %v2957_v12 = vadd.f32 %v2956_v23, %v2955_v62  ;;  %v3008_v25 = vadd.f32 %v3007_v34, %v3006_v20  ;;  %v2871_v27 = vpop.f32.mrb[19].mxu0  ;;  %v6650_v53 = vadd.f32 %v6279_v43, %v8029_v31  ;;  %v2992_v21 = vmul.f32 %v8096_v10, %v8096_v10 }
 0x430   : > { %v2990_v54 = vmul.f32 %v8092_v29, %v8092_v29  ;;  %v6651_v38 = vadd.f32 %v8029_v31, %v2871_v27  ;;  %v2960_v22 = vsel %vm580_vm4, %v8092_v29, 0.0  ;;  %v2964_v19 = vsel %vm580_vm4, %v8096_v10, 0.0 }
 0x431   : > { %v3010_v47 = vadd.f32 %v3009_v14, %v3008_v25  ;;  %v2959_v16 = vadd.f32 %v2958_v35, %v2957_v12  ;;  %v8107_v50 = vmul.f32 0.0, %v6650_v53  ;;  %v3017_v18 = vsel %vm580_vm4, %v2992_v21, 0.0 }
 0x432   : > { %v8109_v51 = vmul.f32 0.0, %v6651_v38  ;;  %v3013_v1 = vsel %vm580_vm4, %v2990_v54, 0.0 }
 0x433   : > { %v2961_v56 = vadd.f32 %v2960_v22, %v2959_v16  ;;  %v3012_v59 = vadd.f32 %v3011_v48, %v3010_v47  ;;  %v2993_v2 = vmul.f32 %v8107_v50, %v8107_v50  ;;  %v2966_v61 = vsel %vm580_vm4, %v8107_v50, 0.0 }
 0x434   : > { %v2962_v57 = vsel %vm580_vm4, %v8109_v51, 0.0  ;;  %v2991_v0 = vmul.f32 %v8109_v51, %v8109_v51  ;;  %v6282_v52 = vpop.f32.mrb[20].mxu0 }
 0x435   : > { %v3014_v36 = vadd.f32 %v3013_v1, %v3012_v59  ;;  %v2963_v40 = vadd.f32 %v2962_v57, %v2961_v56  ;;  %v2884_v46 = vpop.f32.mrb[21].mxu0  ;;  %v8128_v28 = vadd.f32 %v6282_v52, %v8029_v31  ;;  %v3019_v62 = vsel %vm580_vm4, %v2993_v2, 0.0 }
 0x436   : > { %v3015_v5 = vsel %vm580_vm4, %v2991_v0, 0.0  ;;  %v8124_v4 = vadd.f32 %v8029_v31, %v2884_v46  ;;  %v6283_v17 = vpop.f32.mrb[22].mxu0 }
 0x437   : > { %v2965_v24 = vadd.f32 %v2964_v19, %v2963_v40  ;;  %v3016_v49 = vadd.f32 %v3015_v5, %v3014_v36  ;;  %v2887_v55 = vpop.f32.mrb[23].mxu0  ;;  %v6654_v7 = vadd.f32 %v6283_v17, %v8029_v31  ;;  %v2996_v60 = vmul.f32 %v8128_v28, %v8128_v28 }
 0x438   : > { %v2994_v33 = vmul.f32 %v8124_v4, %v8124_v4  ;;  %v6655_v9 = vadd.f32 %v8029_v31, %v2887_v55  ;;  %v2968_v39 = vsel %vm580_vm4, %v8124_v4, 0.0  ;;  %v2972_v54 = vsel %vm580_vm4, %v8128_v28, 0.0 }
 0x439   : > { %v3018_v30 = vadd.f32 %v3017_v18, %v3016_v49  ;;  %v2967_v20 = vadd.f32 %v2966_v61, %v2965_v24  ;;  %v8144_v12 = vmul.f32 0.0, %v6654_v7  ;;  %v3025_v16 = vsel %vm580_vm4, %v2996_v60, 0.0  ;;  %v2940_v24 = vld [vmem:[%s8832_s12 + $0x8] sm:$0xff] }
 0x43a   : > { %v8139_v23 = vmul.f32 0.0, %v6655_v9  ;;  %v3021_v14 = vsel %vm580_vm4, %v2994_v33, 0.0 }
 0x43b   : > { %v2969_v34 = vadd.f32 %v2968_v39, %v2967_v20  ;;  %v3020_v43 = vadd.f32 %v3019_v62, %v3018_v30  ;;  %v2974_v48 = vsel %vm580_vm4, %v8144_v12, 0.0  ;;  %v2997_v22 = vmul.f32 %v8144_v12, %v8144_v12 }
 0x43c   : > { %v2970_v31 = vsel %vm580_vm4, %v8139_v23, 0.0  ;;  %v2995_v25 = vmul.f32 %v8139_v23, %v8139_v23 }
 0x43d   : > { %v3022_v27 = vadd.f32 %v3021_v14, %v3020_v43  ;;  %v2971_v35 = vadd.f32 %v2970_v31, %v2969_v34  ;;  %v3027_v1 = vsel %vm580_vm4, %v2997_v22, 0.0  ;;  %v3507_v14 = vld [vmem:[%s7399_s30] sm:$0xff]  ;;  %v3508_v31 = vld [vmem:[%s7399_s30 + $0x8] sm:$0xff] }
 0x43e   : > { %v3023_v53 = vsel %vm580_vm4, %v2995_v25, 0.0  ;;  %v3523_v25 = vpack.c.bf16 %v3508_v31, %v3507_v14  ;;  %v6994_v22 = vld [vmem:[%s8827_s7 + $0x28] sm:$0xff]   ;;  %v2944_v31 = vld [vmem:[%s8826_s6] sm:$0x1] }
 0x43f   : > { %v2973_v38 = vadd.f32 %v2972_v54, %v2971_v35  ;;  %v3024_v47 = vadd.f32 %v3023_v53, %v3022_v27  ;;  %v3509_v27 = vld [vmem:[%s7399_s30 + $0x10] sm:$0xff]  ;;  %v3510_v35 = vld [vmem:[%s7399_s30 + $0x18] sm:$0xff]  ;;  %v6993_v54 = vld [vmem:[%s8827_s7 + $0x20] sm:$0xff]  }
 0x440   : > { %v3511_v53 = vld [vmem:[%s7399_s30 + $0x20] sm:$0xff] }
 0x441   : > { %v2975_v21 = vadd.f32 %v2974_v48, %v2973_v38  ;;  %v3026_v56 = vadd.f32 %v3025_v16, %v3024_v47  ;;  %v3512_v38 = vld [vmem:[%s7399_s30 + $0x28] sm:$0xff]  ;;  %v3524_v47 = vpack.c.bf16 %v3510_v35, %v3509_v27  ;;  %v6996_v48 = vld [vmem:[%s8827_s7] sm:$0xff]  }
 0x442   : > { %v3525_v16 = vpack.c.bf16 %v3512_v38, %v3511_v53  ;;  %6364 = vmatprep.subr.bf16.mxu0 %v6996_v48 }
 0x443   : > { %v2976_v59 = vrot.slane %v2975_v21, 4  ;;  %v3028_v0 = vadd.f32 %v3027_v1, %v3026_v56  ;;  %6365 = vmatpush3.bf16.msra.mxu0 %v6996_v48  ;;  %v3513_v56 = vld [vmem:[%s7399_s30 + $0x30] sm:$0xff] }
 0x444   : > { %v6999_v1 = vld [vmem:[%s8827_s7 + $0x10] sm:$0xff]  }
 0x445   : > { %v2977_v57 = vadd.f32 %v2976_v59, %v2975_v21  ;;  %v3029_v36 = vrot.slane %v3028_v0, 4  ;;  %v6998_v21 = vld [vmem:[%s8827_s7 + $0x8] sm:$0xff]   ;;  %v3514_v59 = vld [vmem:[%s7399_s30 + $0x38] sm:$0xff] }
 0x446   : > { %6366 = vmatprep.subr.bf16.mxu0 %v6998_v21 }
 0x447   : > { %v2978_v52 = vrot.slane %v2977_v57, 2  ;;  %v3030_v19 = vadd.f32 %v3029_v36, %v3028_v0  ;;  %v3516_v0 = vld [vmem:[%s7399_s30 + $0x48] sm:$0xff]  ;;  %v3526_v36 = vpack.c.bf16 %v3514_v59, %v3513_v56  ;;  %6367 = vmatpush3.bf16.msra.mxu0 %v6998_v21 }
 0x448   : > { %6368 = vmatprep.subr.bf16.mxu0 %v6999_v1 }
 0x449   : > { %v2979_v40 = vadd.f32 %v2978_v52, %v2977_v57  ;;  %v3031_v5 = vrot.slane %v3030_v19, 2  ;;  %v3515_v57 = vld [vmem:[%s7399_s30 + $0x40] sm:$0xff]  ;;  %v6995_v52 = vld [vmem:[%s8827_s7 + $0x30] sm:$0xff]  }
 0x44b   : > { %v2980_v46 = vrot.slane %v2979_v40, 1  ;;  %v3032_v17 = vadd.f32 %v3031_v5, %v3030_v19  ;;  %6369 = vmatpush3.bf16.msra.mxu0 %v6999_v1  ;;  %v3517_v19 = vld [vmem:[%s7399_s30 + $0x50] sm:$0xff]  ;;  %v3519_v5 = vld [vmem:[%s7399_s30 + $0x60] sm:$0xff] }
 0x44d   : > { %v2981_v2 = vadd.f32 %v2980_v46, %v2979_v40  ;;  %v3033_v18 = vrot.slane %v3032_v17, 1  ;;  %v3527_v40 = vpack.c.bf16 %v3516_v0, %v3515_v57  ;;  %v6997_v46 = vld [vmem:[%s8827_s7 + $0x38] sm:$0xff]  }
 0x44f   : > { %6301 = vmatmul.mubr.msk.f32.vlgmr.msra.gmra.mrb[2].mxu1 %vm580_vm4, %v2981_v2  ;;  %v3518_v2 = vld [vmem:[%s7399_s30 + $0x58] sm:$0xff] }
 0x450   : > { %6618 = vmatpush3.bf16.msra.mxu1 %v7995_v41  ;;  %6319 = vmatprep.mubr.msk.f32.mxu1 %vm7226_vm0, %v7227_v6  ;;  %v2939_v41 = vld [vmem:[%s8832_s12] sm:$0xff] }
 0x451   : > { %6619 = vmatprep.subr.bf16.mxu1 %v7225_v3  ;;  %v6629_v49 = vpack.c.bf16 %v2940_v24, %v2939_v41  ;;  %v3528_v41 = vpack.c.bf16 %v3518_v2, %v3517_v19 }
 0x454   : > { %6621 = vmatpush3.bf16.msra.mxu1 %v8001_v11  ;;  %v3034_v11 = vadd.f32 %v3033_v18, %v3032_v17  ;;  %v3520_v17 = vld [vmem:[%s7399_s30 + $0x68] sm:$0xff]  ;;  %v8241_v18 = vld [vmem:[%s8827_s7 + $0x40] sm:$0xff]  }
 0x455   : > { %6622 = vmatprep.subr.bf16.mxu1 %v7225_v3  ;;  %v3529_v24 = vpack.c.bf16 %v3520_v17, %v3519_v5 }
 0x458   : > { %6624 = vmatpush3.bf16.msra.mxu1 %v8011_v8  ;;  %v2941_v8 = vld [vmem:[%s8832_s12 + $0x10] sm:$0xff] }
 0x459   : > { %6625 = vmatprep.subr.bf16.mxu1 %v7225_v3 }
 0x45c   : > { %6627 = vmatpush3.bf16.msra.mxu1 %v8021_v13  ;;  %v2942_v13 = vld [vmem:[%s8832_s12 + $0x18] sm:$0xff] }
 0x45d   : > { %6628 = vmatprep.subr.bf16.mxu1 %v7225_v3  ;;  %v6632_v55 = vpack.c.bf16 %v2942_v13, %v2941_v8  ;;  %v8248_v13 = vld [vmem:[#allocation3 + $0x8] sm:$0xff] }
 0x45f   : > { %6320 = vmatmul.mubr.msk.f32.vlgmr.msra.gmra.mrb[4].mxu1 %vm580_vm4, %v3034_v11  ;;  %v3522_v11 = vld [vmem:[%s7399_s30 + $0x78] sm:$0xff] }
 0x460   : > { %6630 = vmatpush3.bf16.msra.mxu1 %v6629_v49  ;;  %6330 = vmatprep.mubr.msk.f32.mxu1 %vm7226_vm0, %v7227_v6 }
 0x461   : > { %6631 = vmatprep.subr.bf16.mxu1 %v7225_v3 }
 0x464   : > { %6633 = vmatpush3.bf16.msra.mxu1 %v6632_v55 }
 0x465   : > { %6634 = vmatprep.subr.bf16.mxu1 %v7225_v3 }
 0x522   : > { %v3104_v61 = vpop.f32.mrb[2].mxu1 }
 0x523   : > { %v3108_v33 = vmul.f32 0.0078125, %v3104_v61  ;;  %v6302_v7 = vpop.f32.mrb[3].mxu1 }
 0x524   : > { %v7001_v7 = vld [vmem:[%s8827_s7 + $0x18] sm:$0xff]  }
 0x525   : > { %6331 = vmatmul.mubr.msk.f32.vlgmr.msra.gmra.mrb[6].mxu1 %vm575_vm1, %v3108_v33  ;;  %v3183_v30 = vmul.f32 %v3108_v33, %v3108_v33  ;;  %v3707_v33 = vshll.u32 %v8248_v13, 16  ;;  %6370 = vmatprep.subr.bf16.mxu0 %v7001_v7 }
 0x526   : > { %6636 = vmatpush3.bf16.msra.mxu1 %v6629_v49  ;;  %6341 = vmatprep.mubr.msk.f32.mxu1 %vm7226_vm0, %v7227_v6  ;;  %v6992_v6 = vld [vmem:[%s8833_s13 + $0x8] sm:$0xff]   ;;  %v3521_v49 = vld [vmem:[%s7399_s30 + $0x70] sm:$0xff]  ;;  %s5503_s30 = sshll.u32 %s485_s17, 6 }
 0x527   : > { %6637 = vmatprep.subr.bf16.mxu1 %v7225_v3  ;;  %v6991_v3 = vld [vmem:[%s8833_s13] sm:$0xff]   ;;  %v3530_v8 = vpack.c.bf16 %v3522_v11, %v3521_v49  ;;  %6371 = vmatpush3.bf16.msra.mxu0 %v7001_v7  ;;  %s8750_s23 = scalar_lea.vmem [#allocation4], %s5503_s30  ;;  %s7229_s30 = smov [#allocation4]  }
 0x528   : > { %s5437_s27 = sshll.u32 %s8750_s23, 4  ;;  %s7165_s20 = sshll.u32 %s7229_s30, 4  ;;  %s8771_s27 = int_to_ptr.vmem [resolvable:$true] %s5437_s27  ;;  %s7166_s20 = int_to_ptr.vmem [resolvable:$false] %s7165_s20 }
 0x529   : > { %s7161_s16 = scalar_lea.vmem %s8771_s27, 1024  ;;  %s7167_s25 = scalar_lea.vmem %s7166_s20, 2048 }
 0x52a   : > { %6639 = vmatpush3.bf16.msra.mxu1 %v6632_v55  ;;  %v3704_v55 = vshrl.u32 %v8248_v13, 16  ;;  %p7162_p11 = scmp.ne.s32.totalorder %s8771_s27, %s7161_s16  ;;  %p7168_p0 = scmp.lt.s32.totalorder %s8771_s27, %s7166_s20 }
 0x52b   : > { %6344 = vmatprep.subr.bf16.mxu1 %v6991_v3  ;;  %p7169_p1 = scmp.lt.s32.totalorder %s7167_s25, %s7161_s16 }
 0x52c   : > { %v8256_v61 = vrot.slane %v3704_v55, 7  ;;  %p7163_p12 = pnand %p7162_p11, %p7350_p5 }
 0x52d   : > { %p7170_p2 = por %p7169_p1, %p7168_p0 }
 0x52e   : > { %p7164_p13 = pneg %p7163_p12 }
 0x530   : > { %p7171_p3 = pnand %p7170_p2, %p7164_p13 }
 0x532   : > { %v3178_v9 = vpop.f32.mrb[4].mxu1 }
 0x533   : > { %v3182_v20 = vmul.f32 0.0078125, %v3178_v9  ;;  %v6321_v62 = vpop.f32.mrb[5].mxu1  ;;  %v3682_v9 = vld [vmem:[#allocation3] sm:$0x80] }
 0x535   : > { %v3184_v39 = vsub.f32 %v3182_v20, %v3183_v30  ;;  %v3709_v30 = vor.u32 %v3707_v33, %v8256_v61  ;;  %v3700_v20 = vshrl.u32 %v3682_v9, 16 }
 0x537   : > { %v3185_v60 = vmax.f32 %v3184_v39, 0.0  ;;  %v3702_v62 = vrot.slane %v3700_v20, 7 }
 0x539   : > { %v3186_v34 = vadd.f32 1e-05, %v3185_v60  ;;  %v3710_v39 = vsel %vm1187_vm2, %v3702_v62, %v3709_v30 }
 0x53a   : > { %6372 = vmatprep.mubr.msk.bf16.mxu0 %vm580_vm4, %v3710_v39 }
 0x53b   : > { %7095 = vrsqrt.f32 %v3186_v34 }
 0x545   : > { %v7096_v43 = vpop.eup %7095 }
 0x546   : > { %6342 = vmatmul.mubr.msk.f32.vlgmr.msra.gmra.mrb[8].mxu1 %vm575_vm1, %v7096_v43  ;;  %v2943_v43 = vld [vmem:[%s8825_s5] sm:$0x1] }
 0x547   : > { %6345 = vmatpush3.bf16.msra.mxu1 %v6991_v3  ;;  %6348 = vmatprep.mubr.msk.bf16.mxu1 %vm575_vm1, %v3523_v25 }
 0x548   : > { %6346 = vmatprep.subr.bf16.mxu1 %v6992_v6 }
 0x54b   : > { %6347 = vmatpush3.bf16.msra.mxu1 %v6992_v6 }
 0x54c   : > { %6388 = vmatprep.subr.bf16.mxu1 %v6993_v54 }
 0x54e   : > { %6349 = vmatmul.mubr.msk.bf16.vlgmr.msra.gmra.mrb[12].mxu1 %vm575_vm1, %v3524_v47 }
 0x54f   : > { %6389 = vmatpush3.bf16.msra.mxu1 %v6993_v54  ;;  %6352 = vmatprep.mubr.msk.bf16.mxu1 %vm575_vm1, %v3525_v16 }
 0x550   : > { %6390 = vmatprep.subr.bf16.mxu1 %v6994_v22 }
 0x553   : > { %6391 = vmatpush3.bf16.msra.mxu1 %v6994_v22 }
 0x554   : > { %6392 = vmatprep.subr.bf16.mxu1 %v6995_v52 }
 0x556   : > { %6353 = vmatmul.mubr.msk.bf16.gmra.mrb[16].mxu1 %vm575_vm1, %v3526_v36 }
 0x557   : > { %6356 = vmatprep.mubr.msk.bf16.mxu1 %vm575_vm1, %v3527_v40  ;;  %6393 = vmatpush3.bf16.msra.mxu1 %v6995_v52 }
 0x558   : > { %6394 = vmatprep.subr.bf16.mxu1 %v6997_v46 }
 0x55b   : > { %6395 = vmatpush3.bf16.msra.mxu1 %v6997_v46 }
 0x55c   : > { %6412 = vmatprep.subr.bf16.mxu1 %v8241_v18 }
 0x55e   : > { %6357 = vmatmul.mubr.msk.bf16.gmra.mrb[20].mxu1 %vm575_vm1, %v3528_v41 }
 0x55f   : > { %6360 = vmatprep.mubr.msk.bf16.mxu1 %vm575_vm1, %v3529_v24 }
 0x566   : > { %6361 = vmatmul.mubr.msk.bf16.gmra.mrb[24].mxu1 %vm575_vm1, %v3530_v8 }
 0x567   : > { %6396 = vmatprep.mubr.msk.bf16.mxu1 %vm580_vm4, %v8248_v13 }
 0x5f8   : > { %v3257_v60 = vpop.f32.mrb[6].mxu1 }
 0x5f9   : > { %v6332_v34 = vpop.f32.mrb[7].mxu1 }
 0x619   : > { %v3330_v3 = vpop.f32.mrb[8].mxu1 }
 0x61a   : > { %v3334_v6 = vmul.f32 %v3330_v3, %v2943_v43  ;;  %v6343_v14 = vpop.f32.mrb[9].mxu1 }
 0x61c   : > { %v3335_v25 = vmul.f32 %v3334_v6, %v3257_v60  ;;  %v3340_v27 = vrot.slane %v3334_v6, %v7588_v45 }
 0x61e   : > { %v3336_v35 = vsub.f32 %v2944_v31, %v3335_v25  ;;  %v3341_v54 = vmul.f32 %v8032_v26, %v3340_v27  ;;  %v3342_v53 = vmul.f32 %v3340_v27, %v8043_v37  ;;  %v3343_v38 = vmul.f32 %v8035_v15, %v3340_v27 }
 0x61f   : > { %v3344_v47 = vmul.f32 %v3340_v27, %v8041_v44  ;;  %v3345_v16 = vmul.f32 %v8060_v58, %v3340_v27  ;;  %v3346_v22 = vmul.f32 %v3340_v27, %v8077_v42  ;;  %v3347_v21 = vmul.f32 %v8064_v63, %v3340_v27 }
 0x620   : > { %v3361_v48 = vrot.slane %v3336_v35, %v7588_v45  ;;  %v3348_v56 = vmul.f32 %v3340_v27, %v8075_v32  ;;  %v3349_v59 = vmul.f32 %v8092_v29, %v3340_v27  ;;  %v3350_v26 = vmul.f32 %v3340_v27, %v8109_v51 }
 0x621   : > { %v3351_v37 = vmul.f32 %v8096_v10, %v3340_v27  ;;  %v3352_v15 = vmul.f32 %v3340_v27, %v8107_v50  ;;  %v3353_v40 = vmul.f32 %v8124_v4, %v3340_v27  ;;  %v3354_v49 = vmul.f32 %v3340_v27, %v8139_v23 }
 0x622   : > { %v8287_v1 = vadd.f32 %v3361_v48, %v3341_v54  ;;  %v8289_v44 = vadd.f32 %v3361_v48, %v3342_v53  ;;  %v8291_v58 = vadd.f32 %v3361_v48, %v3343_v38  ;;  %v8293_v45 = vadd.f32 %v3361_v48, %v3344_v47 }
 0x623   : > { %v8295_v42 = vadd.f32 %v3361_v48, %v3345_v16  ;;  %v8297_v63 = vadd.f32 %v3361_v48, %v3346_v22  ;;  %v8299_v32 = vadd.f32 %v3361_v48, %v3347_v21  ;;  %v8301_v29 = vadd.f32 %v3361_v48, %v3348_v56 }
 0x624   : > { %v3379_v10 = vsub.f32 0.0, %v8287_v1  ;;  %v3380_v50 = vsub.f32 0.0, %v8289_v44  ;;  %v3381_v51 = vsub.f32 0.0, %v8291_v58  ;;  %v3382_v57 = vsub.f32 0.0, %v8293_v45 }
 0x625   : > { %v3383_v0 = vsub.f32 0.0, %v8295_v42  ;;  %v3384_v52 = vsub.f32 0.0, %v8297_v63  ;;  %v3385_v36 = vsub.f32 0.0, %v8299_v32  ;;  %v8311_v5 = vadd.f32 %v3361_v48, %v3349_v59 }
 0x626   : > { %v3395_v46 = vmul.f32 1.442695, %v3379_v10  ;;  %v3397_v19 = vmul.f32 1.442695, %v3380_v50  ;;  %v3399_v2 = vmul.f32 1.442695, %v3381_v51  ;;  %v8314_v24 = vadd.f32 %v3361_v48, %v3350_v26 }
 0x627   : > { %v3401_v17 = vmul.f32 1.442695, %v3382_v57  ;;  %v3386_v41 = vsub.f32 0.0, %v8301_v29  ;;  %v3403_v11 = vmul.f32 1.442695, %v3383_v0  ;;  %v3387_v7 = vsub.f32 0.0, %v8311_v5 }
 0x628   : > { %7097 = vpow2.f32 %v3395_v46  ;;  %v3405_v8 = vmul.f32 1.442695, %v3384_v52  ;;  %v3388_v4 = vsub.f32 0.0, %v8314_v24  ;;  %v8319_v9 = vadd.f32 %v3361_v48, %v3351_v37 }
 0x629   : > { %7099 = vpow2.f32 %v3397_v19  ;;  %v8321_v30 = vadd.f32 %v3361_v48, %v3352_v15  ;;  %v3407_v20 = vmul.f32 1.442695, %v3385_v36  ;;  %v8323_v62 = vadd.f32 %v3361_v48, %v3353_v40 }
 0x62a   : > { %7101 = vpow2.f32 %v3399_v2  ;;  %v8325_v39 = vadd.f32 %v3361_v48, %v3354_v49  ;;  %v3409_v23 = vmul.f32 1.442695, %v3386_v41  ;;  %v3389_v60 = vsub.f32 0.0, %v8319_v9 }
 0x62b   : > { %7103 = vpow2.f32 %v3401_v17  ;;  %v3390_v34 = vsub.f32 0.0, %v8321_v30  ;;  %v3411_v43 = vmul.f32 1.442695, %v3387_v7  ;;  %v3391_v3 = vsub.f32 0.0, %v8323_v62 }
 0x62c   : > { %7105 = vpow2.f32 %v3403_v11  ;;  %v3355_v6 = vmul.f32 %v8128_v28, %v3340_v27  ;;  %v3413_v14 = vmul.f32 1.442695, %v3388_v4  ;;  %v3356_v31 = vmul.f32 %v3340_v27, %v8144_v12 }
 0x62d   : > { %7107 = vpow2.f32 %v3405_v8  ;;  %v3415_v25 = vmul.f32 1.442695, %v3389_v60  ;;  %v3417_v54 = vmul.f32 1.442695, %v3390_v34  ;;  %v3419_v38 = vmul.f32 1.442695, %v3391_v3 }
 0x62e   : > { %7109 = vpow2.f32 %v3407_v20  ;;  %v8332_v35 = vadd.f32 %v3361_v48, %v3355_v6  ;;  %v8334_v53 = vadd.f32 %v3361_v48, %v3356_v31  ;;  %v3392_v51 = vsub.f32 0.0, %v8325_v39 }
 0x62f   : > { %7111 = vpow2.f32 %v3409_v23 }
 0x630   : > { %7113 = vpow2.f32 %v3411_v43  ;;  %v3393_v40 = vsub.f32 0.0, %v8332_v35  ;;  %v3394_v2 = vsub.f32 0.0, %v8334_v53  ;;  %v3421_v49 = vmul.f32 1.442695, %v3392_v51 }
 0x631   : > { %7115 = vpow2.f32 %v3413_v14 }
 0x632   : > { %v7098_v47 = vpop.eup %7097  ;;  %7117 = vpow2.f32 %v3415_v25  ;;  %v3423_v4 = vmul.f32 1.442695, %v3393_v40  ;;  %v3425_v23 = vmul.f32 1.442695, %v3394_v2 }
 0x633   : > { %v7100_v16 = vpop.eup %7099  ;;  %v3427_v22 = vadd.f32 1.0, %v7098_v47  ;;  %7119 = vpow2.f32 %v3417_v54 }
 0x634   : > { %v7102_v28 = vpop.eup %7101  ;;  %v3428_v21 = vadd.f32 1.0, %v7100_v16  ;;  %7121 = vpow2.f32 %v3419_v38 }
 0x635   : > { %v7104_v12 = vpop.eup %7103  ;;  %7123 = vrcp.f32 %v3427_v22  ;;  %v3429_v27 = vadd.f32 1.0, %v7102_v28 }
 0x636   : > { %v7106_v56 = vpop.eup %7105  ;;  %7125 = vrcp.f32 %v3428_v21  ;;  %v3430_v59 = vadd.f32 1.0, %v7104_v12 }
 0x637   : > { %v7108_v26 = vpop.eup %7107  ;;  %7127 = vrcp.f32 %v3429_v27  ;;  %v3431_v48 = vadd.f32 1.0, %v7106_v56 }
 0x638   : > { %v7110_v37 = vpop.eup %7109  ;;  %7129 = vrcp.f32 %v3430_v59  ;;  %v3432_v15 = vadd.f32 1.0, %v7108_v26 }
 0x639   : > { %v7112_v10 = vpop.eup %7111  ;;  %7131 = vrcp.f32 %v3431_v48  ;;  %v3433_v50 = vadd.f32 1.0, %v7110_v37 }
 0x63a   : > { %v7114_v57 = vpop.eup %7113  ;;  %7133 = vrcp.f32 %v3432_v15  ;;  %v3434_v0 = vadd.f32 1.0, %v7112_v10 }
 0x63b   : > { %v7116_v52 = vpop.eup %7115  ;;  %7135 = vrcp.f32 %v3433_v50  ;;  %v3435_v36 = vadd.f32 1.0, %v7114_v57 }
 0x63c   : > { %v7118_v46 = vpop.eup %7117  ;;  %7137 = vrcp.f32 %v3434_v0  ;;  %v3436_v19 = vadd.f32 1.0, %v7116_v52 }
 0x63d   : > { %v7120_v17 = vpop.eup %7119  ;;  %7139 = vrcp.f32 %v3435_v36  ;;  %v3437_v41 = vadd.f32 1.0, %v7118_v46 }
 0x63e   : > { %v7122_v11 = vpop.eup %7121  ;;  %7141 = vrcp.f32 %v3436_v19  ;;  %v3438_v8 = vadd.f32 1.0, %v7120_v17 }
 0x63f   : > { %v7124_v7 = vpop.eup %7123  ;;  %7143 = vrcp.f32 %v3437_v41  ;;  %v3439_v37 = vadd.f32 1.0, %v7122_v11 }
 0x640   : > { %v7126_v20 = vpop.eup %7125  ;;  %7145 = vrcp.f32 %v3438_v8  ;;  %v3459_v6 = vmul.f32 %v7124_v7, %v8287_v1 }
 0x641   : > { %v7128_v60 = vpop.eup %7127  ;;  %v3460_v34 = vmul.f32 %v7126_v20, %v8289_v44  ;;  %7147 = vpow2.f32 %v3421_v49  ;;  %v7003_v49 = vld [vmem:[%s8827_s7 + $0x50] sm:$0xff]  }
 0x642   : > { %v7130_v43 = vpop.eup %7129  ;;  %7149 = vpow2.f32 %v3423_v4  ;;  %v3461_v47 = vmul.f32 %v7128_v60, %v8291_v58 }
 0x643   : > { %v7132_v3 = vpop.eup %7131  ;;  %v3476_v14 = vmul.f32 0.0, %v3460_v34  ;;  %v3462_v31 = vmul.f32 %v7130_v43, %v8293_v45  ;;  %7151 = vpow2.f32 %v3425_v23 }
 0x644   : > { %v7134_v25 = vpop.eup %7133  ;;  %v3463_v1 = vmul.f32 %v7132_v3, %v8295_v42 }
 0x645   : > { %v7136_v54 = vpop.eup %7135  ;;  %v3491_v38 = vpack.c.bf16 %v3476_v14, %v3459_v6  ;;  %v3478_v16 = vmul.f32 0.0, %v3462_v31  ;;  %v3464_v22 = vmul.f32 %v7134_v25, %v8297_v63  ;;  %v7004_v14 = vld [vmem:[%s8827_s7 + $0x58] sm:$0xff]   ;;  %v4079_v31 = vrot.slane %v3707_v33, 1 }
 0x646   : > { %v7138_v28 = vpop.eup %7137  ;;  %v3465_v58 = vmul.f32 %v7136_v54, %v8299_v32  ;;  %v7002_v32 = vld [vmem:[%s8827_s7 + $0x48] sm:$0xff]  }
 0x647   : > { %v7140_v44 = vpop.eup %7139  ;;  %3499 = vst.msk [vmem:[#allocation3 + $0x10] sm:$0xff] %vm580_vm4, %v3491_v38  ;;  %v3492_v21 = vpack.c.bf16 %v3478_v16, %v3461_v47  ;;  %v3480_v12 = vmul.f32 0.0, %v3464_v22  ;;  %v3466_v45 = vmul.f32 %v7138_v28, %v8301_v29 }
 0x648   : > { %v7142_v27 = vpop.eup %7141  ;;  %v3467_v42 = vmul.f32 %v7140_v44, %v8311_v5 }
 0x649   : > { %v7144_v56 = vpop.eup %7143  ;;  %3500 = vst.msk [vmem:[#allocation3 + $0x18] sm:$0xff] %vm580_vm4, %v3492_v21  ;;  %v3493_v59 = vpack.c.bf16 %v3480_v12, %v3463_v1  ;;  %v3482_v26 = vmul.f32 0.0, %v3466_v45  ;;  %v3468_v63 = vmul.f32 %v7142_v27, %v8314_v24  ;;  %v8425_v12 = vld [vmem:[%s8827_s7 + $0x60] sm:$0xff]  }
 0x64a   : > { %v7146_v48 = vpop.eup %7145  ;;  %v3469_v0 = vmul.f32 %v7144_v56, %v8319_v9  ;;  %v4080_v56 = vor.u32 %v4079_v31, %v3704_v55 }
 0x64b   : > { %v7148_v15 = vpop.eup %7147  ;;  %3501 = vst.msk [vmem:[#allocation3 + $0x20] sm:$0xff] %vm580_vm4, %v3493_v59  ;;  %v3494_v10 = vpack.c.bf16 %v3482_v26, %v3465_v58  ;;  %v3484_v50 = vmul.f32 0.0, %v3468_v63  ;;  %v3470_v29 = vmul.f32 %v7146_v48, %v8321_v30 }
 0x64c   : > { %v3440_v51 = vadd.f32 1.0, %v7148_v15  ;;  %v7150_v57 = vpop.eup %7149 }
 0x64d   : > { %3502 = vst.msk [vmem:[#allocation3 + $0x28] sm:$0xff] %vm580_vm4, %v3494_v10  ;;  %v3495_v24 = vpack.c.bf16 %v3484_v50, %v3467_v42  ;;  %v3486_v52 = vmul.f32 0.0, %v3470_v29  ;;  %v7152_v36 = vpop.eup %7151  ;;  %v3441_v5 = vadd.f32 1.0, %v7150_v57 }
 0x64e   : > { %v8358_v40 = vld [vmem:[#allocation3 + $0x10] sm:$0xff]  ;;  %7153 = vrcp.f32 %v3440_v51  ;;  %v3442_v19 = vadd.f32 1.0, %v7152_v36 }
 0x64f   : > { %v3712_v46 = vshrl.u32 %v8358_v40, 16  ;;  %6397 = vmatmul.mubr.msk.bf16.vlgmr.msra.gmra.mrb[28].mxu1 %vm580_vm4, %v8358_v40  ;;  %3503 = vst.msk [vmem:[#allocation3 + $0x30] sm:$0xff] %vm580_vm4, %v3495_v24  ;;  %v3496_v30 = vpack.c.bf16 %v3486_v52, %v3469_v0  ;;  %7155 = vrcp.f32 %v3439_v37  ;;  %v3715_v17 = vshll.u32 %v8358_v40, 16 }
 0x650   : > { %6413 = vmatpush3.bf16.msra.mxu1 %v8241_v18  ;;  %v8365_v2 = vld [vmem:[#allocation3 + $0x18] sm:$0xff]  ;;  %7157 = vrcp.f32 %v3441_v5 }
 0x651   : > { %v3714_v9 = vrot.slane %v3712_v46, 7  ;;  %v3720_v41 = vshrl.u32 %v8365_v2, 16  ;;  %6400 = vmatprep.mubr.msk.bf16.mxu1 %vm580_vm4, %v8365_v2  ;;  %6414 = vmatprep.subr.bf16.mxu1 %v7002_v32  ;;  %3504 = vst.msk [vmem:[#allocation3 + $0x38] sm:$0xff] %vm580_vm4, %v3496_v30  ;;  %7159 = vrcp.f32 %v3442_v19  ;;  %v3723_v7 = vshll.u32 %v8365_v2, 16 }
 0x652   : > { %v8377_v18 = vld [vmem:[#allocation3 + $0x20] sm:$0xff]  ;;  %v4084_v48 = vrot.slane %v3715_v17, 1 }
 0x653   : > { %v8379_v11 = vor.u32 %v3715_v17, %v3714_v9  ;;  %v3722_v8 = vrot.slane %v3720_v41, 7  ;;  %v3728_v4 = vshrl.u32 %v8377_v18, 16  ;;  %v3731_v3 = vshll.u32 %v8377_v18, 16 }
 0x654   : > { %6415 = vmatpush3.bf16.msra.mxu1 %v7002_v32  ;;  %v8385_v20 = vld [vmem:[#allocation3 + $0x28] sm:$0xff]  ;;  %v4648_v10 = vrot.slane %v3723_v7, 1  ;;  %v4085_v24 = vsel %vm1569_vm3, %v4080_v56, %v4084_v48 }
 0x655   : > { %v8387_v23 = vor.u32 %v3723_v7, %v3722_v8  ;;  %v3718_v60 = vsel %vm1187_vm2, %v8256_v61, %v8379_v11  ;;  %v3730_v34 = vrot.slane %v3728_v4, 7  ;;  %v3736_v43 = vshrl.u32 %v8385_v20, 16  ;;  %6416 = vmatprep.subr.bf16.mxu1 %v7003_v49 }
 0x656   : > { %6373 = vmatmul.mubr.msk.bf16.vlgmr.msra.gmra.mrb[24].mxu0 %vm580_vm4, %v3718_v60  ;;  %v8397_v6 = vld [vmem:[#allocation3 + $0x30] sm:$0xff]  ;;  %v3739_v54 = vshll.u32 %v8385_v20, 16  ;;  %v8446_v50 = vrot.slane %v3731_v3, 1  ;;  %v4652_v57 = vor.u32 %v4648_v10, %v3720_v41 }
 0x657   : > { %v8406_v61 = vsel %vm1187_vm2, %v3714_v9, %v8387_v23  ;;  %6401 = vmatmul.mubr.msk.bf16.gmra.mrb[32].mxu1 %vm580_vm4, %v8377_v18  ;;  %v3738_v25 = vrot.slane %v3736_v43, 7  ;;  %v3744_v38 = vshrl.u32 %v8397_v6, 16  ;;  %v3733_v22 = vor.u32 %v3731_v3, %v3730_v34 }
 0x658   : > { %v7154_v47 = vpop.eup %7153  ;;  %6376 = vmatprep.mubr.msk.bf16.mxu0 %vm580_vm4, %v8406_v61  ;;  %6404 = vmatprep.mubr.msk.bf16.mxu1 %vm580_vm4, %v8385_v20  ;;  %v8418_v33 = vld [vmem:[#allocation3 + $0x38] sm:$0xff]  ;;  %v3747_v58 = vshll.u32 %v8397_v6, 16  ;;  %v4660_v5 = vor.u32 %v8446_v50, %v3728_v4 }
 0x659   : > { %v7156_v16 = vpop.eup %7155  ;;  %v3741_v28 = vor.u32 %v3739_v54, %v3738_v25  ;;  %6417 = vmatpush3.bf16.msra.mxu1 %v7003_v49  ;;  %v3752_v44 = vshrl.u32 %v8418_v33, 16  ;;  %v3746_v21 = vrot.slane %v3744_v38, 7  ;;  %v3472_v1 = vmul.f32 %v7154_v47, %v8325_v39  ;;  %v7006_v47 = vld [vmem:[%s8827_s7 + $0x68] sm:$0xff]  }
 0x65a   : > { %6418 = vmatprep.subr.bf16.mxu1 %v7004_v14  ;;  %v7158_v45 = vpop.eup %7157  ;;  %v3471_v26 = vmul.f32 %v7156_v16, %v8323_v62  ;;  %v8432_v37 = vsel %vm1187_vm2, %v3722_v8, %v3733_v22  ;;  %v3755_v15 = vshll.u32 %v8418_v33, 16  ;;  %v4672_v30 = vrot.slane %v3747_v58, 1 }
 0x65b   : > { %v3754_v27 = vrot.slane %v3752_v44, 7  ;;  %v7160_v59 = vpop.eup %7159  ;;  %v3488_v63 = vmul.f32 0.0, %v3472_v1  ;;  %v8435_v39 = vsel %vm1187_vm2, %v3730_v34, %v3741_v28  ;;  %v3749_v13 = vor.u32 %v3747_v58, %v3746_v21  ;;  %v4287_v58 = vld [vmem:[#allocation3 + $0x8] sm:$0x80] }
 0x65c   : > { %v3474_v62 = vmul.f32 %v7160_v59, %v8334_v53  ;;  %v3473_v29 = vmul.f32 %v7158_v45, %v8332_v35  ;;  %v4644_v53 = vor.u32 %v4084_v48, %v3712_v46  ;;  %v8468_v35 = vsel %vm1569_vm3, %v4652_v57, %v8446_v50  ;;  %v7009_v59 = vld [vmem:[%s8827_s7 + $0x80] sm:$0xff]  }
 0x65d   : > { %6419 = vmatpush3.bf16.msra.mxu1 %v7004_v14  ;;  %v3497_v55 = vpack.c.bf16 %v3488_v63, %v3471_v26  ;;  %v3757_v42 = vor.u32 %v3755_v15, %v3754_v27  ;;  %v8457_v32 = vsel %vm1187_vm2, %v3738_v25, %v3749_v13  ;;  %v4664_v46 = vrot.slane %v3739_v54, 1  ;;  %v8540_v26 = vpop.f32.mrb[12].mxu1 }
 0x65e   : > { %6377 = vmatmul.mubr.msk.bf16.gmra.mrb[28].mxu0 %vm580_vm4, %v8432_v37  ;;  %6436 = vmatprep.subr.bf16.mxu1 %v8425_v12  ;;  %v3490_v51 = vmul.f32 0.0, %v3474_v62  ;;  %v8464_v36 = vsel %vm1569_vm3, %v4644_v53, %v4648_v10  ;;  %v4680_v19 = vrot.slane %v3755_v15, 1  ;;  %v4676_v41 = vor.u32 %v4672_v30, %v3744_v38  ;;  %v8544_v15 = vpop.f32.mrb[13].mxu1 }
 0x65f   : > { %6380 = vmatprep.mubr.msk.bf16.mxu0 %vm580_vm4, %v8435_v39  ;;  %6405 = vmatmul.mubr.msk.bf16.gmra.mrb[36].mxu1 %vm580_vm4, %v8397_v6  ;;  %3505 = vst.msk [vmem:[#allocation3 + $0x40] sm:$0xff] %vm580_vm4, %v3497_v55  ;;  %v8461_v52 = vsel %vm1187_vm2, %v3746_v21, %v3757_v42  ;;  %v8477_v9 = vsel %vm1569_vm3, %v4660_v5, %v4664_v46  ;;  %v4299_v48 = vshrl.u32 %v4287_v58, 16  ;;  %v6351_v55 = vpop.f32.mrb[14].mxu1 }
 0x660   : > { %6408 = vmatprep.mubr.msk.bf16.mxu1 %vm580_vm4, %v8418_v33  ;;  %v3498_v0 = vpack.c.bf16 %v3490_v51, %v3473_v29  ;;  %v4668_v17 = vor.u32 %v4664_v46, %v3736_v43  ;;  %v4684_v49 = vor.u32 %v4680_v19, %v3752_v44  ;;  %v8493_v34 = vsel %vm1569_vm3, %v4676_v41, %v4680_v19  ;;  %v7007_v44 = vld [vmem:[%s8827_s7 + $0x70] sm:$0xff]   ;;  %v3615_v62 = vpop.f32.mrb[15].mxu1  ;;  %v7010_v46 = vld [vmem:[%s8827_s7 + $0x88] sm:$0xff]  }
 0x661   : > { %v4301_v10 = vrot.slane %v4299_v48, 7  ;;  %v8548_v29 = vpop.f32.mrb[16].mxu1  ;;  %v7022_v48 = vld [vmem:[%s8827_s7 + $0xe8] sm:$0xff]   ;;  %v8666_v55 = vld [vmem:[#allocation3 + $0x50] sm:$0xff] }
 0x662   : > { %3506 = vst.msk [vmem:[#allocation3 + $0x48] sm:$0xff] %vm580_vm4, %v3498_v0  ;;  %v8490_v60 = vsel %vm1569_vm3, %v4668_v17, %v4672_v30  ;;  %v8554_v57 = vpop.f32.mrb[17].mxu1  ;;  %v7011_v30 = vld [vmem:[%s8827_s7 + $0x90] sm:$0xff]  }
 0x663   : > { %v4304_v53 = vsel %vm1187_vm2, %v4301_v10, %v8379_v11 }
 0x666   : > { %6381 = vmatmul.mubr.msk.bf16.gmra.mrb[32].mxu0 %vm580_vm4, %v8457_v32  ;;  %v8483_v8 = vld [vmem:[#allocation3 + $0x40] sm:$0xff] }
 0x667   : > { %6384 = vmatprep.mubr.msk.bf16.mxu0 %vm580_vm4, %v8461_v52  ;;  %v3760_v7 = vshrl.u32 %v8483_v8, 16  ;;  %v3763_v4 = vshll.u32 %v8483_v8, 16  ;;  %6409 = vmatmul.mubr.msk.bf16.gmra.mrb[40].mxu1 %vm580_vm4, %v8483_v8 }
 0x668   : > { %6420 = vmatprep.mubr.msk.bf16.mxu1 %vm580_vm4, %v4085_v24  ;;  %v6355_v24 = vpop.f32.mrb[18].mxu1 }
 0x669   : > { %v3762_v43 = vrot.slane %v3760_v7, 7  ;;  %v4688_v3 = vrot.slane %v3763_v4, 1  ;;  %v8496_v14 = vld [vmem:[#allocation3 + $0x48] sm:$0xff]  ;;  %v3629_v0 = vpop.f32.mrb[19].mxu1  ;;  %v5640_v24 = vld [vmem:[%s8828_s8] ss:$0 sm:$0xff] }
 0x66a   : > { %v4324_v25 = vshrl.u32 %v8496_v14, 16  ;;  %v4327_v28 = vshll.u32 %v8496_v14, 16  ;;  %v4065_v63 = vld [vmem:[#allocation3 + $0x48] sm:$0x1]  ;;  %v8557_v5 = vpop.f32.mrb[20].mxu1 }
 0x66b   : > { %v3765_v31 = vor.u32 %v3763_v4, %v3762_v43  ;;  %v8500_v54 = vsel %vm1569_vm3, %v4684_v49, %v4688_v3  ;;  %v4692_v16 = vor.u32 %v4688_v3, %v3760_v7  ;;  %v4138_v13 = vshll.u32 %v4065_v63, 16  ;;  %v8566_v11 = vpop.f32.mrb[21].mxu1  ;;  %v7013_v4 = vld [vmem:[%s8827_s7 + $0xa0] sm:$0xff]   ;;  %v7014_v3 = vld [vmem:[%s8827_s7 + $0xa8] sm:$0xff]  }
 0x66c   : > { %v8510_v22 = vrot.slane %v4324_v25, 7  ;;  %v5252_v45 = vrot.slane %v4327_v28, 1  ;;  %v6359_v19 = vpop.f32.mrb[22].mxu1 }
 0x66d   : > { %v8503_v38 = vsel %vm1187_vm2, %v3754_v27, %v3765_v31  ;;  %v4140_v42 = vrot.slane %v4138_v13, 1  ;;  %v3643_v17 = vpop.f32.mrb[23].mxu1  ;;  %v7015_v31 = vld [vmem:[%s8827_s7 + $0xb0] sm:$0xff]  }
 0x66e   : > { %6385 = vmatmul.mubr.msk.bf16.gmra.mrb[36].mxu0 %vm580_vm4, %v8503_v38  ;;  %v4885_v21 = vor.u32 %v4327_v28, %v8510_v22  ;;  %v8529_v27 = vsel %vm1569_vm3, %v4692_v16, %v5252_v45  ;;  %v8531_v56 = vor.u32 %v5252_v45, %v4324_v25  ;;  %v8571_v41 = vpop.f32.mrb[24].mxu1  ;;  %v7017_v25 = vld [vmem:[%s8827_s7 + $0xc0] sm:$0xff]   ;;  %v4629_v28 = vld [vmem:[#allocation3 + $0x50] sm:$0x1] }
 0x66f   : > { %6421 = vmatmul.mubr.msk.bf16.vlgmr.msra.gmra.mrb[28].mxu1 %vm580_vm4, %v8464_v36  ;;  %v4141_v51 = vsel %vm1569_vm3, %v4692_v16, %v4140_v42  ;;  %v8578_v49 = vpop.f32.mrb[25].mxu1  ;;  %v7019_v16 = vld [vmem:[%s8827_s7 + $0xd0] sm:$0xff]   ;;  %v7026_v42 = vld [vmem:[%s8827_s7 + $0x108] sm:$0xff]  }
 0x670   : > { %6437 = vmatpush3.bf16.msra.mxu1 %v8425_v12  ;;  %6424 = vmatprep.mubr.msk.bf16.mxu1 %vm580_vm4, %v8468_v35  ;;  %v8523_v1 = vsel %vm1187_vm2, %v3762_v43, %v4885_v21  ;;  %v7008_v12 = vld [vmem:[%s8827_s7 + $0x78] sm:$0xff]   ;;  %v6363_v7 = vpop.f32.mrb[26].mxu1  ;;  %v4851_v21 = vld [vmem:[#allocation3 + $0x10] sm:$0x80] }
 0x671   : > { %6438 = vmatprep.subr.bf16.mxu1 %v7006_v47  ;;  %v3657_v43 = vpop.f32.mrb[27].mxu1  ;;  %v4863_v45 = vshrl.u32 %v4851_v21, 16  ;;  %v7023_v13 = vld [vmem:[%s8827_s7 + $0xf0] sm:$0xff]  }
 0x674   : > { %6439 = vmatpush3.bf16.msra.mxu1 %v7006_v47  ;;  %v7018_v47 = vld [vmem:[%s8827_s7 + $0xc8] sm:$0xff]  }
 0x675   : > { %6440 = vmatprep.subr.bf16.mxu1 %v7007_v44 }
 0x677   : > { %6425 = vmatmul.mubr.msk.bf16.gmra.mrb[32].mxu1 %vm580_vm4, %v8477_v9 }
 0x678   : > { %6428 = vmatprep.mubr.msk.bf16.mxu1 %vm580_vm4, %v8490_v60  ;;  %6441 = vmatpush3.bf16.msra.mxu1 %v7007_v44  ;;  %v4702_v44 = vshll.u32 %v4629_v28, 16  ;;  %v5193_v28 = vld [vmem:[#allocation3 + $0x58] sm:$0x1] }
 0x679   : > { %6442 = vmatprep.subr.bf16.mxu1 %v7008_v12 }
 0x67c   : > { %6443 = vmatpush3.bf16.msra.mxu1 %v7008_v12  ;;  %v4704_v12 = vrot.slane %v4702_v44, 1 }
 0x67d   : > { %6460 = vmatprep.subr.bf16.mxu1 %v7009_v59 }
 0x67e   : > { %v4705_v58 = vsel %vm1569_vm3, %v8531_v56, %v4704_v12  ;;  %v5266_v12 = vshll.u32 %v5193_v28, 16 }
 0x67f   : > { %6429 = vmatmul.mubr.msk.bf16.gmra.mrb[36].mxu1 %vm580_vm4, %v8493_v34 }
 0x680   : > { %6432 = vmatprep.mubr.msk.bf16.mxu1 %vm580_vm4, %v8500_v54 }
 0x687   : > { %6433 = vmatmul.mubr.msk.bf16.gmra.mrb[40].mxu1 %vm580_vm4, %v4141_v51 }
 0x688   : > { %6444 = vmatprep.mubr.msk.bf16.mxu1 %vm580_vm4, %v4304_v53 }
 0x68f   : > { %6445 = vmatmul.mubr.msk.bf16.vlgmr.msra.gmra.mrb[28].mxu1 %vm580_vm4, %v8406_v61  ;;  %v7012_v61 = vld [vmem:[%s8827_s7 + $0x98] sm:$0xff]  }
 0x690   : > { %6461 = vmatpush3.bf16.msra.mxu1 %v7009_v59  ;;  %6448 = vmatprep.mubr.msk.bf16.mxu1 %vm580_vm4, %v8432_v37  ;;  %v4865_v59 = vrot.slane %v4863_v45, 7 }
 0x691   : > { %6462 = vmatprep.subr.bf16.mxu1 %v7010_v46 }
 0x692   : > { %v4868_v63 = vsel %vm1187_vm2, %v4865_v59, %v8387_v23  ;;  %v7024_v23 = vld [vmem:[%s8827_s7 + $0xf8] sm:$0xff]  }
 0x694   : > { %6463 = vmatpush3.bf16.msra.mxu1 %v7010_v46 }
 0x695   : > { %6464 = vmatprep.subr.bf16.mxu1 %v7011_v30 }
 0x697   : > { %6449 = vmatmul.mubr.msk.bf16.gmra.mrb[32].mxu1 %vm580_vm4, %v8435_v39 }
 0x698   : > { %6452 = vmatprep.mubr.msk.bf16.mxu1 %vm580_vm4, %v8457_v32  ;;  %6465 = vmatpush3.bf16.msra.mxu1 %v7011_v30 }
 0x699   : > { %6466 = vmatprep.subr.bf16.mxu1 %v7012_v61 }
 0x69c   : > { %6467 = vmatpush3.bf16.msra.mxu1 %v7012_v61 }
 0x69d   : > { %6484 = vmatprep.subr.bf16.mxu1 %v7013_v4 }
 0x69f   : > { %6453 = vmatmul.mubr.msk.bf16.gmra.mrb[36].mxu1 %vm580_vm4, %v8461_v52 }
 0x6a0   : > { %6456 = vmatprep.mubr.msk.bf16.mxu1 %vm580_vm4, %v8503_v38 }
 0x6a7   : > { %6457 = vmatmul.mubr.msk.bf16.gmra.mrb[40].mxu1 %vm580_vm4, %v8523_v1 }
 0x6a8   : > { %6468 = vmatprep.mubr.msk.bf16.mxu1 %vm580_vm4, %v8358_v40  ;;  %v7016_v40 = vld [vmem:[%s8827_s7 + $0xb8] sm:$0xff]  }
 0x6af   : > { %6469 = vmatmul.mubr.msk.bf16.vlgmr.msra.gmra.mrb[28].mxu1 %vm580_vm4, %v8365_v2 }
 0x6b0   : > { %6485 = vmatpush3.bf16.msra.mxu1 %v7013_v4  ;;  %6472 = vmatprep.mubr.msk.bf16.mxu1 %vm580_vm4, %v8377_v18 }
 0x6b1   : > { %6486 = vmatprep.subr.bf16.mxu1 %v7014_v3 }
 0x6b4   : > { %6487 = vmatpush3.bf16.msra.mxu1 %v7014_v3 }
 0x6b5   : > { %6488 = vmatprep.subr.bf16.mxu1 %v7015_v31 }
 0x6b7   : > { %6473 = vmatmul.mubr.msk.bf16.gmra.mrb[32].mxu1 %vm580_vm4, %v8385_v20 }
 0x6b8   : > { %6476 = vmatprep.mubr.msk.bf16.mxu1 %vm580_vm4, %v8397_v6  ;;  %6489 = vmatpush3.bf16.msra.mxu1 %v7015_v31 }
 0x6b9   : > { %6490 = vmatprep.subr.bf16.mxu1 %v7016_v40 }
 0x6bc   : > { %6491 = vmatpush3.bf16.msra.mxu1 %v7016_v40 }
 0x6bd   : > { %6508 = vmatprep.subr.bf16.mxu1 %v7017_v25 }
 0x6bf   : > { %6477 = vmatmul.mubr.msk.bf16.gmra.mrb[36].mxu1 %vm580_vm4, %v8418_v33 }
 0x6c0   : > { %6480 = vmatprep.mubr.msk.bf16.mxu1 %vm580_vm4, %v8483_v8 }
 0x6c7   : > { %6481 = vmatmul.mubr.msk.bf16.gmra.mrb[40].mxu1 %vm580_vm4, %v8496_v14 }
 0x6c8   : > { %6492 = vmatprep.mubr.msk.bf16.mxu1 %vm580_vm4, %v8464_v36  ;;  %v7020_v36 = vld [vmem:[%s8827_s7 + $0xd8] sm:$0xff]  }
 0x6cf   : > { %6493 = vmatmul.mubr.msk.bf16.vlgmr.msra.gmra.mrb[28].mxu1 %vm580_vm4, %v8468_v35  ;;  %v7021_v35 = vld [vmem:[%s8827_s7 + $0xe0] sm:$0xff]  }
 0x6d0   : > { %6509 = vmatpush3.bf16.msra.mxu1 %v7017_v25  ;;  %6496 = vmatprep.mubr.msk.bf16.mxu1 %vm580_vm4, %v8477_v9 }
 0x6d1   : > { %6510 = vmatprep.subr.bf16.mxu1 %v7018_v47 }
 0x6d4   : > { %6511 = vmatpush3.bf16.msra.mxu1 %v7018_v47 }
 0x6d5   : > { %6512 = vmatprep.subr.bf16.mxu1 %v7019_v16 }
 0x6d7   : > { %6497 = vmatmul.mubr.msk.bf16.gmra.mrb[32].mxu1 %vm580_vm4, %v8490_v60 }
 0x6d8   : > { %6500 = vmatprep.mubr.msk.bf16.mxu1 %vm580_vm4, %v8493_v34  ;;  %6513 = vmatpush3.bf16.msra.mxu1 %v7019_v16 }
 0x6d9   : > { %6514 = vmatprep.subr.bf16.mxu1 %v7020_v36 }
 0x6dc   : > { %6515 = vmatpush3.bf16.msra.mxu1 %v7020_v36 }
 0x6dd   : > { %6532 = vmatprep.subr.bf16.mxu1 %v7021_v35 }
 0x6df   : > { %6501 = vmatmul.mubr.msk.bf16.gmra.mrb[36].mxu1 %vm580_vm4, %v8500_v54 }
 0x6e0   : > { %6504 = vmatprep.mubr.msk.bf16.mxu1 %vm580_vm4, %v8529_v27 }
 0x6e7   : > { %6505 = vmatmul.mubr.msk.bf16.gmra.mrb[40].mxu1 %vm580_vm4, %v4705_v58 }
 0x6e8   : > { %6516 = vmatprep.mubr.msk.bf16.mxu1 %vm580_vm4, %v4868_v63  ;;  %v5268_v63 = vrot.slane %v5266_v12, 1 }
 0x6ef   : > { %6517 = vmatmul.mubr.msk.bf16.vlgmr.msra.gmra.mrb[28].mxu1 %vm580_vm4, %v8432_v37  ;;  %v7025_v37 = vld [vmem:[%s8827_s7 + $0x100] sm:$0xff]  }
 0x6f0   : > { %6533 = vmatpush3.bf16.msra.mxu1 %v7021_v35  ;;  %6520 = vmatprep.mubr.msk.bf16.mxu1 %vm580_vm4, %v8435_v39  ;;  %v4888_v39 = vshrl.u32 %v8666_v55, 16 }
 0x6f1   : > { %6534 = vmatprep.subr.bf16.mxu1 %v7022_v48 }
 0x6f2   : > { %v4890_v62 = vrot.slane %v4888_v39, 7 }
 0x6f4   : > { %6535 = vmatpush3.bf16.msra.mxu1 %v7022_v48 }
 0x6f5   : > { %6536 = vmatprep.subr.bf16.mxu1 %v7023_v13 }
 0x6f7   : > { %6521 = vmatmul.mubr.msk.bf16.gmra.mrb[32].mxu1 %vm580_vm4, %v8457_v32  ;;  %v4891_v32 = vshll.u32 %v8666_v55, 16 }
 0x6f8   : > { %6524 = vmatprep.mubr.msk.bf16.mxu1 %vm580_vm4, %v8461_v52  ;;  %6537 = vmatpush3.bf16.msra.mxu1 %v7023_v13 }
 0x6f9   : > { %6538 = vmatprep.subr.bf16.mxu1 %v7024_v23  ;;  %v4893_v52 = vor.u32 %v4891_v32, %v4890_v62 }
 0x6fb   : > { %v4894_v10 = vsel %vm1187_vm2, %v8510_v22, %v4893_v52 }
 0x6fc   : > { %6539 = vmatpush3.bf16.msra.mxu1 %v7024_v23 }
 0x6fd   : > { %6556 = vmatprep.subr.bf16.mxu1 %v7025_v37 }
 0x6ff   : > { %6525 = vmatmul.mubr.msk.bf16.gmra.mrb[36].mxu1 %vm580_vm4, %v8503_v38  ;;  %v7027_v38 = vld [vmem:[%s8827_s7 + $0x110] sm:$0xff]  }
 0x700   : > { %6528 = vmatprep.mubr.msk.bf16.mxu1 %vm580_vm4, %v8523_v1  ;;  %v5629_v1 = vld [vmem:[%s8834_s14] ss:$0 sm:$0xff] }
 0x701   : > { %v3620_v51 = vadd.f32 %v8540_v26, %v5629_v1  ;;  %v3613_v53 = vadd.f32 %v5629_v1, %v8544_v15  ;;  %v3634_v15 = vadd.f32 %v8548_v29, %v5629_v1  ;;  %v3627_v7 = vadd.f32 %v5629_v1, %v8554_v57 }
 0x702   : > { %v3648_v47 = vadd.f32 %v8557_v5, %v5629_v1  ;;  %v3641_v29 = vadd.f32 %v5629_v1, %v8566_v11  ;;  %v5260_v5 = vrot.slane %v4891_v32, 1  ;;  %v3662_v11 = vadd.f32 %v8571_v41, %v5629_v1 }
 0x703   : > { %v3675_v0 = vadd.f32 %v5640_v24, %v3620_v51  ;;  %v3674_v46 = vadd.f32 %v5640_v24, %v3613_v53  ;;  %v3677_v4 = vadd.f32 %v5640_v24, %v3634_v15  ;;  %v3676_v43 = vadd.f32 %v5640_v24, %v3627_v7 }
 0x704   : > { %v3679_v57 = vadd.f32 %v5640_v24, %v3648_v47  ;;  %v3681_v59 = vadd.f32 %v5640_v24, %v3662_v11  ;;  %v5264_v58 = vor.u32 %v5260_v5, %v4888_v39 }
 0x707   : > { %6529 = vmatmul.mubr.msk.bf16.gmra.mrb[40].mxu1 %vm580_vm4, %v4894_v10 }
 0x708   : > { %6540 = vmatprep.mubr.msk.bf16.mxu1 %vm580_vm4, %v8365_v2  ;;  %v7028_v2 = vld [vmem:[%s8827_s7 + $0x118] sm:$0xff]  }
 0x70f   : > { %6541 = vmatmul.mubr.msk.bf16.vlgmr.msra.gmra.mrb[28].mxu1 %vm580_vm4, %v8377_v18  ;;  %v5185_v18 = vld [vmem:[#allocation3 + $0x18] sm:$0xff] }
 0x710   : > { %6557 = vmatpush3.bf16.msra.mxu1 %v7025_v37  ;;  %6544 = vmatprep.mubr.msk.bf16.mxu1 %vm580_vm4, %v8385_v20  ;;  %v5205_v20 = vshll.u32 %v5185_v18, 16 }
 0x711   : > { %6558 = vmatprep.subr.bf16.mxu1 %v7026_v42 }
 0x712   : > { %v5207_v22 = vrot.slane %v5205_v20, 1 }
 0x714   : > { %6559 = vmatpush3.bf16.msra.mxu1 %v7026_v42 }
 0x715   : > { %6560 = vmatprep.subr.bf16.mxu1 %v7027_v38 }
 0x717   : > { %6545 = vmatmul.mubr.msk.bf16.gmra.mrb[32].mxu1 %vm580_vm4, %v8397_v6  ;;  %v5203_v6 = vshrl.u32 %v5185_v18, 16 }
 0x718   : > { %6548 = vmatprep.mubr.msk.bf16.mxu1 %vm580_vm4, %v8418_v33  ;;  %6561 = vmatpush3.bf16.msra.mxu1 %v7027_v38 }
 0x719   : > { %6562 = vmatprep.subr.bf16.mxu1 %v7028_v2  ;;  %v5208_v33 = vor.u32 %v5207_v22, %v5203_v6 }
 0x71c   : > { %6563 = vmatpush3.bf16.msra.mxu1 %v7028_v2 }
 0x71f   : > { %6549 = vmatmul.mubr.msk.bf16.gmra.mrb[36].mxu1 %vm580_vm4, %v8483_v8  ;;  %v5213_v8 = vsel %vm1569_vm3, %v5208_v33, %v8446_v50 }
 0x720   : > { %6552 = vmatprep.mubr.msk.bf16.mxu1 %vm580_vm4, %v8496_v14 }
 0x727   : > { %6553 = vmatmul.mubr.msk.bf16.gmra.mrb[40].mxu1 %vm580_vm4, %v8666_v55 }
 0x728   : > { %6564 = vmatprep.mubr.msk.bf16.mxu1 %vm580_vm4, %v5213_v8 }
 0x729   : > { %v6374_v14 = vpop.f32.mrb[24].mxu0 }
 0x72a   : > { %v3905_v30 = vadd.f32 %v6374_v14, %v3675_v0  ;;  %v3849_v26 = vpop.f32.mrb[25].mxu0 }
 0x72b   : > { %v3904_v19 = vadd.f32 %v3849_v26, %v3674_v46  ;;  %v6375_v17 = vpop.f32.mrb[26].mxu0 }
 0x72c   : > { %v3852_v61 = vpop.f32.mrb[27].mxu0 }
 0x72f   : > { %6565 = vmatmul.mubr.msk.bf16.vlgmr.msra.gmra.mrb[28].mxu1 %vm580_vm4, %v8477_v9 }
 0x730   : > { %6568 = vmatprep.mubr.msk.bf16.mxu1 %vm580_vm4, %v8490_v60  ;;  %v3678_v60 = vadd.f32 %v5640_v24, %v3641_v29 }
 0x731   : > { %v6378_v50 = vpop.f32.mrb[28].mxu0 }
 0x732   : > { %v3907_v3 = vadd.f32 %v6378_v50, %v3677_v4  ;;  %v3863_v31 = vpop.f32.mrb[29].mxu0 }
 0x733   : > { %v3906_v40 = vadd.f32 %v3863_v31, %v3676_v43  ;;  %v6379_v25 = vpop.f32.mrb[30].mxu0 }
 0x734   : > { %v3866_v16 = vpop.f32.mrb[31].mxu0 }
 0x737   : > { %6569 = vmatmul.mubr.msk.bf16.gmra.mrb[32].mxu1 %vm580_vm4, %v8493_v34  ;;  %v3655_v34 = vadd.f32 %v5629_v1, %v8578_v49 }
 0x738   : > { %6572 = vmatprep.mubr.msk.bf16.mxu1 %vm580_vm4, %v8500_v54  ;;  %v5261_v54 = vsel %vm1569_vm3, %v8531_v56, %v5260_v5 }
 0x739   : > { %v6382_v9 = vpop.f32.mrb[32].mxu0  ;;  %v3680_v41 = vadd.f32 %v5640_v24, %v3655_v34 }
 0x73a   : > { %v3909_v36 = vadd.f32 %v6382_v9, %v3679_v57  ;;  %v3877_v35 = vpop.f32.mrb[33].mxu0 }
 0x73b   : > { %v3908_v44 = vadd.f32 %v3877_v35, %v3678_v60  ;;  %v6383_v21 = vpop.f32.mrb[34].mxu0 }
 0x73c   : > { %v3880_v45 = vpop.f32.mrb[35].mxu0 }
 0x73f   : > { %6573 = vmatmul.mubr.msk.bf16.gmra.mrb[36].mxu1 %vm580_vm4, %v8529_v27  ;;  %v5269_v27 = vsel %vm1569_vm3, %v5264_v58, %v5268_v63 }
 0x740   : > { %6576 = vmatprep.mubr.msk.bf16.mxu1 %vm580_vm4, %v5261_v54 }
 0x741   : > { %v6386_v48 = vpop.f32.mrb[36].mxu0 }
 0x742   : > { %v3911_v13 = vadd.f32 %v6386_v48, %v3681_v59  ;;  %v3891_v23 = vpop.f32.mrb[37].mxu0 }
 0x743   : > { %v3910_v49 = vadd.f32 %v3891_v23, %v3680_v41  ;;  %v6387_v37 = vpop.f32.mrb[38].mxu0 }
 0x744   : > { %v3894_v62 = vpop.f32.mrb[39].mxu0 }
 0x747   : > { %6577 = vmatmul.mubr.msk.bf16.gmra.mrb[40].mxu1 %vm580_vm4, %v5269_v27 }
 0x802   : > { %v6566_v56 = vpop.f32.mrb[28].mxu1 }
 0x803   : > { %v6659_v32 = vadd.f32 %v6566_v56, %v3905_v30  ;;  %v5352_v52 = vpop.f32.mrb[29].mxu1 }
 0x804   : > { %v6663_v55 = vadd.f32 %v5352_v52, %v3904_v19  ;;  %v6567_v39 = vpop.f32.mrb[30].mxu1 }
 0x805   : > { %5416 = vst.msk [vmem:[%s8750_s23 + $0x8] sm:$0xff] %vm580_vm4, %v6659_v32  ;;  %v5355_v10 = vpop.f32.mrb[31].mxu1 }
 0x806   : > { %5415 = vst.msk [vmem:[%s8750_s23] sm:$0xff] %vm580_vm4, %v6663_v55 }
 0x80a   : > { %v6570_v42 = vpop.f32.mrb[32].mxu1 }
 0x80b   : > { %v6667_v38 = vadd.f32 %v6570_v42, %v3907_v3  ;;  %v5366_v2 = vpop.f32.mrb[33].mxu1 }
 0x80c   : > { %v6671_v18 = vadd.f32 %v5366_v2, %v3906_v40  ;;  %v6571_v20 = vpop.f32.mrb[34].mxu1 }
 0x80d   : > { %5418 = vst.msk [vmem:[%s8750_s23 + $0x18] sm:$0xff] %vm580_vm4, %v6667_v38  ;;  %v5369_v22 = vpop.f32.mrb[35].mxu1 }
 0x80e   : > { %5417 = vst.msk [vmem:[%s8750_s23 + $0x10] sm:$0xff] %vm580_vm4, %v6671_v18 }
 0x812   : > { %v6574_v1 = vpop.f32.mrb[36].mxu1 }
 0x813   : > { %v6675_v6 = vadd.f32 %v6574_v1, %v3909_v36  ;;  %v5380_v51 = vpop.f32.mrb[37].mxu1 }
 0x814   : > { %v6679_v33 = vadd.f32 %v5380_v51, %v3908_v44  ;;  %v6575_v53 = vpop.f32.mrb[38].mxu1 }
 0x815   : > { %5420 = vst.msk [vmem:[%s8750_s23 + $0x28] sm:$0xff] %vm580_vm4, %v6675_v6  ;;  %v5383_v24 = vpop.f32.mrb[39].mxu1 }
 0x816   : > { %5419 = vst.msk [vmem:[%s8750_s23 + $0x20] sm:$0xff] %vm580_vm4, %v6679_v33 }
 0x81a   : > { %v6578_v8 = vpop.f32.mrb[40].mxu1 }
 0x81b   : > { %v6683_v0 = vadd.f32 %v6578_v8, %v3911_v13  ;;  %v5394_v14 = vpop.f32.mrb[41].mxu1 }
 0x81c   : > { %v6687_v46 = vadd.f32 %v5394_v14, %v3910_v49  ;;  %v6579_v30 = vpop.f32.mrb[42].mxu1 }
 0x81d   : > { %5422 = vst.msk [vmem:[%s8750_s23 + $0x38] sm:$0xff] %vm580_vm4, %v6683_v0  ;;  %v5397_v26 = vpop.f32.mrb[43].mxu1 }
 0x81e   : > { %5421 = vst.msk [vmem:[%s8750_s23 + $0x30] sm:$0xff] %vm580_vm4, %v6687_v46 }
 0x81f   : > { %7174 = shalt.err (!%p7171_p3)
}
 0x820   : > { %s7175_s17 = scalar_lea.hbm %s8769_s26, 1024  ;;  %s7179_s30 = scalar_lea.hbm %s8835_s15, 2048 }
 0x821   : > { %p7176_p4 = scmp.ne.s32.totalorder %s8769_s26, %s7175_s17  ;;  %p7180_p9 = scmp.lt.u32.totalorder %s8769_s26, %s8835_s15 }
 0x822   : > { %p7181_p10 = scmp.lt.u32.totalorder %s7179_s30, %s7175_s17  ;;  %p7183_p12 = scmp.lt.u32.totalorder %s7175_s17, %s8769_s26 }
 0x823   : > { %p7177_p7 = pnand %p7176_p4, %p7350_p5 }
 0x824   : > { %p7182_p11 = por %p7181_p10, %p7180_p9 }
 0x825   : > { %p7178_p8 = pneg %p7177_p7 }
 0x826   : > { %p7184_p13 = por %p7183_p12, %p7182_p11 }
 0x828   : > { %p7185_p0 = pnand %p7184_p13, %p7178_p8 }
 0x82a   : > { %7188 = shalt.err (!%p7185_p0)
}
 0x82b   : > { %s7230_s16 = smov 128   ;;  %s7231_s25 = smov 8  }
 0x82c   : > { %6928 = dma.vmem_to_hbm [thread:$0]  (%p7350_p5), %s8771_s27, 1024, %s8769_s26, %s8779_s22, %s7230_s16, %s7230_s16, %s7231_s25  }
 0x82d PF: > { %p6934_p1 = scmp.ge.s32.totalorder %s7223_s21, 2  ;;  %s5452_s1 = sand.u32 1, %s7211_s18  }
 0x82e   : > { %s5453_s17 = scalar_lea.sflag [#allocation5], %s5452_s1 }
 0x82f   : > { %p6931_p2 = pnand %p6934_p1, %p7354_p6 }
 0x831   : > { %7206 = dma.done.wait (!%p6931_p2), %s5453_s17, 1024  }
 0x832   : > { %7208 = vsyncadd (!%p6931_p2), %s5453_s17, 4294966272  ;;  %s8845_s23 = sld [smem:[#allocation7_spill]]  ;;  %s8846_s20 = sld [smem:[#allocation8_spill]] }
 0x833   : > { %p25_p3 = scmp.ge.s32.totalorder %s7337_s24, 4   ;;  %s8847_s18 = smov %s7215_s19 }
 0x834   : > { %s8849_s21 = smov %s7337_s24 }
 0x835   :  { %27 = sbr.rel (!%p25_p3) target bundleno = 6 (0x6), region = 119 }
 0x838   : > { %s8848_s19 = smov %s8845_s23 }
 0x83c   :  { %5458 = vsyncpa [#allocation5], 1 }
 0x83d   :  { %5460 = vsyncpa [#allocation5 + $0x1], 1 }

</bundles_post_ra>
